<compile_context>
chip_gen: v7x
topology: tpu7x:2x2x1
jax: 0.10.0
libtpu: 0.0.40
codegen_flags: <defaults>
</compile_context>

<pallas_src>
import functools

import jax
import jax.numpy as jnp
from jax.experimental import pallas as pl
from jax.experimental.pallas import tpu as pltpu

LANES = 128          # TPU lane width; slab / output are lane-padded to this.
DEF_ROW_TILE = 256   # batch rows processed per grid step.


def _round_up(n, m):
    return ((n + m - 1) // m) * m


def _pad_lanes(a, lanes=LANES):
    r, c = a.shape
    return jnp.pad(a, ((0, 0), (0, lanes - c)))


def _pack_slab(we, be, wf, bf, wp, bp, n_head):
    """Pack all constant operands into one (rows, 128) f32 slab.

    Layout (every block starts at an 8-aligned row offset):
      we   (input_dim, n_embd)       embed weight
      wf   (n_embd, n_embd)          fc weight
      wp   (n_embd, output_dim)      pred weight (lane-padded -> lane-dense output)
      bias (8, 128)                  row0=be, row1=bf, row2=bp
      mask (n_embd, n_embd)          chunk indicator * 1/sqrt(hs) (scale folded in)
      p_d  (n_embd, n_embd), d=1..nh-1  permutation mats:
                                     (h @ p_d)[:, j] = h[:, (j - d*hs) % n_embd]
    """
    input_dim, n_embd = we.shape
    output_dim = wp.shape[1]
    hs = n_embd // n_head
    scale = 1.0 / float(hs) ** 0.5

    idx = jnp.arange(n_embd)
    chunk = idx // hs
    # Scale is folded into the indicator matrix so the kernel never multiplies
    # by 1/sqrt(hs) explicitly.
    m_mask = (chunk[:, None] == chunk[None, :]).astype(jnp.float32) * scale

    bias_blk = jnp.zeros((8, LANES), jnp.float32)
    bias_blk = bias_blk.at[0, :n_embd].set(be.reshape(-1))
    bias_blk = bias_blk.at[1, :n_embd].set(bf.reshape(-1))
    bias_blk = bias_blk.at[2, :output_dim].set(bp.reshape(-1))

    blocks = [
        ("we", _pad_lanes(we.astype(jnp.float32))),
        ("wf", _pad_lanes(wf.astype(jnp.float32))),
        ("wp", _pad_lanes(wp.astype(jnp.float32))),
        ("bias", bias_blk),
        ("mask", _pad_lanes(m_mask)),
    ]
    for d in range(1, n_head):
        p_d = (idx[None, :] == ((idx[:, None] + d * hs) % n_embd)).astype(jnp.float32)
        blocks.append((f"p{d}", _pad_lanes(p_d)))

    offs, rows, off = {}, [], 0
    for name, blk in blocks:
        r_pad = _round_up(blk.shape[0], 8)
        if r_pad != blk.shape[0]:
            blk = jnp.pad(blk, ((0, r_pad - blk.shape[0]), (0, 0)))
        offs[name] = off
        rows.append(blk)
        off += r_pad
    return jnp.concatenate(rows, axis=0), offs


def feat_attn_kernel(x_ref, slab_ref, o_ref, *, input_dim, n_embd, n_head, offs):
    # Static ref-view slices of the resident slab (loads only what is used).
    we = slab_ref[offs["we"]:offs["we"] + input_dim, 0:n_embd]
    wf = slab_ref[offs["wf"]:offs["wf"] + n_embd, 0:n_embd]
    wp = slab_ref[offs["wp"]:offs["wp"] + n_embd, :]          # (n_embd, 128) lane-dense
    bias = slab_ref[offs["bias"]:offs["bias"] + 8, :]         # (8, 128)
    be = bias[0:1, 0:n_embd]
    bf = bias[1:2, 0:n_embd]
    bp = bias[2:3, :]                                         # (1, 128)
    m_mask = slab_ref[offs["mask"]:offs["mask"] + n_embd, 0:n_embd]
    perms = [slab_ref[offs[f"p{d}"]:offs[f"p{d}"] + n_embd, 0:n_embd]
             for d in range(1, n_head)]

    def attend(h):
        # "rolled" copies via MXU permutation matmuls:
        #   rolled[d][:, n*hs + r] = h[:, ((n - d) % nh)*hs + r]
        rolled = [h] + [jnp.dot(h, p, preferred_element_type=jnp.float32)
                        for p in perms]
        # per-chunk q.k score (already scaled), broadcast across the chunk's
        # hs lanes -- segment sum done on the MXU against the indicator matrix
        scores = [jnp.dot(h * r, m_mask, preferred_element_type=jnp.float32)
                  for r in rolled]
        # softmax over the nh chunk offsets: purely elementwise, no cross-lane ops
        m = scores[0]
        for s in scores[1:]:
            m = jnp.maximum(m, s)
        exps = [jnp.exp(s - m) for s in scores]                # EUP
        denom = exps[0]
        for e in exps[1:]:
            denom = denom + e
        acc = exps[0] * rolled[0]
        for e, r in zip(exps[1:], rolled[1:]):
            acc = acc + e * r
        return acc * pl.reciprocal(denom, approx=True)         # EUP vrcp

    x = x_ref[...]
    h = jnp.dot(x, we, preferred_element_type=jnp.float32) + be
    h = attend(h)
    h = jnp.dot(h, wf, preferred_element_type=jnp.float32) + bf
    h = attend(h)
    out = jnp.dot(h, wp, preferred_element_type=jnp.float32) + bp  # (tm, 128)
    o_ref[...] = out.astype(o_ref.dtype)                          # unmasked lane-dense store


def feat_attn_2h(x, we, be, wf, bf, wp, bp, *, n_head, row_tile=DEF_ROW_TILE):
    b, input_dim = x.shape
    n_embd = we.shape[1]
    output_dim = wp.shape[1]
    assert n_embd % n_head == 0
    assert max(input_dim, n_embd, output_dim) <= LANES

    x = x.astype(jnp.float32)
    tm = min(row_tile, _round_up(b, 8))
    b_pad = _round_up(b, tm)
    if b_pad != b:
        x = jnp.pad(x, ((0, b_pad - b), (0, 0)))

    slab, offs = _pack_slab(we, be, wf, bf, wp, bp, n_head)
    slab_rows = slab.shape[0]

    kernel = functools.partial(
        feat_attn_kernel, input_dim=input_dim, n_embd=n_embd,
        n_head=n_head, offs=offs)

    out = pl.pallas_call(
        kernel,
        out_shape=jax.ShapeDtypeStruct((b_pad, LANES), jnp.float32),
        grid=(b_pad // tm,),
        in_specs=[
            pl.BlockSpec((tm, input_dim), lambda i: (i, 0)),
            # Constant index_map -> the slab is DMA'd once and stays resident
            # across grid steps (no per-step weight re-fetch).
            pl.BlockSpec((slab_rows, LANES), lambda i: (0, 0)),
        ],
        out_specs=pl.BlockSpec((tm, LANES), lambda i: (i, 0)),
        compiler_params=pltpu.CompilerParams(
            # batch axis shards across v7x's two TensorCores; no-op on v5e/v6e
            dimension_semantics=("parallel",)),
    )(x, slab)
    return out[:b, :output_dim]


# ---------------- pure-JAX reference (mirrors the PyTorch forward) ----------
def ref_forward(x, we, be, wf, bf, wp, bp, n_head):
    def attn(h):
        bsz, e = h.shape
        hs = e // n_head
        h3 = h.reshape(bsz, n_head, hs)
        s = jnp.einsum("bnd,bmd->bnm", h3, h3) / jnp.sqrt(jnp.float32(hs))
        p = jax.nn.softmax(s, axis=-1)
        o = jnp.einsum("bnm,bmd->bnd", p, h3)
        return o.reshape(bsz, e)

    h = x @ we + be
    h = attn(h)
    h = h @ wf + bf
    h = attn(h)
    return h @ wp + bp


if __name__ == "__main__":
    key = jax.random.PRNGKey(0)
    kx, k1, k2, k3, k4, k5, k6 = jax.random.split(key, 7)

    B, INPUT_DIM, N_EMBD, N_HEAD, OUTPUT_DIM = 512, 32, 32, 4, 16

    x = jax.random.normal(kx, (B, INPUT_DIM), dtype=jnp.float32)

    # Deterministic Linear parameters (uniform(-1/sqrt(fan_in), 1/sqrt(fan_in))),
    # stored pre-transposed as (in_features, out_features).
    def linear_params(kw, kb, fan_in, fan_out):
        bound = 1.0 / (fan_in ** 0.5)
        w = jax.random.uniform(kw, (fan_in, fan_out), jnp.float32, -bound, bound)
        bias = jax.random.uniform(kb, (1, fan_out), jnp.float32, -bound, bound)
        return w, bias

    we, be = linear_params(k1, k2, INPUT_DIM, N_EMBD)
    wf, bf = linear_params(k3, k4, N_EMBD, N_EMBD)
    wp, bp = linear_params(k5, k6, N_EMBD, OUTPUT_DIM)

    out = jax.block_until_ready(
        feat_attn_2h(x, we, be, wf, bf, wp, bp, n_head=N_HEAD))
    ref = ref_forward(x, we, be, wf, bf, wp, bp, n_head=N_HEAD)

    assert out.shape == (B, OUTPUT_DIM)
    err = float(jnp.max(jnp.abs(out - ref)))
    # tolerance accounts for the EUP approx-reciprocal softmax normalization
    assert jnp.allclose(out, ref, atol=2e-3, rtol=2e-3), f"max abs err = {err}"
    print("KERNEL_OK")
</pallas_src>

<mosaic_0001>
module attributes {stable_mosaic.version = 11 : i64} {
  func.func @feat_attn_kernel(%arg0: i32, %arg1: memref<256x32xf32, #tpu.memory_space<vmem>>, %arg2: memref<232x128xf32, #tpu.memory_space<vmem>>, %arg3: memref<256x128xf32, #tpu.memory_space<vmem>>) attributes {dimension_semantics = [#tpu.dimension_semantics<parallel>], iteration_bounds = array<i64: 2>, scalar_prefetch = 0 : i64, scratch_operands = 0 : i64, tpu.core_type = #tpu.core_type<tc>, window_params = [{transform_indices = @transform_0, window_bounds = array<i64: 256, 32>}, {pipeline_mode = #tpu.pipeline_mode<synchronous>, transform_indices = @transform_1, window_bounds = array<i64: 232, 128>}, {transform_indices = @transform_2, window_bounds = array<i64: 256, 128>}]} {
    %c0 = arith.constant 0 : index
    %c0_0 = arith.constant 0 : index
    %0 = vector.load %arg2[%c0, %c0_0] : memref<232x128xf32, #tpu.memory_space<vmem>>, vector<32x32xf32>
    %c32 = arith.constant 32 : index
    %c0_1 = arith.constant 0 : index
    %1 = vector.load %arg2[%c32, %c0_1] : memref<232x128xf32, #tpu.memory_space<vmem>>, vector<32x32xf32>
    %c64 = arith.constant 64 : index
    %c0_2 = arith.constant 0 : index
    %2 = vector.load %arg2[%c64, %c0_2] : memref<232x128xf32, #tpu.memory_space<vmem>>, vector<32x128xf32>
    %c96 = arith.constant 96 : index
    %c0_3 = arith.constant 0 : index
    %3 = vector.load %arg2[%c96, %c0_3] : memref<232x128xf32, #tpu.memory_space<vmem>>, vector<8x128xf32>
    %4 = vector.extract_strided_slice %3 {offsets = [0, 0], sizes = [1, 32], strides = [1, 1]} : vector<8x128xf32> to vector<1x32xf32>
    %5 = vector.extract_strided_slice %3 {offsets = [1, 0], sizes = [1, 32], strides = [1, 1]} : vector<8x128xf32> to vector<1x32xf32>
    %6 = vector.extract_strided_slice %3 {offsets = [2, 0], sizes = [1, 128], strides = [1, 1]} : vector<8x128xf32> to vector<1x128xf32>
    %c104 = arith.constant 104 : index
    %c0_4 = arith.constant 0 : index
    %7 = vector.load %arg2[%c104, %c0_4] : memref<232x128xf32, #tpu.memory_space<vmem>>, vector<32x32xf32>
    %c136 = arith.constant 136 : index
    %c0_5 = arith.constant 0 : index
    %8 = vector.load %arg2[%c136, %c0_5] : memref<232x128xf32, #tpu.memory_space<vmem>>, vector<32x32xf32>
    %c168 = arith.constant 168 : index
    %c0_6 = arith.constant 0 : index
    %9 = vector.load %arg2[%c168, %c0_6] : memref<232x128xf32, #tpu.memory_space<vmem>>, vector<32x32xf32>
    %c200 = arith.constant 200 : index
    %c0_7 = arith.constant 0 : index
    %10 = vector.load %arg2[%c200, %c0_7] : memref<232x128xf32, #tpu.memory_space<vmem>>, vector<32x32xf32>
    %c0_8 = arith.constant 0 : index
    %c0_9 = arith.constant 0 : index
    %11 = vector.load %arg1[%c0_8, %c0_9] : memref<256x32xf32, #tpu.memory_space<vmem>>, vector<256x32xf32>
    %cst = arith.constant dense<0.000000e+00> : vector<256x32xf32>
    %12 = tpu.matmul %11, %0, %cst {dimension_numbers = #tpu.dot_dimension_numbers<[1], [0], [0], [1], [0, 0, 1, 1], [], []>} : vector<256x32xf32>, vector<32x32xf32>, vector<256x32xf32> -> vector<256x32xf32>
    %13 = vector.broadcast %4 : vector<1x32xf32> to vector<256x32xf32>
    %14 = arith.addf %12, %13 : vector<256x32xf32>
    %cst_10 = arith.constant dense<0.000000e+00> : vector<256x32xf32>
    %15 = tpu.matmul %14, %8, %cst_10 {dimension_numbers = #tpu.dot_dimension_numbers<[1], [0], [0], [1], [0, 0, 1, 1], [], []>} : vector<256x32xf32>, vector<32x32xf32>, vector<256x32xf32> -> vector<256x32xf32>
    %cst_11 = arith.constant dense<0.000000e+00> : vector<256x32xf32>
    %16 = tpu.matmul %14, %9, %cst_11 {dimension_numbers = #tpu.dot_dimension_numbers<[1], [0], [0], [1], [0, 0, 1, 1], [], []>} : vector<256x32xf32>, vector<32x32xf32>, vector<256x32xf32> -> vector<256x32xf32>
    %cst_12 = arith.constant dense<0.000000e+00> : vector<256x32xf32>
    %17 = tpu.matmul %14, %10, %cst_12 {dimension_numbers = #tpu.dot_dimension_numbers<[1], [0], [0], [1], [0, 0, 1, 1], [], []>} : vector<256x32xf32>, vector<32x32xf32>, vector<256x32xf32> -> vector<256x32xf32>
    %18 = arith.mulf %14, %14 : vector<256x32xf32>
    %cst_13 = arith.constant dense<0.000000e+00> : vector<256x32xf32>
    %19 = tpu.matmul %18, %7, %cst_13 {dimension_numbers = #tpu.dot_dimension_numbers<[1], [0], [0], [1], [0, 0, 1, 1], [], []>} : vector<256x32xf32>, vector<32x32xf32>, vector<256x32xf32> -> vector<256x32xf32>
    %20 = arith.mulf %14, %15 : vector<256x32xf32>
    %cst_14 = arith.constant dense<0.000000e+00> : vector<256x32xf32>
    %21 = tpu.matmul %20, %7, %cst_14 {dimension_numbers = #tpu.dot_dimension_numbers<[1], [0], [0], [1], [0, 0, 1, 1], [], []>} : vector<256x32xf32>, vector<32x32xf32>, vector<256x32xf32> -> vector<256x32xf32>
    %22 = arith.mulf %14, %16 : vector<256x32xf32>
    %cst_15 = arith.constant dense<0.000000e+00> : vector<256x32xf32>
    %23 = tpu.matmul %22, %7, %cst_15 {dimension_numbers = #tpu.dot_dimension_numbers<[1], [0], [0], [1], [0, 0, 1, 1], [], []>} : vector<256x32xf32>, vector<32x32xf32>, vector<256x32xf32> -> vector<256x32xf32>
    %24 = arith.mulf %14, %17 : vector<256x32xf32>
    %cst_16 = arith.constant dense<0.000000e+00> : vector<256x32xf32>
    %25 = tpu.matmul %24, %7, %cst_16 {dimension_numbers = #tpu.dot_dimension_numbers<[1], [0], [0], [1], [0, 0, 1, 1], [], []>} : vector<256x32xf32>, vector<32x32xf32>, vector<256x32xf32> -> vector<256x32xf32>
    %26 = arith.maximumf %19, %21 : vector<256x32xf32>
    %27 = arith.maximumf %26, %23 : vector<256x32xf32>
    %28 = arith.maximumf %27, %25 : vector<256x32xf32>
    %29 = arith.subf %19, %28 : vector<256x32xf32>
    %30 = math.exp %29 : vector<256x32xf32>
    %31 = arith.subf %21, %28 : vector<256x32xf32>
    %32 = math.exp %31 : vector<256x32xf32>
    %33 = arith.subf %23, %28 : vector<256x32xf32>
    %34 = math.exp %33 : vector<256x32xf32>
    %35 = arith.subf %25, %28 : vector<256x32xf32>
    %36 = math.exp %35 : vector<256x32xf32>
    %37 = arith.addf %30, %32 : vector<256x32xf32>
    %38 = arith.addf %37, %34 : vector<256x32xf32>
    %39 = arith.addf %38, %36 : vector<256x32xf32>
    %40 = arith.mulf %30, %14 : vector<256x32xf32>
    %41 = arith.mulf %32, %15 : vector<256x32xf32>
    %42 = arith.addf %40, %41 : vector<256x32xf32>
    %43 = arith.mulf %34, %16 : vector<256x32xf32>
    %44 = arith.addf %42, %43 : vector<256x32xf32>
    %45 = arith.mulf %36, %17 : vector<256x32xf32>
    %46 = arith.addf %44, %45 : vector<256x32xf32>
    %47 = tpu.reciprocal %39 {approx = true} : vector<256x32xf32> -> vector<256x32xf32>
    %48 = arith.mulf %46, %47 : vector<256x32xf32>
    %cst_17 = arith.constant dense<0.000000e+00> : vector<256x32xf32>
    %49 = tpu.matmul %48, %1, %cst_17 {dimension_numbers = #tpu.dot_dimension_numbers<[1], [0], [0], [1], [0, 0, 1, 1], [], []>} : vector<256x32xf32>, vector<32x32xf32>, vector<256x32xf32> -> vector<256x32xf32>
    %50 = vector.broadcast %5 : vector<1x32xf32> to vector<256x32xf32>
    %51 = arith.addf %49, %50 : vector<256x32xf32>
    %cst_18 = arith.constant dense<0.000000e+00> : vector<256x32xf32>
    %52 = tpu.matmul %51, %8, %cst_18 {dimension_numbers = #tpu.dot_dimension_numbers<[1], [0], [0], [1], [0, 0, 1, 1], [], []>} : vector<256x32xf32>, vector<32x32xf32>, vector<256x32xf32> -> vector<256x32xf32>
    %cst_19 = arith.constant dense<0.000000e+00> : vector<256x32xf32>
    %53 = tpu.matmul %51, %9, %cst_19 {dimension_numbers = #tpu.dot_dimension_numbers<[1], [0], [0], [1], [0, 0, 1, 1], [], []>} : vector<256x32xf32>, vector<32x32xf32>, vector<256x32xf32> -> vector<256x32xf32>
    %cst_20 = arith.constant dense<0.000000e+00> : vector<256x32xf32>
    %54 = tpu.matmul %51, %10, %cst_20 {dimension_numbers = #tpu.dot_dimension_numbers<[1], [0], [0], [1], [0, 0, 1, 1], [], []>} : vector<256x32xf32>, vector<32x32xf32>, vector<256x32xf32> -> vector<256x32xf32>
    %55 = arith.mulf %51, %51 : vector<256x32xf32>
    %cst_21 = arith.constant dense<0.000000e+00> : vector<256x32xf32>
    %56 = tpu.matmul %55, %7, %cst_21 {dimension_numbers = #tpu.dot_dimension_numbers<[1], [0], [0], [1], [0, 0, 1, 1], [], []>} : vector<256x32xf32>, vector<32x32xf32>, vector<256x32xf32> -> vector<256x32xf32>
    %57 = arith.mulf %51, %52 : vector<256x32xf32>
    %cst_22 = arith.constant dense<0.000000e+00> : vector<256x32xf32>
    %58 = tpu.matmul %57, %7, %cst_22 {dimension_numbers = #tpu.dot_dimension_numbers<[1], [0], [0], [1], [0, 0, 1, 1], [], []>} : vector<256x32xf32>, vector<32x32xf32>, vector<256x32xf32> -> vector<256x32xf32>
    %59 = arith.mulf %51, %53 : vector<256x32xf32>
    %cst_23 = arith.constant dense<0.000000e+00> : vector<256x32xf32>
    %60 = tpu.matmul %59, %7, %cst_23 {dimension_numbers = #tpu.dot_dimension_numbers<[1], [0], [0], [1], [0, 0, 1, 1], [], []>} : vector<256x32xf32>, vector<32x32xf32>, vector<256x32xf32> -> vector<256x32xf32>
    %61 = arith.mulf %51, %54 : vector<256x32xf32>
    %cst_24 = arith.constant dense<0.000000e+00> : vector<256x32xf32>
    %62 = tpu.matmul %61, %7, %cst_24 {dimension_numbers = #tpu.dot_dimension_numbers<[1], [0], [0], [1], [0, 0, 1, 1], [], []>} : vector<256x32xf32>, vector<32x32xf32>, vector<256x32xf32> -> vector<256x32xf32>
    %63 = arith.maximumf %56, %58 : vector<256x32xf32>
    %64 = arith.maximumf %63, %60 : vector<256x32xf32>
    %65 = arith.maximumf %64, %62 : vector<256x32xf32>
    %66 = arith.subf %56, %65 : vector<256x32xf32>
    %67 = math.exp %66 : vector<256x32xf32>
    %68 = arith.subf %58, %65 : vector<256x32xf32>
    %69 = math.exp %68 : vector<256x32xf32>
    %70 = arith.subf %60, %65 : vector<256x32xf32>
    %71 = math.exp %70 : vector<256x32xf32>
    %72 = arith.subf %62, %65 : vector<256x32xf32>
    %73 = math.exp %72 : vector<256x32xf32>
    %74 = arith.addf %67, %69 : vector<256x32xf32>
    %75 = arith.addf %74, %71 : vector<256x32xf32>
    %76 = arith.addf %75, %73 : vector<256x32xf32>
    %77 = arith.mulf %67, %51 : vector<256x32xf32>
    %78 = arith.mulf %69, %52 : vector<256x32xf32>
    %79 = arith.addf %77, %78 : vector<256x32xf32>
    %80 = arith.mulf %71, %53 : vector<256x32xf32>
    %81 = arith.addf %79, %80 : vector<256x32xf32>
    %82 = arith.mulf %73, %54 : vector<256x32xf32>
    %83 = arith.addf %81, %82 : vector<256x32xf32>
    %84 = tpu.reciprocal %76 {approx = true} : vector<256x32xf32> -> vector<256x32xf32>
    %85 = arith.mulf %83, %84 : vector<256x32xf32>
    %cst_25 = arith.constant dense<0.000000e+00> : vector<256x128xf32>
    %86 = tpu.matmul %85, %2, %cst_25 {dimension_numbers = #tpu.dot_dimension_numbers<[1], [0], [0], [1], [0, 0, 1, 1], [], []>} : vector<256x32xf32>, vector<32x128xf32>, vector<256x128xf32> -> vector<256x128xf32>
    %87 = vector.broadcast %6 : vector<1x128xf32> to vector<256x128xf32>
    %88 = arith.addf %86, %87 : vector<256x128xf32>
    %c0_26 = arith.constant 0 : index
    %c0_27 = arith.constant 0 : index
    %89 = vector.load %arg3[%c0_26, %c0_27] : memref<256x128xf32, #tpu.memory_space<vmem>>, vector<256x128xf32>
    tpu.vector_store %arg3[%c0_26, %c0_27], %88 {strides = array<i32>} : memref<256x128xf32, #tpu.memory_space<vmem>>, vector<256x128xf32>,
    return
  }
  func.func @transform_0(%arg0: i32) -> (i32, i32) {
    %c0_i32 = arith.constant 0 : i32
    %c0_i32_0 = arith.constant 0 : i32
    return %arg0, %c0_i32 : i32, i32
  }
  func.func @transform_1(%arg0: i32) -> (i32, i32) {
    %c0_i32 = arith.constant 0 : i32
    %c0_i32_0 = arith.constant 0 : i32
    %c0_i32_1 = arith.constant 0 : i32
    return %c0_i32, %c0_i32_0 : i32, i32
  }
  func.func @transform_2(%arg0: i32) -> (i32, i32) {
    %c0_i32 = arith.constant 0 : i32
    %c0_i32_0 = arith.constant 0 : i32
    return %arg0, %c0_i32 : i32, i32
  }
}

</mosaic_0001>

<bundles_post_ra>
// kernel: tpu_custom_call.1
= control target key start
LH: loop header
LB: loop body
LE: loop exit
PB: predicated region body
PF: predicated region fallthrough
CT: control target
= control target key end

     0   :  { %7 = vsyncpa [#allocation3], 0  ;;  %s15612_s0 = inlined_call_operand.vmem [shape: f32[512,32], index: 0, kind: input, shape index: {}]   ;;  %s15613_s1 = inlined_call_operand.vmem [shape: f32[232,128], index: 1, kind: input, shape index: {}]   ;;  %s15614_s2 = inlined_call_operand.hbm [shape: f32[512,128], index: 2, kind: output, shape index: {}]  }
   0x1   :  { %9 = vsyncpa [#allocation3 + $0x1], 0  ;;  %s10410_s9 = smov 0   ;;  %s10412_s10 = smov 0  }
   0x2   :  { %s10414_s11 = smov 0   ;;  %s10416_s12 = smov 0  }
   0x3 LB: > { %s10431_s13 = sadd.s32 4294967295, %s10390_s12   ;;  %s7384_s14 = sadd.s32 4294967294, %s10390_s12   ;;  %s10390_s12 = sphi %s10416_s12, %s17329_s12   ;;  %s10386_s11 = sphi %s10414_s11, %s17328_s11   ;;  %s10382_s10 = sphi %s10412_s10, %s17327_s10   ;;  %s10378_s9 = sphi %s10410_s9, %s17326_s9  }
   0x4   : > { %s10435_s15 = sadd.s32 1, %s10390_s12   ;;  %s69_s16 = sadd.s32 1, %s10386_s11 }
   0x5   : > { %s66_s17 = ssub.s32 %s10390_s12, %s10435_s15  ;;  %p79_p0 = scmp.ne.s32.totalorder %s10386_s11, %s10382_s10 }
   0x6   : > { %p67_p1 = scmp.eq.s32.totalorder %s66_s17, 0  ;;  %p80_p2 = scmp.eq.s32.totalorder %s10431_s13, 1 }
   0x7   : > { %p85_p3 = scmp.ne.s32.totalorder %s10382_s10, %s10378_s9  ;;  %p86_p4 = scmp.eq.s32.totalorder %s7384_s14, 1 }
   0x8   : > { %s10446_s18 = scalar_select %p67_p1, %s10386_s11, %s69_s16  }
   0x9   : > { %p10448_p5 = por %p80_p2, %p79_p0  ;;  %p10452_p6 = por %p86_p4, %p85_p3 }
   0xa   : > { %p7387_p7 = scmp.ge.s32.totalorder %s10390_s12, 1  ;;  %p116_p8 = scmp.lt.s32.totalorder %s10390_s12, 3 }
   0xc   : > { %p117_p9 = pnand %p7387_p7, %p116_p8 }
   0xe   : > { %120 = sbr.rel (%p117_p9) target bundleno = 2055 (0x807), region = 28 }
  0x15   : > { %v145_v0 = vld [vmem:[%s15613_s1] sm:$0xff]  ;;  %v146_v1 = vld [vmem:[%s15613_s1 + $0x8] sm:$0xff]  ;;  %v147_v2 = vld [vmem:[%s15613_s1 + $0x10] sm:$0xff]  ;;  %s7389_s27 = sshll.u32 %s10431_s13, 5  ;;  %vm210_vm0 = vcmask 261120   ;;  %v206_v56 = vlaneseq  ;;  %s135_s29 = sand.u32 1, %s10382_s10  }
  0x16   : > { %v9505_v3 = vpack.c.bf16 %v146_v1, %v145_v0  ;;  %v148_v4 = vld [vmem:[%s15613_s1 + $0x18] sm:$0xff]  ;;  %p139_p10 = scmp.lt.s32.totalorder %s7389_s27, 63  ;;  %v166_v6 = vld [vmem:[%s15613_s1 + $0xa8] sm:$0xff]  ;;  %v163_v8 = vld [vmem:[%s15613_s1 + $0x90] sm:$0xff]  ;;  %s7388_s30 = sshll.u32 %s135_s29, 8 }
  0x17   : > { %v9509_v5 = vpack.c.bf16 %v148_v4, %v147_v2  ;;  %v162_v7 = vld [vmem:[%s15613_s1 + $0x88] sm:$0xff]  ;;  %v167_v9 = vld [vmem:[%s15613_s1 + $0xb0] sm:$0xff]  ;;  %v164_v15 = vld [vmem:[%s15613_s1 + $0x98] sm:$0xff]  ;;  %v10598_v57 = vshrl.u32 %v206_v56, 7  ;;  %s15496_s5 = scalar_lea.vmem [#allocation2], %s7388_s30  ;;  %s7940_s6 = sshll.u32 %s10431_s13, 12 }
  0x18   : > { %9506 = vmatprep.subr.bf16.mxu0 %v9505_v3  ;;  %s17331_s27 = smov (!%p139_p10, %s7389_s27), 63  ;;  %9641 = vmatprep.subr.bf16.mxu1 %v9505_v3  ;;  %v10483_v10 = vpack.c.bf16 %v167_v9, %v166_v6  ;;  %v10490_v11 = vpack.c.bf16 %v163_v8, %v162_v7  ;;  %v165_v16 = vld [vmem:[%s15613_s1 + $0xa0] sm:$0xff]  ;;  %v168_v47 = vld [vmem:[%s15613_s1 + $0xb8] sm:$0xff]  ;;  %v170_v50 = vld [vmem:[%s15613_s1 + $0xc8] sm:$0xff]  ;;  %s7322_s7 = sshll.u32 %s15496_s5, 4  ;;  %s15564_s7 = int_to_ptr.vmem [resolvable:$true] %s7322_s7 }
  0x19   : > { %9508 = vmatpush3.bf16.msra.mxu0 %v9505_v3  ;;  %9643 = vmatpush3.bf16.msra.mxu1 %v9505_v3  ;;  %s7390_s16 = sshll.u32 %s17331_s27, 3  ;;  %v10513_v22 = vpack.c.bf16 %v165_v16, %v164_v15  ;;  %v169_v48 = vld [vmem:[%s15613_s1 + $0xc0] sm:$0xff]  ;;  %v171_v51 = vld [vmem:[%s15613_s1 + $0xd0] sm:$0xff]  ;;  %v158_v53 = vld [vmem:[%s15613_s1 + $0x68] sm:$0xff]  ;;  %16158 = vst [vmem:[#allocation9_spill] sm:$0xff] %v10598_v57  ;;  %v208_v58 = vsub.s32 0, %v10598_v57 }
  0x1a   : > { %9510 = vmatprep.subr.bf16.mxu0 %v9509_v5  ;;  %9642 = vmatprep.subr.bf16.mxu1 %v9509_v5  ;;  %16154 = vst [vmem:[#allocation5_spill] sm:$0xff] %v10483_v10  ;;  %s10488_s22 = scalar_lea.vmem %s15612_s0, %s7390_s16  ;;  %v10576_v49 = vpack.c.bf16 %v169_v48, %v168_v47  ;;  %v10586_v52 = vpack.c.bf16 %v171_v51, %v170_v50  ;;  %v159_v54 = vld [vmem:[%s15613_s1 + $0x70] sm:$0xff]  ;;  %v157_v59 = vld [vmem:[%s15613_s1 + $0x60] sm:$0xff]  ;;  %v172_v61 = vld [vmem:[%s15613_s1 + $0xd8] sm:$0xff]  ;;  %s15562_s16 = scalar_lea.hbm %s15614_s2, %s7940_s6 }
  0x1b   : > { %v174_v12 = vld [vmem:[%s10488_s22] sm:$0xff]  ;;  %v175_v13 = vld [vmem:[%s10488_s22 + $0x8] sm:$0xff]  ;;  %v176_v14 = vld [vmem:[%s10488_s22 + $0x10] sm:$0xff]  ;;  %v10595_v55 = vpack.c.bf16 %v159_v54, %v158_v53  ;;  %v10604_v60 = vrot.slane %v157_v59, %v208_v58  ;;  %s15571_s13 = scalar_lea.sflag [#allocation3], %s135_s29  ;;  %s10328_s17 = scalar_lea.vmem %s15564_s7, 4096 }
  0x1c   : > { %8561 = vmatprep.mubr.msk.f32.mxu0 %vm210_vm0, %v174_v12  ;;  %v177_v17 = vld [vmem:[%s10488_s22 + $0x18] sm:$0xff]  ;;  %v190_v18 = vld [vmem:[%s10488_s22 + $0x80] sm:$0xff]  ;;  %v191_v19 = vld [vmem:[%s10488_s22 + $0x88] sm:$0xff]  ;;  %16155 = vst [vmem:[#allocation6_spill] sm:$0xff] %v10576_v49  ;;  %p10329_p11 = scmp.ne.s32.totalorder %s15564_s7, %s10328_s17  ;;  %s10392_s21 = smov [#allocation2]  }
  0x1d   : > { %9512 = vmatpush3.bf16.msra.mxu0 %v9509_v5  ;;  %9644 = vmatpush3.bf16.msra.mxu1 %v9509_v5  ;;  %v178_v20 = vld [vmem:[%s10488_s22 + $0x20] sm:$0xff]  ;;  %v192_v21 = vld [vmem:[%s10488_s22 + $0x90] sm:$0xff]  ;;  %v193_v23 = vld [vmem:[%s10488_s22 + $0x98] sm:$0xff]  ;;  %16156 = vst [vmem:[#allocation7_spill] sm:$0xff] %v10586_v52 }
  0x1e   : > { %9522 = vmatprep.subr.bf16.mxu0 %v10483_v10  ;;  %9514 = vmatprep.subr.bf16.mxu1 %v10490_v11  ;;  %v179_v24 = vld [vmem:[%s10488_s22 + $0x28] sm:$0xff]  ;;  %v194_v25 = vld [vmem:[%s10488_s22 + $0xa0] sm:$0xff]  ;;  %v180_v26 = vld [vmem:[%s10488_s22 + $0x30] sm:$0xff]  ;;  %16157 = vst [vmem:[#allocation8_spill] sm:$0xff] %v10595_v55  ;;  %p10330_p12 = pnand %p10329_p11, %p10448_p5 }
  0x1f   : > { %8585 = vmatprep.mubr.msk.f32.mxu1 %vm210_vm0, %v190_v18  ;;  %v195_v27 = vld [vmem:[%s10488_s22 + $0xa8] sm:$0xff]  ;;  %v181_v28 = vld [vmem:[%s10488_s22 + $0x38] sm:$0xff]  ;;  %v196_v29 = vld [vmem:[%s10488_s22 + $0xb0] sm:$0xff] }
  0x20   : > { %8562 = vmatmul.mubr.msk.f32.vlgmr.msra.gmra.mrb[0].mxu0 %vm210_vm0, %v175_v13  ;;  %8586 = vmatmul.mubr.msk.f32.vlgmr.msra.gmra.mrb[0].mxu1 %vm210_vm0, %v191_v19  ;;  %v182_v30 = vld [vmem:[%s10488_s22 + $0x40] sm:$0xff]  ;;  %v197_v31 = vld [vmem:[%s10488_s22 + $0xb8] sm:$0xff]  ;;  %v183_v32 = vld [vmem:[%s10488_s22 + $0x48] sm:$0xff]  ;;  %p10331_p13 = pneg %p10330_p12 }
  0x21   : > { %8564 = vmatprep.mubr.msk.f32.mxu0 %vm210_vm0, %v176_v14  ;;  %9524 = vmatpush3.bf16.msra.mxu0 %v10483_v10  ;;  %v198_v33 = vld [vmem:[%s10488_s22 + $0xc0] sm:$0xff]  ;;  %v184_v34 = vld [vmem:[%s10488_s22 + $0x50] sm:$0xff]  ;;  %v199_v35 = vld [vmem:[%s10488_s22 + $0xc8] sm:$0xff] }
  0x22   : > { %8588 = vmatprep.mubr.msk.f32.mxu1 %vm210_vm0, %v192_v21  ;;  %9516 = vmatpush3.bf16.msra.mxu1 %v10490_v11  ;;  %v185_v36 = vld [vmem:[%s10488_s22 + $0x58] sm:$0xff]  ;;  %v200_v37 = vld [vmem:[%s10488_s22 + $0xd0] sm:$0xff]  ;;  %v186_v38 = vld [vmem:[%s10488_s22 + $0x60] sm:$0xff] }
  0x23   : > { %9518 = vmatprep.subr.bf16.mxu1 %v10513_v22  ;;  %v201_v39 = vld [vmem:[%s10488_s22 + $0xd8] sm:$0xff]  ;;  %v187_v40 = vld [vmem:[%s10488_s22 + $0x68] sm:$0xff]  ;;  %v202_v41 = vld [vmem:[%s10488_s22 + $0xe0] sm:$0xff]  ;;  %9526 = vmatprep.subr.bf16.mxu0 %v10576_v49 }
  0x24   : > { %8565 = vmatmul.mubr.msk.f32.gmra.mrb[2].mxu0 %vm210_vm0, %v177_v17  ;;  %8589 = vmatmul.mubr.msk.f32.gmra.mrb[2].mxu1 %vm210_vm0, %v193_v23  ;;  %v188_v42 = vld [vmem:[%s10488_s22 + $0x70] sm:$0xff]  ;;  %v203_v43 = vld [vmem:[%s10488_s22 + $0xe8] sm:$0xff]  ;;  %v189_v44 = vld [vmem:[%s10488_s22 + $0x78] sm:$0xff] }
  0x25   : > { %8567 = vmatprep.mubr.msk.f32.mxu0 %vm210_vm0, %v178_v20  ;;  %8591 = vmatprep.mubr.msk.f32.mxu1 %vm210_vm0, %v194_v25  ;;  %v204_v45 = vld [vmem:[%s10488_s22 + $0xf0] sm:$0xff]  ;;  %v205_v46 = vld [vmem:[%s10488_s22 + $0xf8] sm:$0xff]  ;;  %v173_v63 = vld [vmem:[%s15613_s1 + $0xe0] sm:$0xff]  ;;  %s10332_s22 = sshll.u32 %s10392_s21, 4  ;;  %s10333_s22 = int_to_ptr.vmem [resolvable:$false] %s10332_s22 }
  0x26   : > { %9520 = vmatpush3.bf16.msra.mxu1 %v10513_v22  ;;  %9528 = vmatpush3.bf16.msra.mxu0 %v10576_v49  ;;  %v160_v0 = vld [vmem:[%s15613_s1 + $0x78] sm:$0xff]  ;;  %v161_v1 = vld [vmem:[%s15613_s1 + $0x80] sm:$0xff]  ;;  %v10626_v6 = vpack.c.bf16 %v173_v63, %v172_v61  ;;  %s10334_s23 = scalar_lea.vmem %s10333_s22, 8192  ;;  %p10335_p0 = scmp.lt.s32.totalorder %s15564_s7, %s10333_s22 }
  0x27   : > { %9530 = vmatprep.subr.bf16.mxu1 %v10586_v52  ;;  %9538 = vmatprep.subr.bf16.mxu0 %v10595_v55  ;;  %v10628_v7 = vpack.c.bf16 %v161_v1, %v160_v0  ;;  %p10336_p1 = scmp.lt.s32.totalorder %s10334_s23, %s10328_s17 }
  0x28   : > { %8568 = vmatmul.mubr.msk.f32.gmra.mrb[4].mxu0 %vm210_vm0, %v179_v24  ;;  %8592 = vmatmul.mubr.msk.f32.gmra.mrb[4].mxu1 %vm210_vm0, %v195_v27  ;;  %16160 = vst [vmem:[#allocation11_spill] sm:$0xff] %v10626_v6 }
  0x29   : > { %8570 = vmatprep.mubr.msk.f32.mxu0 %vm210_vm0, %v180_v26  ;;  %8594 = vmatprep.mubr.msk.f32.mxu1 %vm210_vm0, %v196_v29  ;;  %16161 = vst [vmem:[#allocation12_spill] sm:$0xff] %v10628_v7  ;;  %p10337_p2 = por %p10336_p1, %p10335_p0 }
  0x2b   : > { %p10338_p3 = pnand %p10337_p2, %p10331_p13 }
  0x2c   : > { %8571 = vmatmul.mubr.msk.f32.gmra.mrb[6].mxu0 %vm210_vm0, %v181_v28  ;;  %8595 = vmatmul.mubr.msk.f32.gmra.mrb[6].mxu1 %vm210_vm0, %v197_v31 }
  0x2d   : > { %8573 = vmatprep.mubr.msk.f32.mxu0 %vm210_vm0, %v182_v30  ;;  %8597 = vmatprep.mubr.msk.f32.mxu1 %vm210_vm0, %v198_v33 }
  0x30   : > { %8574 = vmatmul.mubr.msk.f32.gmra.mrb[8].mxu0 %vm210_vm0, %v183_v32  ;;  %8598 = vmatmul.mubr.msk.f32.gmra.mrb[8].mxu1 %vm210_vm0, %v199_v35 }
  0x31   : > { %8576 = vmatprep.mubr.msk.f32.mxu0 %vm210_vm0, %v184_v34  ;;  %8600 = vmatprep.mubr.msk.f32.mxu1 %vm210_vm0, %v200_v37 }
  0x34   : > { %8577 = vmatmul.mubr.msk.f32.gmra.mrb[10].mxu0 %vm210_vm0, %v185_v36  ;;  %8601 = vmatmul.mubr.msk.f32.gmra.mrb[10].mxu1 %vm210_vm0, %v201_v39 }
  0x35   : > { %8579 = vmatprep.mubr.msk.f32.mxu0 %vm210_vm0, %v186_v38  ;;  %8603 = vmatprep.mubr.msk.f32.mxu1 %vm210_vm0, %v202_v41 }
  0x38   : > { %8580 = vmatmul.mubr.msk.f32.gmra.mrb[12].mxu0 %vm210_vm0, %v187_v40  ;;  %8604 = vmatmul.mubr.msk.f32.gmra.mrb[12].mxu1 %vm210_vm0, %v203_v43 }
  0x39   : > { %8582 = vmatprep.mubr.msk.f32.mxu0 %vm210_vm0, %v188_v42  ;;  %8606 = vmatprep.mubr.msk.f32.mxu1 %vm210_vm0, %v204_v45 }
  0x3c   : > { %8583 = vmatmul.mubr.msk.f32.gmra.mrb[14].mxu0 %vm210_vm0, %v189_v44  ;;  %8607 = vmatmul.mubr.msk.f32.gmra.mrb[14].mxu1 %vm210_vm0, %v205_v46 }
  0xf3   : > { %v8563_v62 = vpop.f32.mrb[0].mxu0  ;;  %v10624_v5 = vpop.f32.mrb[0].mxu1 }
  0xf4   : > { %v373_v2 = vpop.f32.mrb[1].mxu0  ;;  %v10622_v4 = vadd.f32 %v8563_v62, %v10604_v60  ;;  %v10634_v9 = vpop.f32.mrb[1].mxu1  ;;  %v10770_v61 = vadd.f32 %v10624_v5, %v10604_v60 }
  0xf5   : > { %v10619_v3 = vadd.f32 %v373_v2, %v10604_v60  ;;  %v10747_v53 = vadd.f32 %v10634_v9, %v10604_v60 }
  0xf6   : > { %16178 = vst [vmem:[#allocation29_spill] sm:$0xff] %v10770_v61 }
  0xf7   : > { %16159 = vst [vmem:[#allocation10_spill] sm:$0xff] %v10619_v3  ;;  %v8566_v8 = vpop.f32.mrb[2].mxu0  ;;  %8617 = vmatprep.mubr.msk.f32.mxu1 %vm210_vm0, %v10619_v3  ;;  %8673 = vmatprep.mubr.msk.f32.mxu0 %vm210_vm0, %v10619_v3  ;;  %v10648_v15 = vpop.f32.mrb[2].mxu1  ;;  %16175 = vst [vmem:[#allocation26_spill] sm:$0xff] %v10747_v53 }
  0xf8   : > { %v383_v12 = vpop.f32.mrb[3].mxu0  ;;  %8618 = vmatmul.mubr.msk.f32.vlgmr.msra.gmra.mrb[16].mxu1 %vm210_vm0, %v10622_v4  ;;  %8674 = vmatmul.mubr.msk.f32.vlgmr.msra.gmra.mrb[16].mxu0 %vm210_vm0, %v10622_v4  ;;  %v10646_v14 = vadd.f32 %v8566_v8, %v10604_v60  ;;  %v10656_v17 = vpop.f32.mrb[3].mxu1  ;;  %v10785_v63 = vadd.f32 %v10648_v15, %v10604_v60 }
  0xf9   : > { %v10641_v13 = vadd.f32 %v383_v12, %v10604_v60  ;;  %9532 = vmatpush3.bf16.msra.mxu1 %v10586_v52  ;;  %9540 = vmatpush3.bf16.msra.mxu0 %v10595_v55  ;;  %v10766_v59 = vadd.f32 %v10656_v17, %v10604_v60 }
  0xfa   : > { %16163 = vst [vmem:[#allocation14_spill] sm:$0xff] %v10646_v14  ;;  %9534 = vmatprep.subr.bf16.mxu1 %v10626_v6  ;;  %9542 = vmatprep.subr.bf16.mxu0 %v10628_v7  ;;  %16180 = vst [vmem:[#allocation31_spill] sm:$0xff] %v10785_v63 }
  0xfb   : > { %16162 = vst [vmem:[#allocation13_spill] sm:$0xff] %v10641_v13  ;;  %v8569_v16 = vpop.f32.mrb[4].mxu0  ;;  %8620 = vmatprep.mubr.msk.f32.mxu1 %vm210_vm0, %v10641_v13  ;;  %8676 = vmatprep.mubr.msk.f32.mxu0 %vm210_vm0, %v10641_v13  ;;  %v10670_v21 = vpop.f32.mrb[4].mxu1  ;;  %16177 = vst [vmem:[#allocation28_spill] sm:$0xff] %v10766_v59 }
  0xfc   : > { %v393_v18 = vpop.f32.mrb[5].mxu0  ;;  %8621 = vmatmul.mubr.msk.f32.gmra.mrb[18].mxu1 %vm210_vm0, %v10646_v14  ;;  %8677 = vmatmul.mubr.msk.f32.gmra.mrb[18].mxu0 %vm210_vm0, %v10646_v14  ;;  %v10668_v20 = vadd.f32 %v8569_v16, %v10604_v60  ;;  %v473_v24 = vpop.f32.mrb[5].mxu1  ;;  %v10800_v1 = vadd.f32 %v10670_v21, %v10604_v60  ;;  %v1303_v21 = vmul.f32 %v10619_v3, %v10619_v3 }
  0xfd   : > { %v10663_v19 = vadd.f32 %v393_v18, %v10604_v60  ;;  %9536 = vmatpush3.bf16.msra.mxu1 %v10626_v6  ;;  %9544 = vmatpush3.bf16.msra.mxu0 %v10628_v7  ;;  %v10781_v62 = vadd.f32 %v473_v24, %v10604_v60  ;;  %v1306_v24 = vmul.f32 %v10646_v14, %v10646_v14 }
  0xfe   : > { %16165 = vst [vmem:[#allocation16_spill] sm:$0xff] %v10668_v20  ;;  %9546 = vmatprep.subr.bf16.mxu1 %v10595_v55  ;;  %9554 = vmatprep.subr.bf16.mxu0 %v10595_v55  ;;  %16182 = vst [vmem:[#allocation33_spill] sm:$0xff] %v10800_v1 }
  0xff   : > { %16164 = vst [vmem:[#allocation15_spill] sm:$0xff] %v10663_v19  ;;  %v8572_v23 = vpop.f32.mrb[6].mxu0  ;;  %8623 = vmatprep.mubr.msk.f32.mxu1 %vm210_vm0, %v10663_v19  ;;  %8679 = vmatprep.mubr.msk.f32.mxu0 %vm210_vm0, %v10663_v19  ;;  %v10688_v28 = vpop.f32.mrb[6].mxu1  ;;  %16179 = vst [vmem:[#allocation30_spill] sm:$0xff] %v10781_v62 }
 0x100   : > { %v403_v25 = vpop.f32.mrb[7].mxu0  ;;  %8624 = vmatmul.mubr.msk.f32.gmra.mrb[20].mxu1 %vm210_vm0, %v10668_v20  ;;  %8680 = vmatmul.mubr.msk.f32.gmra.mrb[20].mxu0 %vm210_vm0, %v10668_v20  ;;  %v10686_v27 = vadd.f32 %v8572_v23, %v10604_v60  ;;  %v483_v30 = vpop.f32.mrb[7].mxu1  ;;  %v10815_v5 = vadd.f32 %v10688_v28, %v10604_v60  ;;  %v1304_v23 = vmul.f32 %v10622_v4, %v10622_v4 }
 0x101   : > { %v10683_v26 = vadd.f32 %v403_v25, %v10604_v60  ;;  %v10796_v0 = vadd.f32 %v483_v30, %v10604_v60  ;;  %v1307_v25 = vmul.f32 %v10663_v19, %v10663_v19  ;;  %v1308_v28 = vmul.f32 %v10668_v20, %v10668_v20 }
 0x102   : > { %16167 = vst [vmem:[#allocation18_spill] sm:$0xff] %v10686_v27  ;;  %16184 = vst [vmem:[#allocation35_spill] sm:$0xff] %v10815_v5  ;;  %v1310_v30 = vmul.f32 %v10686_v27, %v10686_v27 }
 0x103   : > { %16166 = vst [vmem:[#allocation17_spill] sm:$0xff] %v10683_v26  ;;  %v8575_v29 = vpop.f32.mrb[8].mxu0  ;;  %8626 = vmatprep.mubr.msk.f32.mxu1 %vm210_vm0, %v10683_v26  ;;  %8682 = vmatprep.mubr.msk.f32.mxu0 %vm210_vm0, %v10683_v26  ;;  %v10704_v34 = vpop.f32.mrb[8].mxu1  ;;  %16181 = vst [vmem:[#allocation32_spill] sm:$0xff] %v10796_v0 }
 0x104   : > { %v413_v31 = vpop.f32.mrb[9].mxu0  ;;  %8627 = vmatmul.mubr.msk.f32.gmra.mrb[22].mxu1 %vm210_vm0, %v10686_v27  ;;  %8683 = vmatmul.mubr.msk.f32.gmra.mrb[22].mxu0 %vm210_vm0, %v10686_v27  ;;  %v10702_v33 = vadd.f32 %v8575_v29, %v10604_v60  ;;  %v493_v36 = vpop.f32.mrb[9].mxu1  ;;  %v10830_v9 = vadd.f32 %v10704_v34, %v10604_v60  ;;  %v1309_v29 = vmul.f32 %v10683_v26, %v10683_v26 }
 0x105   : > { %v10699_v32 = vadd.f32 %v413_v31, %v10604_v60  ;;  %v10811_v2 = vadd.f32 %v493_v36, %v10604_v60 }
 0x106   : > { %16169 = vst [vmem:[#allocation20_spill] sm:$0xff] %v10702_v33  ;;  %16186 = vst [vmem:[#allocation37_spill] sm:$0xff] %v10830_v9  ;;  %v1312_v34 = vmul.f32 %v10702_v33, %v10702_v33 }
 0x107   : > { %16168 = vst [vmem:[#allocation19_spill] sm:$0xff] %v10699_v32  ;;  %v8578_v35 = vpop.f32.mrb[10].mxu0  ;;  %8629 = vmatprep.mubr.msk.f32.mxu1 %vm210_vm0, %v10699_v32  ;;  %8685 = vmatprep.mubr.msk.f32.mxu0 %vm210_vm0, %v10699_v32  ;;  %v8602_v40 = vpop.f32.mrb[10].mxu1  ;;  %16183 = vst [vmem:[#allocation34_spill] sm:$0xff] %v10811_v2  ;;  %v1311_v31 = vmul.f32 %v10699_v32, %v10699_v32 }
 0x108   : > { %v423_v37 = vpop.f32.mrb[11].mxu0  ;;  %8630 = vmatmul.mubr.msk.f32.gmra.mrb[24].mxu1 %vm210_vm0, %v10702_v33  ;;  %8686 = vmatmul.mubr.msk.f32.gmra.mrb[24].mxu0 %vm210_vm0, %v10702_v33  ;;  %v10718_v39 = vadd.f32 %v8578_v35, %v10604_v60  ;;  %v503_v42 = vpop.f32.mrb[11].mxu1  ;;  %v10844_v15 = vadd.f32 %v8602_v40, %v10604_v60 }
 0x109   : > { %v10715_v38 = vadd.f32 %v423_v37, %v10604_v60  ;;  %v10826_v8 = vadd.f32 %v503_v42, %v10604_v60 }
 0x10a   : > { %16171 = vst [vmem:[#allocation22_spill] sm:$0xff] %v10718_v39  ;;  %16188 = vst [vmem:[#allocation39_spill] sm:$0xff] %v10844_v15  ;;  %v1314_v36 = vmul.f32 %v10718_v39, %v10718_v39 }
 0x10b   : > { %16170 = vst [vmem:[#allocation21_spill] sm:$0xff] %v10715_v38  ;;  %v8581_v41 = vpop.f32.mrb[12].mxu0  ;;  %8632 = vmatprep.mubr.msk.f32.mxu1 %vm210_vm0, %v10715_v38  ;;  %8688 = vmatprep.mubr.msk.f32.mxu0 %vm210_vm0, %v10715_v38  ;;  %v8605_v46 = vpop.f32.mrb[12].mxu1  ;;  %16185 = vst [vmem:[#allocation36_spill] sm:$0xff] %v10826_v8  ;;  %v1313_v35 = vmul.f32 %v10715_v38, %v10715_v38 }
 0x10c   : > { %v433_v43 = vpop.f32.mrb[13].mxu0  ;;  %8633 = vmatmul.mubr.msk.f32.gmra.mrb[26].mxu1 %vm210_vm0, %v10718_v39  ;;  %8689 = vmatmul.mubr.msk.f32.gmra.mrb[26].mxu0 %vm210_vm0, %v10718_v39  ;;  %v10732_v45 = vadd.f32 %v8581_v41, %v10604_v60  ;;  %v513_v48 = vpop.f32.mrb[13].mxu1  ;;  %v10858_v17 = vadd.f32 %v8605_v46, %v10604_v60  ;;  %v1320_v46 = vmul.f32 %v10770_v61, %v10770_v61 }
 0x10d   : > { %v10729_v44 = vadd.f32 %v433_v43, %v10604_v60  ;;  %v10841_v12 = vadd.f32 %v513_v48, %v10604_v60  ;;  %v1319_v43 = vmul.f32 %v10747_v53, %v10747_v53  ;;  %v1322_v48 = vmul.f32 %v10785_v63, %v10785_v63 }
 0x10e   : > { %16173 = vst [vmem:[#allocation24_spill] sm:$0xff] %v10732_v45  ;;  %16190 = vst [vmem:[#allocation41_spill] sm:$0xff] %v10858_v17  ;;  %v1316_v40 = vmul.f32 %v10732_v45, %v10732_v45 }
 0x10f   : > { %16172 = vst [vmem:[#allocation23_spill] sm:$0xff] %v10729_v44  ;;  %v8584_v47 = vpop.f32.mrb[14].mxu0  ;;  %8635 = vmatprep.mubr.msk.f32.mxu1 %vm210_vm0, %v10729_v44  ;;  %8691 = vmatprep.mubr.msk.f32.mxu0 %vm210_vm0, %v10729_v44  ;;  %v8608_v56 = vpop.f32.mrb[14].mxu1  ;;  %16187 = vst [vmem:[#allocation38_spill] sm:$0xff] %v10841_v12  ;;  %v1315_v37 = vmul.f32 %v10729_v44, %v10729_v44 }
 0x110   : > { %v443_v50 = vpop.f32.mrb[15].mxu0  ;;  %8636 = vmatmul.mubr.msk.f32.gmra.mrb[28].mxu1 %vm210_vm0, %v10732_v45  ;;  %8692 = vmatmul.mubr.msk.f32.gmra.mrb[28].mxu0 %vm210_vm0, %v10732_v45  ;;  %v10750_v54 = vadd.f32 %v8584_v47, %v10604_v60  ;;  %v523_v58 = vpop.f32.mrb[15].mxu1  ;;  %v10869_v18 = vadd.f32 %v8608_v56, %v10604_v60  ;;  %v1321_v47 = vmul.f32 %v10766_v59, %v10766_v59 }
 0x111   : > { %v10743_v51 = vadd.f32 %v443_v50, %v10604_v60  ;;  %v10855_v16 = vadd.f32 %v523_v58, %v10604_v60  ;;  %v1305_v60 = vmul.f32 %v10641_v13, %v10641_v13  ;;  %v1323_v50 = vmul.f32 %v10781_v62, %v10781_v62 }
 0x112   : > { %16176 = vst [vmem:[#allocation27_spill] sm:$0xff] %v10750_v54  ;;  %16191 = vst [vmem:[#allocation42_spill] sm:$0xff] %v10869_v18  ;;  %v1318_v42 = vmul.f32 %v10750_v54, %v10750_v54  ;;  %v1324_v56 = vmul.f32 %v10800_v1, %v10800_v1  ;;  %v1325_v58 = vmul.f32 %v10796_v0, %v10796_v0 }
 0x113   : > { %16174 = vst [vmem:[#allocation25_spill] sm:$0xff] %v10743_v51  ;;  %8638 = vmatprep.mubr.msk.f32.mxu1 %vm210_vm0, %v10743_v51  ;;  %8694 = vmatprep.mubr.msk.f32.mxu0 %vm210_vm0, %v10743_v51  ;;  %16189 = vst [vmem:[#allocation40_spill] sm:$0xff] %v10855_v16  ;;  %v1317_v41 = vmul.f32 %v10743_v51, %v10743_v51 }
 0x114   : > { %8639 = vmatmul.mubr.msk.f32.gmra.mrb[30].mxu1 %vm210_vm0, %v10750_v54  ;;  %8695 = vmatmul.mubr.msk.f32.gmra.mrb[30].mxu0 %vm210_vm0, %v10750_v54 }
 0x115   : > { %8641 = vmatprep.mubr.msk.f32.mxu1 %vm210_vm0, %v10747_v53  ;;  %8697 = vmatprep.mubr.msk.f32.mxu0 %vm210_vm0, %v10747_v53 }
 0x118   : > { %8642 = vmatmul.mubr.msk.f32.gmra.mrb[32].mxu1 %vm210_vm0, %v10770_v61  ;;  %8698 = vmatmul.mubr.msk.f32.gmra.mrb[32].mxu0 %vm210_vm0, %v10770_v61 }
 0x119   : > { %8644 = vmatprep.mubr.msk.f32.mxu1 %vm210_vm0, %v10766_v59  ;;  %8700 = vmatprep.mubr.msk.f32.mxu0 %vm210_vm0, %v10766_v59 }
 0x11c   : > { %8645 = vmatmul.mubr.msk.f32.gmra.mrb[34].mxu1 %vm210_vm0, %v10785_v63  ;;  %8701 = vmatmul.mubr.msk.f32.gmra.mrb[34].mxu0 %vm210_vm0, %v10785_v63 }
 0x11d   : > { %8647 = vmatprep.mubr.msk.f32.mxu1 %vm210_vm0, %v10781_v62  ;;  %8703 = vmatprep.mubr.msk.f32.mxu0 %vm210_vm0, %v10781_v62 }
 0x120   : > { %8648 = vmatmul.mubr.msk.f32.gmra.mrb[36].mxu1 %vm210_vm0, %v10800_v1  ;;  %8704 = vmatmul.mubr.msk.f32.gmra.mrb[36].mxu0 %vm210_vm0, %v10800_v1 }
 0x121   : > { %8650 = vmatprep.mubr.msk.f32.mxu1 %vm210_vm0, %v10796_v0  ;;  %8706 = vmatprep.mubr.msk.f32.mxu0 %vm210_vm0, %v10796_v0 }
 0x124   : > { %8651 = vmatmul.mubr.msk.f32.gmra.mrb[38].mxu1 %vm210_vm0, %v10815_v5  ;;  %8707 = vmatmul.mubr.msk.f32.gmra.mrb[38].mxu0 %vm210_vm0, %v10815_v5 }
 0x125   : > { %8653 = vmatprep.mubr.msk.f32.mxu1 %vm210_vm0, %v10811_v2  ;;  %8709 = vmatprep.mubr.msk.f32.mxu0 %vm210_vm0, %v10811_v2 }
 0x128   : > { %8654 = vmatmul.mubr.msk.f32.gmra.mrb[40].mxu1 %vm210_vm0, %v10830_v9  ;;  %8710 = vmatmul.mubr.msk.f32.gmra.mrb[40].mxu0 %vm210_vm0, %v10830_v9 }
 0x129   : > { %8656 = vmatprep.mubr.msk.f32.mxu1 %vm210_vm0, %v10826_v8  ;;  %8712 = vmatprep.mubr.msk.f32.mxu0 %vm210_vm0, %v10826_v8 }
 0x12c   : > { %8657 = vmatmul.mubr.msk.f32.gmra.mrb[42].mxu1 %vm210_vm0, %v10844_v15  ;;  %8713 = vmatmul.mubr.msk.f32.gmra.mrb[42].mxu0 %vm210_vm0, %v10844_v15 }
 0x12d   : > { %8659 = vmatprep.mubr.msk.f32.mxu1 %vm210_vm0, %v10841_v12  ;;  %8715 = vmatprep.mubr.msk.f32.mxu0 %vm210_vm0, %v10841_v12 }
 0x130   : > { %8660 = vmatmul.mubr.msk.f32.gmra.mrb[44].mxu1 %vm210_vm0, %v10858_v17  ;;  %8716 = vmatmul.mubr.msk.f32.gmra.mrb[44].mxu0 %vm210_vm0, %v10858_v17 }
 0x131   : > { %8662 = vmatprep.mubr.msk.f32.mxu1 %vm210_vm0, %v10855_v16  ;;  %8718 = vmatprep.mubr.msk.f32.mxu0 %vm210_vm0, %v10855_v16 }
 0x134   : > { %8663 = vmatmul.mubr.msk.f32.gmra.mrb[46].mxu1 %vm210_vm0, %v10869_v18  ;;  %8719 = vmatmul.mubr.msk.f32.gmra.mrb[46].mxu0 %vm210_vm0, %v10869_v18 }
 0x135   : > { %8729 = vmatprep.mubr.msk.f32.mxu1 %vm210_vm0, %v10619_v3  ;;  %8785 = vmatprep.mubr.msk.f32.mxu0 %vm210_vm0, %v1303_v21  ;;  %v1326_v21 = vmul.f32 %v10815_v5, %v10815_v5 }
 0x138   : > { %8730 = vmatmul.mubr.msk.f32.vlgmr.msra.gmra.mrb[48].mxu1 %vm210_vm0, %v10622_v4  ;;  %8786 = vmatmul.mubr.msk.f32.vlgmr.msra.gmra.mrb[48].mxu0 %vm210_vm0, %v1304_v23  ;;  %v1327_v23 = vmul.f32 %v10811_v2, %v10811_v2 }
 0x139   : > { %8732 = vmatprep.mubr.msk.f32.mxu1 %vm210_vm0, %v10641_v13  ;;  %8788 = vmatprep.mubr.msk.f32.mxu0 %vm210_vm0, %v1305_v60  ;;  %v1328_v60 = vmul.f32 %v10830_v9, %v10830_v9 }
 0x13a   : > { %9548 = vmatpush3.bf16.msra.mxu1 %v10595_v55  ;;  %9556 = vmatpush3.bf16.msra.mxu0 %v10595_v55 }
 0x13b   : > { %9550 = vmatprep.subr.bf16.mxu1 %v10628_v7  ;;  %9558 = vmatprep.subr.bf16.mxu0 %v10628_v7 }
 0x13c   : > { %8733 = vmatmul.mubr.msk.f32.gmra.mrb[50].mxu1 %vm210_vm0, %v10646_v14  ;;  %8789 = vmatmul.mubr.msk.f32.gmra.mrb[50].mxu0 %vm210_vm0, %v1306_v24  ;;  %v1329_v24 = vmul.f32 %v10826_v8, %v10826_v8 }
 0x13d   : > { %8735 = vmatprep.mubr.msk.f32.mxu1 %vm210_vm0, %v10663_v19  ;;  %8791 = vmatprep.mubr.msk.f32.mxu0 %vm210_vm0, %v1307_v25  ;;  %v1330_v25 = vmul.f32 %v10844_v15, %v10844_v15 }
 0x13e   : > { %9552 = vmatpush3.bf16.msra.mxu1 %v10628_v7  ;;  %9560 = vmatpush3.bf16.msra.mxu0 %v10628_v7 }
 0x13f   : > { %9562 = vmatprep.subr.bf16.mxu1 %v10595_v55 }
 0x140   : > { %8736 = vmatmul.mubr.msk.f32.gmra.mrb[52].mxu1 %vm210_vm0, %v10668_v20  ;;  %8792 = vmatmul.mubr.msk.f32.gmra.mrb[52].mxu0 %vm210_vm0, %v1308_v28  ;;  %v1331_v28 = vmul.f32 %v10841_v12, %v10841_v12 }
 0x141   : > { %8738 = vmatprep.mubr.msk.f32.mxu1 %vm210_vm0, %v10683_v26  ;;  %8794 = vmatprep.mubr.msk.f32.mxu0 %vm210_vm0, %v1309_v29  ;;  %v1332_v29 = vmul.f32 %v10858_v17, %v10858_v17 }
 0x144   : > { %8739 = vmatmul.mubr.msk.f32.gmra.mrb[54].mxu1 %vm210_vm0, %v10686_v27  ;;  %8795 = vmatmul.mubr.msk.f32.gmra.mrb[54].mxu0 %vm210_vm0, %v1310_v30  ;;  %v1333_v30 = vmul.f32 %v10855_v16, %v10855_v16 }
 0x145   : > { %8741 = vmatprep.mubr.msk.f32.mxu1 %vm210_vm0, %v10699_v32  ;;  %8797 = vmatprep.mubr.msk.f32.mxu0 %vm210_vm0, %v1311_v31  ;;  %v1334_v31 = vmul.f32 %v10869_v18, %v10869_v18 }
 0x148   : > { %8742 = vmatmul.mubr.msk.f32.gmra.mrb[56].mxu1 %vm210_vm0, %v10702_v33  ;;  %8798 = vmatmul.mubr.msk.f32.gmra.mrb[56].mxu0 %vm210_vm0, %v1312_v34 }
 0x149   : > { %8744 = vmatprep.mubr.msk.f32.mxu1 %vm210_vm0, %v10715_v38  ;;  %8800 = vmatprep.mubr.msk.f32.mxu0 %vm210_vm0, %v1313_v35 }
 0x14c   : > { %8745 = vmatmul.mubr.msk.f32.gmra.mrb[58].mxu1 %vm210_vm0, %v10718_v39  ;;  %8801 = vmatmul.mubr.msk.f32.gmra.mrb[58].mxu0 %vm210_vm0, %v1314_v36 }
 0x14d   : > { %8747 = vmatprep.mubr.msk.f32.mxu1 %vm210_vm0, %v10729_v44  ;;  %8803 = vmatprep.mubr.msk.f32.mxu0 %vm210_vm0, %v1315_v37 }
 0x150   : > { %8748 = vmatmul.mubr.msk.f32.gmra.mrb[60].mxu1 %vm210_vm0, %v10732_v45  ;;  %8804 = vmatmul.mubr.msk.f32.gmra.mrb[60].mxu0 %vm210_vm0, %v1316_v40 }
 0x151   : > { %8750 = vmatprep.mubr.msk.f32.mxu1 %vm210_vm0, %v10743_v51  ;;  %8806 = vmatprep.mubr.msk.f32.mxu0 %vm210_vm0, %v1317_v41 }
 0x154   : > { %8751 = vmatmul.mubr.msk.f32.gmra.mrb[62].mxu1 %vm210_vm0, %v10750_v54  ;;  %8807 = vmatmul.mubr.msk.f32.gmra.mrb[62].mxu0 %vm210_vm0, %v1318_v42 }
 0x155   : > { %8753 = vmatprep.mubr.msk.f32.mxu1 %vm210_vm0, %v10747_v53  ;;  %8809 = vmatprep.mubr.msk.f32.mxu0 %vm210_vm0, %v1319_v43 }
 0x158   : > { %8754 = vmatmul.mubr.msk.f32.gmra.mrb[64].mxu1 %vm210_vm0, %v10770_v61  ;;  %8810 = vmatmul.mubr.msk.f32.gmra.mrb[64].mxu0 %vm210_vm0, %v1320_v46 }
 0x159   : > { %8756 = vmatprep.mubr.msk.f32.mxu1 %vm210_vm0, %v10766_v59  ;;  %8812 = vmatprep.mubr.msk.f32.mxu0 %vm210_vm0, %v1321_v47 }
 0x15c   : > { %8757 = vmatmul.mubr.msk.f32.gmra.mrb[66].mxu1 %vm210_vm0, %v10785_v63  ;;  %8813 = vmatmul.mubr.msk.f32.gmra.mrb[66].mxu0 %vm210_vm0, %v1322_v48 }
 0x15d   : > { %8759 = vmatprep.mubr.msk.f32.mxu1 %vm210_vm0, %v10781_v62  ;;  %8815 = vmatprep.mubr.msk.f32.mxu0 %vm210_vm0, %v1323_v50 }
 0x160   : > { %8760 = vmatmul.mubr.msk.f32.gmra.mrb[68].mxu1 %vm210_vm0, %v10800_v1  ;;  %8816 = vmatmul.mubr.msk.f32.gmra.mrb[68].mxu0 %vm210_vm0, %v1324_v56 }
 0x161   : > { %8762 = vmatprep.mubr.msk.f32.mxu1 %vm210_vm0, %v10796_v0  ;;  %8818 = vmatprep.mubr.msk.f32.mxu0 %vm210_vm0, %v1325_v58 }
 0x164   : > { %8763 = vmatmul.mubr.msk.f32.gmra.mrb[70].mxu1 %vm210_vm0, %v10815_v5  ;;  %8819 = vmatmul.mubr.msk.f32.gmra.mrb[70].mxu0 %vm210_vm0, %v1326_v21 }
 0x165   : > { %8765 = vmatprep.mubr.msk.f32.mxu1 %vm210_vm0, %v10811_v2  ;;  %8821 = vmatprep.mubr.msk.f32.mxu0 %vm210_vm0, %v1327_v23 }
 0x168   : > { %8766 = vmatmul.mubr.msk.f32.gmra.mrb[72].mxu1 %vm210_vm0, %v10830_v9  ;;  %8822 = vmatmul.mubr.msk.f32.gmra.mrb[72].mxu0 %vm210_vm0, %v1328_v60 }
 0x169   : > { %8768 = vmatprep.mubr.msk.f32.mxu1 %vm210_vm0, %v10826_v8  ;;  %8824 = vmatprep.mubr.msk.f32.mxu0 %vm210_vm0, %v1329_v24 }
 0x16c   : > { %8769 = vmatmul.mubr.msk.f32.gmra.mrb[74].mxu1 %vm210_vm0, %v10844_v15  ;;  %8825 = vmatmul.mubr.msk.f32.gmra.mrb[74].mxu0 %vm210_vm0, %v1330_v25 }
 0x16d   : > { %8771 = vmatprep.mubr.msk.f32.mxu1 %vm210_vm0, %v10841_v12  ;;  %8827 = vmatprep.mubr.msk.f32.mxu0 %vm210_vm0, %v1331_v28 }
 0x170   : > { %8772 = vmatmul.mubr.msk.f32.gmra.mrb[76].mxu1 %vm210_vm0, %v10858_v17  ;;  %8828 = vmatmul.mubr.msk.f32.gmra.mrb[76].mxu0 %vm210_vm0, %v1332_v29 }
 0x171   : > { %8774 = vmatprep.mubr.msk.f32.mxu1 %vm210_vm0, %v10855_v16  ;;  %8830 = vmatprep.mubr.msk.f32.mxu0 %vm210_vm0, %v1333_v30 }
 0x174   : > { %8775 = vmatmul.mubr.msk.f32.gmra.mrb[78].mxu1 %vm210_vm0, %v10869_v18  ;;  %8831 = vmatmul.mubr.msk.f32.gmra.mrb[78].mxu0 %vm210_vm0, %v1334_v31 }
 0x1cb   : > { %v11042_v34 = vpop.f32.mrb[16].mxu1  ;;  %v11044_v35 = vpop.f32.mrb[16].mxu0 }
 0x1cc   : > { %v11046_v36 = vpop.f32.mrb[17].mxu1  ;;  %v11048_v37 = vpop.f32.mrb[17].mxu0  ;;  %v1657_v42 = vmul.f32 %v11042_v34, %v10622_v4  ;;  %v2010_v43 = vmul.f32 %v11044_v35, %v10622_v4 }
 0x1cd   : > { %16192 = vst [vmem:[#allocation43_spill] sm:$0xff] %v11046_v36  ;;  %16193 = vst [vmem:[#allocation44_spill] sm:$0xff] %v11048_v37  ;;  %v1656_v40 = vmul.f32 %v11046_v36, %v10619_v3  ;;  %v2009_v41 = vmul.f32 %v11048_v37, %v10619_v3 }
 0x1cf   : > { %v11058_v46 = vpop.f32.mrb[18].mxu1  ;;  %v11060_v47 = vpop.f32.mrb[18].mxu0  ;;  %8841 = vmatprep.mubr.msk.f32.mxu1 %vm210_vm0, %v1656_v40  ;;  %8897 = vmatprep.mubr.msk.f32.mxu0 %vm210_vm0, %v2009_v41 }
 0x1d0   : > { %16194 = vst [vmem:[#allocation45_spill] sm:$0xff] %v11058_v46  ;;  %16195 = vst [vmem:[#allocation46_spill] sm:$0xff] %v11060_v47  ;;  %v11064_v48 = vpop.f32.mrb[19].mxu1  ;;  %v11066_v50 = vpop.f32.mrb[19].mxu0  ;;  %8842 = vmatmul.mubr.msk.f32.vlgmr.msra.gmra.mrb[80].mxu1 %vm210_vm0, %v1657_v42  ;;  %8898 = vmatmul.mubr.msk.f32.vlgmr.msra.gmra.mrb[80].mxu0 %vm210_vm0, %v2010_v43  ;;  %v1659_v21 = vmul.f32 %v11058_v46, %v10646_v14  ;;  %v2012_v23 = vmul.f32 %v11060_v47, %v10646_v14 }
 0x1d1   : > { %16196 = vst [vmem:[#allocation47_spill] sm:$0xff] %v11064_v48  ;;  %16197 = vst [vmem:[#allocation48_spill] sm:$0xff] %v11066_v50  ;;  %v1658_v56 = vmul.f32 %v11064_v48, %v10641_v13  ;;  %v2011_v58 = vmul.f32 %v11066_v50, %v10641_v13  ;;  %9564 = vmatpush3.bf16.msra.mxu1 %v10595_v55 }
 0x1d2   : > { %9566 = vmatprep.subr.bf16.mxu1 %v10628_v7 }
 0x1d3   : > { %v11080_v60 = vpop.f32.mrb[20].mxu1  ;;  %v11082_v24 = vpop.f32.mrb[20].mxu0  ;;  %8844 = vmatprep.mubr.msk.f32.mxu1 %vm210_vm0, %v1658_v56  ;;  %8900 = vmatprep.mubr.msk.f32.mxu0 %vm210_vm0, %v2011_v58 }
 0x1d4   : > { %16198 = vst [vmem:[#allocation49_spill] sm:$0xff] %v11080_v60  ;;  %16199 = vst [vmem:[#allocation50_spill] sm:$0xff] %v11082_v24  ;;  %v11086_v25 = vpop.f32.mrb[21].mxu1  ;;  %v11088_v28 = vpop.f32.mrb[21].mxu0  ;;  %8845 = vmatmul.mubr.msk.f32.gmra.mrb[82].mxu1 %vm210_vm0, %v1659_v21  ;;  %8901 = vmatmul.mubr.msk.f32.gmra.mrb[82].mxu0 %vm210_vm0, %v2012_v23  ;;  %v1661_v31 = vmul.f32 %v11080_v60, %v10668_v20  ;;  %v2014_v40 = vmul.f32 %v11082_v24, %v10668_v20 }
 0x1d5   : > { %16200 = vst [vmem:[#allocation51_spill] sm:$0xff] %v11086_v25  ;;  %16201 = vst [vmem:[#allocation52_spill] sm:$0xff] %v11088_v28  ;;  %v1660_v29 = vmul.f32 %v11086_v25, %v10663_v19  ;;  %v2013_v30 = vmul.f32 %v11088_v28, %v10663_v19  ;;  %9568 = vmatpush3.bf16.msra.mxu1 %v10628_v7 }
 0x1d6   : > { %9578 = vmatprep.subr.bf16.mxu1 %v10490_v11 }
 0x1d7   : > { %v11102_v41 = vpop.f32.mrb[22].mxu1  ;;  %v11104_v42 = vpop.f32.mrb[22].mxu0  ;;  %8847 = vmatprep.mubr.msk.f32.mxu1 %vm210_vm0, %v1660_v29  ;;  %8903 = vmatprep.mubr.msk.f32.mxu0 %vm210_vm0, %v2013_v30 }
 0x1d8   : > { %16202 = vst [vmem:[#allocation53_spill] sm:$0xff] %v11102_v41  ;;  %16203 = vst [vmem:[#allocation54_spill] sm:$0xff] %v11104_v42  ;;  %v11108_v43 = vpop.f32.mrb[23].mxu1  ;;  %v11110_v56 = vpop.f32.mrb[23].mxu0  ;;  %8848 = vmatmul.mubr.msk.f32.gmra.mrb[84].mxu1 %vm210_vm0, %v1661_v31  ;;  %8904 = vmatmul.mubr.msk.f32.gmra.mrb[84].mxu0 %vm210_vm0, %v2014_v40  ;;  %v1663_v23 = vmul.f32 %v11102_v41, %v10686_v27  ;;  %v2016_v29 = vmul.f32 %v11104_v42, %v10686_v27 }
 0x1d9   : > { %16204 = vst [vmem:[#allocation55_spill] sm:$0xff] %v11108_v43  ;;  %16205 = vst [vmem:[#allocation56_spill] sm:$0xff] %v11110_v56  ;;  %v1662_v58 = vmul.f32 %v11108_v43, %v10683_v26  ;;  %v2015_v21 = vmul.f32 %v11110_v56, %v10683_v26 }
 0x1db   : > { %v11122_v30 = vpop.f32.mrb[24].mxu1  ;;  %v11124_v7 = vpop.f32.mrb[24].mxu0  ;;  %8850 = vmatprep.mubr.msk.f32.mxu1 %vm210_vm0, %v1662_v58  ;;  %8906 = vmatprep.mubr.msk.f32.mxu0 %vm210_vm0, %v2015_v21 }
 0x1dc   : > { %16206 = vst [vmem:[#allocation57_spill] sm:$0xff] %v11122_v30  ;;  %16207 = vst [vmem:[#allocation58_spill] sm:$0xff] %v11124_v7  ;;  %v11128_v31 = vpop.f32.mrb[25].mxu1  ;;  %v11130_v40 = vpop.f32.mrb[25].mxu0  ;;  %8851 = vmatmul.mubr.msk.f32.gmra.mrb[86].mxu1 %vm210_vm0, %v1663_v23  ;;  %8907 = vmatmul.mubr.msk.f32.gmra.mrb[86].mxu0 %vm210_vm0, %v2016_v29  ;;  %v1665_v42 = vmul.f32 %v11122_v30, %v10702_v33  ;;  %v2018_v58 = vmul.f32 %v11124_v7, %v10702_v33 }
 0x1dd   : > { %16208 = vst [vmem:[#allocation59_spill] sm:$0xff] %v11128_v31  ;;  %16209 = vst [vmem:[#allocation60_spill] sm:$0xff] %v11130_v40  ;;  %v1664_v6 = vmul.f32 %v11128_v31, %v10699_v32  ;;  %v2017_v57 = vmul.f32 %v11130_v40, %v10699_v32 }
 0x1df   : > { %v11142_v21 = vpop.f32.mrb[26].mxu1  ;;  %v11144_v41 = vpop.f32.mrb[26].mxu0  ;;  %8853 = vmatprep.mubr.msk.f32.mxu1 %vm210_vm0, %v1664_v6  ;;  %8909 = vmatprep.mubr.msk.f32.mxu0 %vm210_vm0, %v2017_v57 }
 0x1e0   : > { %16210 = vst [vmem:[#allocation61_spill] sm:$0xff] %v11142_v21  ;;  %16211 = vst [vmem:[#allocation62_spill] sm:$0xff] %v11144_v41  ;;  %v11148_v23 = vpop.f32.mrb[27].mxu1  ;;  %v11150_v29 = vpop.f32.mrb[27].mxu0  ;;  %8854 = vmatmul.mubr.msk.f32.gmra.mrb[88].mxu1 %vm210_vm0, %v1665_v42  ;;  %8910 = vmatmul.mubr.msk.f32.gmra.mrb[88].mxu0 %vm210_vm0, %v2018_v58  ;;  %v1667_v40 = vmul.f32 %v11142_v21, %v10718_v39  ;;  %v2020_v57 = vmul.f32 %v11144_v41, %v10718_v39 }
 0x1e1   : > { %16212 = vst [vmem:[#allocation63_spill] sm:$0xff] %v11148_v23  ;;  %16213 = vst [vmem:[#allocation64_spill] sm:$0xff] %v11150_v29  ;;  %v1666_v30 = vmul.f32 %v11148_v23, %v10715_v38  ;;  %v2019_v7 = vmul.f32 %v11150_v29, %v10715_v38 }
 0x1e3   : > { %v11162_v6 = vpop.f32.mrb[28].mxu1  ;;  %v11164_v31 = vpop.f32.mrb[28].mxu0  ;;  %8856 = vmatprep.mubr.msk.f32.mxu1 %vm210_vm0, %v1666_v30  ;;  %8912 = vmatprep.mubr.msk.f32.mxu0 %vm210_vm0, %v2019_v7 }
 0x1e4   : > { %16214 = vst [vmem:[#allocation65_spill] sm:$0xff] %v11162_v6  ;;  %16215 = vst [vmem:[#allocation66_spill] sm:$0xff] %v11164_v31  ;;  %v11168_v42 = vpop.f32.mrb[29].mxu1  ;;  %v11170_v58 = vpop.f32.mrb[29].mxu0  ;;  %8857 = vmatmul.mubr.msk.f32.gmra.mrb[90].mxu1 %vm210_vm0, %v1667_v40  ;;  %8913 = vmatmul.mubr.msk.f32.gmra.mrb[90].mxu0 %vm210_vm0, %v2020_v57  ;;  %v1669_v29 = vmul.f32 %v11162_v6, %v10732_v45  ;;  %v2022_v7 = vmul.f32 %v11164_v31, %v10732_v45 }
 0x1e5   : > { %16216 = vst [vmem:[#allocation67_spill] sm:$0xff] %v11168_v42  ;;  %16217 = vst [vmem:[#allocation68_spill] sm:$0xff] %v11170_v58  ;;  %v1668_v21 = vmul.f32 %v11168_v42, %v10729_v44  ;;  %v2021_v41 = vmul.f32 %v11170_v58, %v10729_v44 }
 0x1e7   : > { %v11182_v30 = vpop.f32.mrb[30].mxu1  ;;  %v11184_v23 = vpop.f32.mrb[30].mxu0  ;;  %8859 = vmatprep.mubr.msk.f32.mxu1 %vm210_vm0, %v1668_v21  ;;  %8915 = vmatprep.mubr.msk.f32.mxu0 %vm210_vm0, %v2021_v41 }
 0x1e8   : > { %16218 = vst [vmem:[#allocation69_spill] sm:$0xff] %v11182_v30  ;;  %16219 = vst [vmem:[#allocation70_spill] sm:$0xff] %v11184_v23  ;;  %v11188_v40 = vpop.f32.mrb[31].mxu1  ;;  %v11190_v57 = vpop.f32.mrb[31].mxu0  ;;  %8860 = vmatmul.mubr.msk.f32.gmra.mrb[92].mxu1 %vm210_vm0, %v1669_v29  ;;  %8916 = vmatmul.mubr.msk.f32.gmra.mrb[92].mxu0 %vm210_vm0, %v2022_v7  ;;  %v1671_v58 = vmul.f32 %v11182_v30, %v10750_v54  ;;  %v2024_v41 = vmul.f32 %v11184_v23, %v10750_v54 }
 0x1e9   : > { %16220 = vst [vmem:[#allocation71_spill] sm:$0xff] %v11188_v40  ;;  %16221 = vst [vmem:[#allocation72_spill] sm:$0xff] %v11190_v57  ;;  %v1670_v6 = vmul.f32 %v11188_v40, %v10743_v51  ;;  %v2023_v31 = vmul.f32 %v11190_v57, %v10743_v51 }
 0x1eb   : > { %v11202_v21 = vpop.f32.mrb[32].mxu1  ;;  %v11204_v42 = vpop.f32.mrb[32].mxu0  ;;  %8862 = vmatprep.mubr.msk.f32.mxu1 %vm210_vm0, %v1670_v6  ;;  %8918 = vmatprep.mubr.msk.f32.mxu0 %vm210_vm0, %v2023_v31 }
 0x1ec   : > { %16222 = vst [vmem:[#allocation73_spill] sm:$0xff] %v11202_v21  ;;  %16223 = vst [vmem:[#allocation74_spill] sm:$0xff] %v11204_v42  ;;  %v11208_v29 = vpop.f32.mrb[33].mxu1  ;;  %v11210_v7 = vpop.f32.mrb[33].mxu0  ;;  %8863 = vmatmul.mubr.msk.f32.gmra.mrb[94].mxu1 %vm210_vm0, %v1671_v58  ;;  %8919 = vmatmul.mubr.msk.f32.gmra.mrb[94].mxu0 %vm210_vm0, %v2024_v41  ;;  %v1673_v57 = vmul.f32 %v11202_v21, %v10770_v61  ;;  %v2026_v31 = vmul.f32 %v11204_v42, %v10770_v61 }
 0x1ed   : > { %16224 = vst [vmem:[#allocation75_spill] sm:$0xff] %v11208_v29  ;;  %16225 = vst [vmem:[#allocation76_spill] sm:$0xff] %v11210_v7  ;;  %v1672_v30 = vmul.f32 %v11208_v29, %v10747_v53  ;;  %v2025_v23 = vmul.f32 %v11210_v7, %v10747_v53 }
 0x1ef   : > { %v11222_v6 = vpop.f32.mrb[34].mxu1  ;;  %v11224_v40 = vpop.f32.mrb[34].mxu0  ;;  %8865 = vmatprep.mubr.msk.f32.mxu1 %vm210_vm0, %v1672_v30  ;;  %8921 = vmatprep.mubr.msk.f32.mxu0 %vm210_vm0, %v2025_v23 }
 0x1f0   : > { %16226 = vst [vmem:[#allocation77_spill] sm:$0xff] %v11222_v6  ;;  %16227 = vst [vmem:[#allocation78_spill] sm:$0xff] %v11224_v40  ;;  %v11228_v58 = vpop.f32.mrb[35].mxu1  ;;  %v11230_v41 = vpop.f32.mrb[35].mxu0  ;;  %8866 = vmatmul.mubr.msk.f32.gmra.mrb[96].mxu1 %vm210_vm0, %v1673_v57  ;;  %8922 = vmatmul.mubr.msk.f32.gmra.mrb[96].mxu0 %vm210_vm0, %v2026_v31  ;;  %v1675_v7 = vmul.f32 %v11222_v6, %v10785_v63  ;;  %v2028_v23 = vmul.f32 %v11224_v40, %v10785_v63 }
 0x1f1   : > { %16228 = vst [vmem:[#allocation79_spill] sm:$0xff] %v11228_v58  ;;  %16229 = vst [vmem:[#allocation80_spill] sm:$0xff] %v11230_v41  ;;  %v1674_v21 = vmul.f32 %v11228_v58, %v10766_v59  ;;  %v2027_v42 = vmul.f32 %v11230_v41, %v10766_v59 }
 0x1f3   : > { %v11242_v30 = vpop.f32.mrb[36].mxu1  ;;  %v11244_v29 = vpop.f32.mrb[36].mxu0  ;;  %8868 = vmatprep.mubr.msk.f32.mxu1 %vm210_vm0, %v1674_v21  ;;  %8924 = vmatprep.mubr.msk.f32.mxu0 %vm210_vm0, %v2027_v42 }
 0x1f4   : > { %16230 = vst [vmem:[#allocation81_spill] sm:$0xff] %v11242_v30  ;;  %16231 = vst [vmem:[#allocation82_spill] sm:$0xff] %v11244_v29  ;;  %v11248_v57 = vpop.f32.mrb[37].mxu1  ;;  %v11250_v31 = vpop.f32.mrb[37].mxu0  ;;  %8869 = vmatmul.mubr.msk.f32.gmra.mrb[98].mxu1 %vm210_vm0, %v1675_v7  ;;  %8925 = vmatmul.mubr.msk.f32.gmra.mrb[98].mxu0 %vm210_vm0, %v2028_v23  ;;  %v1677_v41 = vmul.f32 %v11242_v30, %v10800_v1  ;;  %v2030_v42 = vmul.f32 %v11244_v29, %v10800_v1 }
 0x1f5   : > { %16232 = vst [vmem:[#allocation83_spill] sm:$0xff] %v11248_v57  ;;  %16233 = vst [vmem:[#allocation84_spill] sm:$0xff] %v11250_v31  ;;  %v1676_v6 = vmul.f32 %v11248_v57, %v10781_v62  ;;  %v2029_v40 = vmul.f32 %v11250_v31, %v10781_v62 }
 0x1f7   : > { %v11262_v21 = vpop.f32.mrb[38].mxu1  ;;  %v11264_v58 = vpop.f32.mrb[38].mxu0  ;;  %8871 = vmatprep.mubr.msk.f32.mxu1 %vm210_vm0, %v1676_v6  ;;  %8927 = vmatprep.mubr.msk.f32.mxu0 %vm210_vm0, %v2029_v40 }
 0x1f8   : > { %16234 = vst [vmem:[#allocation85_spill] sm:$0xff] %v11262_v21  ;;  %16235 = vst [vmem:[#allocation86_spill] sm:$0xff] %v11264_v58  ;;  %v11268_v7 = vpop.f32.mrb[39].mxu1  ;;  %v11270_v23 = vpop.f32.mrb[39].mxu0  ;;  %8872 = vmatmul.mubr.msk.f32.gmra.mrb[100].mxu1 %vm210_vm0, %v1677_v41  ;;  %8928 = vmatmul.mubr.msk.f32.gmra.mrb[100].mxu0 %vm210_vm0, %v2030_v42  ;;  %v1679_v31 = vmul.f32 %v11262_v21, %v10815_v5  ;;  %v2032_v40 = vmul.f32 %v11264_v58, %v10815_v5 }
 0x1f9   : > { %16236 = vst [vmem:[#allocation87_spill] sm:$0xff] %v11268_v7  ;;  %16237 = vst [vmem:[#allocation88_spill] sm:$0xff] %v11270_v23  ;;  %v1678_v30 = vmul.f32 %v11268_v7, %v10796_v0  ;;  %v2031_v29 = vmul.f32 %v11270_v23, %v10796_v0 }
 0x1fb   : > { %v11282_v6 = vpop.f32.mrb[40].mxu1  ;;  %v11284_v57 = vpop.f32.mrb[40].mxu0  ;;  %8874 = vmatprep.mubr.msk.f32.mxu1 %vm210_vm0, %v1678_v30  ;;  %8930 = vmatprep.mubr.msk.f32.mxu0 %vm210_vm0, %v2031_v29 }
 0x1fc   : > { %16238 = vst [vmem:[#allocation89_spill] sm:$0xff] %v11282_v6  ;;  %16239 = vst [vmem:[#allocation90_spill] sm:$0xff] %v11284_v57  ;;  %v11288_v41 = vpop.f32.mrb[41].mxu1  ;;  %v11290_v42 = vpop.f32.mrb[41].mxu0  ;;  %8875 = vmatmul.mubr.msk.f32.gmra.mrb[102].mxu1 %vm210_vm0, %v1679_v31  ;;  %8931 = vmatmul.mubr.msk.f32.gmra.mrb[102].mxu0 %vm210_vm0, %v2032_v40  ;;  %v1681_v23 = vmul.f32 %v11282_v6, %v10830_v9  ;;  %v2034_v29 = vmul.f32 %v11284_v57, %v10830_v9 }
 0x1fd   : > { %16240 = vst [vmem:[#allocation91_spill] sm:$0xff] %v11288_v41  ;;  %16241 = vst [vmem:[#allocation92_spill] sm:$0xff] %v11290_v42  ;;  %v1680_v21 = vmul.f32 %v11288_v41, %v10811_v2  ;;  %v2033_v58 = vmul.f32 %v11290_v42, %v10811_v2 }
 0x1ff   : > { %v11302_v30 = vpop.f32.mrb[42].mxu1  ;;  %v11304_v7 = vpop.f32.mrb[42].mxu0  ;;  %8877 = vmatprep.mubr.msk.f32.mxu1 %vm210_vm0, %v1680_v21  ;;  %8933 = vmatprep.mubr.msk.f32.mxu0 %vm210_vm0, %v2033_v58 }
 0x200   : > { %16242 = vst [vmem:[#allocation93_spill] sm:$0xff] %v11302_v30  ;;  %16243 = vst [vmem:[#allocation94_spill] sm:$0xff] %v11304_v7  ;;  %v11308_v31 = vpop.f32.mrb[43].mxu1  ;;  %v11310_v40 = vpop.f32.mrb[43].mxu0  ;;  %8878 = vmatmul.mubr.msk.f32.gmra.mrb[104].mxu1 %vm210_vm0, %v1681_v23  ;;  %8934 = vmatmul.mubr.msk.f32.gmra.mrb[104].mxu0 %vm210_vm0, %v2034_v29  ;;  %v1683_v42 = vmul.f32 %v11302_v30, %v10844_v15  ;;  %v2036_v58 = vmul.f32 %v11304_v7, %v10844_v15 }
 0x201   : > { %16244 = vst [vmem:[#allocation95_spill] sm:$0xff] %v11308_v31  ;;  %16245 = vst [vmem:[#allocation96_spill] sm:$0xff] %v11310_v40  ;;  %v1682_v6 = vmul.f32 %v11308_v31, %v10826_v8  ;;  %v2035_v57 = vmul.f32 %v11310_v40, %v10826_v8 }
 0x203   : > { %v11322_v21 = vpop.f32.mrb[44].mxu1  ;;  %v11324_v41 = vpop.f32.mrb[44].mxu0  ;;  %8880 = vmatprep.mubr.msk.f32.mxu1 %vm210_vm0, %v1682_v6  ;;  %8936 = vmatprep.mubr.msk.f32.mxu0 %vm210_vm0, %v2035_v57 }
 0x204   : > { %16246 = vst [vmem:[#allocation97_spill] sm:$0xff] %v11322_v21  ;;  %16247 = vst [vmem:[#allocation98_spill] sm:$0xff] %v11324_v41  ;;  %v11328_v23 = vpop.f32.mrb[45].mxu1  ;;  %v11330_v29 = vpop.f32.mrb[45].mxu0  ;;  %8881 = vmatmul.mubr.msk.f32.gmra.mrb[106].mxu1 %vm210_vm0, %v1683_v42  ;;  %8937 = vmatmul.mubr.msk.f32.gmra.mrb[106].mxu0 %vm210_vm0, %v2036_v58  ;;  %v1685_v40 = vmul.f32 %v11322_v21, %v10858_v17  ;;  %v2038_v57 = vmul.f32 %v11324_v41, %v10858_v17 }
 0x205   : > { %16248 = vst [vmem:[#allocation99_spill] sm:$0xff] %v11328_v23  ;;  %16249 = vst [vmem:[#allocation100_spill] sm:$0xff] %v11330_v29  ;;  %v1684_v30 = vmul.f32 %v11328_v23, %v10841_v12  ;;  %v2037_v7 = vmul.f32 %v11330_v29, %v10841_v12 }
 0x207   : > { %v11342_v6 = vpop.f32.mrb[46].mxu1  ;;  %v11344_v31 = vpop.f32.mrb[46].mxu0  ;;  %8883 = vmatprep.mubr.msk.f32.mxu1 %vm210_vm0, %v1684_v30  ;;  %8939 = vmatprep.mubr.msk.f32.mxu0 %vm210_vm0, %v2037_v7 }
 0x208   : > { %16250 = vst [vmem:[#allocation101_spill] sm:$0xff] %v11342_v6  ;;  %16251 = vst [vmem:[#allocation102_spill] sm:$0xff] %v11344_v31  ;;  %v11348_v42 = vpop.f32.mrb[47].mxu1  ;;  %v11350_v58 = vpop.f32.mrb[47].mxu0  ;;  %8884 = vmatmul.mubr.msk.f32.gmra.mrb[108].mxu1 %vm210_vm0, %v1685_v40  ;;  %8940 = vmatmul.mubr.msk.f32.gmra.mrb[108].mxu0 %vm210_vm0, %v2038_v57  ;;  %v1687_v29 = vmul.f32 %v11342_v6, %v10869_v18  ;;  %v2040_v7 = vmul.f32 %v11344_v31, %v10869_v18 }
 0x209   : > { %16252 = vst [vmem:[#allocation103_spill] sm:$0xff] %v11348_v42  ;;  %16253 = vst [vmem:[#allocation104_spill] sm:$0xff] %v11350_v58  ;;  %v1686_v21 = vmul.f32 %v11348_v42, %v10855_v16  ;;  %v2039_v41 = vmul.f32 %v11350_v58, %v10855_v16 }
 0x20b   : > { %v11362_v30 = vpop.f32.mrb[48].mxu1  ;;  %v11364_v23 = vpop.f32.mrb[48].mxu0  ;;  %8886 = vmatprep.mubr.msk.f32.mxu1 %vm210_vm0, %v1686_v21  ;;  %8942 = vmatprep.mubr.msk.f32.mxu0 %vm210_vm0, %v2039_v41 }
 0x20c   : > { %16254 = vst [vmem:[#allocation105_spill] sm:$0xff] %v11362_v30  ;;  %v11368_v40 = vpop.f32.mrb[49].mxu1  ;;  %v11370_v57 = vpop.f32.mrb[49].mxu0  ;;  %8887 = vmatmul.mubr.msk.f32.gmra.mrb[110].mxu1 %vm210_vm0, %v1687_v29  ;;  %8943 = vmatmul.mubr.msk.f32.gmra.mrb[110].mxu0 %vm210_vm0, %v2040_v7  ;;  %v2363_v31 = vmul.f32 %v11362_v30, %v10622_v4 }
 0x20d   : > { %16255 = vst [vmem:[#allocation106_spill] sm:$0xff] %v11368_v40  ;;  %v2362_v6 = vmul.f32 %v11368_v40, %v10619_v3 }
 0x20f   : > { %v11378_v58 = vpop.f32.mrb[50].mxu1  ;;  %v11380_v42 = vpop.f32.mrb[50].mxu0  ;;  %8953 = vmatprep.mubr.msk.f32.mxu1 %vm210_vm0, %v2362_v6 }
 0x210   : > { %16256 = vst [vmem:[#allocation107_spill] sm:$0xff] %v11378_v58  ;;  %v11383_v41 = vpop.f32.mrb[51].mxu1  ;;  %v11385_v21 = vpop.f32.mrb[51].mxu0  ;;  %8954 = vmatmul.mubr.msk.f32.vlgmr.msra.gmra.mrb[112].mxu1 %vm210_vm0, %v2363_v31  ;;  %v2365_v7 = vmul.f32 %v11378_v58, %v10646_v14 }
 0x211   : > { %16257 = vst [vmem:[#allocation108_spill] sm:$0xff] %v11383_v41  ;;  %v2364_v29 = vmul.f32 %v11383_v41, %v10641_v13  ;;  %9580 = vmatpush3.bf16.msra.mxu1 %v10490_v11 }
 0x212   : > { %9582 = vmatprep.subr.bf16.mxu1 %v10513_v22 }
 0x213   : > { %v11394_v56 = vpop.f32.mrb[52].mxu1  ;;  %v11396_v43 = vpop.f32.mrb[52].mxu0  ;;  %8956 = vmatprep.mubr.msk.f32.mxu1 %vm210_vm0, %v2364_v29 }
 0x214   : > { %16258 = vst [vmem:[#allocation109_spill] sm:$0xff] %v11394_v56  ;;  %v11399_v6 = vpop.f32.mrb[53].mxu1  ;;  %v11401_v24 = vpop.f32.mrb[53].mxu0  ;;  %8957 = vmatmul.mubr.msk.f32.gmra.mrb[114].mxu1 %vm210_vm0, %v2365_v7  ;;  %v2367_v31 = vmul.f32 %v11394_v56, %v10668_v20 }
 0x215   : > { %16259 = vst [vmem:[#allocation110_spill] sm:$0xff] %v11399_v6  ;;  %v2366_v11 = vmul.f32 %v11399_v6, %v10663_v19  ;;  %9584 = vmatpush3.bf16.msra.mxu1 %v10513_v22 }
 0x216   : > { %9594 = vmatprep.subr.bf16.mxu1 %v10586_v52 }
 0x217   : > { %v11410_v60 = vpop.f32.mrb[54].mxu1  ;;  %v11412_v28 = vpop.f32.mrb[54].mxu0  ;;  %8959 = vmatprep.mubr.msk.f32.mxu1 %vm210_vm0, %v2366_v11 }
 0x218   : > { %16260 = vst [vmem:[#allocation111_spill] sm:$0xff] %v11410_v60  ;;  %16261 = vst [vmem:[#allocation112_spill] sm:$0xff] %v11412_v28  ;;  %v11415_v29 = vpop.f32.mrb[55].mxu1  ;;  %v11417_v25 = vpop.f32.mrb[55].mxu0  ;;  %8960 = vmatmul.mubr.msk.f32.gmra.mrb[116].mxu1 %vm210_vm0, %v2367_v31  ;;  %v2369_v7 = vmul.f32 %v11410_v60, %v10686_v27 }
 0x219   : > { %16262 = vst [vmem:[#allocation113_spill] sm:$0xff] %v11415_v29  ;;  %16263 = vst [vmem:[#allocation114_spill] sm:$0xff] %v11417_v25  ;;  %v2368_v22 = vmul.f32 %v11415_v29, %v10683_v26 }
 0x21b   : > { %v11424_v56 = vpop.f32.mrb[56].mxu1  ;;  %v11426_v52 = vpop.f32.mrb[56].mxu0  ;;  %8962 = vmatprep.mubr.msk.f32.mxu1 %vm210_vm0, %v2368_v22 }
 0x21c   : > { %16264 = vst [vmem:[#allocation115_spill] sm:$0xff] %v11424_v56  ;;  %16265 = vst [vmem:[#allocation116_spill] sm:$0xff] %v11426_v52  ;;  %v11429_v20 = vpop.f32.mrb[57].mxu1  ;;  %v11431_v11 = vpop.f32.mrb[57].mxu0  ;;  %8963 = vmatmul.mubr.msk.f32.gmra.mrb[118].mxu1 %vm210_vm0, %v2369_v7  ;;  %v2371_v29 = vmul.f32 %v11424_v56, %v10702_v33 }
 0x21d   : > { %16266 = vst [vmem:[#allocation117_spill] sm:$0xff] %v11429_v20  ;;  %16267 = vst [vmem:[#allocation118_spill] sm:$0xff] %v11431_v11  ;;  %v2370_v31 = vmul.f32 %v11429_v20, %v10699_v32 }
 0x21f   : > { %v11438_v26 = vpop.f32.mrb[58].mxu1  ;;  %v11440_v60 = vpop.f32.mrb[58].mxu0  ;;  %8965 = vmatprep.mubr.msk.f32.mxu1 %vm210_vm0, %v2370_v31 }
 0x220   : > { %16268 = vst [vmem:[#allocation119_spill] sm:$0xff] %v11438_v26  ;;  %16269 = vst [vmem:[#allocation120_spill] sm:$0xff] %v11440_v60  ;;  %v11443_v27 = vpop.f32.mrb[59].mxu1  ;;  %v11445_v22 = vpop.f32.mrb[59].mxu0  ;;  %8966 = vmatmul.mubr.msk.f32.gmra.mrb[120].mxu1 %vm210_vm0, %v2371_v29  ;;  %v2373_v20 = vmul.f32 %v11438_v26, %v10718_v39 }
 0x221   : > { %16270 = vst [vmem:[#allocation121_spill] sm:$0xff] %v11443_v27  ;;  %16271 = vst [vmem:[#allocation122_spill] sm:$0xff] %v11445_v22  ;;  %v2372_v7 = vmul.f32 %v11443_v27, %v10715_v38 }
 0x223   : > { %v11452_v32 = vpop.f32.mrb[60].mxu1  ;;  %v11454_v56 = vpop.f32.mrb[60].mxu0  ;;  %8968 = vmatprep.mubr.msk.f32.mxu1 %vm210_vm0, %v2372_v7 }
 0x224   : > { %16272 = vst [vmem:[#allocation123_spill] sm:$0xff] %v11452_v32  ;;  %16273 = vst [vmem:[#allocation124_spill] sm:$0xff] %v11454_v56  ;;  %v11457_v33 = vpop.f32.mrb[61].mxu1  ;;  %v11459_v31 = vpop.f32.mrb[61].mxu0  ;;  %8969 = vmatmul.mubr.msk.f32.gmra.mrb[122].mxu1 %vm210_vm0, %v2373_v20  ;;  %v2375_v27 = vmul.f32 %v11452_v32, %v10732_v45 }
 0x225   : > { %16274 = vst [vmem:[#allocation125_spill] sm:$0xff] %v11457_v33  ;;  %16275 = vst [vmem:[#allocation126_spill] sm:$0xff] %v11459_v31  ;;  %v2374_v29 = vmul.f32 %v11457_v33, %v10729_v44 }
 0x227   : > { %v11466_v38 = vpop.f32.mrb[62].mxu1  ;;  %v11468_v26 = vpop.f32.mrb[62].mxu0  ;;  %8971 = vmatprep.mubr.msk.f32.mxu1 %vm210_vm0, %v2374_v29 }
 0x228   : > { %16276 = vst [vmem:[#allocation127_spill] sm:$0xff] %v11466_v38  ;;  %16277 = vst [vmem:[#allocation128_spill] sm:$0xff] %v11468_v26  ;;  %v11471_v39 = vpop.f32.mrb[63].mxu1  ;;  %v11473_v7 = vpop.f32.mrb[63].mxu0  ;;  %8972 = vmatmul.mubr.msk.f32.gmra.mrb[124].mxu1 %vm210_vm0, %v2375_v27  ;;  %v2377_v33 = vmul.f32 %v11466_v38, %v10750_v54 }
 0x229   : > { %16278 = vst [vmem:[#allocation129_spill] sm:$0xff] %v11471_v39  ;;  %16279 = vst [vmem:[#allocation130_spill] sm:$0xff] %v11473_v7  ;;  %v2376_v20 = vmul.f32 %v11471_v39, %v10743_v51 }
 0x22b   : > { %v11480_v44 = vpop.f32.mrb[64].mxu1  ;;  %v11482_v32 = vpop.f32.mrb[64].mxu0  ;;  %8974 = vmatprep.mubr.msk.f32.mxu1 %vm210_vm0, %v2376_v20 }
 0x22c   : > { %16280 = vst [vmem:[#allocation131_spill] sm:$0xff] %v11480_v44  ;;  %16281 = vst [vmem:[#allocation132_spill] sm:$0xff] %v11482_v32  ;;  %v11485_v45 = vpop.f32.mrb[65].mxu1  ;;  %v11487_v29 = vpop.f32.mrb[65].mxu0  ;;  %8975 = vmatmul.mubr.msk.f32.gmra.mrb[126].mxu1 %vm210_vm0, %v2377_v33  ;;  %v2379_v39 = vmul.f32 %v11480_v44, %v10770_v61 }
 0x22d   : > { %16282 = vst [vmem:[#allocation133_spill] sm:$0xff] %v11485_v45  ;;  %16283 = vst [vmem:[#allocation134_spill] sm:$0xff] %v11487_v29  ;;  %v2378_v27 = vmul.f32 %v11485_v45, %v10747_v53 }
 0x22f   : > { %v11494_v51 = vpop.f32.mrb[66].mxu1  ;;  %v11496_v38 = vpop.f32.mrb[66].mxu0  ;;  %8977 = vmatprep.mubr.msk.f32.mxu1 %vm210_vm0, %v2378_v27 }
 0x230   : > { %16284 = vst [vmem:[#allocation135_spill] sm:$0xff] %v11494_v51  ;;  %16285 = vst [vmem:[#allocation136_spill] sm:$0xff] %v11496_v38  ;;  %v11499_v54 = vpop.f32.mrb[67].mxu1  ;;  %v11501_v20 = vpop.f32.mrb[67].mxu0  ;;  %8978 = vmatmul.mubr.msk.f32.gmra.mrb[128].mxu1 %vm210_vm0, %v2379_v39  ;;  %v2381_v45 = vmul.f32 %v11494_v51, %v10785_v63 }
 0x231   : > { %16286 = vst [vmem:[#allocation137_spill] sm:$0xff] %v11499_v54  ;;  %16287 = vst [vmem:[#allocation138_spill] sm:$0xff] %v11501_v20  ;;  %v2380_v33 = vmul.f32 %v11499_v54, %v10766_v59 }
 0x233   : > { %v11508_v53 = vpop.f32.mrb[68].mxu1  ;;  %v11510_v44 = vpop.f32.mrb[68].mxu0  ;;  %8980 = vmatprep.mubr.msk.f32.mxu1 %vm210_vm0, %v2380_v33 }
 0x234   : > { %16288 = vst [vmem:[#allocation139_spill] sm:$0xff] %v11508_v53  ;;  %16289 = vst [vmem:[#allocation140_spill] sm:$0xff] %v11510_v44  ;;  %v11513_v61 = vpop.f32.mrb[69].mxu1  ;;  %v11515_v27 = vpop.f32.mrb[69].mxu0  ;;  %8981 = vmatmul.mubr.msk.f32.gmra.mrb[130].mxu1 %vm210_vm0, %v2381_v45  ;;  %v2383_v54 = vmul.f32 %v11508_v53, %v10800_v1 }
 0x235   : > { %16290 = vst [vmem:[#allocation141_spill] sm:$0xff] %v11513_v61  ;;  %16291 = vst [vmem:[#allocation142_spill] sm:$0xff] %v11515_v27  ;;  %v2382_v39 = vmul.f32 %v11513_v61, %v10781_v62 }
 0x237   : > { %v11522_v59 = vpop.f32.mrb[70].mxu1  ;;  %v11524_v51 = vpop.f32.mrb[70].mxu0  ;;  %8983 = vmatprep.mubr.msk.f32.mxu1 %vm210_vm0, %v2382_v39 }
 0x238   : > { %16292 = vst [vmem:[#allocation143_spill] sm:$0xff] %v11522_v59  ;;  %16293 = vst [vmem:[#allocation144_spill] sm:$0xff] %v11524_v51  ;;  %v11527_v63 = vpop.f32.mrb[71].mxu1  ;;  %v11529_v33 = vpop.f32.mrb[71].mxu0  ;;  %8984 = vmatmul.mubr.msk.f32.gmra.mrb[132].mxu1 %vm210_vm0, %v2383_v54  ;;  %v2385_v61 = vmul.f32 %v11522_v59, %v10815_v5 }
 0x239   : > { %16294 = vst [vmem:[#allocation145_spill] sm:$0xff] %v11527_v63  ;;  %16295 = vst [vmem:[#allocation146_spill] sm:$0xff] %v11529_v33  ;;  %v2384_v45 = vmul.f32 %v11527_v63, %v10796_v0 }
 0x23b   : > { %v11536_v62 = vpop.f32.mrb[72].mxu1  ;;  %v11538_v53 = vpop.f32.mrb[72].mxu0  ;;  %8986 = vmatprep.mubr.msk.f32.mxu1 %vm210_vm0, %v2384_v45 }
 0x23c   : > { %16296 = vst [vmem:[#allocation147_spill] sm:$0xff] %v11536_v62  ;;  %16297 = vst [vmem:[#allocation148_spill] sm:$0xff] %v11538_v53  ;;  %v11541_v1 = vpop.f32.mrb[73].mxu1  ;;  %v11543_v39 = vpop.f32.mrb[73].mxu0  ;;  %8987 = vmatmul.mubr.msk.f32.gmra.mrb[134].mxu1 %vm210_vm0, %v2385_v61  ;;  %v2387_v63 = vmul.f32 %v11536_v62, %v10830_v9 }
 0x23d   : > { %16298 = vst [vmem:[#allocation149_spill] sm:$0xff] %v11541_v1  ;;  %16299 = vst [vmem:[#allocation150_spill] sm:$0xff] %v11543_v39  ;;  %v2386_v54 = vmul.f32 %v11541_v1, %v10811_v2 }
 0x23f   : > { %v11550_v0 = vpop.f32.mrb[74].mxu1  ;;  %v11552_v59 = vpop.f32.mrb[74].mxu0  ;;  %8989 = vmatprep.mubr.msk.f32.mxu1 %vm210_vm0, %v2386_v54 }
 0x240   : > { %16300 = vst [vmem:[#allocation151_spill] sm:$0xff] %v11550_v0  ;;  %16301 = vst [vmem:[#allocation152_spill] sm:$0xff] %v11552_v59  ;;  %v11555_v5 = vpop.f32.mrb[75].mxu1  ;;  %v11557_v45 = vpop.f32.mrb[75].mxu0  ;;  %8990 = vmatmul.mubr.msk.f32.gmra.mrb[136].mxu1 %vm210_vm0, %v2387_v63  ;;  %v2389_v1 = vmul.f32 %v11550_v0, %v10844_v15 }
 0x241   : > { %16302 = vst [vmem:[#allocation153_spill] sm:$0xff] %v11555_v5  ;;  %16303 = vst [vmem:[#allocation154_spill] sm:$0xff] %v11557_v45  ;;  %v2388_v61 = vmul.f32 %v11555_v5, %v10826_v8 }
 0x243   : > { %v11564_v2 = vpop.f32.mrb[76].mxu1  ;;  %v11566_v62 = vpop.f32.mrb[76].mxu0  ;;  %8992 = vmatprep.mubr.msk.f32.mxu1 %vm210_vm0, %v2388_v61 }
 0x244   : > { %16304 = vst [vmem:[#allocation155_spill] sm:$0xff] %v11564_v2  ;;  %16305 = vst [vmem:[#allocation156_spill] sm:$0xff] %v11566_v62  ;;  %v11569_v9 = vpop.f32.mrb[77].mxu1  ;;  %v11571_v54 = vpop.f32.mrb[77].mxu0  ;;  %8993 = vmatmul.mubr.msk.f32.gmra.mrb[138].mxu1 %vm210_vm0, %v2389_v1  ;;  %v2391_v5 = vmul.f32 %v11564_v2, %v10858_v17  ;;  %v149_v2 = vld [vmem:[%s15613_s1 + $0x20] sm:$0xff] }
 0x245   : > { %16306 = vst [vmem:[#allocation157_spill] sm:$0xff] %v11569_v9  ;;  %16307 = vst [vmem:[#allocation158_spill] sm:$0xff] %v11571_v54  ;;  %v2390_v63 = vmul.f32 %v11569_v9, %v10841_v12 }
 0x247   : > { %v11578_v8 = vpop.f32.mrb[78].mxu1  ;;  %v11580_v0 = vpop.f32.mrb[78].mxu0  ;;  %8995 = vmatprep.mubr.msk.f32.mxu1 %vm210_vm0, %v2390_v63  ;;  %v150_v63 = vld [vmem:[%s15613_s1 + $0x28] sm:$0xff] }
 0x248   : > { %16308 = vst [vmem:[#allocation159_spill] sm:$0xff] %v11578_v8  ;;  %16309 = vst [vmem:[#allocation160_spill] sm:$0xff] %v11580_v0  ;;  %v11583_v15 = vpop.f32.mrb[79].mxu1  ;;  %v11585_v61 = vpop.f32.mrb[79].mxu0  ;;  %8996 = vmatmul.mubr.msk.f32.gmra.mrb[140].mxu1 %vm210_vm0, %v2391_v5  ;;  %v2393_v9 = vmul.f32 %v11578_v8, %v10869_v18  ;;  %v9569_v17 = vpack.c.bf16 %v150_v63, %v149_v2  ;;  %v151_v5 = vld [vmem:[%s15613_s1 + $0x30] sm:$0xff] }
 0x249   : > { %16310 = vst [vmem:[#allocation161_spill] sm:$0xff] %v11583_v15  ;;  %16311 = vst [vmem:[#allocation162_spill] sm:$0xff] %v11585_v61  ;;  %v2392_v1 = vmul.f32 %v11583_v15, %v10855_v16 }
 0x24a   : > { %9570 = vmatprep.subr.bf16.mxu0 %v9569_v17 }
 0x24b   : > { %8998 = vmatprep.mubr.msk.f32.mxu1 %vm210_vm0, %v2392_v1  ;;  %9572 = vmatpush3.bf16.msra.mxu0 %v9569_v17  ;;  %v152_v1 = vld [vmem:[%s15613_s1 + $0x38] sm:$0xff] }
 0x24c   : > { %8999 = vmatmul.mubr.msk.f32.gmra.mrb[142].mxu1 %vm210_vm0, %v2393_v9  ;;  %v9573_v8 = vpack.c.bf16 %v152_v1, %v151_v5 }
 0x24e   : > { %9574 = vmatprep.subr.bf16.mxu0 %v9573_v8 }
 0x24f   : > { %9576 = vmatpush3.bf16.msra.mxu0 %v9573_v8 }
 0x250   : > { %9586 = vmatprep.subr.bf16.mxu0 %v10483_v10 }
 0x2a3   : > { %v11607_v18 = vpop.f32.mrb[80].mxu1  ;;  %v11609_v15 = vpop.f32.mrb[80].mxu0 }
 0x2a4   : > { %v2716_v2 = vmax.f32 %v11364_v23, %v11607_v18  ;;  %v11613_v9 = vpop.f32.mrb[81].mxu1  ;;  %v11615_v17 = vpop.f32.mrb[81].mxu0 }
 0x2a5   : > { %v2715_v63 = vmax.f32 %v11370_v57, %v11613_v9 }
 0x2a6   : > { %v11620_v5 = vmax.f32 %v2716_v2, %v11609_v15 }
 0x2a7   : > { %v11623_v8 = vmax.f32 %v2715_v63, %v11615_v17  ;;  %v11625_v1 = vpop.f32.mrb[82].mxu1  ;;  %v11627_v16 = vpop.f32.mrb[82].mxu0 }
 0x2a8   : > { %v2718_v12 = vmax.f32 %v11380_v42, %v11625_v1  ;;  %v11631_v6 = vpop.f32.mrb[83].mxu1  ;;  %v11633_v55 = vpop.f32.mrb[83].mxu0 }
 0x2a9   : > { %v2717_v19 = vmax.f32 %v11385_v21, %v11631_v6 }
 0x2aa   : > { %v11638_v2 = vmax.f32 %v2718_v12, %v11627_v16 }
 0x2ab   : > { %v11641_v63 = vmax.f32 %v2717_v19, %v11633_v55  ;;  %v11643_v58 = vpop.f32.mrb[84].mxu1  ;;  %v11645_v47 = vpop.f32.mrb[84].mxu0 }
 0x2ac   : > { %v2720_v46 = vmax.f32 %v11396_v43, %v11643_v58  ;;  %v11649_v14 = vpop.f32.mrb[85].mxu1  ;;  %v11651_v49 = vpop.f32.mrb[85].mxu0 }
 0x2ad   : > { %v2719_v41 = vmax.f32 %v11401_v24, %v11649_v14 }
 0x2ae   : > { %v11656_v12 = vmax.f32 %v2720_v46, %v11645_v47 }
 0x2af   : > { %v11659_v19 = vmax.f32 %v2719_v41, %v11651_v49  ;;  %v11661_v50 = vpop.f32.mrb[86].mxu1  ;;  %v11663_v10 = vpop.f32.mrb[86].mxu0 }
 0x2b0   : > { %16312 = vst [vmem:[#allocation163_spill] sm:$0xff] %v11661_v50  ;;  %16313 = vst [vmem:[#allocation164_spill] sm:$0xff] %v11663_v10  ;;  %v2722_v48 = vmax.f32 %v11412_v28, %v11661_v50  ;;  %v11667_v13 = vpop.f32.mrb[87].mxu1  ;;  %v11669_v40 = vpop.f32.mrb[87].mxu0 }
 0x2b1   : > { %16314 = vst [vmem:[#allocation165_spill] sm:$0xff] %v11667_v13  ;;  %16315 = vst [vmem:[#allocation166_spill] sm:$0xff] %v11669_v40  ;;  %v2721_v37 = vmax.f32 %v11417_v25, %v11667_v13 }
 0x2b2   : > { %v11674_v46 = vmax.f32 %v2722_v48, %v11663_v10 }
 0x2b3   : > { %v11677_v41 = vmax.f32 %v2721_v37, %v11669_v40  ;;  %v11679_v36 = vpop.f32.mrb[88].mxu1  ;;  %v11681_v3 = vpop.f32.mrb[88].mxu0 }
 0x2b4   : > { %16316 = vst [vmem:[#allocation167_spill] sm:$0xff] %v11679_v36  ;;  %16317 = vst [vmem:[#allocation168_spill] sm:$0xff] %v11681_v3  ;;  %v2724_v50 = vmax.f32 %v11426_v52, %v11679_v36  ;;  %v11685_v28 = vpop.f32.mrb[89].mxu1  ;;  %v11687_v30 = vpop.f32.mrb[89].mxu0 }
 0x2b5   : > { %16318 = vst [vmem:[#allocation169_spill] sm:$0xff] %v11685_v28  ;;  %16319 = vst [vmem:[#allocation170_spill] sm:$0xff] %v11687_v30  ;;  %v2723_v13 = vmax.f32 %v11431_v11, %v11685_v28 }
 0x2b6   : > { %v11692_v48 = vmax.f32 %v2724_v50, %v11681_v3 }
 0x2b7   : > { %v11695_v37 = vmax.f32 %v2723_v13, %v11687_v30  ;;  %v11697_v40 = vpop.f32.mrb[90].mxu1  ;;  %v11699_v25 = vpop.f32.mrb[90].mxu0 }
 0x2b8   : > { %16320 = vst [vmem:[#allocation171_spill] sm:$0xff] %v11697_v40  ;;  %v2726_v36 = vmax.f32 %v11440_v60, %v11697_v40  ;;  %v11703_v52 = vpop.f32.mrb[91].mxu1  ;;  %v11705_v10 = vpop.f32.mrb[91].mxu0 }
 0x2b9   : > { %16321 = vst [vmem:[#allocation172_spill] sm:$0xff] %v11703_v52  ;;  %16322 = vst [vmem:[#allocation173_spill] sm:$0xff] %v11705_v10  ;;  %v2725_v28 = vmax.f32 %v11445_v22, %v11703_v52 }
 0x2ba   : > { %v11710_v50 = vmax.f32 %v2726_v36, %v11699_v25 }
 0x2bb   : > { %v11713_v13 = vmax.f32 %v2725_v28, %v11705_v10  ;;  %v11715_v30 = vpop.f32.mrb[92].mxu1  ;;  %v11717_v11 = vpop.f32.mrb[92].mxu0 }
 0x2bc   : > { %16324 = vst [vmem:[#allocation175_spill] sm:$0xff] %v11715_v30  ;;  %16325 = vst [vmem:[#allocation176_spill] sm:$0xff] %v11717_v11  ;;  %v2728_v40 = vmax.f32 %v11454_v56, %v11715_v30  ;;  %v11721_v60 = vpop.f32.mrb[93].mxu1  ;;  %v11723_v3 = vpop.f32.mrb[93].mxu0 }
 0x2bd   : > { %16323 = vst [vmem:[#allocation174_spill] sm:$0xff] %v11713_v13  ;;  %16326 = vst [vmem:[#allocation177_spill] sm:$0xff] %v11721_v60  ;;  %v2727_v52 = vmax.f32 %v11459_v31, %v11721_v60 }
 0x2be   : > { %16327 = vst [vmem:[#allocation178_spill] sm:$0xff] %v11723_v3  ;;  %v11728_v36 = vmax.f32 %v2728_v40, %v11717_v11 }
 0x2bf   : > { %v11731_v28 = vmax.f32 %v2727_v52, %v11723_v3  ;;  %v11733_v10 = vpop.f32.mrb[94].mxu1  ;;  %v11735_v22 = vpop.f32.mrb[94].mxu0 }
 0x2c0   : > { %16328 = vst [vmem:[#allocation179_spill] sm:$0xff] %v11733_v10  ;;  %16329 = vst [vmem:[#allocation180_spill] sm:$0xff] %v11735_v22  ;;  %v2730_v30 = vmax.f32 %v11468_v26, %v11733_v10  ;;  %v11739_v56 = vpop.f32.mrb[95].mxu1  ;;  %v11741_v13 = vpop.f32.mrb[95].mxu0 }
 0x2c1   : > { %16330 = vst [vmem:[#allocation181_spill] sm:$0xff] %v11739_v56  ;;  %16331 = vst [vmem:[#allocation182_spill] sm:$0xff] %v11741_v13  ;;  %v2729_v60 = vmax.f32 %v11473_v7, %v11739_v56 }
 0x2c2   : > { %v11746_v40 = vmax.f32 %v2730_v30, %v11735_v22 }
 0x2c3   : > { %v11749_v52 = vmax.f32 %v2729_v60, %v11741_v13  ;;  %v11751_v3 = vpop.f32.mrb[96].mxu1  ;;  %v11753_v31 = vpop.f32.mrb[96].mxu0 }
 0x2c4   : > { %16332 = vst [vmem:[#allocation183_spill] sm:$0xff] %v11751_v3  ;;  %v2732_v10 = vmax.f32 %v11482_v32, %v11751_v3  ;;  %v11757_v26 = vpop.f32.mrb[97].mxu1  ;;  %v11759_v11 = vpop.f32.mrb[97].mxu0 }
 0x2c5   : > { %16333 = vst [vmem:[#allocation184_spill] sm:$0xff] %v11757_v26  ;;  %16334 = vst [vmem:[#allocation185_spill] sm:$0xff] %v11759_v11  ;;  %v2731_v56 = vmax.f32 %v11487_v29, %v11757_v26 }
 0x2c6   : > { %v11764_v30 = vmax.f32 %v2732_v10, %v11753_v31 }
 0x2c7   : > { %v11767_v60 = vmax.f32 %v2731_v56, %v11759_v11  ;;  %v11769_v13 = vpop.f32.mrb[98].mxu1  ;;  %v11771_v7 = vpop.f32.mrb[98].mxu0 }
 0x2c8   : > { %16336 = vst [vmem:[#allocation187_spill] sm:$0xff] %v11769_v13  ;;  %v2734_v3 = vmax.f32 %v11496_v38, %v11769_v13  ;;  %v11775_v32 = vpop.f32.mrb[99].mxu1  ;;  %v11777_v22 = vpop.f32.mrb[99].mxu0 }
 0x2c9   : > { %16335 = vst [vmem:[#allocation186_spill] sm:$0xff] %v11767_v60  ;;  %16337 = vst [vmem:[#allocation188_spill] sm:$0xff] %v11775_v32  ;;  %v2733_v26 = vmax.f32 %v11501_v20, %v11775_v32 }
 0x2ca   : > { %16338 = vst [vmem:[#allocation189_spill] sm:$0xff] %v11777_v22  ;;  %v11782_v10 = vmax.f32 %v2734_v3, %v11771_v7 }
 0x2cb   : > { %v11785_v56 = vmax.f32 %v2733_v26, %v11777_v22  ;;  %v11787_v11 = vpop.f32.mrb[100].mxu1  ;;  %v11789_v29 = vpop.f32.mrb[100].mxu0 }
 0x2cc   : > { %16340 = vst [vmem:[#allocation191_spill] sm:$0xff] %v11787_v11  ;;  %16341 = vst [vmem:[#allocation192_spill] sm:$0xff] %v11789_v29  ;;  %v2736_v13 = vmax.f32 %v11510_v44, %v11787_v11  ;;  %v11793_v38 = vpop.f32.mrb[101].mxu1  ;;  %v11795_v60 = vpop.f32.mrb[101].mxu0 }
 0x2cd   : > { %16339 = vst [vmem:[#allocation190_spill] sm:$0xff] %v11785_v56  ;;  %16342 = vst [vmem:[#allocation193_spill] sm:$0xff] %v11793_v38  ;;  %v2735_v32 = vmax.f32 %v11515_v27, %v11793_v38 }
 0x2ce   : > { %16343 = vst [vmem:[#allocation194_spill] sm:$0xff] %v11795_v60  ;;  %v11800_v3 = vmax.f32 %v2736_v13, %v11789_v29 }
 0x2cf   : > { %v11803_v26 = vmax.f32 %v2735_v32, %v11795_v60  ;;  %v11805_v22 = vpop.f32.mrb[102].mxu1  ;;  %v11807_v20 = vpop.f32.mrb[102].mxu0 }
 0x2d0   : > { %16344 = vst [vmem:[#allocation195_spill] sm:$0xff] %v11805_v22  ;;  %16345 = vst [vmem:[#allocation196_spill] sm:$0xff] %v11807_v20  ;;  %v2738_v11 = vmax.f32 %v11524_v51, %v11805_v22  ;;  %v11811_v44 = vpop.f32.mrb[103].mxu1  ;;  %v11813_v56 = vpop.f32.mrb[103].mxu0 }
 0x2d1   : > { %16346 = vst [vmem:[#allocation197_spill] sm:$0xff] %v11811_v44  ;;  %16347 = vst [vmem:[#allocation198_spill] sm:$0xff] %v11813_v56  ;;  %v2737_v38 = vmax.f32 %v11529_v33, %v11811_v44 }
 0x2d2   : > { %v11818_v13 = vmax.f32 %v2738_v11, %v11807_v20 }
 0x2d3   : > { %v11821_v32 = vmax.f32 %v2737_v38, %v11813_v56  ;;  %v11823_v60 = vpop.f32.mrb[104].mxu1  ;;  %v11825_v27 = vpop.f32.mrb[104].mxu0 }
 0x2d4   : > { %16348 = vst [vmem:[#allocation199_spill] sm:$0xff] %v11818_v13  ;;  %16350 = vst [vmem:[#allocation201_spill] sm:$0xff] %v11823_v60  ;;  %v2740_v22 = vmax.f32 %v11538_v53, %v11823_v60  ;;  %v11829_v51 = vpop.f32.mrb[105].mxu1  ;;  %v11831_v29 = vpop.f32.mrb[105].mxu0  ;;  %v16404_v13 = vld [vmem:[#allocation173_spill] sm:$0xff] }
 0x2d5   : > { %16349 = vst [vmem:[#allocation200_spill] sm:$0xff] %v11821_v32  ;;  %16351 = vst [vmem:[#allocation202_spill] sm:$0xff] %v11825_v27  ;;  %v2739_v44 = vmax.f32 %v11543_v39, %v11829_v51 }
 0x2d6   : > { %16352 = vst [vmem:[#allocation203_spill] sm:$0xff] %v11829_v51  ;;  %16353 = vst [vmem:[#allocation204_spill] sm:$0xff] %v11831_v29  ;;  %v11836_v11 = vmax.f32 %v2740_v22, %v11825_v27 }
 0x2d7   : > { %v11839_v38 = vmax.f32 %v2739_v44, %v11831_v29  ;;  %v11841_v56 = vpop.f32.mrb[106].mxu1  ;;  %v11843_v33 = vpop.f32.mrb[106].mxu0 }
 0x2d8   : > { %16354 = vst [vmem:[#allocation205_spill] sm:$0xff] %v11836_v11  ;;  %16356 = vst [vmem:[#allocation207_spill] sm:$0xff] %v11841_v56  ;;  %v2742_v60 = vmax.f32 %v11552_v59, %v11841_v56  ;;  %v11847_v53 = vpop.f32.mrb[107].mxu1  ;;  %v11849_v20 = vpop.f32.mrb[107].mxu0  ;;  %v16392_v11 = vld [vmem:[#allocation170_spill] sm:$0xff] }
 0x2d9   : > { %16355 = vst [vmem:[#allocation206_spill] sm:$0xff] %v11839_v38  ;;  %16357 = vst [vmem:[#allocation208_spill] sm:$0xff] %v11843_v33  ;;  %v2741_v51 = vmax.f32 %v11557_v45, %v11847_v53 }
 0x2da   : > { %16358 = vst [vmem:[#allocation209_spill] sm:$0xff] %v11847_v53  ;;  %16359 = vst [vmem:[#allocation210_spill] sm:$0xff] %v11849_v20  ;;  %v11854_v22 = vmax.f32 %v2742_v60, %v11843_v33 }
 0x2db   : > { %v11857_v44 = vmax.f32 %v2741_v51, %v11849_v20  ;;  %v11859_v29 = vpop.f32.mrb[108].mxu1  ;;  %v11861_v39 = vpop.f32.mrb[108].mxu0 }
 0x2dc   : > { %16360 = vst [vmem:[#allocation211_spill] sm:$0xff] %v11854_v22  ;;  %16362 = vst [vmem:[#allocation213_spill] sm:$0xff] %v11859_v29  ;;  %v2744_v56 = vmax.f32 %v11566_v62, %v11859_v29  ;;  %v11865_v59 = vpop.f32.mrb[109].mxu1  ;;  %v11867_v27 = vpop.f32.mrb[109].mxu0 }
 0x2dd   : > { %16361 = vst [vmem:[#allocation212_spill] sm:$0xff] %v11857_v44  ;;  %16363 = vst [vmem:[#allocation214_spill] sm:$0xff] %v11861_v39  ;;  %v2743_v53 = vmax.f32 %v11571_v54, %v11865_v59 }
 0x2de   : > { %16364 = vst [vmem:[#allocation215_spill] sm:$0xff] %v11865_v59  ;;  %16365 = vst [vmem:[#allocation216_spill] sm:$0xff] %v11867_v27  ;;  %v11872_v60 = vmax.f32 %v2744_v56, %v11861_v39 }
 0x2df   : > { %v11875_v51 = vmax.f32 %v2743_v53, %v11867_v27  ;;  %v11877_v20 = vpop.f32.mrb[110].mxu1  ;;  %v11879_v45 = vpop.f32.mrb[110].mxu0 }
 0x2e0   : > { %16366 = vst [vmem:[#allocation217_spill] sm:$0xff] %v11872_v60  ;;  %16368 = vst [vmem:[#allocation219_spill] sm:$0xff] %v11877_v20  ;;  %v2746_v29 = vmax.f32 %v11580_v0, %v11877_v20  ;;  %v11883_v62 = vpop.f32.mrb[111].mxu1  ;;  %v11885_v33 = vpop.f32.mrb[111].mxu0 }
 0x2e1   : > { %16367 = vst [vmem:[#allocation218_spill] sm:$0xff] %v11875_v51  ;;  %16369 = vst [vmem:[#allocation220_spill] sm:$0xff] %v11879_v45  ;;  %v2745_v59 = vmax.f32 %v11585_v61, %v11883_v62 }
 0x2e2   : > { %16370 = vst [vmem:[#allocation221_spill] sm:$0xff] %v11883_v62  ;;  %16371 = vst [vmem:[#allocation222_spill] sm:$0xff] %v11885_v33  ;;  %v11890_v56 = vmax.f32 %v2746_v29, %v11879_v45 }
 0x2e3   : > { %v11893_v53 = vmax.f32 %v2745_v59, %v11885_v33  ;;  %v8955_v27 = vpop.f32.mrb[112].mxu1 }
 0x2e4   : > { %16372 = vst [vmem:[#allocation223_spill] sm:$0xff] %v11890_v56  ;;  %v2780_v54 = vmax.f32 %v11620_v5, %v8955_v27  ;;  %v2556_v39 = vpop.f32.mrb[113].mxu1 }
 0x2e5   : > { %16373 = vst [vmem:[#allocation224_spill] sm:$0xff] %v11893_v53  ;;  %v2779_v51 = vmax.f32 %v11623_v8, %v2556_v39 }
 0x2e6   : > { %v2812_v20 = vsub.f32 %v11364_v23, %v2780_v54  ;;  %v2908_v0 = vsub.f32 %v11607_v18, %v2780_v54  ;;  %v3004_v60 = vsub.f32 %v11609_v15, %v2780_v54  ;;  %v3100_v44 = vsub.f32 %v8955_v27, %v2780_v54 }
 0x2e7   : > { %v2811_v62 = vsub.f32 %v11370_v57, %v2779_v51  ;;  %v2907_v29 = vsub.f32 %v11613_v9, %v2779_v51  ;;  %v3003_v59 = vsub.f32 %v11615_v17, %v2779_v51  ;;  %v3099_v33 = vsub.f32 %v2556_v39, %v2779_v51  ;;  %v8958_v61 = vpop.f32.mrb[114].mxu1 }
 0x2e8   : > { %v2845_v45 = vmul.f32 1.442695, %v2812_v20  ;;  %v2941_v5 = vmul.f32 1.442695, %v2908_v0  ;;  %v3037_v53 = vmul.f32 1.442695, %v3004_v60  ;;  %v2782_v8 = vmax.f32 %v11638_v2, %v8958_v61 }
 0x2e9   : > { %v3133_v56 = vmul.f32 1.442695, %v3100_v44  ;;  %v2843_v23 = vmul.f32 1.442695, %v2811_v62  ;;  %v2939_v18 = vmul.f32 1.442695, %v2907_v29 }
 0x2ea   : > { %9686 = vpow2.f32 %v2845_v45  ;;  %v3035_v22 = vmul.f32 1.442695, %v3003_v59  ;;  %v2814_v15 = vsub.f32 %v11380_v42, %v2782_v8  ;;  %v2566_v27 = vpop.f32.mrb[115].mxu1  ;;  %v2910_v57 = vsub.f32 %v11625_v1, %v2782_v8 }
 0x2eb   : > { %9688 = vpow2.f32 %v2941_v5  ;;  %v3006_v54 = vsub.f32 %v11627_v16, %v2782_v8  ;;  %v3102_v39 = vsub.f32 %v8958_v61, %v2782_v8  ;;  %v8961_v9 = vpop.f32.mrb[116].mxu1  ;;  %v3131_v0 = vmul.f32 1.442695, %v3099_v33 }
 0x2ec   : > { %9690 = vpow2.f32 %v3037_v53  ;;  %v2781_v20 = vmax.f32 %v11641_v63, %v2566_v27  ;;  %v2784_v17 = vmax.f32 %v11656_v12, %v8961_v9  ;;  %v11909_v62 = vpop.f32.mrb[117].mxu1  ;;  %v2849_v45 = vmul.f32 1.442695, %v2814_v15 }
 0x2ed   : > { %9692 = vpow2.f32 %v3133_v56  ;;  %v2945_v2 = vmul.f32 1.442695, %v2910_v57  ;;  %v3041_v42 = vmul.f32 1.442695, %v3006_v54  ;;  %v3137_v60 = vmul.f32 1.442695, %v3102_v39 }
 0x2ee   : > { %9694 = vpow2.f32 %v2843_v23  ;;  %v2813_v44 = vsub.f32 %v11385_v21, %v2781_v20  ;;  %v2909_v1 = vsub.f32 %v11631_v6, %v2781_v20  ;;  %v3005_v16 = vsub.f32 %v11633_v55, %v2781_v20 }
 0x2ef   : > { %9696 = vpow2.f32 %v2939_v18  ;;  %v3101_v61 = vsub.f32 %v2566_v27, %v2781_v20  ;;  %v2816_v33 = vsub.f32 %v11396_v43, %v2784_v17  ;;  %v2912_v63 = vsub.f32 %v11643_v58, %v2784_v17  ;;  %v11916_v12 = vpop.f32.mrb[118].mxu1 }
 0x2f0   : > { %9698 = vpow2.f32 %v3035_v22  ;;  %v2847_v51 = vmul.f32 1.442695, %v2813_v44  ;;  %v2943_v56 = vmul.f32 1.442695, %v2909_v1  ;;  %v3039_v53 = vmul.f32 1.442695, %v3005_v16 }
 0x2f1   : > { %9700 = vpow2.f32 %v3131_v0  ;;  %v3135_v29 = vmul.f32 1.442695, %v3101_v61  ;;  %v2853_v21 = vmul.f32 1.442695, %v2816_v33  ;;  %v3008_v6 = vsub.f32 %v11645_v47, %v2784_v17  ;;  %v11921_v43 = vpop.f32.mrb[119].mxu1  ;;  %v16374_v44 = vld [vmem:[#allocation105_spill] sm:$0xff] }
 0x2f2   : > { %9702 = vpow2.f32 %v2849_v45  ;;  %v3104_v55 = vsub.f32 %v8961_v9, %v2784_v17  ;;  %v2783_v59 = vmax.f32 %v11659_v19, %v11909_v62  ;;  %v2949_v58 = vmul.f32 1.442695, %v2912_v63  ;;  %v16376_v33 = vld [vmem:[#allocation163_spill] sm:$0xff] }
 0x2f3   : > { %9704 = vpow2.f32 %v2945_v2  ;;  %v11925_v22 = vmax.f32 %v11674_v46, %v11916_v12  ;;  %v11929_v5 = vmax.f32 %v11677_v41, %v11921_v43  ;;  %v11931_v8 = vpop.f32.mrb[120].mxu1  ;;  %v3045_v47 = vmul.f32 1.442695, %v3008_v6 }
 0x2f4   : > { %v9687_v23 = vpop.eup %9686  ;;  %9706 = vpow2.f32 %v3041_v42  ;;  %v3141_v18 = vmul.f32 1.442695, %v3104_v55  ;;  %v2815_v19 = vsub.f32 %v11401_v24, %v2783_v59  ;;  %v11934_v15 = vpop.f32.mrb[121].mxu1  ;;  %v2911_v46 = vsub.f32 %v11649_v14, %v2783_v59 }
 0x2f5   : > { %v9689_v27 = vpop.eup %9688  ;;  %v3292_v57 = vmul.f32 %v9687_v23, %v10622_v4  ;;  %9708 = vpow2.f32 %v3137_v60  ;;  %v3007_v54 = vsub.f32 %v11651_v49, %v2783_v59  ;;  %v3103_v16 = vsub.f32 %v11909_v62, %v2783_v59 }
 0x2f6   : > { %v9691_v41 = vpop.eup %9690  ;;  %v3196_v39 = vadd.f32 %v9689_v27, %v9687_v23  ;;  %v3324_v9 = vmul.f32 %v9689_v27, %v11042_v34  ;;  %9710 = vpow2.f32 %v2847_v51  ;;  %v2851_v0 = vmul.f32 1.442695, %v2815_v19  ;;  %v16377_v27 = vld [vmem:[#allocation164_spill] sm:$0xff] }
 0x2f7   : > { %v9693_v20 = vpop.eup %9692  ;;  %v3388_v17 = vmul.f32 %v9691_v41, %v11044_v35  ;;  %9712 = vpow2.f32 %v2943_v56  ;;  %v2947_v24 = vmul.f32 1.442695, %v2911_v46  ;;  %v3043_v45 = vmul.f32 1.442695, %v3007_v54  ;;  %v11941_v2 = vpop.f32.mrb[122].mxu1  ;;  %v16375_v35 = vld [vmem:[#allocation112_spill] sm:$0xff] }
 0x2f8   : > { %v11943_v4 = vpop.eup %9694  ;;  %v3228_v42 = vadd.f32 %v9691_v41, %v3196_v39  ;;  %v3356_v14 = vadd.f32 %v3324_v9, %v3292_v57  ;;  %v3452_v49 = vmul.f32 %v9693_v20, %v16374_v44  ;;  %9714 = vpow2.f32 %v3039_v53  ;;  %v11946_v1 = vpop.f32.mrb[123].mxu1  ;;  %v16379_v39 = vld [vmem:[#allocation165_spill] sm:$0xff] }
 0x2f9   : > { %v11948_v34 = vpop.eup %9696  ;;  %9716 = vpow2.f32 %v3135_v29  ;;  %v2818_v61 = vsub.f32 %v16375_v35, %v11925_v22  ;;  %v2914_v63 = vsub.f32 %v16376_v33, %v11925_v22  ;;  %v3139_v29 = vmul.f32 1.442695, %v3103_v16 }
 0x2fa   : > { %v11955_v60 = vpop.eup %9698  ;;  %v3260_v51 = vadd.f32 %v9693_v20, %v3228_v42  ;;  %v3420_v56 = vadd.f32 %v3388_v17, %v3356_v14  ;;  %v3195_v53 = vadd.f32 %v11948_v34, %v11943_v4  ;;  %9718 = vpow2.f32 %v2853_v21 }
 0x2fb   : > { %v11959_v6 = vpop.eup %9700  ;;  %9720 = vpow2.f32 %v2949_v58  ;;  %v2857_v55 = vmul.f32 1.442695, %v2818_v61  ;;  %v2953_v62 = vmul.f32 1.442695, %v2914_v63  ;;  %v3010_v57 = vsub.f32 %v16377_v27, %v11925_v22  ;;  %v11968_v46 = vpop.f32.mrb[124].mxu1  ;;  %v16378_v58 = vld [vmem:[#allocation114_spill] sm:$0xff] }
 0x2fc   : > { %v11961_v59 = vpop.eup %9702  ;;  %v11963_v23 = vadd.f32 %v3452_v49, %v3420_v56  ;;  %9722 = vrcp.f32 %v3260_v51  ;;  %v3227_v19 = vadd.f32 %v11955_v60, %v3195_v53  ;;  %v3106_v21 = vsub.f32 %v11916_v12, %v11925_v22  ;;  %v11978_v20 = vpop.f32.mrb[125].mxu1  ;;  %v16382_v61 = vld [vmem:[#allocation166_spill] sm:$0xff] }
 0x2fd   : > { %v11970_v54 = vpop.eup %9704  ;;  %9724 = vpow2.f32 %v3045_v47  ;;  %v2817_v41 = vsub.f32 %v16378_v58, %v11929_v5  ;;  %v2913_v9 = vsub.f32 %v16379_v39, %v11929_v5  ;;  %v3049_v47 = vmul.f32 1.442695, %v3010_v57  ;;  %v16384_v58 = vld [vmem:[#allocation167_spill] sm:$0xff] }
 0x2fe   : > { %v11980_v17 = vpop.eup %9706  ;;  %v3259_v42 = vadd.f32 %v11959_v6, %v3227_v19  ;;  %v3198_v14 = vadd.f32 %v11970_v54, %v11961_v59  ;;  %9726 = vpow2.f32 %v3141_v18  ;;  %v3145_v12 = vmul.f32 1.442695, %v3106_v21 }
 0x2ff   : > { %16380 = vst [vmem:[#allocation105_spill] sm:$0xff] %v11980_v17  ;;  %v11985_v44 = vpop.eup %9708  ;;  %9728 = vpow2.f32 %v2851_v0  ;;  %v2855_v22 = vmul.f32 1.442695, %v2817_v41  ;;  %v2951_v49 = vmul.f32 1.442695, %v2913_v9  ;;  %v3009_v33 = vsub.f32 %v16382_v61, %v11929_v5  ;;  %v11994_v51 = vpop.f32.mrb[126].mxu1 }
 0x300   : > { %16381 = vst [vmem:[#allocation112_spill] sm:$0xff] %v11985_v44  ;;  %v11987_v16 = vpop.eup %9710  ;;  %9730 = vrcp.f32 %v3259_v42  ;;  %v3230_v35 = vadd.f32 %v11980_v17, %v3198_v14  ;;  %v3105_v63 = vsub.f32 %v11921_v43, %v11929_v5  ;;  %v2788_v0 = vmax.f32 %v11692_v48, %v11931_v8  ;;  %v12006_v19 = vpop.f32.mrb[127].mxu1  ;;  %v16386_v42 = vld [vmem:[#allocation168_spill] sm:$0xff] }
 0x301   : > { %v11996_v18 = vpop.eup %9712  ;;  %9732 = vpow2.f32 %v2947_v24  ;;  %v2787_v56 = vmax.f32 %v11695_v37, %v11934_v15  ;;  %v12004_v53 = vmax.f32 %v11710_v50, %v11941_v2  ;;  %v3047_v24 = vmul.f32 1.442695, %v3009_v33  ;;  %v16383_v37 = vld [vmem:[#allocation116_spill] sm:$0xff] }
 0x302   : > { %v12008_v27 = vpop.eup %9714  ;;  %v3262_v43 = vadd.f32 %v11985_v44, %v3230_v35  ;;  %v3197_v5 = vadd.f32 %v11996_v18, %v11987_v16  ;;  %9734 = vpow2.f32 %v3043_v45  ;;  %v3143_v48 = vmul.f32 1.442695, %v3105_v63  ;;  %v16388_v63 = vld [vmem:[#allocation118_spill] sm:$0xff] }
 0x303   : > { %v12013_v57 = vpop.eup %9716  ;;  %9736 = vpow2.f32 %v3139_v29  ;;  %v2820_v21 = vsub.f32 %v16383_v37, %v2788_v0  ;;  %v2916_v50 = vsub.f32 %v16384_v58, %v2788_v0  ;;  %v12017_v41 = vpop.f32.mrb[128].mxu1  ;;  %v3012_v14 = vsub.f32 %v16386_v42, %v2788_v0 }
 0x304   : > { %v12019_v39 = vpop.eup %9718  ;;  %9738 = vrcp.f32 %v3262_v43  ;;  %v3229_v9 = vadd.f32 %v12008_v27, %v3197_v5  ;;  %v3108_v45 = vsub.f32 %v11931_v8, %v2788_v0  ;;  %v12024_v35 = vpop.f32.mrb[129].mxu1  ;;  %v2819_v37 = vsub.f32 %v16388_v63, %v2787_v56 }
 0x305   : > { %16385 = vst [vmem:[#allocation163_spill] sm:$0xff] %v12019_v39  ;;  %v12026_v61 = vpop.eup %9720  ;;  %9740 = vpow2.f32 %v2857_v55  ;;  %v2861_v29 = vmul.f32 1.442695, %v2820_v21  ;;  %v2957_v33 = vmul.f32 1.442695, %v2916_v50  ;;  %v16390_v55 = vld [vmem:[#allocation169_spill] sm:$0xff] }
 0x306   : > { %16387 = vst [vmem:[#allocation164_spill] sm:$0xff] %v12026_v61  ;;  %v12029_v58 = vpop.eup %9722  ;;  %v3261_v38 = vadd.f32 %v12013_v57, %v3229_v9  ;;  %v3200_v43 = vadd.f32 %v12026_v61, %v12019_v39  ;;  %9742 = vpow2.f32 %v2953_v62  ;;  %v3053_v5 = vmul.f32 1.442695, %v3012_v14  ;;  %v16395_v39 = vld [vmem:[#allocation171_spill] sm:$0xff] }
 0x307   : > { %v12034_v42 = vpop.eup %9724  ;;  %9744 = vpow2.f32 %v3049_v47  ;;  %v12036_v8 = vmul.f32 1.442695, %v3108_v45  ;;  %v12038_v0 = vmul.f32 1.442695, %v2819_v37  ;;  %v2915_v21 = vsub.f32 %v16390_v55, %v2787_v56  ;;  %v12041_v50 = vpop.f32.mrb[130].mxu1  ;;  %v16394_v37 = vld [vmem:[#allocation120_spill] sm:$0xff] }
 0x308   : > { %16389 = vst [vmem:[#allocation114_spill] sm:$0xff] %v12034_v42  ;;  %v12043_v63 = vpop.eup %9726  ;;  %9746 = vrcp.f32 %v3261_v38  ;;  %v3232_v9 = vadd.f32 %v12034_v42, %v3200_v43  ;;  %v3011_v61 = vsub.f32 %v16392_v11, %v2787_v56  ;;  %v3107_v62 = vsub.f32 %v11934_v15, %v2787_v56  ;;  %v12048_v14 = vpop.f32.mrb[131].mxu1 }
 0x309   : > { %16391 = vst [vmem:[#allocation165_spill] sm:$0xff] %v12043_v63  ;;  %v12050_v47 = vpop.eup %9728  ;;  %9748 = vpow2.f32 %v3145_v12  ;;  %v12052_v45 = vmul.f32 1.442695, %v2915_v21  ;;  %v2822_v55 = vsub.f32 %v16394_v37, %v12004_v53  ;;  %v2918_v32 = vsub.f32 %v16395_v39, %v12004_v53 }
 0x30a   : > { %16393 = vst [vmem:[#allocation166_spill] sm:$0xff] %v12050_v47  ;;  %v12058_v38 = vpop.eup %9730  ;;  %v3264_v43 = vadd.f32 %v12043_v63, %v3232_v9  ;;  %9750 = vpow2.f32 %v2855_v22  ;;  %v12061_v11 = vmul.f32 1.442695, %v3011_v61  ;;  %v12063_v15 = vmul.f32 1.442695, %v3107_v62 }
 0x30b   : > { %v12065_v56 = vpop.eup %9732  ;;  %9752 = vpow2.f32 %v2951_v49  ;;  %v12067_v12 = vmul.f32 1.442695, %v2822_v55  ;;  %v12069_v21 = vmul.f32 1.442695, %v2918_v32  ;;  %v3014_v37 = vsub.f32 %v11699_v25, %v12004_v53  ;;  %v12073_v39 = vpop.f32.mrb[132].mxu1  ;;  %v16398_v49 = vld [vmem:[#allocation174_spill] sm:$0xff] }
 0x30c   : > { %16396 = vst [vmem:[#allocation116_spill] sm:$0xff] %v12065_v56  ;;  %v12075_v42 = vpop.eup %9734  ;;  %9754 = vrcp.f32 %v3264_v43  ;;  %v3199_v22 = vadd.f32 %v12065_v56, %v12050_v47  ;;  %v3110_v61 = vsub.f32 %v11941_v2, %v12004_v53  ;;  %v2789_v9 = vmax.f32 %v16398_v49, %v11946_v1  ;;  %v12083_v62 = vpop.f32.mrb[133].mxu1  ;;  %v16401_v49 = vld [vmem:[#allocation122_spill] sm:$0xff] }
 0x30d   : > { %16397 = vst [vmem:[#allocation167_spill] sm:$0xff] %v12075_v42  ;;  %v12085_v32 = vpop.eup %9736  ;;  %9756 = vpow2.f32 %v3047_v24  ;;  %v12087_v25 = vmul.f32 1.442695, %v3014_v37  ;;  %v2792_v55 = vmax.f32 %v11728_v36, %v11968_v46  ;;  %v12093_v43 = vmax.f32 %v11731_v28, %v11978_v20  ;;  %v16403_v24 = vld [vmem:[#allocation172_spill] sm:$0xff] }
 0x30e   : > { %16399 = vst [vmem:[#allocation168_spill] sm:$0xff] %v12085_v32  ;;  %v12095_v63 = vpop.eup %9738  ;;  %v3231_v2 = vadd.f32 %v12075_v42, %v3199_v22  ;;  %9758 = vpow2.f32 %v3143_v48  ;;  %v12098_v53 = vmul.f32 1.442695, %v3110_v61  ;;  %v2821_v56 = vsub.f32 %v16401_v49, %v2789_v9  ;;  %v16406_v61 = vld [vmem:[#allocation124_spill] sm:$0xff] }
 0x30f   : > { %16400 = vst [vmem:[#allocation118_spill] sm:$0xff] %v12095_v63  ;;  %v12101_v47 = vpop.eup %9740  ;;  %9760 = vpow2.f32 %v2861_v29  ;;  %v2917_v37 = vsub.f32 %v16403_v24, %v2789_v9  ;;  %v3013_v36 = vsub.f32 %v16404_v13, %v2789_v9  ;;  %v3109_v44 = vsub.f32 %v11946_v1, %v2789_v9  ;;  %v12106_v28 = vpop.f32.mrb[134].mxu1 }
 0x310   : > { %16402 = vst [vmem:[#allocation169_spill] sm:$0xff] %v12101_v47  ;;  %v12108_v17 = vpop.eup %9742  ;;  %v3263_v22 = vadd.f32 %v12085_v32, %v3231_v2  ;;  %9762 = vpow2.f32 %v2957_v33  ;;  %v12111_v48 = vmul.f32 1.442695, %v2821_v56  ;;  %v2824_v49 = vsub.f32 %v16406_v61, %v2792_v55  ;;  %v12114_v42 = vpop.f32.mrb[135].mxu1  ;;  %v16408_v2 = vld [vmem:[#allocation175_spill] sm:$0xff] }
 0x311   : > { %16405 = vst [vmem:[#allocation170_spill] sm:$0xff] %v12108_v17  ;;  %v12116_v29 = vpop.eup %9744  ;;  %v3202_v13 = vadd.f32 %v12108_v17, %v12101_v47  ;;  %9764 = vpow2.f32 %v3053_v5  ;;  %v12120_v1 = vmul.f32 1.442695, %v2917_v37  ;;  %v12122_v9 = vmul.f32 1.442695, %v3013_v36  ;;  %v16410_v5 = vld [vmem:[#allocation176_spill] sm:$0xff] }
 0x312   : > { %16407 = vst [vmem:[#allocation120_spill] sm:$0xff] %v12116_v29  ;;  %v12124_v24 = vpop.eup %9746  ;;  %9766 = vrcp.f32 %v3263_v22  ;;  %v12126_v33 = vmul.f32 1.442695, %v3109_v44  ;;  %v12128_v56 = vmul.f32 1.442695, %v2824_v49  ;;  %v2920_v61 = vsub.f32 %v16408_v2, %v2792_v55  ;;  %v16412_v22 = vld [vmem:[#allocation126_spill] sm:$0xff] }
 0x313   : > { %v12131_v32 = vpop.eup %9748  ;;  %v3234_v63 = vadd.f32 %v12116_v29, %v3202_v13  ;;  %9768 = vpow2.f32 %v12036_v8  ;;  %v3016_v37 = vsub.f32 %v16410_v5, %v2792_v55  ;;  %v3112_v36 = vsub.f32 %v11968_v46, %v2792_v55  ;;  %v12137_v17 = vpop.f32.mrb[136].mxu1  ;;  %v16413_v2 = vld [vmem:[#allocation177_spill] sm:$0xff] }
 0x314   : > { %16409 = vst [vmem:[#allocation171_spill] sm:$0xff] %v12131_v32  ;;  %v12139_v47 = vpop.eup %9750  ;;  %9770 = vpow2.f32 %v12038_v0  ;;  %v12142_v44 = vmul.f32 1.442695, %v2920_v61  ;;  %v2823_v49 = vsub.f32 %v16412_v22, %v12093_v43  ;;  %v2919_v13 = vsub.f32 %v16413_v2, %v12093_v43  ;;  %v12148_v29 = vpop.f32.mrb[137].mxu1 }
 0x315   : > { %16411 = vst [vmem:[#allocation174_spill] sm:$0xff] %v12139_v47  ;;  %16414 = vst [vmem:[#allocation122_spill] sm:$0xff] %v12148_v29  ;;  %v12150_v8 = vpop.eup %9752  ;;  %v3266_v46 = vadd.f32 %v12131_v32, %v3234_v63  ;;  %9772 = vpow2.f32 %v12052_v45  ;;  %v12154_v55 = vmul.f32 1.442695, %v3016_v37  ;;  %v12156_v5 = vmul.f32 1.442695, %v3112_v36 }
 0x316   : > { %16415 = vst [vmem:[#allocation172_spill] sm:$0xff] %v12150_v8  ;;  %v12158_v0 = vpop.eup %9754  ;;  %v3201_v61 = vadd.f32 %v12150_v8, %v12139_v47  ;;  %9774 = vpow2.f32 %v12061_v11  ;;  %v12163_v22 = vmul.f32 1.442695, %v2823_v49  ;;  %v12165_v2 = vmul.f32 1.442695, %v2919_v13  ;;  %v16418_v63 = vld [vmem:[#allocation178_spill] sm:$0xff] }
 0x317   : > { %16416 = vst [vmem:[#allocation173_spill] sm:$0xff] %v12158_v0  ;;  %v12167_v29 = vpop.eup %9756  ;;  %9776 = vrcp.f32 %v3266_v46  ;;  %v3015_v45 = vsub.f32 %v16418_v63, %v12093_v43  ;;  %v3111_v37 = vsub.f32 %v11978_v20, %v12093_v43  ;;  %v2794_v36 = vmax.f32 %v11746_v40, %v11994_v51  ;;  %v12175_v32 = vpop.f32.mrb[138].mxu1 }
 0x318   : > { %16417 = vst [vmem:[#allocation124_spill] sm:$0xff] %v12167_v29  ;;  %16419 = vst [vmem:[#allocation175_spill] sm:$0xff] %v12175_v32  ;;  %v12177_v8 = vpop.eup %9758  ;;  %v3233_v11 = vadd.f32 %v12167_v29, %v3201_v61  ;;  %9778 = vpow2.f32 %v12063_v15  ;;  %v2793_v49 = vmax.f32 %v11749_v52, %v12006_v19  ;;  %v12185_v13 = vmax.f32 %v11764_v30, %v12017_v41  ;;  %v12187_v46 = vpop.f32.mrb[139].mxu1  ;;  %v16423_v61 = vld [vmem:[#allocation128_spill] sm:$0xff]  ;;  %v16425_v30 = vld [vmem:[#allocation179_spill] sm:$0xff] }
 0x319   : > { %16420 = vst [vmem:[#allocation176_spill] sm:$0xff] %v12177_v8  ;;  %16421 = vst [vmem:[#allocation126_spill] sm:$0xff] %v12187_v46  ;;  %v12189_v20 = vpop.eup %9760  ;;  %9780 = vpow2.f32 %v12067_v12  ;;  %v12192_v40 = vmul.f32 1.442695, %v3015_v45  ;;  %v12194_v43 = vmul.f32 1.442695, %v3111_v37  ;;  %v2826_v63 = vsub.f32 %v16423_v61, %v2794_v36 }
 0x31a   : > { %16422 = vst [vmem:[#allocation177_spill] sm:$0xff] %v12189_v20  ;;  %v12197_v15 = vpop.eup %9762  ;;  %v3265_v52 = vadd.f32 %v12177_v8, %v3233_v11  ;;  %9782 = vpow2.f32 %v12069_v21  ;;  %v2922_v32 = vsub.f32 %v16425_v30, %v2794_v36  ;;  %v16426_v29 = vld [vmem:[#allocation180_spill] sm:$0xff]  ;;  %v3114_v37 = vsub.f32 %v11994_v51, %v2794_v36 }
 0x31b   : > { %16424 = vst [vmem:[#allocation178_spill] sm:$0xff] %v12197_v15  ;;  %v3018_v46 = vsub.f32 %v16426_v29, %v2794_v36  ;;  %v12203_v47 = vpop.eup %9764  ;;  %v3204_v12 = vadd.f32 %v12197_v15, %v12189_v20  ;;  %9784 = vpow2.f32 %v12087_v25  ;;  %v12208_v45 = vmul.f32 1.442695, %v2826_v63  ;;  %v12211_v61 = vpop.f32.mrb[140].mxu1  ;;  %v16429_v29 = vld [vmem:[#allocation130_spill] sm:$0xff]  ;;  %v16432_v36 = vld [vmem:[#allocation181_spill] sm:$0xff] }
 0x31c   : > { %16427 = vst [vmem:[#allocation128_spill] sm:$0xff] %v12203_v47  ;;  %16428 = vst [vmem:[#allocation179_spill] sm:$0xff] %v12211_v61  ;;  %v12213_v11 = vpop.eup %9766  ;;  %9786 = vrcp.f32 %v3265_v52  ;;  %v12215_v21 = vmul.f32 1.442695, %v2922_v32  ;;  %v2825_v8 = vsub.f32 %v16429_v29, %v2793_v49  ;;  %v12220_v0 = vpop.f32.mrb[141].mxu1  ;;  %v2921_v63 = vsub.f32 %v16432_v36, %v2793_v49 }
 0x31d   : > { %v12217_v30 = vmul.f32 1.442695, %v3018_v46  ;;  %16430 = vst [vmem:[#allocation180_spill] sm:$0xff] %v12220_v0  ;;  %v12222_v15 = vpop.eup %9768  ;;  %v3236_v25 = vadd.f32 %v12203_v47, %v3204_v12  ;;  %9788 = vpow2.f32 %v12098_v53  ;;  %v12226_v51 = vmul.f32 1.442695, %v3114_v37  ;;  %v16434_v46 = vld [vmem:[#allocation182_spill] sm:$0xff] }
 0x31e   : > { %16431 = vst [vmem:[#allocation130_spill] sm:$0xff] %v12222_v15  ;;  %v12229_v61 = vpop.eup %9770  ;;  %9790 = vpow2.f32 %v12111_v48  ;;  %v12232_v32 = vmul.f32 1.442695, %v2825_v8  ;;  %v3017_v52 = vsub.f32 %v16434_v46, %v2793_v49  ;;  %v3113_v29 = vsub.f32 %v12006_v19, %v2793_v49  ;;  %v16436_v37 = vld [vmem:[#allocation132_spill] sm:$0xff]  ;;  %v16440_v46 = vld [vmem:[#allocation183_spill] sm:$0xff] }
 0x31f   : > { %16433 = vst [vmem:[#allocation181_spill] sm:$0xff] %v12229_v61  ;;  %v12236_v0 = vpop.eup %9772  ;;  %v3268_v12 = vadd.f32 %v12222_v15, %v3236_v25  ;;  %9792 = vpow2.f32 %v12120_v1  ;;  %v12240_v53 = vmul.f32 1.442695, %v2921_v63  ;;  %v2828_v36 = vsub.f32 %v16436_v37, %v12185_v13  ;;  %v12244_v47 = vpop.f32.mrb[142].mxu1 }
 0x320   : > { %16435 = vst [vmem:[#allocation182_spill] sm:$0xff] %v12236_v0  ;;  %16437 = vst [vmem:[#allocation132_spill] sm:$0xff] %v12244_v47  ;;  %v12246_v48 = vpop.eup %9774  ;;  %v3203_v8 = vadd.f32 %v12236_v0, %v12229_v61  ;;  %9794 = vpow2.f32 %v12122_v9  ;;  %v12251_v19 = vmul.f32 1.442695, %v3017_v52  ;;  %v12253_v49 = vmul.f32 1.442695, %v3113_v29 }
 0x321   : > { %16438 = vst [vmem:[#allocation225_spill] sm:$0xff] %v12246_v48  ;;  %v12255_v25 = vpop.f32.mrb[143].mxu1  ;;  %v12257_v1 = vpop.eup %9776  ;;  %9796 = vrcp.f32 %v3268_v12  ;;  %v12259_v63 = vmul.f32 1.442695, %v2828_v36  ;;  %v2924_v37 = vsub.f32 %v16440_v46, %v12185_v13  ;;  %v3020_v47 = vsub.f32 %v11753_v31, %v12185_v13  ;;  %v16442_v29 = vld [vmem:[#allocation186_spill] sm:$0xff] }
 0x322   : > { %16439 = vst [vmem:[#allocation226_spill] sm:$0xff] %v12255_v25  ;;  %v12265_v15 = vpop.eup %9778  ;;  %v3235_v9 = vadd.f32 %v12246_v48, %v3203_v8  ;;  %9798 = vpow2.f32 %v12126_v33  ;;  %v3116_v52 = vsub.f32 %v12017_v41, %v12185_v13  ;;  %v2795_v12 = vmax.f32 %v16442_v29, %v12024_v35  ;;  %v16445_v13 = vld [vmem:[#allocation134_spill] sm:$0xff] }
 0x323   : > { %16441 = vst [vmem:[#allocation183_spill] sm:$0xff] %v12265_v15  ;;  %v12273_v36 = vpop.eup %9780  ;;  %9800 = vpow2.f32 %v12128_v56  ;;  %v12276_v46 = vmul.f32 1.442695, %v2924_v37  ;;  %v12278_v25 = vmul.f32 1.442695, %v3020_v47  ;;  %v2798_v31 = vmax.f32 %v11782_v10, %v12041_v50  ;;  %v16447_v47 = vld [vmem:[#allocation184_spill] sm:$0xff] }
 0x324   : > { %16443 = vst [vmem:[#allocation186_spill] sm:$0xff] %v12273_v36  ;;  %v12282_v8 = vpop.eup %9782  ;;  %v3267_v33 = vadd.f32 %v12265_v15, %v3235_v9  ;;  %9802 = vpow2.f32 %v12142_v44  ;;  %v12286_v41 = vmul.f32 1.442695, %v3116_v52  ;;  %v2827_v29 = vsub.f32 %v16445_v13, %v2795_v12  ;;  %v16448_v10 = vld [vmem:[#allocation185_spill] sm:$0xff]  ;;  %v16449_v52 = vld [vmem:[#allocation136_spill] sm:$0xff] }
 0x325   : > { %16444 = vst [vmem:[#allocation227_spill] sm:$0xff] %v12282_v8  ;;  %v12289_v20 = vpop.eup %9784  ;;  %v3206_v56 = vadd.f32 %v12282_v8, %v12273_v36  ;;  %9804 = vpow2.f32 %v12154_v55  ;;  %v2923_v37 = vsub.f32 %v16447_v47, %v2795_v12  ;;  %v3019_v48 = vsub.f32 %v16448_v10, %v2795_v12  ;;  %v16456_v8 = vld [vmem:[#allocation188_spill] sm:$0xff] }
 0x326   : > { %16446 = vst [vmem:[#allocation134_spill] sm:$0xff] %v12289_v20  ;;  %v12296_v0 = vpop.eup %9786  ;;  %9806 = vrcp.f32 %v3267_v33  ;;  %v12298_v9 = vmul.f32 1.442695, %v2827_v29  ;;  %v3115_v44 = vsub.f32 %v12024_v35, %v2795_v12  ;;  %v2830_v13 = vsub.f32 %v16449_v52, %v2798_v31  ;;  %v16451_v35 = vld [vmem:[#allocation187_spill] sm:$0xff] }
 0x327   : > { %v12302_v15 = vpop.eup %9788  ;;  %v3238_v61 = vadd.f32 %v12289_v20, %v3206_v56  ;;  %9808 = vpow2.f32 %v12156_v5  ;;  %v12306_v55 = vmul.f32 1.442695, %v2923_v37  ;;  %v12308_v47 = vmul.f32 1.442695, %v3019_v48 }
 0x328   : > { %16450 = vst [vmem:[#allocation184_spill] sm:$0xff] %v12302_v15  ;;  %v12310_v10 = vpop.eup %9790  ;;  %9810 = vpow2.f32 %v12163_v22  ;;  %v12313_v33 = vmul.f32 1.442695, %v3115_v44  ;;  %v12315_v29 = vmul.f32 1.442695, %v2830_v13  ;;  %v2926_v12 = vsub.f32 %v16451_v35, %v2798_v31  ;;  %v16453_v13 = vld [vmem:[#allocation190_spill] sm:$0xff] }
 0x329   : > { %v12318_v52 = vpop.eup %9792  ;;  %v3270_v56 = vadd.f32 %v12302_v15, %v3238_v61  ;;  %9812 = vpow2.f32 %v12165_v2  ;;  %v3022_v5 = vsub.f32 %v11771_v7, %v2798_v31  ;;  %v3118_v48 = vsub.f32 %v12041_v50, %v2798_v31  ;;  %v16454_v50 = vld [vmem:[#allocation10_spill] sm:$0xff] }
 0x32a   : > { %16452 = vst [vmem:[#allocation185_spill] sm:$0xff] %v12318_v52  ;;  %v12324_v37 = vpop.eup %9794  ;;  %v3205_v22 = vadd.f32 %v12318_v52, %v12310_v10  ;;  %9814 = vpow2.f32 %v12192_v40  ;;  %v12329_v44 = vmul.f32 1.442695, %v2926_v12  ;;  %v2797_v35 = vmax.f32 %v16453_v13, %v12048_v14  ;;  %v16455_v40 = vld [vmem:[#allocation138_spill] sm:$0xff]  ;;  %v16458_v52 = vld [vmem:[#allocation43_spill] sm:$0xff] }
 0x32b   : > { %v12333_v20 = vpop.eup %9796  ;;  %9816 = vrcp.f32 %v3270_v56  ;;  %v12335_v2 = vmul.f32 1.442695, %v3022_v5  ;;  %v12337_v7 = vmul.f32 1.442695, %v3118_v48  ;;  %v3291_v61 = vmul.f32 %v11943_v4, %v16454_v50  ;;  %v16457_v56 = vld [vmem:[#allocation189_spill] sm:$0xff] }
 0x32c   : > { %v12341_v31 = vpop.eup %9798  ;;  %v3237_v15 = vadd.f32 %v12324_v37, %v3205_v22  ;;  %9818 = vpow2.f32 %v12194_v43  ;;  %v2829_v12 = vsub.f32 %v16455_v40, %v2797_v35  ;;  %v2925_v13 = vsub.f32 %v16456_v8, %v2797_v35 }
 0x32d   : > { %v12347_v36 = vpop.eup %9800  ;;  %9820 = vpow2.f32 %v12208_v45  ;;  %v3021_v5 = vsub.f32 %v16457_v56, %v2797_v35  ;;  %v3117_v48 = vsub.f32 %v12048_v14, %v2797_v35  ;;  %v3323_v4 = vmul.f32 %v11948_v34, %v16458_v52 }
 0x32e   : > { %v12354_v50 = vpop.eup %9802  ;;  %v3269_v22 = vadd.f32 %v12341_v31, %v3237_v15  ;;  %9822 = vpow2.f32 %v12215_v21  ;;  %v12358_v43 = vmul.f32 1.442695, %v2829_v12  ;;  %v12360_v8 = vmul.f32 1.442695, %v2925_v13  ;;  %v16460_v21 = vld [vmem:[#allocation44_spill] sm:$0xff]  ;;  %v16461_v12 = vld [vmem:[#allocation106_spill] sm:$0xff] }
 0x32f   : > { %16459 = vst [vmem:[#allocation136_spill] sm:$0xff] %v12354_v50  ;;  %v12362_v40 = vpop.eup %9804  ;;  %v3208_v45 = vadd.f32 %v12354_v50, %v12347_v36  ;;  %9824 = vpow2.f32 %v12217_v30  ;;  %v12367_v14 = vmul.f32 1.442695, %v3021_v5  ;;  %v12369_v34 = vmul.f32 1.442695, %v3117_v48 }
 0x330   : > { %v12371_v52 = vpop.eup %9806  ;;  %9826 = vrcp.f32 %v3269_v22  ;;  %v3355_v15 = vadd.f32 %v3323_v4, %v3291_v61  ;;  %v3387_v35 = vmul.f32 %v11955_v60, %v16460_v21  ;;  %v3451_v13 = vmul.f32 %v11959_v6, %v16461_v12  ;;  %v16462_v61 = vld [vmem:[#allocation13_spill] sm:$0xff] }
 0x331   : > { %v12377_v56 = vpop.eup %9808  ;;  %v3240_v50 = vadd.f32 %v12362_v40, %v3208_v45  ;;  %9828 = vpow2.f32 %v12226_v51  ;;  %v3548_v30 = vmul.f32 %v12029_v58, %v11963_v23  ;;  %v2800_v5 = vmax.f32 %v11800_v3, %v12073_v39  ;;  %v16463_v23 = vld [vmem:[#allocation140_spill] sm:$0xff]  ;;  %v16464_v3 = vld [vmem:[#allocation191_spill] sm:$0xff] }
 0x332   : > { %v12385_v48 = vpop.eup %9810  ;;  %9830 = vpow2.f32 %v12232_v32  ;;  %v3419_v60 = vadd.f32 %v3387_v35, %v3355_v15  ;;  %v2799_v6 = vmax.f32 %v11803_v26, %v12083_v62  ;;  %v3293_v4 = vmul.f32 %v11987_v16, %v16462_v61  ;;  %v16465_v15 = vld [vmem:[#allocation192_spill] sm:$0xff] }
 0x333   : > { %v12392_v22 = vpop.eup %9812  ;;  %v3272_v51 = vadd.f32 %v12377_v56, %v3240_v50  ;;  %9832 = vpow2.f32 %v12240_v53  ;;  %v2832_v58 = vsub.f32 %v16463_v23, %v2800_v5  ;;  %v2928_v45 = vsub.f32 %v16464_v3, %v2800_v5 }
 0x334   : > { %v12398_v21 = vpop.eup %9814  ;;  %v3207_v32 = vadd.f32 %v12392_v22, %v12385_v48  ;;  %9834 = vpow2.f32 %v12251_v19  ;;  %v3483_v26 = vadd.f32 %v3451_v13, %v3419_v60  ;;  %v3024_v16 = vsub.f32 %v16465_v15, %v2800_v5 }
 0x335   : > { %v12404_v35 = vpop.eup %9816  ;;  %9836 = vrcp.f32 %v3272_v51  ;;  %v12406_v50 = vmul.f32 1.442695, %v2832_v58  ;;  %v12408_v53 = vmul.f32 1.442695, %v2928_v45  ;;  %v3120_v12 = vsub.f32 %v12073_v39, %v2800_v5  ;;  %v16467_v58 = vld [vmem:[#allocation142_spill] sm:$0xff]  ;;  %v16468_v45 = vld [vmem:[#allocation193_spill] sm:$0xff] }
 0x336   : > { %v12411_v61 = vpop.eup %9818  ;;  %v3239_v23 = vadd.f32 %v12398_v21, %v3207_v32  ;;  %9838 = vpow2.f32 %v12253_v49  ;;  %v3547_v19 = vmul.f32 %v12058_v38, %v3483_v26  ;;  %v12416_v13 = vmul.f32 1.442695, %v3024_v16  ;;  %v16470_v38 = vld [vmem:[#allocation194_spill] sm:$0xff] }
 0x337   : > { %v12418_v60 = vpop.eup %9820  ;;  %9840 = vpow2.f32 %v12259_v63  ;;  %v12421_v51 = vmul.f32 1.442695, %v3120_v12  ;;  %v2831_v3 = vsub.f32 %v16467_v58, %v2799_v6  ;;  %v2927_v39 = vsub.f32 %v16468_v45, %v2799_v6  ;;  %v16473_v58 = vld [vmem:[#allocation5_spill] sm:$0xff] }
 0x338   : > { %16466 = vst [vmem:[#allocation187_spill] sm:$0xff] %v12418_v60  ;;  %v12425_v5 = vpop.eup %9822  ;;  %v3271_v32 = vadd.f32 %v12411_v61, %v3239_v23  ;;  %9842 = vpow2.f32 %v12276_v46  ;;  %9009 = vmatprep.mubr.msk.f32.mxu0 %vm210_vm0, %v3547_v19  ;;  %v3023_v49 = vsub.f32 %v16470_v38, %v2799_v6  ;;  %v3119_v26 = vsub.f32 %v12083_v62, %v2799_v6  ;;  %v16472_v62 = vld [vmem:[#allocation47_spill] sm:$0xff]  ;;  %v16477_v38 = vld [vmem:[#allocation6_spill] sm:$0xff] }
 0x339   : > { %16469 = vst [vmem:[#allocation190_spill] sm:$0xff] %v12425_v5  ;;  %v12432_v15 = vpop.eup %9824  ;;  %v3210_v63 = vadd.f32 %v12425_v5, %v12418_v60  ;;  %9844 = vpow2.f32 %v12278_v25  ;;  %9010 = vmatmul.mubr.msk.f32.vlgmr.msra.gmra.mrb[112].mxu0 %vm210_vm0, %v3548_v30  ;;  %v12438_v16 = vmul.f32 1.442695, %v2831_v3  ;;  %v12440_v12 = vmul.f32 1.442695, %v2927_v39  ;;  %v16475_v30 = vld [vmem:[#allocation48_spill] sm:$0xff] }
 0x33a   : > { %16471 = vst [vmem:[#allocation10_spill] sm:$0xff] %v12432_v15  ;;  %v12442_v46 = vpop.eup %9826  ;;  %9846 = vrcp.f32 %v3271_v32  ;;  %v12444_v23 = vmul.f32 1.442695, %v3023_v49  ;;  %v12446_v19 = vmul.f32 1.442695, %v3119_v26  ;;  %v3325_v6 = vmul.f32 %v11996_v18, %v16472_v62  ;;  %9588 = vmatpush3.bf16.msra.mxu0 %v16473_v58  ;;  %v16476_v39 = vld [vmem:[#allocation108_spill] sm:$0xff] }
 0x33b   : > { %v12451_v45 = vpop.eup %9828  ;;  %v3242_v25 = vadd.f32 %v12432_v15, %v3210_v63  ;;  %9848 = vpow2.f32 %v12286_v41  ;;  %v3389_v3 = vmul.f32 %v12008_v27, %v16475_v30  ;;  %v3453_v32 = vmul.f32 %v12013_v57, %v16476_v39  ;;  %9590 = vmatprep.subr.bf16.mxu0 %v16477_v38  ;;  %v16478_v26 = vld [vmem:[#allocation14_spill] sm:$0xff]  ;;  %v16479_v58 = vld [vmem:[#allocation45_spill] sm:$0xff]  ;;  %v16482_v15 = vld [vmem:[#allocation107_spill] sm:$0xff] }
 0x33c   : > { %16474 = vst [vmem:[#allocation138_spill] sm:$0xff] %v12451_v45  ;;  %v12460_v49 = vpop.eup %9830  ;;  %9850 = vpow2.f32 %v12298_v9  ;;  %v3357_v18 = vadd.f32 %v3325_v6, %v3293_v4  ;;  %v3294_v62 = vmul.f32 %v11961_v59, %v16478_v26  ;;  %v3326_v63 = vmul.f32 %v11970_v54, %v16479_v58  ;;  %v16480_v57 = vld [vmem:[#allocation46_spill] sm:$0xff]  ;;  %v16481_v30 = vld [vmem:[#allocation105_spill] sm:$0xff]  ;;  %v16483_v5 = vld [vmem:[#allocation112_spill] sm:$0xff] }
 0x33d   : > { %v12467_v41 = vpop.eup %9832  ;;  %v3274_v27 = vadd.f32 %v12451_v45, %v3242_v25  ;;  %9852 = vpow2.f32 %v12306_v55  ;;  %v3390_v39 = vmul.f32 %v16481_v30, %v16480_v57  ;;  %v3454_v60 = vmul.f32 %v16483_v5, %v16482_v15  ;;  %v16484_v55 = vld [vmem:[#allocation199_spill] sm:$0xff]  ;;  %v16485_v26 = vld [vmem:[#allocation200_spill] sm:$0xff]  ;;  %v16487_v58 = vld [vmem:[#allocation166_spill] sm:$0xff] }
 0x33e   : > { %v12475_v9 = vpop.eup %9834  ;;  %v3209_v59 = vadd.f32 %v12467_v41, %v12460_v49  ;;  %9854 = vpow2.f32 %v12308_v47  ;;  %v3421_v54 = vadd.f32 %v3389_v3, %v3357_v18  ;;  %v3358_v4 = vadd.f32 %v3326_v63, %v3294_v62  ;;  %9592 = vmatpush3.bf16.msra.mxu0 %v16477_v38  ;;  %v16486_v15 = vld [vmem:[#allocation15_spill] sm:$0xff]  ;;  %v16488_v30 = vld [vmem:[#allocation8_spill] sm:$0xff] }
 0x33f   : > { %v12481_v6 = vpop.eup %9836  ;;  %9856 = vrcp.f32 %v3274_v27  ;;  %v2802_v25 = vmax.f32 %v16484_v55, %v12106_v28  ;;  %v2801_v5 = vmax.f32 %v16485_v26, %v12114_v42  ;;  %v3295_v57 = vmul.f32 %v16487_v58, %v16486_v15  ;;  %9602 = vmatprep.subr.bf16.mxu0 %v16488_v30  ;;  %v16490_v62 = vld [vmem:[#allocation144_spill] sm:$0xff]  ;;  %v16491_v27 = vld [vmem:[#allocation195_spill] sm:$0xff] }
 0x340   : > { %v12490_v45 = vpop.eup %9838  ;;  %v3241_v47 = vadd.f32 %v12475_v9, %v3209_v59  ;;  %9858 = vpow2.f32 %v12313_v33  ;;  %v3485_v3 = vadd.f32 %v3453_v32, %v3421_v54  ;;  %v3422_v38 = vadd.f32 %v3390_v39, %v3358_v4  ;;  %v16492_v26 = vld [vmem:[#allocation196_spill] sm:$0xff] }
 0x341   : > { %v12494_v18 = vpop.eup %9840  ;;  %9860 = vpow2.f32 %v12315_v29  ;;  %v2834_v63 = vsub.f32 %v16490_v62, %v2802_v25  ;;  %v2930_v55 = vsub.f32 %v16491_v27, %v2802_v25  ;;  %v3026_v15 = vsub.f32 %v16492_v26, %v2802_v25  ;;  %v16499_v26 = vld [vmem:[#allocation198_spill] sm:$0xff] }
 0x342   : > { %16489 = vst [vmem:[#allocation188_spill] sm:$0xff] %v12494_v18  ;;  %v12500_v58 = vpop.eup %9842  ;;  %v3273_v30 = vadd.f32 %v12490_v45, %v3241_v47  ;;  %9862 = vpow2.f32 %v12329_v44  ;;  %v3549_v33 = vmul.f32 %v12124_v24, %v3485_v3  ;;  %v3486_v32 = vadd.f32 %v3454_v60, %v3422_v38  ;;  %v16495_v44 = vld [vmem:[#allocation118_spill] sm:$0xff] }
 0x343   : > { %16493 = vst [vmem:[#allocation189_spill] sm:$0xff] %v12500_v58  ;;  %v12505_v39 = vpop.eup %9844  ;;  %v3212_v29 = vadd.f32 %v12500_v58, %v12494_v18  ;;  %9864 = vpow2.f32 %v12335_v2  ;;  %v12510_v59 = vmul.f32 1.442695, %v2834_v63  ;;  %v12512_v54 = vmul.f32 1.442695, %v2930_v55  ;;  %v16497_v2 = vld [vmem:[#allocation146_spill] sm:$0xff] }
 0x344   : > { %16494 = vst [vmem:[#allocation43_spill] sm:$0xff] %v12505_v39  ;;  %v12514_v4 = vpop.eup %9846  ;;  %9866 = vrcp.f32 %v3273_v30  ;;  %9012 = vmatprep.mubr.msk.f32.mxu0 %vm210_vm0, %v3549_v33  ;;  %v3550_v47 = vmul.f32 %v16495_v44, %v3486_v32  ;;  %v12518_v24 = vmul.f32 1.442695, %v3026_v15  ;;  %v3122_v60 = vsub.f32 %v12106_v28, %v2802_v25  ;;  %v16498_v63 = vld [vmem:[#allocation197_spill] sm:$0xff] }
 0x345   : > { %v12521_v3 = vpop.eup %9848  ;;  %v3244_v38 = vadd.f32 %v12505_v39, %v3212_v29  ;;  %9868 = vpow2.f32 %v12337_v7  ;;  %v2833_v62 = vsub.f32 %v16497_v2, %v2801_v5  ;;  %v2929_v27 = vsub.f32 %v16498_v63, %v2801_v5  ;;  %v16505_v2 = vld [vmem:[#allocation167_spill] sm:$0xff]  ;;  %v16506_v63 = vld [vmem:[#allocation110_spill] sm:$0xff] }
 0x346   : > { %16496 = vst [vmem:[#allocation44_spill] sm:$0xff] %v12521_v3  ;;  %v12527_v55 = vpop.eup %9850  ;;  %9870 = vpow2.f32 %v12358_v43  ;;  %9013 = vmatmul.mubr.msk.f32.gmra.mrb[114].mxu0 %vm210_vm0, %v3550_v47  ;;  %v12531_v30 = vmul.f32 1.442695, %v3122_v60  ;;  %v3025_v28 = vsub.f32 %v16499_v26, %v2801_v5  ;;  %v3121_v25 = vsub.f32 %v12114_v42, %v2801_v5  ;;  %v16502_v47 = vld [vmem:[#allocation51_spill] sm:$0xff] }
 0x347   : > { %v12535_v15 = vpop.eup %9852  ;;  %v3276_v7 = vadd.f32 %v12521_v3, %v3244_v38  ;;  %9872 = vpow2.f32 %v12360_v8  ;;  %v12539_v33 = vmul.f32 1.442695, %v2833_v62  ;;  %v12541_v32 = vmul.f32 1.442695, %v2929_v27  ;;  %v16503_v8 = vld [vmem:[#allocation116_spill] sm:$0xff] }
 0x348   : > { %16500 = vst [vmem:[#allocation106_spill] sm:$0xff] %v12535_v15  ;;  %v12543_v29 = vpop.eup %9854  ;;  %v3211_v43 = vadd.f32 %v12535_v15, %v12527_v55  ;;  %9874 = vpow2.f32 %v12367_v14  ;;  %v12548_v44 = vmul.f32 1.442695, %v3025_v28  ;;  %v12550_v42 = vmul.f32 1.442695, %v3121_v25  ;;  %v16504_v38 = vld [vmem:[#allocation52_spill] sm:$0xff] }
 0x349   : > { %v12552_v5 = vpop.eup %9856  ;;  %9876 = vrcp.f32 %v3276_v7  ;;  %v3327_v60 = vmul.f32 %v16503_v8, %v16502_v47  ;;  %v3391_v62 = vmul.f32 %v16505_v2, %v16504_v38  ;;  %v16507_v27 = vld [vmem:[#allocation168_spill] sm:$0xff]  ;;  %v16510_v25 = vld [vmem:[#allocation163_spill] sm:$0xff]  ;;  %v16514_v8 = vld [vmem:[#allocation50_spill] sm:$0xff] }
 0x34a   : > { %16501 = vst [vmem:[#allocation13_spill] sm:$0xff] %v12552_v5  ;;  %v3455_v26 = vmul.f32 %v16507_v27, %v16506_v63  ;;  %v12560_v3 = vpop.eup %9858  ;;  %v3243_v14 = vadd.f32 %v12543_v29, %v3211_v43  ;;  %9878 = vpow2.f32 %v12369_v34  ;;  %v16509_v28 = vld [vmem:[#allocation16_spill] sm:$0xff]  ;;  %v16511_v5 = vld [vmem:[#allocation49_spill] sm:$0xff]  ;;  %v16515_v38 = vld [vmem:[#allocation114_spill] sm:$0xff] }
 0x34b   : > { %16508 = vst [vmem:[#allocation140_spill] sm:$0xff] %v12560_v3  ;;  %v3296_v39 = vmul.f32 %v16510_v25, %v16509_v28  ;;  %v16512_v7 = vld [vmem:[#allocation164_spill] sm:$0xff]  ;;  %v12568_v18 = vpop.eup %9860  ;;  %9880 = vpow2.f32 %v12406_v50  ;;  %v3359_v47 = vadd.f32 %v3327_v60, %v3295_v57  ;;  %v3392_v2 = vmul.f32 %v16515_v38, %v16514_v8  ;;  %v16516_v63 = vld [vmem:[#allocation109_spill] sm:$0xff]  ;;  %v16521_v60 = vld [vmem:[#allocation122_spill] sm:$0xff] }
 0x34c   : > { %v3328_v58 = vmul.f32 %v16512_v7, %v16511_v5  ;;  %16513 = vst [vmem:[#allocation191_spill] sm:$0xff] %v12568_v18  ;;  %v16517_v27 = vld [vmem:[#allocation165_spill] sm:$0xff]  ;;  %v12575_v43 = vpop.eup %9862  ;;  %v3275_v34 = vadd.f32 %v12560_v3, %v3243_v14  ;;  %9882 = vpow2.f32 %v12408_v53  ;;  %v16522_v8 = vld [vmem:[#allocation206_spill] sm:$0xff]  ;;  %v16523_v53 = vld [vmem:[#allocation148_spill] sm:$0xff] }
 0x34d   : > { %v3456_v15 = vmul.f32 %v16517_v27, %v16516_v63  ;;  %16518 = vst [vmem:[#allocation192_spill] sm:$0xff] %v12575_v43  ;;  %v16519_v5 = vld [vmem:[#allocation205_spill] sm:$0xff]  ;;  %v12581_v7 = vpop.eup %9864  ;;  %v3214_v50 = vadd.f32 %v12575_v43, %v12568_v18  ;;  %9884 = vpow2.f32 %v12416_v13  ;;  %v3423_v57 = vadd.f32 %v3391_v62, %v3359_v47  ;;  %v16526_v13 = vld [vmem:[#allocation202_spill] sm:$0xff] }
 0x34e   : > { %v3360_v28 = vadd.f32 %v3328_v58, %v3296_v39  ;;  %v2804_v25 = vmax.f32 %v16519_v5, %v12137_v17  ;;  %16520 = vst [vmem:[#allocation142_spill] sm:$0xff] %v12581_v7  ;;  %v2803_v38 = vmax.f32 %v16522_v8, %v16521_v60  ;;  %v12588_v63 = vpop.eup %9866  ;;  %9886 = vrcp.f32 %v3275_v34  ;;  %v16524_v39 = vld [vmem:[#allocation201_spill] sm:$0xff]  ;;  %v16548_v18 = vld [vmem:[#allocation170_spill] sm:$0xff] }
 0x34f   : > { %v12592_v5 = vpop.eup %9868  ;;  %v3246_v3 = vadd.f32 %v12581_v7, %v3214_v50  ;;  %9888 = vpow2.f32 %v12421_v51  ;;  %v3487_v43 = vadd.f32 %v3455_v26, %v3423_v57  ;;  %v16547_v7 = vld [vmem:[#allocation53_spill] sm:$0xff] }
 0x350   : > { %v3424_v14 = vadd.f32 %v3392_v2, %v3360_v28  ;;  %v2836_v58 = vsub.f32 %v16523_v53, %v2804_v25  ;;  %v2932_v27 = vsub.f32 %v16524_v39, %v2804_v25  ;;  %16525 = vst [vmem:[#allocation193_spill] sm:$0xff] %v12592_v5  ;;  %v3028_v62 = vsub.f32 %v16526_v13, %v2804_v25  ;;  %v12597_v47 = vpop.eup %9870  ;;  %v16531_v39 = vld [vmem:[#allocation204_spill] sm:$0xff] }
 0x351   : > { %9890 = vpow2.f32 %v12438_v16  ;;  %v12604_v28 = vpop.eup %9872  ;;  %v3278_v53 = vadd.f32 %v12592_v5, %v3246_v3  ;;  %v3551_v51 = vmul.f32 %v12213_v11, %v3487_v43  ;;  %v16530_v3 = vld [vmem:[#allocation203_spill] sm:$0xff] }
 0x352   : > { %v3488_v8 = vadd.f32 %v3456_v15, %v3424_v14  ;;  %v12600_v34 = vmul.f32 1.442695, %v2836_v58  ;;  %v12602_v2 = vmul.f32 1.442695, %v2932_v27  ;;  %9892 = vpow2.f32 %v12440_v12  ;;  %v12611_v50 = vpop.eup %9874  ;;  %v16527_v15 = vld [vmem:[#allocation173_spill] sm:$0xff]  ;;  %v16529_v12 = vld [vmem:[#allocation150_spill] sm:$0xff] }
 0x353   : > { %v12609_v26 = vmul.f32 1.442695, %v3028_v62  ;;  %v3213_v16 = vadd.f32 %v12604_v28, %v12597_v47  ;;  %9894 = vpow2.f32 %v12444_v23  ;;  %v3124_v14 = vsub.f32 %v12137_v17, %v2804_v25  ;;  %v12618_v58 = vpop.eup %9876  ;;  %9015 = vmatprep.mubr.msk.f32.mxu0 %vm210_vm0, %v3551_v51 }
 0x354   : > { %v3552_v57 = vmul.f32 %v16527_v15, %v3488_v8  ;;  %16528 = vst [vmem:[#allocation194_spill] sm:$0xff] %v12618_v58  ;;  %9896 = vrcp.f32 %v3278_v53  ;;  %v2835_v11 = vsub.f32 %v16529_v12, %v2803_v38  ;;  %v2931_v43 = vsub.f32 %v16530_v3, %v2803_v38  ;;  %v12624_v13 = vpop.eup %9878  ;;  %v16538_v12 = vld [vmem:[#allocation55_spill] sm:$0xff] }
 0x355   : > { %v3027_v27 = vsub.f32 %v16531_v39, %v2803_v38  ;;  %16532 = vst [vmem:[#allocation47_spill] sm:$0xff] %v12624_v13  ;;  %v3245_v62 = vadd.f32 %v12611_v50, %v3213_v16  ;;  %9898 = vpow2.f32 %v12446_v19  ;;  %v12629_v17 = vmul.f32 1.442695, %v3124_v14  ;;  %v12632_v25 = vpop.eup %9880  ;;  %v16541_v39 = vld [vmem:[#allocation124_spill] sm:$0xff] }
 0x356   : > { %9016 = vmatmul.mubr.msk.f32.gmra.mrb[116].mxu0 %vm210_vm0, %v3552_v57  ;;  %v3123_v23 = vsub.f32 %v16521_v60, %v2803_v38  ;;  %16533 = vst [vmem:[#allocation5_spill] sm:$0xff] %v12632_v25  ;;  %9900 = vpow2.f32 %v12510_v59  ;;  %v12635_v8 = vmul.f32 1.442695, %v2835_v11  ;;  %v12637_v53 = vmul.f32 1.442695, %v2931_v43  ;;  %v12641_v15 = vpop.eup %9882  ;;  %v16535_v57 = vld [vmem:[#allocation17_spill] sm:$0xff] }
 0x357   : > { %v12639_v51 = vmul.f32 1.442695, %v3027_v27  ;;  %16534 = vst [vmem:[#allocation48_spill] sm:$0xff] %v12641_v15  ;;  %v3277_v19 = vadd.f32 %v12624_v13, %v3245_v62  ;;  %9902 = vpow2.f32 %v12512_v54  ;;  %v16536_v60 = vld [vmem:[#allocation174_spill] sm:$0xff]  ;;  %v12649_v14 = vpop.eup %9884  ;;  %v3216_v59 = vadd.f32 %v12641_v15, %v12632_v25  ;;  %v16539_v11 = vld [vmem:[#allocation172_spill] sm:$0xff]  ;;  %v16543_v54 = vld [vmem:[#allocation113_spill] sm:$0xff] }
 0x358   : > { %v12645_v16 = vmul.f32 1.442695, %v3123_v23  ;;  %v3297_v38 = vmul.f32 %v16536_v60, %v16535_v57  ;;  %16537 = vst [vmem:[#allocation108_spill] sm:$0xff] %v12649_v14  ;;  %9904 = vpow2.f32 %v12518_v24  ;;  %v3329_v3 = vmul.f32 %v16539_v11, %v16538_v12  ;;  %v16540_v43 = vld [vmem:[#allocation56_spill] sm:$0xff]  ;;  %v12658_v62 = vpop.eup %9886  ;;  %v16545_v57 = vld [vmem:[#allocation18_spill] sm:$0xff]  ;;  %v16546_v60 = vld [vmem:[#allocation169_spill] sm:$0xff] }
 0x359   : > { %v3393_v27 = vmul.f32 %v16541_v39, %v16540_v43  ;;  %16542 = vst [vmem:[#allocation6_spill] sm:$0xff] %v12658_v62  ;;  %9906 = vrcp.f32 %v3277_v19  ;;  %v16544_v23 = vld [vmem:[#allocation176_spill] sm:$0xff]  ;;  %v3298_v5 = vmul.f32 %v16546_v60, %v16545_v57  ;;  %v3330_v15 = vmul.f32 %v16548_v18, %v16547_v7  ;;  %v12666_v25 = vpop.eup %9888  ;;  %v16550_v11 = vld [vmem:[#allocation54_spill] sm:$0xff]  ;;  %v16553_v57 = vld [vmem:[#allocation171_spill] sm:$0xff] }
 0x35a   : > { %v3457_v58 = vmul.f32 %v16544_v23, %v16543_v54  ;;  %16549 = vst [vmem:[#allocation14_spill] sm:$0xff] %v12666_v25  ;;  %v3248_v24 = vadd.f32 %v12649_v14, %v3216_v59  ;;  %9908 = vpow2.f32 %v12531_v30  ;;  %v3361_v12 = vadd.f32 %v3329_v3, %v3297_v38  ;;  %v16551_v43 = vld [vmem:[#allocation120_spill] sm:$0xff]  ;;  %v16552_v23 = vld [vmem:[#allocation111_spill] sm:$0xff]  ;;  %v16557_v38 = vld [vmem:[#allocation126_spill] sm:$0xff] }
 0x35b   : > { %v3394_v39 = vmul.f32 %v16551_v43, %v16550_v11  ;;  %v12672_v19 = vpop.eup %9890  ;;  %9910 = vpow2.f32 %v12539_v33  ;;  %v3362_v54 = vadd.f32 %v3330_v15, %v3298_v5  ;;  %v3458_v60 = vmul.f32 %v16553_v57, %v16552_v23  ;;  %v16554_v62 = vld [vmem:[#allocation175_spill] sm:$0xff]  ;;  %v16558_v3 = vld [vmem:[#allocation212_spill] sm:$0xff] }
 0x35c   : > { %v16555_v18 = vld [vmem:[#allocation211_spill] sm:$0xff]  ;;  %v12679_v13 = vpop.eup %9892  ;;  %v3280_v59 = vadd.f32 %v12666_v25, %v3248_v24  ;;  %9912 = vpow2.f32 %v12541_v32  ;;  %v3425_v30 = vadd.f32 %v3393_v27, %v3361_v12  ;;  %v2805_v11 = vmax.f32 %v16558_v3, %v16557_v38  ;;  %v16559_v15 = vld [vmem:[#allocation152_spill] sm:$0xff] }
 0x35d   : > { %v2806_v7 = vmax.f32 %v16555_v18, %v16554_v62  ;;  %16556 = vst [vmem:[#allocation45_spill] sm:$0xff] %v12679_v13  ;;  %v12685_v43 = vpop.eup %9894  ;;  %v3215_v33 = vadd.f32 %v12679_v13, %v12672_v19  ;;  %9914 = vpow2.f32 %v12548_v44  ;;  %v3426_v5 = vadd.f32 %v3394_v39, %v3362_v54  ;;  %v16561_v18 = vld [vmem:[#allocation207_spill] sm:$0xff]  ;;  %v16562_v27 = vld [vmem:[#allocation208_spill] sm:$0xff] }
 0x35e   : > { %v12691_v57 = vpop.eup %9896  ;;  %9916 = vrcp.f32 %v3280_v59  ;;  %v3489_v24 = vadd.f32 %v3457_v58, %v3425_v30 }
 0x35f   : > { %v2838_v23 = vsub.f32 %v16559_v15, %v2806_v7  ;;  %16560 = vst [vmem:[#allocation46_spill] sm:$0xff] %v12691_v57  ;;  %v2934_v32 = vsub.f32 %v16561_v18, %v2806_v7  ;;  %v3030_v12 = vsub.f32 %v16562_v27, %v2806_v7  ;;  %v12695_v25 = vpop.eup %9898  ;;  %v3247_v3 = vadd.f32 %v12685_v43, %v3215_v33  ;;  %v16567_v15 = vld [vmem:[#allocation209_spill] sm:$0xff] }
 0x360   : > { %9918 = vpow2.f32 %v12550_v42  ;;  %v3490_v14 = vadd.f32 %v3458_v60, %v3426_v5  ;;  %v12699_v44 = vpop.eup %9900  ;;  %v3553_v39 = vmul.f32 %v12296_v0, %v3489_v24  ;;  %v3126_v42 = vsub.f32 %v16554_v62, %v2806_v7  ;;  %v16566_v0 = vld [vmem:[#allocation154_spill] sm:$0xff] }
 0x361   : > { %v2897_v13 = vmul.f32 1.442695, %v2838_v23  ;;  %16563 = vst [vmem:[#allocation105_spill] sm:$0xff] %v12699_v44  ;;  %9920 = vpow2.f32 %v12600_v34  ;;  %v2993_v54 = vmul.f32 1.442695, %v2934_v32  ;;  %v12703_v59 = vpop.eup %9902  ;;  %v3279_v30 = vadd.f32 %v12695_v25, %v3247_v3 }
 0x362   : > { %v3089_v58 = vmul.f32 1.442695, %v3030_v12  ;;  %16564 = vst [vmem:[#allocation107_spill] sm:$0xff] %v12703_v59  ;;  %9922 = vpow2.f32 %v12602_v2  ;;  %v3554_v33 = vmul.f32 %v12257_v1, %v3490_v14  ;;  %v12709_v60 = vpop.eup %9904  ;;  %v3218_v5 = vadd.f32 %v12703_v59, %v12699_v44  ;;  %9018 = vmatprep.mubr.msk.f32.mxu0 %vm210_vm0, %v3553_v39  ;;  %v16569_v2 = vld [vmem:[#allocation210_spill] sm:$0xff]  ;;  %v16571_v39 = vld [vmem:[#allocation19_spill] sm:$0xff] }
 0x363   : > { %16565 = vst [vmem:[#allocation112_spill] sm:$0xff] %v12709_v60  ;;  %9924 = vpow2.f32 %v12609_v26  ;;  %v2837_v34 = vsub.f32 %v16566_v0, %v2805_v11  ;;  %v2933_v23 = vsub.f32 %v16567_v15, %v2805_v11  ;;  %v12717_v24 = vpop.eup %9906  ;;  %v3185_v1 = vmul.f32 1.442695, %v3126_v42  ;;  %v16576_v0 = vld [vmem:[#allocation60_spill] sm:$0xff] }
 0x364   : > { %16568 = vst [vmem:[#allocation199_spill] sm:$0xff] %v12717_v24  ;;  %9926 = vrcp.f32 %v3279_v30  ;;  %9019 = vmatmul.mubr.msk.f32.gmra.mrb[118].mxu0 %vm210_vm0, %v3554_v33  ;;  %v3029_v14 = vsub.f32 %v16569_v2, %v2805_v11  ;;  %v3125_v62 = vsub.f32 %v16557_v38, %v2805_v11  ;;  %v12722_v7 = vpop.eup %9908  ;;  %v3250_v26 = vadd.f32 %v12709_v60, %v3218_v5  ;;  %v16572_v30 = vld [vmem:[#allocation181_spill] sm:$0xff]  ;;  %v16574_v11 = vld [vmem:[#allocation59_spill] sm:$0xff]  ;;  %v16587_v60 = vld [vmem:[#allocation128_spill] sm:$0xff] }
 0x365   : > { %16570 = vst [vmem:[#allocation200_spill] sm:$0xff] %v12722_v7  ;;  %9928 = vpow2.f32 %v12629_v17  ;;  %v2895_v18 = vmul.f32 1.442695, %v2837_v34  ;;  %v2991_v32 = vmul.f32 1.442695, %v2933_v23  ;;  %v12726_v27 = vpop.eup %9910  ;;  %v3299_v33 = vmul.f32 %v16572_v30, %v16571_v39  ;;  %v16575_v17 = vld [vmem:[#allocation182_spill] sm:$0xff] }
 0x366   : > { %9930 = vpow2.f32 %v12635_v8  ;;  %v3087_v12 = vmul.f32 1.442695, %v3029_v14  ;;  %v12729_v3 = vmul.f32 1.442695, %v3125_v62  ;;  %v12733_v42 = vpop.eup %9912  ;;  %v3282_v38 = vadd.f32 %v12722_v7, %v3250_v26  ;;  %v16577_v34 = vld [vmem:[#allocation225_spill] sm:$0xff]  ;;  %v16580_v14 = vld [vmem:[#allocation183_spill] sm:$0xff] }
 0x367   : > { %16573 = vst [vmem:[#allocation15_spill] sm:$0xff] %v12733_v42  ;;  %9932 = vpow2.f32 %v12637_v53  ;;  %v3331_v5 = vmul.f32 %v16575_v17, %v16574_v11  ;;  %v3395_v15 = vmul.f32 %v16577_v34, %v16576_v0  ;;  %v12741_v23 = vpop.eup %9914  ;;  %v3217_v8 = vadd.f32 %v12733_v42, %v12726_v27  ;;  %v16579_v2 = vld [vmem:[#allocation117_spill] sm:$0xff]  ;;  %v16581_v39 = vld [vmem:[#allocation20_spill] sm:$0xff]  ;;  %v16585_v7 = vld [vmem:[#allocation178_spill] sm:$0xff] }
 0x368   : > { %16578 = vst [vmem:[#allocation166_spill] sm:$0xff] %v12741_v23  ;;  %9934 = vpow2.f32 %v12639_v51  ;;  %v3459_v62 = vmul.f32 %v16580_v14, %v16579_v2  ;;  %v16582_v26 = vld [vmem:[#allocation177_spill] sm:$0xff]  ;;  %v12750_v53 = vpop.eup %9916  ;;  %v16586_v34 = vld [vmem:[#allocation58_spill] sm:$0xff]  ;;  %v16589_v2 = vld [vmem:[#allocation115_spill] sm:$0xff] }
 0x369   : > { %v3300_v30 = vmul.f32 %v16582_v26, %v16581_v39  ;;  %16583 = vst [vmem:[#allocation144_spill] sm:$0xff] %v12750_v53  ;;  %9936 = vrcp.f32 %v3282_v38  ;;  %v3363_v11 = vadd.f32 %v3331_v5, %v3299_v33  ;;  %v16584_v17 = vld [vmem:[#allocation57_spill] sm:$0xff]  ;;  %v3396_v59 = vmul.f32 %v16587_v60, %v16586_v34  ;;  %v16590_v14 = vld [vmem:[#allocation130_spill] sm:$0xff]  ;;  %v16591_v39 = vld [vmem:[#allocation179_spill] sm:$0xff] }
 0x36a   : > { %v3332_v0 = vmul.f32 %v16585_v7, %v16584_v17  ;;  %v12756_v57 = vpop.eup %9918  ;;  %v3249_v51 = vadd.f32 %v12741_v23, %v3217_v8  ;;  %9938 = vpow2.f32 %v12645_v16  ;;  %v3460_v44 = vmul.f32 %v16590_v14, %v16589_v2  ;;  %v16592_v26 = vld [vmem:[#allocation217_spill] sm:$0xff]  ;;  %v16593_v5 = vld [vmem:[#allocation180_spill] sm:$0xff]  ;;  %v16594_v17 = vld [vmem:[#allocation218_spill] sm:$0xff] }
 0x36b   : > { %16588 = vst [vmem:[#allocation195_spill] sm:$0xff] %v12756_v57  ;;  %v2808_v53 = vmax.f32 %v16592_v26, %v16591_v39  ;;  %v12764_v38 = vpop.eup %9920  ;;  %9940 = vpow2.f32 %v2897_v13  ;;  %v3427_v33 = vadd.f32 %v3395_v15, %v3363_v11  ;;  %v2807_v60 = vmax.f32 %v16594_v17, %v16593_v5  ;;  %v16595_v16 = vld [vmem:[#allocation156_spill] sm:$0xff]  ;;  %v16596_v24 = vld [vmem:[#allocation213_spill] sm:$0xff]  ;;  %v16597_v17 = vld [vmem:[#allocation214_spill] sm:$0xff] }
 0x36c   : > { %v3364_v7 = vadd.f32 %v3332_v0, %v3300_v30  ;;  %v12768_v34 = vpop.eup %9922  ;;  %v3281_v8 = vadd.f32 %v12756_v57, %v3249_v51  ;;  %9942 = vpow2.f32 %v2993_v54 }
 0x36d   : > { %v2840_v23 = vsub.f32 %v16595_v16, %v2808_v53  ;;  %v2936_v2 = vsub.f32 %v16596_v24, %v2808_v53  ;;  %v12773_v14 = vpop.eup %9924  ;;  %v3220_v26 = vadd.f32 %v12768_v34, %v12764_v38  ;;  %9944 = vpow2.f32 %v3089_v58 }
 0x36e   : > { %v3491_v13 = vadd.f32 %v3459_v62, %v3427_v33  ;;  %v3428_v15 = vadd.f32 %v3396_v59, %v3364_v7  ;;  %v12777_v30 = vpop.eup %9926  ;;  %9946 = vrcp.f32 %v3281_v8  ;;  %v3032_v51 = vsub.f32 %v16597_v17, %v2808_v53  ;;  %v16598_v62 = vld [vmem:[#allocation158_spill] sm:$0xff]  ;;  %v16599_v8 = vld [vmem:[#allocation215_spill] sm:$0xff]  ;;  %v16602_v17 = vld [vmem:[#allocation21_spill] sm:$0xff] }
 0x36f   : > { %v2901_v11 = vmul.f32 1.442695, %v2840_v23  ;;  %v2997_v0 = vmul.f32 1.442695, %v2936_v2  ;;  %v12780_v54 = vpop.eup %9928  ;;  %v3252_v16 = vadd.f32 %v12773_v14, %v3220_v26  ;;  %9948 = vpow2.f32 %v3185_v1  ;;  %v16601_v26 = vld [vmem:[#allocation216_spill] sm:$0xff] }
 0x370   : > { %v3555_v24 = vmul.f32 %v12371_v52, %v3491_v13  ;;  %v3492_v57 = vadd.f32 %v3460_v44, %v3428_v15  ;;  %v12784_v42 = vpop.eup %9930  ;;  %9950 = vpow2.f32 %v2895_v18  ;;  %v3093_v58 = vmul.f32 1.442695, %v3032_v51  ;;  %v16603_v51 = vld [vmem:[#allocation63_spill] sm:$0xff] }
 0x371   : > { %v3128_v59 = vsub.f32 %v16591_v39, %v2808_v53  ;;  %v2839_v33 = vsub.f32 %v16598_v62, %v2807_v60  ;;  %v12788_v23 = vpop.eup %9932  ;;  %v3284_v7 = vadd.f32 %v12780_v54, %v3252_v16  ;;  %9952 = vpow2.f32 %v2991_v32  ;;  %v16604_v16 = vld [vmem:[#allocation185_spill] sm:$0xff] }
 0x372   : > { %9021 = vmatprep.mubr.msk.f32.mxu0 %vm210_vm0, %v3555_v24  ;;  %v3556_v1 = vmul.f32 %v12333_v20, %v3492_v57  ;;  %v2935_v52 = vsub.f32 %v16599_v8, %v2807_v60  ;;  %v12794_v44 = vpop.eup %9934  ;;  %v3219_v18 = vadd.f32 %v12788_v23, %v12784_v42  ;;  %9954 = vpow2.f32 %v3087_v12  ;;  %v16607_v8 = vld [vmem:[#allocation121_spill] sm:$0xff] }
 0x373   : > { %v3189_v53 = vmul.f32 1.442695, %v3128_v59  ;;  %v2899_v39 = vmul.f32 1.442695, %v2839_v33  ;;  %v12798_v2 = vpop.eup %9936  ;;  %9956 = vrcp.f32 %v3284_v7  ;;  %v3031_v13 = vsub.f32 %v16601_v26, %v2807_v60  ;;  %v16605_v7 = vld [vmem:[#allocation64_spill] sm:$0xff]  ;;  %v16609_v26 = vld [vmem:[#allocation186_spill] sm:$0xff] }
 0x374   : > { %16600 = vst [vmem:[#allocation196_spill] sm:$0xff] %v12798_v2  ;;  %9022 = vmatmul.mubr.msk.f32.gmra.mrb[120].mxu0 %vm210_vm0, %v3556_v1  ;;  %v2995_v32 = vmul.f32 1.442695, %v2935_v52  ;;  %v3127_v20 = vsub.f32 %v16593_v5, %v2807_v60  ;;  %v12803_v57 = vpop.eup %9938  ;;  %v3251_v15 = vadd.f32 %v12794_v44, %v3219_v18  ;;  %9958 = vpow2.f32 %v12729_v3 }
 0x375   : > { %v3301_v12 = vmul.f32 %v12310_v10, %v16602_v17  ;;  %v3333_v24 = vmul.f32 %v16604_v16, %v16603_v51  ;;  %v12811_v59 = vpop.eup %9940  ;;  %9960 = vpow2.f32 %v2901_v11  ;;  %v3091_v62 = vmul.f32 1.442695, %v3031_v13  ;;  %v16608_v11 = vld [vmem:[#allocation22_spill] sm:$0xff] }
 0x376   : > { %v3187_v33 = vmul.f32 1.442695, %v3127_v20  ;;  %v3397_v5 = vmul.f32 %v12324_v37, %v16605_v7  ;;  %v12815_v60 = vpop.eup %9942  ;;  %v3283_v1 = vadd.f32 %v12803_v57, %v3251_v15  ;;  %9962 = vpow2.f32 %v2997_v0  ;;  %v16610_v20 = vld [vmem:[#allocation61_spill] sm:$0xff]  ;;  %v16611_v37 = vld [vmem:[#allocation227_spill] sm:$0xff]  ;;  %v16612_v15 = vld [vmem:[#allocation62_spill] sm:$0xff] }
 0x377   : > { %16606 = vst [vmem:[#allocation118_spill] sm:$0xff] %v12815_v60  ;;  %v3365_v3 = vadd.f32 %v3333_v24, %v3301_v12  ;;  %v3461_v10 = vmul.f32 %v12341_v31, %v16607_v8  ;;  %v12820_v52 = vpop.eup %9944  ;;  %v3222_v18 = vadd.f32 %v12815_v60, %v12811_v59  ;;  %9964 = vpow2.f32 %v3093_v58  ;;  %v16613_v12 = vld [vmem:[#allocation134_spill] sm:$0xff]  ;;  %v16614_v31 = vld [vmem:[#allocation119_spill] sm:$0xff]  ;;  %v16615_v24 = vld [vmem:[#allocation184_spill] sm:$0xff] }
 0x378   : > { %v3302_v13 = vmul.f32 %v16609_v26, %v16608_v11  ;;  %v3334_v17 = vmul.f32 %v16611_v37, %v16610_v20  ;;  %v12828_v51 = vpop.eup %9946  ;;  %9966 = vrcp.f32 %v3283_v1  ;;  %v3398_v16 = vmul.f32 %v16613_v12, %v16612_v15  ;;  %v16616_v11 = vld [vmem:[#allocation132_spill] sm:$0xff]  ;;  %v16617_v26 = vld [vmem:[#allocation223_spill] sm:$0xff] }
 0x379   : > { %v3429_v0 = vadd.f32 %v3397_v5, %v3365_v3  ;;  %v3462_v7 = vmul.f32 %v16615_v24, %v16614_v31  ;;  %v12834_v8 = vpop.eup %9948  ;;  %v3254_v58 = vadd.f32 %v12820_v52, %v3222_v18  ;;  %9968 = vpow2.f32 %v3189_v53  ;;  %v16618_v5 = vld [vmem:[#allocation226_spill] sm:$0xff]  ;;  %v16619_v3 = vld [vmem:[#allocation224_spill] sm:$0xff]  ;;  %v16620_v15 = vld [vmem:[#allocation23_spill] sm:$0xff] }
 0x37a   : > { %v3366_v2 = vadd.f32 %v3334_v17, %v3302_v13  ;;  %v2810_v60 = vmax.f32 %v16617_v26, %v16616_v11  ;;  %v12839_v20 = vpop.eup %9950  ;;  %9970 = vpow2.f32 %v2899_v39  ;;  %v2809_v37 = vmax.f32 %v16619_v3, %v16618_v5  ;;  %v16621_v18 = vld [vmem:[#allocation160_spill] sm:$0xff] }
 0x37b   : > { %v3493_v1 = vadd.f32 %v3461_v10, %v3429_v0  ;;  %v3303_v12 = vmul.f32 %v12385_v48, %v16620_v15  ;;  %v12845_v31 = vpop.eup %9952  ;;  %v3286_v24 = vadd.f32 %v12834_v8, %v3254_v58  ;;  %9972 = vpow2.f32 %v2995_v32  ;;  %v16622_v0 = vld [vmem:[#allocation219_spill] sm:$0xff]  ;;  %v16623_v58 = vld [vmem:[#allocation220_spill] sm:$0xff] }
 0x37c   : > { %v3430_v53 = vadd.f32 %v3398_v16, %v3366_v2  ;;  %v2842_v13 = vsub.f32 %v16621_v18, %v2810_v60  ;;  %v12849_v17 = vpop.eup %9954  ;;  %v3221_v39 = vadd.f32 %v12845_v31, %v12839_v20  ;;  %9974 = vpow2.f32 %v3091_v62 }
 0x37d   : > { %v3557_v10 = vmul.f32 %v12442_v46, %v3493_v1  ;;  %v2938_v26 = vsub.f32 %v16622_v0, %v2810_v60  ;;  %v12855_v3 = vpop.eup %9956  ;;  %9976 = vrcp.f32 %v3286_v24  ;;  %v3034_v32 = vsub.f32 %v16623_v58, %v2810_v60 }
 0x37e   : > { %v3494_v48 = vadd.f32 %v3462_v7, %v3430_v53  ;;  %v2905_v15 = vmul.f32 1.442695, %v2842_v13  ;;  %v12858_v2 = vpop.eup %9958  ;;  %v3253_v16 = vadd.f32 %v12849_v17, %v3221_v39  ;;  %9978 = vpow2.f32 %v3187_v33  ;;  %v16624_v7 = vld [vmem:[#allocation162_spill] sm:$0xff]  ;;  %v16625_v33 = vld [vmem:[#allocation221_spill] sm:$0xff] }
 0x37f   : > { %9024 = vmatprep.mubr.msk.f32.mxu0 %vm210_vm0, %v3557_v10  ;;  %v3001_v18 = vmul.f32 1.442695, %v2938_v26  ;;  %v3130_v62 = vsub.f32 %v16616_v11, %v2810_v60  ;;  %v12863_v46 = vpop.eup %9960  ;;  %v3097_v24 = vmul.f32 1.442695, %v3034_v32  ;;  %v2841_v53 = vsub.f32 %v16624_v7, %v2809_v37  ;;  %v16627_v11 = vld [vmem:[#allocation222_spill] sm:$0xff] }
 0x380   : > { %v3558_v1 = vmul.f32 %v12404_v35, %v3494_v48  ;;  %9980 = vpow2.f32 %v2905_v15  ;;  %v12867_v13 = vpop.eup %9962  ;;  %v3285_v0 = vadd.f32 %v12858_v2, %v3253_v16  ;;  %v2937_v58 = vsub.f32 %v16625_v33, %v2809_v37  ;;  %v16628_v16 = vld [vmem:[#allocation67_spill] sm:$0xff] }
 0x381   : > { %9982 = vpow2.f32 %v3001_v18  ;;  %v3193_v39 = vmul.f32 1.442695, %v3130_v62  ;;  %v12871_v10 = vpop.eup %9964  ;;  %v3224_v60 = vadd.f32 %v12867_v13, %v12863_v46  ;;  %v2903_v35 = vmul.f32 1.442695, %v2841_v53 }
 0x382   : > { %16626 = vst [vmem:[#allocation146_spill] sm:$0xff] %v12871_v10  ;;  %9025 = vmatmul.mubr.msk.f32.gmra.mrb[122].mxu0 %vm210_vm0, %v3558_v1  ;;  %9984 = vpow2.f32 %v3097_v24  ;;  %v3033_v26 = vsub.f32 %v16627_v11, %v2809_v37  ;;  %v12877_v48 = vpop.eup %9966  ;;  %v2999_v15 = vmul.f32 1.442695, %v2937_v58  ;;  %v3129_v32 = vsub.f32 %v16618_v5, %v2809_v37  ;;  %v16630_v1 = vld [vmem:[#allocation68_spill] sm:$0xff]  ;;  %v16631_v58 = vld [vmem:[#allocation125_spill] sm:$0xff] }
 0x383   : > { %9986 = vrcp.f32 %v3285_v0  ;;  %v3335_v18 = vmul.f32 %v12392_v22, %v16628_v16  ;;  %v12882_v62 = vpop.eup %9968  ;;  %v3256_v7 = vadd.f32 %v12871_v10, %v3224_v60  ;;  %v3399_v24 = vmul.f32 %v12398_v21, %v16630_v1  ;;  %v16632_v16 = vld [vmem:[#allocation24_spill] sm:$0xff]  ;;  %v16633_v60 = vld [vmem:[#allocation65_spill] sm:$0xff] }
 0x384   : > { %16629 = vst [vmem:[#allocation197_spill] sm:$0xff] %v12882_v62  ;;  %9988 = vpow2.f32 %v3193_v39  ;;  %v3095_v33 = vmul.f32 1.442695, %v3033_v26  ;;  %v12887_v53 = vpop.eup %9970  ;;  %v3191_v11 = vmul.f32 1.442695, %v3129_v32  ;;  %v3463_v5 = vmul.f32 %v12411_v61, %v16631_v58  ;;  %v16634_v26 = vld [vmem:[#allocation136_spill] sm:$0xff] }
 0x385   : > { %9990 = vpow2.f32 %v2903_v35  ;;  %v3367_v0 = vadd.f32 %v3335_v18, %v3303_v12  ;;  %v12891_v37 = vpop.eup %9972  ;;  %v3288_v22 = vadd.f32 %v12882_v62, %v3256_v7  ;;  %v3304_v39 = vmul.f32 %v12347_v36, %v16632_v16  ;;  %v16635_v32 = vld [vmem:[#allocation66_spill] sm:$0xff]  ;;  %v16637_v7 = vld [vmem:[#allocation123_spill] sm:$0xff]  ;;  %v16638_v1 = vld [vmem:[#allocation25_spill] sm:$0xff] }
 0x386   : > { %9992 = vpow2.f32 %v2999_v15  ;;  %v3336_v10 = vmul.f32 %v16634_v26, %v16633_v60  ;;  %v12898_v21 = vpop.eup %9974  ;;  %v3223_v35 = vadd.f32 %v12891_v37, %v12887_v53  ;;  %v3400_v61 = vmul.f32 %v12362_v40, %v16635_v32  ;;  %v16642_v32 = vld [vmem:[#allocation27_spill] sm:$0xff] }
 0x387   : > { %9994 = vpow2.f32 %v3095_v33  ;;  %v3431_v12 = vadd.f32 %v3399_v24, %v3367_v0  ;;  %v12904_v18 = vpop.eup %9976  ;;  %v3464_v36 = vmul.f32 %v12377_v56, %v16637_v7  ;;  %v3305_v58 = vmul.f32 %v12460_v49, %v16638_v1  ;;  %v16639_v24 = vld [vmem:[#allocation71_spill] sm:$0xff] }
 0x388   : > { %16636 = vst [vmem:[#allocation198_spill] sm:$0xff] %v12904_v18  ;;  %9996 = vrcp.f32 %v3288_v22  ;;  %v3368_v15 = vadd.f32 %v3336_v10, %v3304_v39  ;;  %v12910_v16 = vpop.eup %9978  ;;  %v3255_v60 = vadd.f32 %v12898_v21, %v3223_v35  ;;  %v3337_v0 = vmul.f32 %v12467_v41, %v16639_v24  ;;  %v16640_v22 = vld [vmem:[#allocation72_spill] sm:$0xff]  ;;  %v16641_v39 = vld [vmem:[#allocation129_spill] sm:$0xff]  ;;  %v16643_v49 = vld [vmem:[#allocation187_spill] sm:$0xff] }
 0x389   : > { %9998 = vpow2.f32 %v3191_v11  ;;  %v3495_v33 = vadd.f32 %v3463_v5, %v3431_v12  ;;  %v3401_v10 = vmul.f32 %v12475_v9, %v16640_v22  ;;  %v3465_v56 = vmul.f32 %v12490_v45, %v16641_v39  ;;  %v16645_v41 = vld [vmem:[#allocation69_spill] sm:$0xff]  ;;  %v16646_v12 = vld [vmem:[#allocation190_spill] sm:$0xff] }
 0x38a   : > { %v12915_v40 = vpop.eup %9980  ;;  %v3432_v26 = vadd.f32 %v3400_v61, %v3368_v15  ;;  %v3306_v7 = vmul.f32 %v16643_v49, %v16642_v32  ;;  %v3287_v11 = vadd.f32 %v12910_v16, %v3255_v60  ;;  %v3369_v35 = vadd.f32 %v3337_v0, %v3305_v58  ;;  %v16647_v45 = vld [vmem:[#allocation70_spill] sm:$0xff]  ;;  %v16649_v32 = vld [vmem:[#allocation127_spill] sm:$0xff] }
 0x38b   : > { %v12923_v1 = vpop.eup %9982  ;;  %v3559_v5 = vmul.f32 %v12514_v4, %v3495_v33  ;;  %v3338_v24 = vmul.f32 %v16646_v12, %v16645_v41  ;;  %v16648_v22 = vld [vmem:[#allocation10_spill] sm:$0xff]  ;;  %v16653_v41 = vld [vmem:[#allocation75_spill] sm:$0xff] }
 0x38c   : > { %16644 = vst [vmem:[#allocation51_spill] sm:$0xff] %v12923_v1  ;;  %v12929_v61 = vpop.eup %9984  ;;  %v3226_v9 = vadd.f32 %v12923_v1, %v12915_v40  ;;  %v3496_v15 = vadd.f32 %v3464_v36, %v3432_v26  ;;  %v3402_v39 = vmul.f32 %v16648_v22, %v16647_v45  ;;  %v16650_v49 = vld [vmem:[#allocation138_spill] sm:$0xff]  ;;  %10000 = vrcp.f32 %v3287_v11  ;;  %v16655_v22 = vld [vmem:[#allocation76_spill] sm:$0xff] }
 0x38d   : > { %v3466_v18 = vmul.f32 %v16650_v49, %v16649_v32  ;;  %v12937_v62 = vpop.eup %9986  ;;  %9027 = vmatprep.mubr.msk.f32.mxu0 %vm210_vm0, %v3559_v5  ;;  %v3433_v4 = vadd.f32 %v3401_v10, %v3369_v35  ;;  %v3370_v58 = vadd.f32 %v3338_v24, %v3306_v7  ;;  %v16651_v60 = vld [vmem:[#allocation26_spill] sm:$0xff]  ;;  %v3403_v32 = vmul.f32 %v12543_v29, %v16655_v22  ;;  %v16656_v7 = vld [vmem:[#allocation133_spill] sm:$0xff]  ;;  %v16657_v35 = vld [vmem:[#allocation140_spill] sm:$0xff] }
 0x38e   : > { %v3307_v33 = vmul.f32 %v12527_v55, %v16651_v60  ;;  %v12942_v0 = vpop.eup %9988  ;;  %v3258_v36 = vadd.f32 %v12929_v61, %v3226_v9  ;;  %v3560_v26 = vmul.f32 %v12481_v6, %v3496_v15  ;;  %v16654_v12 = vld [vmem:[#allocation106_spill] sm:$0xff]  ;;  %v3467_v24 = vmul.f32 %v16657_v35, %v16656_v7  ;;  %v16658_v55 = vld [vmem:[#allocation29_spill] sm:$0xff]  ;;  %v16659_v49 = vld [vmem:[#allocation188_spill] sm:$0xff] }
 0x38f   : > { %16652 = vst [vmem:[#allocation116_spill] sm:$0xff] %v12942_v0  ;;  %v3339_v45 = vmul.f32 %v16654_v12, %v16653_v41  ;;  %v12950_v11 = vpop.eup %9990  ;;  %v3497_v5 = vadd.f32 %v3465_v56, %v3433_v4  ;;  %v3434_v10 = vadd.f32 %v3402_v39, %v3370_v58  ;;  %v3308_v60 = vmul.f32 %v16659_v49, %v16658_v55  ;;  %v16660_v15 = vld [vmem:[#allocation73_spill] sm:$0xff]  ;;  %v16662_v12 = vld [vmem:[#allocation74_spill] sm:$0xff]  ;;  %v16663_v22 = vld [vmem:[#allocation43_spill] sm:$0xff] }
 0x390   : > { %v12956_v1 = vpop.eup %9992  ;;  %v3290_v6 = vadd.f32 %v12942_v0, %v3258_v36  ;;  %9028 = vmatmul.mubr.msk.f32.gmra.mrb[124].mxu0 %vm210_vm0, %v3560_v26  ;;  %v16661_v41 = vld [vmem:[#allocation189_spill] sm:$0xff]  ;;  %v3404_v56 = vmul.f32 %v16663_v22, %v16662_v12  ;;  %v16664_v35 = vld [vmem:[#allocation131_spill] sm:$0xff]  ;;  %v16665_v55 = vld [vmem:[#allocation44_spill] sm:$0xff] }
 0x391   : > { %v3371_v9 = vadd.f32 %v3339_v45, %v3307_v33  ;;  %v3340_v29 = vmul.f32 %v16661_v41, %v16660_v15  ;;  %v12964_v39 = vpop.eup %9994  ;;  %v3225_v4 = vadd.f32 %v12956_v1, %v12950_v11  ;;  %v3561_v58 = vmul.f32 %v12588_v63, %v3497_v5  ;;  %v16667_v45 = vld [vmem:[#allocation28_spill] sm:$0xff]  ;;  %v16668_v22 = vld [vmem:[#allocation13_spill] sm:$0xff] }
 0x392   : > { %v3498_v7 = vadd.f32 %v3466_v18, %v3434_v10  ;;  %v3468_v36 = vmul.f32 %v16665_v55, %v16664_v35  ;;  %v12971_v49 = vpop.eup %9996  ;;  %10002 = vrcp.f32 %v3290_v6  ;;  %v3309_v15 = vmul.f32 %v12597_v47, %v16667_v45  ;;  %v16669_v18 = vld [vmem:[#allocation79_spill] sm:$0xff]  ;;  %v16670_v10 = vld [vmem:[#allocation80_spill] sm:$0xff] }
 0x393   : > { %16666 = vst [vmem:[#allocation52_spill] sm:$0xff] %v12971_v49  ;;  %v3435_v33 = vadd.f32 %v3403_v32, %v3371_v9  ;;  %v3372_v26 = vadd.f32 %v3340_v29, %v3308_v60  ;;  %v12975_v41 = vpop.eup %9998  ;;  %v3257_v12 = vadd.f32 %v12964_v39, %v3225_v4  ;;  %9030 = vmatprep.mubr.msk.f32.mxu0 %vm210_vm0, %v3561_v58  ;;  %v16671_v60 = vld [vmem:[#allocation137_spill] sm:$0xff]  ;;  %v16672_v9 = vld [vmem:[#allocation47_spill] sm:$0xff] }
 0x394   : > { %v3562_v63 = vmul.f32 %v16668_v22, %v3498_v7  ;;  %v3341_v5 = vmul.f32 %v12604_v28, %v16669_v18  ;;  %v3405_v35 = vmul.f32 %v12611_v50, %v16670_v10  ;;  %v3469_v29 = vmul.f32 %v16672_v9, %v16671_v60  ;;  %v16673_v47 = vld [vmem:[#allocation31_spill] sm:$0xff]  ;;  %v16675_v7 = vld [vmem:[#allocation77_spill] sm:$0xff]  ;;  %v16676_v22 = vld [vmem:[#allocation192_spill] sm:$0xff] }
 0x395   : > { %v3499_v6 = vadd.f32 %v3467_v24, %v3435_v33  ;;  %v3436_v32 = vadd.f32 %v3404_v56, %v3372_v26  ;;  %v16674_v55 = vld [vmem:[#allocation191_spill] sm:$0xff]  ;;  %v3289_v4 = vadd.f32 %v12975_v41, %v3257_v12  ;;  %v3342_v49 = vmul.f32 %v16676_v22, %v16675_v7  ;;  %v16677_v28 = vld [vmem:[#allocation78_spill] sm:$0xff]  ;;  %v16681_v26 = vld [vmem:[#allocation193_spill] sm:$0xff] }
 0x396   : > { %v3310_v45 = vmul.f32 %v16674_v55, %v16673_v47  ;;  %9031 = vmatmul.mubr.msk.f32.gmra.mrb[126].mxu0 %vm210_vm0, %v3562_v63  ;;  %v3373_v58 = vadd.f32 %v3341_v5, %v3309_v15  ;;  %v16678_v18 = vld [vmem:[#allocation142_spill] sm:$0xff]  ;;  %v16680_v33 = vld [vmem:[#allocation135_spill] sm:$0xff]  ;;  %v12999_v47 = vpop.eup %10000  ;;  %v16684_v5 = vld [vmem:[#allocation45_spill] sm:$0xff] }
 0x397   : > { %v3406_v0 = vmul.f32 %v16678_v18, %v16677_v28  ;;  %v16679_v50 = vld [vmem:[#allocation6_spill] sm:$0xff]  ;;  %v3500_v56 = vadd.f32 %v3468_v36, %v3436_v32  ;;  %v3470_v10 = vmul.f32 %v16681_v26, %v16680_v33  ;;  %10004 = vrcp.f32 %v3289_v4  ;;  %v16683_v63 = vld [vmem:[#allocation83_spill] sm:$0xff]  ;;  %v16687_v32 = vld [vmem:[#allocation141_spill] sm:$0xff] }
 0x398   : > { %v3563_v24 = vmul.f32 %v16679_v50, %v3499_v6  ;;  %v16682_v60 = vld [vmem:[#allocation30_spill] sm:$0xff]  ;;  %v3437_v12 = vadd.f32 %v3405_v35, %v3373_v58  ;;  %v3374_v15 = vadd.f32 %v3342_v49, %v3310_v45  ;;  %v3343_v55 = vmul.f32 %v16684_v5, %v16683_v63  ;;  %v16686_v6 = vld [vmem:[#allocation84_spill] sm:$0xff]  ;;  %v16688_v18 = vld [vmem:[#allocation33_spill] sm:$0xff] }
 0x399   : > { %v3311_v9 = vmul.f32 %v12672_v19, %v16682_v60  ;;  %v16685_v7 = vld [vmem:[#allocation194_spill] sm:$0xff]  ;;  %v3407_v36 = vmul.f32 %v12685_v43, %v16686_v6  ;;  %v3471_v28 = vmul.f32 %v12695_v25, %v16687_v32  ;;  %v16689_v19 = vld [vmem:[#allocation5_spill] sm:$0xff]  ;;  %v16691_v45 = vld [vmem:[#allocation48_spill] sm:$0xff] }
 0x39a   : > { %9033 = vmatprep.mubr.msk.f32.mxu0 %vm210_vm0, %v3563_v24  ;;  %v3564_v22 = vmul.f32 %v16685_v7, %v3500_v56  ;;  %v3312_v50 = vmul.f32 %v16689_v19, %v16688_v18  ;;  %v3501_v33 = vadd.f32 %v3469_v29, %v3437_v12  ;;  %v3438_v4 = vadd.f32 %v3406_v0, %v3374_v15  ;;  %v16690_v49 = vld [vmem:[#allocation81_spill] sm:$0xff]  ;;  %v16692_v24 = vld [vmem:[#allocation82_spill] sm:$0xff]  ;;  %v16693_v26 = vld [vmem:[#allocation108_spill] sm:$0xff] }
 0x39b   : > { %v3375_v35 = vadd.f32 %v3343_v55, %v3311_v9  ;;  %v3344_v58 = vmul.f32 %v16691_v45, %v16690_v49  ;;  %v3408_v56 = vmul.f32 %v16693_v26, %v16692_v24  ;;  %v16694_v60 = vld [vmem:[#allocation139_spill] sm:$0xff]  ;;  %v16695_v63 = vld [vmem:[#allocation14_spill] sm:$0xff]  ;;  %v16696_v5 = vld [vmem:[#allocation32_spill] sm:$0xff] }
 0x39c   : > { %9034 = vmatmul.mubr.msk.f32.gmra.mrb[128].mxu0 %vm210_vm0, %v3564_v22  ;;  %v3472_v43 = vmul.f32 %v16695_v63, %v16694_v60  ;;  %v3313_v25 = vmul.f32 %v12726_v27, %v16696_v5  ;;  %v16697_v7 = vld [vmem:[#allocation87_spill] sm:$0xff]  ;;  %v3502_v9 = vadd.f32 %v3470_v10, %v3438_v4  ;;  %v13023_v55 = vpop.eup %10002  ;;  %v16700_v18 = vld [vmem:[#allocation88_spill] sm:$0xff]  ;;  %v16701_v19 = vld [vmem:[#allocation166_spill] sm:$0xff] }
 0x39d   : > { %v16698_v6 = vld [vmem:[#allocation15_spill] sm:$0xff]  ;;  %v3439_v12 = vadd.f32 %v3407_v36, %v3375_v35  ;;  %v3376_v15 = vadd.f32 %v3344_v58, %v3312_v50  ;;  %v3409_v49 = vmul.f32 %v16701_v19, %v16700_v18  ;;  %v16702_v45 = vld [vmem:[#allocation145_spill] sm:$0xff]  ;;  %v16706_v5 = vld [vmem:[#allocation46_spill] sm:$0xff] }
 0x39e   : > { %v3345_v32 = vmul.f32 %v16698_v6, %v16697_v7  ;;  %v16699_v29 = vld [vmem:[#allocation199_spill] sm:$0xff]  ;;  %v16705_v63 = vld [vmem:[#allocation105_spill] sm:$0xff]  ;;  %v3566_v7 = vmul.f32 %v16706_v5, %v3502_v9  ;;  %v16709_v58 = vld [vmem:[#allocation86_spill] sm:$0xff] }
 0x39f   : > { %v3565_v0 = vmul.f32 %v16699_v29, %v3501_v33  ;;  %v16703_v24 = vld [vmem:[#allocation195_spill] sm:$0xff]  ;;  %v3503_v33 = vadd.f32 %v3471_v28, %v3439_v12  ;;  %v3440_v10 = vadd.f32 %v3408_v56, %v3376_v15  ;;  %v16707_v36 = vld [vmem:[#allocation85_spill] sm:$0xff]  ;;  %v16712_v29 = vld [vmem:[#allocation200_spill] sm:$0xff] }
 0x3a0   : > { %v3377_v22 = vadd.f32 %v3345_v32, %v3313_v25  ;;  %v3473_v26 = vmul.f32 %v16703_v24, %v16702_v45  ;;  %v16704_v60 = vld [vmem:[#allocation35_spill] sm:$0xff]  ;;  %v16710_v25 = vld [vmem:[#allocation112_spill] sm:$0xff]  ;;  %v16713_v19 = vld [vmem:[#allocation34_spill] sm:$0xff] }
 0x3a1   : > { %v3314_v27 = vmul.f32 %v16705_v63, %v16704_v60  ;;  %9036 = vmatprep.mubr.msk.f32.mxu0 %vm210_vm0, %v3565_v0  ;;  %v16708_v50 = vld [vmem:[#allocation107_spill] sm:$0xff]  ;;  %v3410_v6 = vmul.f32 %v16710_v25, %v16709_v58  ;;  %v3315_v45 = vmul.f32 %v12784_v42, %v16713_v19  ;;  %v3567_v0 = vmul.f32 %v12777_v30, %v3503_v33  ;;  %v16716_v24 = vld [vmem:[#allocation149_spill] sm:$0xff]  ;;  %v13051_v42 = vpop.eup %10004  ;;  %v16718_v30 = vld [vmem:[#allocation144_spill] sm:$0xff] }
 0x3a2   : > { %v3346_v4 = vmul.f32 %v16708_v50, %v16707_v36  ;;  %v3441_v35 = vadd.f32 %v3409_v49, %v3377_v22  ;;  %v16711_v32 = vld [vmem:[#allocation143_spill] sm:$0xff]  ;;  %9037 = vmatmul.mubr.msk.f32.gmra.mrb[130].mxu0 %vm210_vm0, %v3566_v7  ;;  %v3504_v9 = vadd.f32 %v3472_v43, %v3440_v10  ;;  %v16715_v22 = vld [vmem:[#allocation92_spill] sm:$0xff]  ;;  %v3475_v60 = vmul.f32 %v12803_v57, %v16716_v24  ;;  %v16717_v63 = vld [vmem:[#allocation37_spill] sm:$0xff] }
 0x3a3   : > { %v3474_v18 = vmul.f32 %v16712_v29, %v16711_v32  ;;  %v16714_v56 = vld [vmem:[#allocation91_spill] sm:$0xff]  ;;  %v3411_v49 = vmul.f32 %v12794_v44, %v16715_v22  ;;  %v3316_v5 = vmul.f32 %v12764_v38, %v16717_v63  ;;  %9039 = vmatprep.mubr.msk.f32.mxu0 %vm210_vm0, %v3567_v0  ;;  %v16719_v33 = vld [vmem:[#allocation89_spill] sm:$0xff]  ;;  %v16720_v44 = vld [vmem:[#allocation90_spill] sm:$0xff] }
 0x3a4   : > { %v3378_v28 = vadd.f32 %v3346_v4, %v3314_v27  ;;  %v3347_v12 = vmul.f32 %v12788_v23, %v16714_v56  ;;  %v3505_v15 = vadd.f32 %v3473_v26, %v3441_v35  ;;  %v3568_v43 = vmul.f32 %v16718_v30, %v3504_v9  ;;  %v16721_v57 = vld [vmem:[#allocation147_spill] sm:$0xff]  ;;  %v16722_v38 = vld [vmem:[#allocation36_spill] sm:$0xff]  ;;  %v16728_v19 = vld [vmem:[#allocation118_spill] sm:$0xff] }
 0x3a5   : > { %v3348_v23 = vmul.f32 %v12768_v34, %v16719_v33  ;;  %v3412_v10 = vmul.f32 %v12773_v14, %v16720_v44  ;;  %v3476_v36 = vmul.f32 %v12780_v54, %v16721_v57  ;;  %v3317_v50 = vmul.f32 %v12839_v20, %v16722_v38  ;;  %v16723_v25 = vld [vmem:[#allocation95_spill] sm:$0xff]  ;;  %v16724_v34 = vld [vmem:[#allocation96_spill] sm:$0xff]  ;;  %v16725_v14 = vld [vmem:[#allocation153_spill] sm:$0xff] }
 0x3a6   : > { %v3442_v27 = vadd.f32 %v3410_v6, %v3378_v28  ;;  %v3379_v7 = vadd.f32 %v3347_v12, %v3315_v45  ;;  %v3569_v26 = vmul.f32 %v12828_v51, %v3505_v15  ;;  %9040 = vmatmul.mubr.msk.f32.gmra.mrb[132].mxu0 %vm210_vm0, %v3568_v43  ;;  %v3349_v6 = vmul.f32 %v12845_v31, %v16723_v25  ;;  %v16726_v54 = vld [vmem:[#allocation39_spill] sm:$0xff]  ;;  %v16727_v20 = vld [vmem:[#allocation93_spill] sm:$0xff]  ;;  %v16730_v12 = vld [vmem:[#allocation94_spill] sm:$0xff] }
 0x3a7   : > { %v3380_v58 = vadd.f32 %v3348_v23, %v3316_v5  ;;  %v3413_v51 = vmul.f32 %v12849_v17, %v16724_v34  ;;  %v3477_v32 = vmul.f32 %v12858_v2, %v16725_v14  ;;  %v3318_v29 = vmul.f32 %v12811_v59, %v16726_v54  ;;  %v16731_v22 = vld [vmem:[#allocation151_spill] sm:$0xff]  ;;  %v16734_v43 = vld [vmem:[#allocation100_spill] sm:$0xff]  ;;  %v16739_v57 = vld [vmem:[#allocation146_spill] sm:$0xff] }
 0x3a8   : > { %v3506_v4 = vadd.f32 %v3474_v18, %v3442_v27  ;;  %v3443_v35 = vadd.f32 %v3411_v49, %v3379_v7  ;;  %9042 = vmatprep.mubr.msk.f32.mxu0 %vm210_vm0, %v3569_v26  ;;  %v3350_v45 = vmul.f32 %v16728_v19, %v16727_v20  ;;  %v16729_v18 = vld [vmem:[#allocation196_spill] sm:$0xff]  ;;  %v3381_v56 = vadd.f32 %v3349_v6, %v3317_v50  ;;  %v16732_v49 = vld [vmem:[#allocation38_spill] sm:$0xff]  ;;  %v16733_v5 = vld [vmem:[#allocation99_spill] sm:$0xff] }
 0x3a9   : > { %v3444_v28 = vadd.f32 %v3412_v10, %v3380_v58  ;;  %v3414_v15 = vmul.f32 %v12820_v52, %v16730_v12  ;;  %v3478_v17 = vmul.f32 %v12834_v8, %v16731_v22  ;;  %v3319_v2 = vmul.f32 %v12887_v53, %v16732_v49  ;;  %v16735_v52 = vld [vmem:[#allocation157_spill] sm:$0xff]  ;;  %v16738_v10 = vld [vmem:[#allocation98_spill] sm:$0xff]  ;;  %v16743_v58 = vld [vmem:[#allocation103_spill] sm:$0xff] }
 0x3aa   : > { %v3570_v0 = vmul.f32 %v16729_v18, %v3506_v4  ;;  %v3507_v9 = vadd.f32 %v3475_v60, %v3443_v35  ;;  %v3382_v31 = vadd.f32 %v3350_v45, %v3318_v29  ;;  %v3445_v63 = vadd.f32 %v3413_v51, %v3381_v56  ;;  %v16736_v8 = vld [vmem:[#allocation41_spill] sm:$0xff]  ;;  %v16745_v34 = vld [vmem:[#allocation104_spill] sm:$0xff]  ;;  %v16747_v54 = vld [vmem:[#allocation42_spill] sm:$0xff] }
 0x3ab   : > { %v3508_v24 = vadd.f32 %v3476_v36, %v3444_v28  ;;  %v3351_v60 = vmul.f32 %v12891_v37, %v16733_v5  ;;  %v3415_v27 = vmul.f32 %v12898_v21, %v16734_v43  ;;  %v3479_v7 = vmul.f32 %v12910_v16, %v16735_v52  ;;  %v16737_v26 = vld [vmem:[#allocation97_spill] sm:$0xff]  ;;  %v16740_v21 = vld [vmem:[#allocation155_spill] sm:$0xff]  ;;  %v16742_v16 = vld [vmem:[#allocation40_spill] sm:$0xff] }
 0x3ac   : > { %9043 = vmatmul.mubr.msk.f32.gmra.mrb[134].mxu0 %vm210_vm0, %v3570_v0  ;;  %v3571_v59 = vmul.f32 %v12877_v48, %v3507_v9  ;;  %v3446_v30 = vadd.f32 %v3414_v15, %v3382_v31  ;;  %v3320_v33 = vmul.f32 %v12863_v46, %v16736_v8  ;;  %v3509_v48 = vadd.f32 %v3477_v32, %v3445_v63  ;;  %v16741_v38 = vld [vmem:[#allocation197_spill] sm:$0xff]  ;;  %v16749_v45 = vld [vmem:[#allocation51_spill] sm:$0xff]  ;;  %v16752_v28 = vld [vmem:[#allocation116_spill] sm:$0xff] }
 0x3ad   : > { %v3572_v53 = vmul.f32 %v12855_v3, %v3508_v24  ;;  %v3383_v23 = vadd.f32 %v3351_v60, %v3319_v2  ;;  %v3352_v44 = vmul.f32 %v12867_v13, %v16737_v26  ;;  %v3416_v36 = vmul.f32 %v16739_v57, %v16738_v10  ;;  %v16744_v13 = vld [vmem:[#allocation198_spill] sm:$0xff]  ;;  %v16746_v14 = vld [vmem:[#allocation161_spill] sm:$0xff]  ;;  %v16751_v9 = vld [vmem:[#allocation159_spill] sm:$0xff] }
 0x3ae   : > { %9045 = vmatprep.mubr.msk.f32.mxu0 %vm210_vm0, %v3571_v59  ;;  %v3510_v37 = vadd.f32 %v3478_v17, %v3446_v30  ;;  %v3480_v50 = vmul.f32 %v16741_v38, %v16740_v21  ;;  %v3321_v4 = vmul.f32 %v12950_v11, %v16742_v16  ;;  %v3573_v46 = vmul.f32 %v12937_v62, %v3509_v48  ;;  %v16748_v19 = vld [vmem:[#allocation101_spill] sm:$0xff]  ;;  %v16753_v12 = vld [vmem:[#allocation52_spill] sm:$0xff] }
 0x3af   : > { %v3447_v3 = vadd.f32 %v3415_v27, %v3383_v23  ;;  %v3384_v35 = vadd.f32 %v3352_v44, %v3320_v33  ;;  %v3353_v25 = vmul.f32 %v12956_v1, %v16743_v58  ;;  %v3417_v51 = vmul.f32 %v12964_v39, %v16745_v34  ;;  %v16750_v1 = vld [vmem:[#allocation102_spill] sm:$0xff]  ;;  %v10326_v24 = vld [vmem:[%s15613_s1 + $0x60] sm:$0xff]  ;;  %v16757_v43 = vld [vmem:[#allocation8_spill] sm:$0xff] }
 0x3b0   : > { %9046 = vmatmul.mubr.msk.f32.gmra.mrb[136].mxu0 %vm210_vm0, %v3572_v53  ;;  %v3574_v6 = vmul.f32 %v16744_v13, %v3510_v37  ;;  %v3481_v32 = vmul.f32 %v12975_v41, %v16746_v14  ;;  %v3322_v11 = vmul.f32 %v12915_v40, %v16747_v54  ;;  %v3354_v18 = vmul.f32 %v16749_v45, %v16748_v19  ;;  %v16758_v27 = vld [vmem:[#allocation11_spill] sm:$0xff]  ;;  %v16759_v52 = vld [vmem:[#allocation12_spill] sm:$0xff] }
 0x3b1   : > { %9048 = vmatprep.mubr.msk.f32.mxu0 %vm210_vm0, %v3573_v46  ;;  %v3511_v29 = vadd.f32 %v3479_v7, %v3447_v3  ;;  %v3448_v62 = vadd.f32 %v3416_v36, %v3384_v35  ;;  %v3385_v20 = vadd.f32 %v3353_v25, %v3321_v4  ;;  %v3418_v0 = vmul.f32 %v12929_v61, %v16750_v1 }
 0x3b2   : > { %v3482_v39 = vmul.f32 %v16752_v28, %v16751_v9  ;;  %v3386_v31 = vadd.f32 %v3354_v18, %v3322_v11 }
 0x3b3   : > { %v3575_v41 = vmul.f32 %v12999_v47, %v3511_v29  ;;  %v3512_v56 = vadd.f32 %v3480_v50, %v3448_v62  ;;  %v3449_v40 = vadd.f32 %v3417_v51, %v3385_v20  ;;  %v16754_v47 = vld [vmem:[#allocation9_spill] sm:$0xff] }
 0x3b4   : > { %9049 = vmatmul.mubr.msk.f32.gmra.mrb[138].mxu0 %vm210_vm0, %v3574_v6  ;;  %v3450_v17 = vadd.f32 %v3418_v0, %v3386_v31  ;;  %v3581_v59 = vsub.s32 1, %v16754_v47 }
 0x3b5   : > { %9051 = vmatprep.mubr.msk.f32.mxu0 %vm210_vm0, %v3575_v41  ;;  %v3576_v15 = vmul.f32 %v16753_v12, %v3512_v56  ;;  %v3513_v22 = vadd.f32 %v3481_v32, %v3449_v40 }
 0x3b6   : > { %v3514_v49 = vadd.f32 %v3482_v39, %v3450_v17  ;;  %v13134_v63 = vrot.slane %v10326_v24, %v3581_v59 }
 0x3b7   : > { %v3577_v61 = vmul.f32 %v13051_v42, %v3513_v22 }
 0x3b8   : > { %9052 = vmatmul.mubr.msk.f32.gmra.mrb[140].mxu0 %vm210_vm0, %v3576_v15  ;;  %v3578_v2 = vmul.f32 %v13023_v55, %v3514_v49  ;;  %v16756_v55 = vld [vmem:[#allocation7_spill] sm:$0xff] }
 0x3b9   : > { %9054 = vmatprep.mubr.msk.f32.mxu0 %vm210_vm0, %v3577_v61 }
 0x3bc   : > { %9055 = vmatmul.mubr.msk.f32.gmra.mrb[142].mxu0 %vm210_vm0, %v3578_v2 }
 0x40c   : > { %v9011_v5 = vpop.f32.mrb[112].mxu0 }
 0x40d   : > { %v3745_v60 = vpop.f32.mrb[113].mxu0  ;;  %v13140_v42 = vadd.f32 %v9011_v5, %v13134_v63 }
 0x40e   : > { %v13137_v30 = vadd.f32 %v3745_v60, %v13134_v63 }
 0x410   : > { %16755 = vst [vmem:[#allocation167_spill] sm:$0xff] %v13137_v30  ;;  %9065 = vmatprep.mubr.msk.f32.mxu1 %vm210_vm0, %v13137_v30  ;;  %9121 = vmatprep.mubr.msk.f32.mxu0 %vm210_vm0, %v13137_v30 }
 0x411   : > { %9066 = vmatmul.mubr.msk.f32.vlgmr.msra.gmra.mrb[144].mxu1 %vm210_vm0, %v13140_v42  ;;  %9122 = vmatmul.mubr.msk.f32.vlgmr.msra.gmra.mrb[144].mxu0 %vm210_vm0, %v13140_v42 }
 0x412   : > { %9596 = vmatpush3.bf16.msra.mxu1 %v16756_v55  ;;  %9604 = vmatpush3.bf16.msra.mxu0 %v16757_v43 }
 0x413   : > { %9598 = vmatprep.subr.bf16.mxu1 %v16758_v27  ;;  %9606 = vmatprep.subr.bf16.mxu0 %v16759_v52 }
 0x416   : > { %9600 = vmatpush3.bf16.msra.mxu1 %v16758_v27  ;;  %9608 = vmatpush3.bf16.msra.mxu0 %v16759_v52 }
 0x417   : > { %9610 = vmatprep.subr.bf16.mxu1 %v16757_v43  ;;  %9618 = vmatprep.subr.bf16.mxu0 %v16757_v43 }
 0x419   : > { %v9014_v7 = vpop.f32.mrb[114].mxu0 }
 0x41a   : > { %v3755_v8 = vpop.f32.mrb[115].mxu0  ;;  %v13162_v53 = vadd.f32 %v9014_v7, %v13134_v63 }
 0x41b   : > { %v13159_v33 = vadd.f32 %v3755_v8, %v13134_v63 }
 0x41c   : > { %16761 = vst [vmem:[#allocation168_spill] sm:$0xff] %v13162_v53 }
 0x41d   : > { %16760 = vst [vmem:[#allocation110_spill] sm:$0xff] %v13159_v33  ;;  %9068 = vmatprep.mubr.msk.f32.mxu1 %vm210_vm0, %v13159_v33  ;;  %9124 = vmatprep.mubr.msk.f32.mxu0 %vm210_vm0, %v13159_v33 }
 0x41e   : > { %9069 = vmatmul.mubr.msk.f32.gmra.mrb[146].mxu1 %vm210_vm0, %v13162_v53  ;;  %9125 = vmatmul.mubr.msk.f32.gmra.mrb[146].mxu0 %vm210_vm0, %v13162_v53 }
 0x429   : > { %v9017_v48 = vpop.f32.mrb[116].mxu0 }
 0x42a   : > { %v3765_v23 = vpop.f32.mrb[117].mxu0  ;;  %v13176_v44 = vadd.f32 %v9017_v48, %v13134_v63  ;;  %v4675_v48 = vmul.f32 %v13137_v30, %v13137_v30 }
 0x42b   : > { %v13173_v26 = vadd.f32 %v3765_v23, %v13134_v63  ;;  %v4677_v23 = vmul.f32 %v13159_v33, %v13159_v33 }
 0x42c   : > { %16763 = vst [vmem:[#allocation163_spill] sm:$0xff] %v13176_v44 }
 0x42d   : > { %16762 = vst [vmem:[#allocation16_spill] sm:$0xff] %v13173_v26  ;;  %9071 = vmatprep.mubr.msk.f32.mxu1 %vm210_vm0, %v13173_v26  ;;  %9127 = vmatprep.mubr.msk.f32.mxu0 %vm210_vm0, %v13173_v26 }
 0x42e   : > { %9072 = vmatmul.mubr.msk.f32.gmra.mrb[148].mxu1 %vm210_vm0, %v13176_v44  ;;  %9128 = vmatmul.mubr.msk.f32.gmra.mrb[148].mxu0 %vm210_vm0, %v13176_v44 }
 0x437   : > { %v9020_v37 = vpop.f32.mrb[118].mxu0 }
 0x438   : > { %v3775_v10 = vpop.f32.mrb[119].mxu0  ;;  %v13190_v36 = vadd.f32 %v9020_v37, %v13134_v63  ;;  %v4678_v37 = vmul.f32 %v13162_v53, %v13162_v53 }
 0x439   : > { %v13187_v57 = vadd.f32 %v3775_v10, %v13134_v63  ;;  %v4679_v10 = vmul.f32 %v13173_v26, %v13173_v26 }
 0x43a   : > { %16765 = vst [vmem:[#allocation164_spill] sm:$0xff] %v13190_v36 }
 0x43b   : > { %16764 = vst [vmem:[#allocation49_spill] sm:$0xff] %v13187_v57  ;;  %9074 = vmatprep.mubr.msk.f32.mxu1 %vm210_vm0, %v13187_v57  ;;  %9130 = vmatprep.mubr.msk.f32.mxu0 %vm210_vm0, %v13187_v57 }
 0x43c   : > { %9075 = vmatmul.mubr.msk.f32.gmra.mrb[150].mxu1 %vm210_vm0, %v13190_v36  ;;  %9131 = vmatmul.mubr.msk.f32.gmra.mrb[150].mxu0 %vm210_vm0, %v13190_v36 }
 0x447   : > { %v9023_v21 = vpop.f32.mrb[120].mxu0 }
 0x448   : > { %v3785_v38 = vpop.f32.mrb[121].mxu0  ;;  %v13204_v16 = vadd.f32 %v9023_v21, %v13134_v63  ;;  %v4680_v21 = vmul.f32 %v13176_v44, %v13176_v44 }
 0x449   : > { %v13201_v50 = vadd.f32 %v3785_v38, %v13134_v63  ;;  %v4681_v38 = vmul.f32 %v13187_v57, %v13187_v57 }
 0x44a   : > { %16767 = vst [vmem:[#allocation114_spill] sm:$0xff] %v13204_v16 }
 0x44b   : > { %16766 = vst [vmem:[#allocation50_spill] sm:$0xff] %v13201_v50  ;;  %9077 = vmatprep.mubr.msk.f32.mxu1 %vm210_vm0, %v13201_v50  ;;  %9133 = vmatprep.mubr.msk.f32.mxu0 %vm210_vm0, %v13201_v50 }
 0x44c   : > { %9078 = vmatmul.mubr.msk.f32.gmra.mrb[152].mxu1 %vm210_vm0, %v13204_v16  ;;  %9134 = vmatmul.mubr.msk.f32.gmra.mrb[152].mxu0 %vm210_vm0, %v13204_v16 }
 0x455   : > { %v9026_v4 = vpop.f32.mrb[122].mxu0 }
 0x456   : > { %v3795_v46 = vpop.f32.mrb[123].mxu0  ;;  %v13218_v35 = vadd.f32 %v9026_v4, %v13134_v63  ;;  %v4682_v4 = vmul.f32 %v13190_v36, %v13190_v36 }
 0x457   : > { %v13215_v3 = vadd.f32 %v3795_v46, %v13134_v63  ;;  %v4683_v46 = vmul.f32 %v13201_v50, %v13201_v50 }
 0x458   : > { %16769 = vst [vmem:[#allocation165_spill] sm:$0xff] %v13218_v35 }
 0x459   : > { %16768 = vst [vmem:[#allocation109_spill] sm:$0xff] %v13215_v3  ;;  %9080 = vmatprep.mubr.msk.f32.mxu1 %vm210_vm0, %v13215_v3  ;;  %9136 = vmatprep.mubr.msk.f32.mxu0 %vm210_vm0, %v13215_v3 }
 0x45a   : > { %9081 = vmatmul.mubr.msk.f32.gmra.mrb[154].mxu1 %vm210_vm0, %v13218_v35  ;;  %9137 = vmatmul.mubr.msk.f32.gmra.mrb[154].mxu0 %vm210_vm0, %v13218_v35 }
 0x463   : > { %v9029_v58 = vpop.f32.mrb[124].mxu0 }
 0x464   : > { %v3805_v25 = vpop.f32.mrb[125].mxu0  ;;  %v13232_v6 = vadd.f32 %v9029_v58, %v13134_v63  ;;  %v4684_v58 = vmul.f32 %v13204_v16, %v13204_v16 }
 0x465   : > { %v13229_v13 = vadd.f32 %v3805_v25, %v13134_v63  ;;  %v4685_v25 = vmul.f32 %v13215_v3, %v13215_v3 }
 0x466   : > { %16771 = vst [vmem:[#allocation122_spill] sm:$0xff] %v13232_v6 }
 0x467   : > { %16770 = vst [vmem:[#allocation205_spill] sm:$0xff] %v13229_v13  ;;  %9083 = vmatprep.mubr.msk.f32.mxu1 %vm210_vm0, %v13229_v13  ;;  %9139 = vmatprep.mubr.msk.f32.mxu0 %vm210_vm0, %v13229_v13 }
 0x468   : > { %9084 = vmatmul.mubr.msk.f32.gmra.mrb[156].mxu1 %vm210_vm0, %v13232_v6  ;;  %9140 = vmatmul.mubr.msk.f32.gmra.mrb[156].mxu0 %vm210_vm0, %v13232_v6 }
 0x469   : > { %v9032_v34 = vpop.f32.mrb[126].mxu0 }
 0x46a   : > { %v3815_v51 = vpop.f32.mrb[127].mxu0  ;;  %v13246_v32 = vadd.f32 %v9032_v34, %v13134_v63  ;;  %v4686_v34 = vmul.f32 %v13218_v35, %v13218_v35 }
 0x46b   : > { %v13243_v14 = vadd.f32 %v3815_v51, %v13134_v63  ;;  %v4687_v51 = vmul.f32 %v13229_v13, %v13229_v13 }
 0x46c   : > { %16773 = vst [vmem:[#allocation148_spill] sm:$0xff] %v13246_v32 }
 0x46d   : > { %16772 = vst [vmem:[#allocation206_spill] sm:$0xff] %v13243_v14  ;;  %9086 = vmatprep.mubr.msk.f32.mxu1 %vm210_vm0, %v13243_v14  ;;  %9142 = vmatprep.mubr.msk.f32.mxu0 %vm210_vm0, %v13243_v14 }
 0x46e   : > { %9087 = vmatmul.mubr.msk.f32.gmra.mrb[158].mxu1 %vm210_vm0, %v13246_v32  ;;  %9143 = vmatmul.mubr.msk.f32.gmra.mrb[158].mxu0 %vm210_vm0, %v13246_v32 }
 0x46f   : > { %v9035_v54 = vpop.f32.mrb[128].mxu0 }
 0x470   : > { %v3825_v11 = vpop.f32.mrb[129].mxu0  ;;  %v13260_v62 = vadd.f32 %v9035_v54, %v13134_v63  ;;  %v4688_v54 = vmul.f32 %v13232_v6, %v13232_v6 }
 0x471   : > { %v13257_v29 = vadd.f32 %v3825_v11, %v13134_v63  ;;  %v4689_v11 = vmul.f32 %v13243_v14, %v13243_v14 }
 0x472   : > { %16775 = vst [vmem:[#allocation202_spill] sm:$0xff] %v13260_v62 }
 0x473   : > { %16774 = vst [vmem:[#allocation201_spill] sm:$0xff] %v13257_v29  ;;  %9089 = vmatprep.mubr.msk.f32.mxu1 %vm210_vm0, %v13257_v29  ;;  %9145 = vmatprep.mubr.msk.f32.mxu0 %vm210_vm0, %v13257_v29 }
 0x474   : > { %9090 = vmatmul.mubr.msk.f32.gmra.mrb[160].mxu1 %vm210_vm0, %v13260_v62  ;;  %9146 = vmatmul.mubr.msk.f32.gmra.mrb[160].mxu0 %vm210_vm0, %v13260_v62 }
 0x475   : > { %v9038_v20 = vpop.f32.mrb[130].mxu0 }
 0x476   : > { %v3835_v19 = vpop.f32.mrb[131].mxu0  ;;  %v13274_v18 = vadd.f32 %v9038_v20, %v13134_v63  ;;  %v4690_v20 = vmul.f32 %v13246_v32, %v13246_v32 }
 0x477   : > { %v13271_v45 = vadd.f32 %v3835_v19, %v13134_v63  ;;  %v4691_v19 = vmul.f32 %v13257_v29, %v13257_v29 }
 0x478   : > { %16777 = vst [vmem:[#allocation150_spill] sm:$0xff] %v13274_v18 }
 0x479   : > { %16776 = vst [vmem:[#allocation173_spill] sm:$0xff] %v13271_v45  ;;  %v9041_v1 = vpop.f32.mrb[132].mxu0  ;;  %9092 = vmatprep.mubr.msk.f32.mxu1 %vm210_vm0, %v13271_v45  ;;  %9148 = vmatprep.mubr.msk.f32.mxu0 %vm210_vm0, %v13271_v45 }
 0x47a   : > { %v3845_v0 = vpop.f32.mrb[133].mxu0  ;;  %9093 = vmatmul.mubr.msk.f32.gmra.mrb[162].mxu1 %vm210_vm0, %v13274_v18  ;;  %9149 = vmatmul.mubr.msk.f32.gmra.mrb[162].mxu0 %vm210_vm0, %v13274_v18  ;;  %v13288_v28 = vadd.f32 %v9041_v1, %v13134_v63  ;;  %v4692_v1 = vmul.f32 %v13260_v62, %v13260_v62 }
 0x47b   : > { %v13285_v9 = vadd.f32 %v3845_v0, %v13134_v63  ;;  %v4693_v0 = vmul.f32 %v13271_v45, %v13271_v45 }
 0x47c   : > { %16779 = vst [vmem:[#allocation204_spill] sm:$0xff] %v13288_v28 }
 0x47d   : > { %16778 = vst [vmem:[#allocation203_spill] sm:$0xff] %v13285_v9  ;;  %9095 = vmatprep.mubr.msk.f32.mxu1 %vm210_vm0, %v13285_v9  ;;  %9151 = vmatprep.mubr.msk.f32.mxu0 %vm210_vm0, %v13285_v9 }
 0x47e   : > { %9096 = vmatmul.mubr.msk.f32.gmra.mrb[164].mxu1 %vm210_vm0, %v13288_v28  ;;  %9152 = vmatmul.mubr.msk.f32.gmra.mrb[164].mxu0 %vm210_vm0, %v13288_v28 }
 0x47f   : > { %v9044_v39 = vpop.f32.mrb[134].mxu0 }
 0x480   : > { %v3855_v41 = vpop.f32.mrb[135].mxu0  ;;  %v13302_v40 = vadd.f32 %v9044_v39, %v13134_v63  ;;  %v4694_v39 = vmul.f32 %v13274_v18, %v13274_v18 }
 0x481   : > { %v13299_v56 = vadd.f32 %v3855_v41, %v13134_v63  ;;  %v4695_v41 = vmul.f32 %v13285_v9, %v13285_v9 }
 0x482   : > { %16781 = vst [vmem:[#allocation174_spill] sm:$0xff] %v13302_v40 }
 0x483   : > { %16780 = vst [vmem:[#allocation17_spill] sm:$0xff] %v13299_v56  ;;  %v9047_v31 = vpop.f32.mrb[136].mxu0  ;;  %9098 = vmatprep.mubr.msk.f32.mxu1 %vm210_vm0, %v13299_v56  ;;  %9154 = vmatprep.mubr.msk.f32.mxu0 %vm210_vm0, %v13299_v56 }
 0x484   : > { %v3865_v12 = vpop.f32.mrb[137].mxu0  ;;  %9099 = vmatmul.mubr.msk.f32.gmra.mrb[166].mxu1 %vm210_vm0, %v13302_v40  ;;  %9155 = vmatmul.mubr.msk.f32.gmra.mrb[166].mxu0 %vm210_vm0, %v13302_v40  ;;  %v13316_v22 = vadd.f32 %v9047_v31, %v13134_v63  ;;  %v4696_v31 = vmul.f32 %v13288_v28, %v13288_v28 }
 0x485   : > { %v13313_v15 = vadd.f32 %v3865_v12, %v13134_v63  ;;  %v4697_v12 = vmul.f32 %v13299_v56, %v13299_v56 }
 0x486   : > { %16783 = vst [vmem:[#allocation172_spill] sm:$0xff] %v13316_v22 }
 0x487   : > { %16782 = vst [vmem:[#allocation55_spill] sm:$0xff] %v13313_v15  ;;  %v9050_v17 = vpop.f32.mrb[138].mxu0  ;;  %9101 = vmatprep.mubr.msk.f32.mxu1 %vm210_vm0, %v13313_v15  ;;  %9157 = vmatprep.mubr.msk.f32.mxu0 %vm210_vm0, %v13313_v15 }
 0x488   : > { %v3875_v61 = vpop.f32.mrb[139].mxu0  ;;  %9102 = vmatmul.mubr.msk.f32.gmra.mrb[168].mxu1 %vm210_vm0, %v13316_v22  ;;  %9158 = vmatmul.mubr.msk.f32.gmra.mrb[168].mxu0 %vm210_vm0, %v13316_v22  ;;  %v13330_v2 = vadd.f32 %v9050_v17, %v13134_v63  ;;  %v4698_v17 = vmul.f32 %v13302_v40, %v13302_v40 }
 0x489   : > { %v13327_v49 = vadd.f32 %v3875_v61, %v13134_v63  ;;  %v4699_v61 = vmul.f32 %v13313_v15, %v13313_v15 }
 0x48a   : > { %16785 = vst [vmem:[#allocation124_spill] sm:$0xff] %v13330_v2 }
 0x48b   : > { %16784 = vst [vmem:[#allocation56_spill] sm:$0xff] %v13327_v49  ;;  %v9053_v59 = vpop.f32.mrb[140].mxu0  ;;  %9104 = vmatprep.mubr.msk.f32.mxu1 %vm210_vm0, %v13327_v49  ;;  %9160 = vmatprep.mubr.msk.f32.mxu0 %vm210_vm0, %v13327_v49 }
 0x48c   : > { %v3885_v24 = vpop.f32.mrb[141].mxu0  ;;  %9105 = vmatmul.mubr.msk.f32.gmra.mrb[170].mxu1 %vm210_vm0, %v13330_v2  ;;  %9161 = vmatmul.mubr.msk.f32.gmra.mrb[170].mxu0 %vm210_vm0, %v13330_v2  ;;  %v13344_v60 = vadd.f32 %v9053_v59, %v13134_v63  ;;  %v4700_v59 = vmul.f32 %v13316_v22, %v13316_v22 }
 0x48d   : > { %v13341_v5 = vadd.f32 %v3885_v24, %v13134_v63  ;;  %v4701_v24 = vmul.f32 %v13327_v49, %v13327_v49 }
 0x48e   : > { %16787 = vst [vmem:[#allocation176_spill] sm:$0xff] %v13344_v60 }
 0x48f   : > { %16786 = vst [vmem:[#allocation113_spill] sm:$0xff] %v13341_v5  ;;  %v9056_v55 = vpop.f32.mrb[142].mxu0  ;;  %9107 = vmatprep.mubr.msk.f32.mxu1 %vm210_vm0, %v13341_v5  ;;  %9163 = vmatprep.mubr.msk.f32.mxu0 %vm210_vm0, %v13341_v5 }
 0x490   : > { %v3895_v27 = vpop.f32.mrb[143].mxu0  ;;  %9108 = vmatmul.mubr.msk.f32.gmra.mrb[172].mxu1 %vm210_vm0, %v13344_v60  ;;  %9164 = vmatmul.mubr.msk.f32.gmra.mrb[172].mxu0 %vm210_vm0, %v13344_v60  ;;  %v13358_v8 = vadd.f32 %v9056_v55, %v13134_v63  ;;  %v4702_v55 = vmul.f32 %v13330_v2, %v13330_v2 }
 0x491   : > { %v13355_v7 = vadd.f32 %v3895_v27, %v13134_v63  ;;  %v4676_v63 = vmul.f32 %v13140_v42, %v13140_v42  ;;  %v4703_v27 = vmul.f32 %v13341_v5, %v13341_v5 }
 0x492   : > { %16789 = vst [vmem:[#allocation169_spill] sm:$0xff] %v13358_v8 }
 0x493   : > { %16788 = vst [vmem:[#allocation18_spill] sm:$0xff] %v13355_v7  ;;  %9110 = vmatprep.mubr.msk.f32.mxu1 %vm210_vm0, %v13355_v7  ;;  %9166 = vmatprep.mubr.msk.f32.mxu0 %vm210_vm0, %v13355_v7 }
 0x494   : > { %9111 = vmatmul.mubr.msk.f32.gmra.mrb[174].mxu1 %vm210_vm0, %v13358_v8  ;;  %9167 = vmatmul.mubr.msk.f32.gmra.mrb[174].mxu0 %vm210_vm0, %v13358_v8 }
 0x495   : > { %9177 = vmatprep.mubr.msk.f32.mxu1 %vm210_vm0, %v13137_v30  ;;  %9233 = vmatprep.mubr.msk.f32.mxu0 %vm210_vm0, %v4675_v48  ;;  %v4704_v48 = vmul.f32 %v13344_v60, %v13344_v60 }
 0x498   : > { %9178 = vmatmul.mubr.msk.f32.vlgmr.msra.gmra.mrb[176].mxu1 %vm210_vm0, %v13140_v42  ;;  %9234 = vmatmul.mubr.msk.f32.vlgmr.msra.gmra.mrb[176].mxu0 %vm210_vm0, %v4676_v63  ;;  %v4705_v63 = vmul.f32 %v13355_v7, %v13355_v7 }
 0x499   : > { %9180 = vmatprep.mubr.msk.f32.mxu1 %vm210_vm0, %v13159_v33  ;;  %9236 = vmatprep.mubr.msk.f32.mxu0 %vm210_vm0, %v4677_v23  ;;  %v4706_v23 = vmul.f32 %v13358_v8, %v13358_v8 }
 0x49a   : > { %9612 = vmatpush3.bf16.msra.mxu1 %v16757_v43  ;;  %9620 = vmatpush3.bf16.msra.mxu0 %v16757_v43 }
 0x49b   : > { %9614 = vmatprep.subr.bf16.mxu1 %v16759_v52  ;;  %9622 = vmatprep.subr.bf16.mxu0 %v16759_v52 }
 0x49c   : > { %9181 = vmatmul.mubr.msk.f32.gmra.mrb[178].mxu1 %vm210_vm0, %v13162_v53  ;;  %9237 = vmatmul.mubr.msk.f32.gmra.mrb[178].mxu0 %vm210_vm0, %v4678_v37 }
 0x49d   : > { %9183 = vmatprep.mubr.msk.f32.mxu1 %vm210_vm0, %v13173_v26  ;;  %9239 = vmatprep.mubr.msk.f32.mxu0 %vm210_vm0, %v4679_v10 }
 0x49e   : > { %9616 = vmatpush3.bf16.msra.mxu1 %v16759_v52  ;;  %9624 = vmatpush3.bf16.msra.mxu0 %v16759_v52 }
 0x49f   : > { %9626 = vmatprep.subr.bf16.mxu1 %v16757_v43 }
 0x4a0   : > { %9184 = vmatmul.mubr.msk.f32.gmra.mrb[180].mxu1 %vm210_vm0, %v13176_v44  ;;  %9240 = vmatmul.mubr.msk.f32.gmra.mrb[180].mxu0 %vm210_vm0, %v4680_v21 }
 0x4a1   : > { %9186 = vmatprep.mubr.msk.f32.mxu1 %vm210_vm0, %v13187_v57  ;;  %9242 = vmatprep.mubr.msk.f32.mxu0 %vm210_vm0, %v4681_v38 }
 0x4a4   : > { %9187 = vmatmul.mubr.msk.f32.gmra.mrb[182].mxu1 %vm210_vm0, %v13190_v36  ;;  %9243 = vmatmul.mubr.msk.f32.gmra.mrb[182].mxu0 %vm210_vm0, %v4682_v4 }
 0x4a5   : > { %9189 = vmatprep.mubr.msk.f32.mxu1 %vm210_vm0, %v13201_v50  ;;  %9245 = vmatprep.mubr.msk.f32.mxu0 %vm210_vm0, %v4683_v46 }
 0x4a8   : > { %9190 = vmatmul.mubr.msk.f32.gmra.mrb[184].mxu1 %vm210_vm0, %v13204_v16  ;;  %9246 = vmatmul.mubr.msk.f32.gmra.mrb[184].mxu0 %vm210_vm0, %v4684_v58 }
 0x4a9   : > { %9192 = vmatprep.mubr.msk.f32.mxu1 %vm210_vm0, %v13215_v3  ;;  %9248 = vmatprep.mubr.msk.f32.mxu0 %vm210_vm0, %v4685_v25 }
 0x4ac   : > { %9193 = vmatmul.mubr.msk.f32.gmra.mrb[186].mxu1 %vm210_vm0, %v13218_v35  ;;  %9249 = vmatmul.mubr.msk.f32.gmra.mrb[186].mxu0 %vm210_vm0, %v4686_v34 }
 0x4ad   : > { %9195 = vmatprep.mubr.msk.f32.mxu1 %vm210_vm0, %v13229_v13  ;;  %9251 = vmatprep.mubr.msk.f32.mxu0 %vm210_vm0, %v4687_v51 }
 0x4b0   : > { %9196 = vmatmul.mubr.msk.f32.gmra.mrb[188].mxu1 %vm210_vm0, %v13232_v6  ;;  %9252 = vmatmul.mubr.msk.f32.gmra.mrb[188].mxu0 %vm210_vm0, %v4688_v54 }
 0x4b1   : > { %9198 = vmatprep.mubr.msk.f32.mxu1 %vm210_vm0, %v13243_v14  ;;  %9254 = vmatprep.mubr.msk.f32.mxu0 %vm210_vm0, %v4689_v11 }
 0x4b4   : > { %9199 = vmatmul.mubr.msk.f32.gmra.mrb[190].mxu1 %vm210_vm0, %v13246_v32  ;;  %9255 = vmatmul.mubr.msk.f32.gmra.mrb[190].mxu0 %vm210_vm0, %v4690_v20 }
 0x4b5   : > { %9201 = vmatprep.mubr.msk.f32.mxu1 %vm210_vm0, %v13257_v29  ;;  %9257 = vmatprep.mubr.msk.f32.mxu0 %vm210_vm0, %v4691_v19 }
 0x4b8   : > { %9202 = vmatmul.mubr.msk.f32.gmra.mrb[192].mxu1 %vm210_vm0, %v13260_v62  ;;  %9258 = vmatmul.mubr.msk.f32.gmra.mrb[192].mxu0 %vm210_vm0, %v4692_v1 }
 0x4b9   : > { %9204 = vmatprep.mubr.msk.f32.mxu1 %vm210_vm0, %v13271_v45  ;;  %9260 = vmatprep.mubr.msk.f32.mxu0 %vm210_vm0, %v4693_v0 }
 0x4bc   : > { %9205 = vmatmul.mubr.msk.f32.gmra.mrb[194].mxu1 %vm210_vm0, %v13274_v18  ;;  %9261 = vmatmul.mubr.msk.f32.gmra.mrb[194].mxu0 %vm210_vm0, %v4694_v39 }
 0x4bd   : > { %9207 = vmatprep.mubr.msk.f32.mxu1 %vm210_vm0, %v13285_v9  ;;  %9263 = vmatprep.mubr.msk.f32.mxu0 %vm210_vm0, %v4695_v41 }
 0x4c0   : > { %9208 = vmatmul.mubr.msk.f32.gmra.mrb[196].mxu1 %vm210_vm0, %v13288_v28  ;;  %9264 = vmatmul.mubr.msk.f32.gmra.mrb[196].mxu0 %vm210_vm0, %v4696_v31 }
 0x4c1   : > { %9210 = vmatprep.mubr.msk.f32.mxu1 %vm210_vm0, %v13299_v56  ;;  %9266 = vmatprep.mubr.msk.f32.mxu0 %vm210_vm0, %v4697_v12 }
 0x4c4   : > { %9211 = vmatmul.mubr.msk.f32.gmra.mrb[198].mxu1 %vm210_vm0, %v13302_v40  ;;  %9267 = vmatmul.mubr.msk.f32.gmra.mrb[198].mxu0 %vm210_vm0, %v4698_v17 }
 0x4c5   : > { %9213 = vmatprep.mubr.msk.f32.mxu1 %vm210_vm0, %v13313_v15  ;;  %9269 = vmatprep.mubr.msk.f32.mxu0 %vm210_vm0, %v4699_v61 }
 0x4c8   : > { %9214 = vmatmul.mubr.msk.f32.gmra.mrb[200].mxu1 %vm210_vm0, %v13316_v22  ;;  %9270 = vmatmul.mubr.msk.f32.gmra.mrb[200].mxu0 %vm210_vm0, %v4700_v59 }
 0x4c9   : > { %9216 = vmatprep.mubr.msk.f32.mxu1 %vm210_vm0, %v13327_v49  ;;  %9272 = vmatprep.mubr.msk.f32.mxu0 %vm210_vm0, %v4701_v24 }
 0x4cc   : > { %9217 = vmatmul.mubr.msk.f32.gmra.mrb[202].mxu1 %vm210_vm0, %v13330_v2  ;;  %9273 = vmatmul.mubr.msk.f32.gmra.mrb[202].mxu0 %vm210_vm0, %v4702_v55 }
 0x4cd   : > { %9219 = vmatprep.mubr.msk.f32.mxu1 %vm210_vm0, %v13341_v5  ;;  %9275 = vmatprep.mubr.msk.f32.mxu0 %vm210_vm0, %v4703_v27 }
 0x4d0   : > { %9220 = vmatmul.mubr.msk.f32.gmra.mrb[204].mxu1 %vm210_vm0, %v13344_v60  ;;  %9276 = vmatmul.mubr.msk.f32.gmra.mrb[204].mxu0 %vm210_vm0, %v4704_v48 }
 0x4d1   : > { %9222 = vmatprep.mubr.msk.f32.mxu1 %vm210_vm0, %v13355_v7  ;;  %9278 = vmatprep.mubr.msk.f32.mxu0 %vm210_vm0, %v4705_v63 }
 0x4d4   : > { %9223 = vmatmul.mubr.msk.f32.gmra.mrb[206].mxu1 %vm210_vm0, %v13358_v8  ;;  %9279 = vmatmul.mubr.msk.f32.gmra.mrb[206].mxu0 %vm210_vm0, %v4706_v23 }
 0x4e4   : > { %v13535_v37 = vpop.f32.mrb[144].mxu1  ;;  %v13537_v10 = vpop.f32.mrb[144].mxu0 }
 0x4e5   : > { %v13539_v21 = vpop.f32.mrb[145].mxu1  ;;  %v13541_v38 = vpop.f32.mrb[145].mxu0  ;;  %v5029_v58 = vmul.f32 %v13535_v37, %v13140_v42  ;;  %v5382_v25 = vmul.f32 %v13537_v10, %v13140_v42 }
 0x4e6   : > { %16790 = vst [vmem:[#allocation53_spill] sm:$0xff] %v13539_v21  ;;  %16791 = vst [vmem:[#allocation170_spill] sm:$0xff] %v13541_v38  ;;  %v5028_v4 = vmul.f32 %v13539_v21, %v13137_v30  ;;  %v5381_v46 = vmul.f32 %v13541_v38, %v13137_v30 }
 0x4e8   : > { %9289 = vmatprep.mubr.msk.f32.mxu1 %vm210_vm0, %v5028_v4  ;;  %9345 = vmatprep.mubr.msk.f32.mxu0 %vm210_vm0, %v5381_v46 }
 0x4e9   : > { %9290 = vmatmul.mubr.msk.f32.vlgmr.msra.gmra.mrb[208].mxu1 %vm210_vm0, %v5029_v58  ;;  %9346 = vmatmul.mubr.msk.f32.vlgmr.msra.gmra.mrb[208].mxu0 %vm210_vm0, %v5382_v25 }
 0x4ea   : > { %9628 = vmatpush3.bf16.msra.mxu1 %v16757_v43 }
 0x4eb   : > { %9630 = vmatprep.subr.bf16.mxu1 %v16759_v52 }
 0x4ee   : > { %9632 = vmatpush3.bf16.msra.mxu1 %v16759_v52 }
 0x4f1   : > { %v13558_v34 = vpop.f32.mrb[146].mxu1  ;;  %v13560_v51 = vpop.f32.mrb[146].mxu0 }
 0x4f2   : > { %16792 = vst [vmem:[#allocation54_spill] sm:$0xff] %v13558_v34  ;;  %16793 = vst [vmem:[#allocation120_spill] sm:$0xff] %v13560_v51  ;;  %v13562_v54 = vpop.f32.mrb[147].mxu1  ;;  %v13564_v11 = vpop.f32.mrb[147].mxu0  ;;  %v5031_v43 = vmul.f32 %v13558_v34, %v13162_v53  ;;  %v5384_v52 = vmul.f32 %v13560_v51, %v13162_v53 }
 0x4f3   : > { %16794 = vst [vmem:[#allocation111_spill] sm:$0xff] %v13562_v54  ;;  %16795 = vst [vmem:[#allocation171_spill] sm:$0xff] %v13564_v11  ;;  %v5030_v20 = vmul.f32 %v13562_v54, %v13159_v33  ;;  %v5383_v19 = vmul.f32 %v13564_v11, %v13159_v33  ;;  %v156_v11 = vld [vmem:[%s15613_s1 + $0x58] sm:$0xff] }
 0x4f5   : > { %9292 = vmatprep.mubr.msk.f32.mxu1 %vm210_vm0, %v5030_v20  ;;  %9348 = vmatprep.mubr.msk.f32.mxu0 %vm210_vm0, %v5383_v19 }
 0x4f6   : > { %9293 = vmatmul.mubr.msk.f32.gmra.mrb[210].mxu1 %vm210_vm0, %v5031_v43  ;;  %9349 = vmatmul.mubr.msk.f32.gmra.mrb[210].mxu0 %vm210_vm0, %v5384_v52 }
 0x501   : > { %v13578_v1 = vpop.f32.mrb[148].mxu1  ;;  %v13580_v0 = vpop.f32.mrb[148].mxu0 }
 0x502   : > { %16796 = vst [vmem:[#allocation175_spill] sm:$0xff] %v13578_v1  ;;  %16797 = vst [vmem:[#allocation211_spill] sm:$0xff] %v13580_v0  ;;  %v13582_v39 = vpop.f32.mrb[149].mxu1  ;;  %v13584_v41 = vpop.f32.mrb[149].mxu0  ;;  %v5033_v17 = vmul.f32 %v13578_v1, %v13176_v44  ;;  %v5386_v61 = vmul.f32 %v13580_v0, %v13176_v44 }
 0x503   : > { %16798 = vst [vmem:[#allocation126_spill] sm:$0xff] %v13582_v39  ;;  %16799 = vst [vmem:[#allocation212_spill] sm:$0xff] %v13584_v41  ;;  %v5032_v31 = vmul.f32 %v13582_v39, %v13173_v26  ;;  %v5385_v12 = vmul.f32 %v13584_v41, %v13173_v26 }
 0x505   : > { %9295 = vmatprep.mubr.msk.f32.mxu1 %vm210_vm0, %v5032_v31  ;;  %9351 = vmatprep.mubr.msk.f32.mxu0 %vm210_vm0, %v5385_v12 }
 0x506   : > { %9296 = vmatmul.mubr.msk.f32.gmra.mrb[212].mxu1 %vm210_vm0, %v5033_v17  ;;  %9352 = vmatmul.mubr.msk.f32.gmra.mrb[212].mxu0 %vm210_vm0, %v5386_v61 }
 0x50f   : > { %v13598_v59 = vpop.f32.mrb[150].mxu1  ;;  %v13600_v24 = vpop.f32.mrb[150].mxu0 }
 0x510   : > { %16800 = vst [vmem:[#allocation152_spill] sm:$0xff] %v13598_v59  ;;  %16801 = vst [vmem:[#allocation207_spill] sm:$0xff] %v13600_v24  ;;  %v13602_v55 = vpop.f32.mrb[151].mxu1  ;;  %v13604_v27 = vpop.f32.mrb[151].mxu0  ;;  %v5035_v23 = vmul.f32 %v13598_v59, %v13190_v36  ;;  %v5388_v4 = vmul.f32 %v13600_v24, %v13190_v36 }
 0x511   : > { %16802 = vst [vmem:[#allocation208_spill] sm:$0xff] %v13602_v55  ;;  %16803 = vst [vmem:[#allocation154_spill] sm:$0xff] %v13604_v27  ;;  %v5034_v48 = vmul.f32 %v13602_v55, %v13187_v57  ;;  %v5387_v63 = vmul.f32 %v13604_v27, %v13187_v57 }
 0x513   : > { %9298 = vmatprep.mubr.msk.f32.mxu1 %vm210_vm0, %v5034_v48  ;;  %9354 = vmatprep.mubr.msk.f32.mxu0 %vm210_vm0, %v5387_v63 }
 0x514   : > { %9299 = vmatmul.mubr.msk.f32.gmra.mrb[214].mxu1 %vm210_vm0, %v5035_v23  ;;  %9355 = vmatmul.mubr.msk.f32.gmra.mrb[214].mxu0 %vm210_vm0, %v5388_v4 }
 0x51f   : > { %v13618_v46 = vpop.f32.mrb[152].mxu1  ;;  %v13620_v58 = vpop.f32.mrb[152].mxu0 }
 0x520   : > { %16804 = vst [vmem:[#allocation209_spill] sm:$0xff] %v13618_v46  ;;  %16805 = vst [vmem:[#allocation210_spill] sm:$0xff] %v13620_v58  ;;  %v13622_v25 = vpop.f32.mrb[153].mxu1  ;;  %v13624_v20 = vpop.f32.mrb[153].mxu0  ;;  %v5037_v52 = vmul.f32 %v13618_v46, %v13204_v16  ;;  %v5390_v31 = vmul.f32 %v13620_v58, %v13204_v16 }
 0x521   : > { %16806 = vst [vmem:[#allocation19_spill] sm:$0xff] %v13622_v25  ;;  %16807 = vst [vmem:[#allocation181_spill] sm:$0xff] %v13624_v20  ;;  %v5036_v19 = vmul.f32 %v13622_v25, %v13201_v50  ;;  %v5389_v43 = vmul.f32 %v13624_v20, %v13201_v50 }
 0x523   : > { %9301 = vmatprep.mubr.msk.f32.mxu1 %vm210_vm0, %v5036_v19  ;;  %9357 = vmatprep.mubr.msk.f32.mxu0 %vm210_vm0, %v5389_v43 }
 0x524   : > { %9302 = vmatmul.mubr.msk.f32.gmra.mrb[216].mxu1 %vm210_vm0, %v5037_v52  ;;  %9358 = vmatmul.mubr.msk.f32.gmra.mrb[216].mxu0 %vm210_vm0, %v5390_v31 }
 0x52d   : > { %v13638_v12 = vpop.f32.mrb[154].mxu1  ;;  %v13640_v17 = vpop.f32.mrb[154].mxu0 }
 0x52e   : > { %16808 = vst [vmem:[#allocation59_spill] sm:$0xff] %v13638_v12  ;;  %16809 = vst [vmem:[#allocation182_spill] sm:$0xff] %v13640_v17  ;;  %v13642_v61 = vpop.f32.mrb[155].mxu1  ;;  %v13644_v48 = vpop.f32.mrb[155].mxu0  ;;  %v5039_v4 = vmul.f32 %v13638_v12, %v13218_v35  ;;  %v5392_v19 = vmul.f32 %v13640_v17, %v13218_v35 }
 0x52f   : > { %16810 = vst [vmem:[#allocation60_spill] sm:$0xff] %v13642_v61  ;;  %16811 = vst [vmem:[#allocation225_spill] sm:$0xff] %v13644_v48  ;;  %v5038_v63 = vmul.f32 %v13642_v61, %v13215_v3  ;;  %v5391_v23 = vmul.f32 %v13644_v48, %v13215_v3 }
 0x531   : > { %9304 = vmatprep.mubr.msk.f32.mxu1 %vm210_vm0, %v5038_v63  ;;  %9360 = vmatprep.mubr.msk.f32.mxu0 %vm210_vm0, %v5391_v23 }
 0x532   : > { %9305 = vmatmul.mubr.msk.f32.gmra.mrb[218].mxu1 %vm210_vm0, %v5039_v4  ;;  %9361 = vmatmul.mubr.msk.f32.gmra.mrb[218].mxu0 %vm210_vm0, %v5392_v19 }
 0x53b   : > { %v13658_v43 = vpop.f32.mrb[156].mxu1  ;;  %v13660_v52 = vpop.f32.mrb[156].mxu0 }
 0x53c   : > { %16812 = vst [vmem:[#allocation117_spill] sm:$0xff] %v13658_v43  ;;  %16813 = vst [vmem:[#allocation183_spill] sm:$0xff] %v13660_v52  ;;  %v13662_v31 = vpop.f32.mrb[157].mxu1  ;;  %v13664_v47 = vpop.f32.mrb[157].mxu0  ;;  %v5041_v23 = vmul.f32 %v13658_v43, %v13232_v6  ;;  %v5394_v4 = vmul.f32 %v13660_v52, %v13232_v6 }
 0x53d   : > { %16814 = vst [vmem:[#allocation20_spill] sm:$0xff] %v13662_v31  ;;  %16815 = vst [vmem:[#allocation177_spill] sm:$0xff] %v13664_v47  ;;  %v5040_v12 = vmul.f32 %v13662_v31, %v13229_v13  ;;  %v5393_v63 = vmul.f32 %v13664_v47, %v13229_v13 }
 0x53f   : > { %9307 = vmatprep.mubr.msk.f32.mxu1 %vm210_vm0, %v5040_v12  ;;  %9363 = vmatprep.mubr.msk.f32.mxu0 %vm210_vm0, %v5393_v63 }
 0x540   : > { %9308 = vmatmul.mubr.msk.f32.gmra.mrb[220].mxu1 %vm210_vm0, %v5041_v23  ;;  %9364 = vmatmul.mubr.msk.f32.gmra.mrb[220].mxu0 %vm210_vm0, %v5394_v4 }
 0x541   : > { %v13676_v19 = vpop.f32.mrb[158].mxu1  ;;  %v13678_v17 = vpop.f32.mrb[158].mxu0 }
 0x542   : > { %16816 = vst [vmem:[#allocation57_spill] sm:$0xff] %v13676_v19  ;;  %16817 = vst [vmem:[#allocation178_spill] sm:$0xff] %v13678_v17  ;;  %v13682_v31 = vpop.f32.mrb[159].mxu1  ;;  %v13684_v47 = vpop.f32.mrb[159].mxu0  ;;  %v5043_v63 = vmul.f32 %v13676_v19, %v13246_v32  ;;  %v5396_v52 = vmul.f32 %v13678_v17, %v13246_v32 }
 0x543   : > { %16818 = vst [vmem:[#allocation58_spill] sm:$0xff] %v13682_v31  ;;  %16819 = vst [vmem:[#allocation128_spill] sm:$0xff] %v13684_v47  ;;  %v5042_v43 = vmul.f32 %v13682_v31, %v13243_v14  ;;  %v5395_v12 = vmul.f32 %v13684_v47, %v13243_v14 }
 0x545   : > { %9310 = vmatprep.mubr.msk.f32.mxu1 %vm210_vm0, %v5042_v43  ;;  %9366 = vmatprep.mubr.msk.f32.mxu0 %vm210_vm0, %v5395_v12 }
 0x546   : > { %9311 = vmatmul.mubr.msk.f32.gmra.mrb[222].mxu1 %vm210_vm0, %v5043_v63  ;;  %9367 = vmatmul.mubr.msk.f32.gmra.mrb[222].mxu0 %vm210_vm0, %v5396_v52 }
 0x547   : > { %v13696_v23 = vpop.f32.mrb[160].mxu1  ;;  %v13698_v4 = vpop.f32.mrb[160].mxu0 }
 0x548   : > { %16820 = vst [vmem:[#allocation115_spill] sm:$0xff] %v13696_v23  ;;  %16821 = vst [vmem:[#allocation130_spill] sm:$0xff] %v13698_v4  ;;  %v13702_v31 = vpop.f32.mrb[161].mxu1  ;;  %v13704_v47 = vpop.f32.mrb[161].mxu0  ;;  %v5045_v12 = vmul.f32 %v13696_v23, %v13260_v62  ;;  %v5398_v17 = vmul.f32 %v13698_v4, %v13260_v62 }
 0x549   : > { %16822 = vst [vmem:[#allocation179_spill] sm:$0xff] %v13702_v31  ;;  %16823 = vst [vmem:[#allocation217_spill] sm:$0xff] %v13704_v47  ;;  %v5044_v19 = vmul.f32 %v13702_v31, %v13257_v29  ;;  %v5397_v43 = vmul.f32 %v13704_v47, %v13257_v29 }
 0x54b   : > { %9313 = vmatprep.mubr.msk.f32.mxu1 %vm210_vm0, %v5044_v19  ;;  %9369 = vmatprep.mubr.msk.f32.mxu0 %vm210_vm0, %v5397_v43 }
 0x54c   : > { %9314 = vmatmul.mubr.msk.f32.gmra.mrb[224].mxu1 %vm210_vm0, %v5045_v12  ;;  %9370 = vmatmul.mubr.msk.f32.gmra.mrb[224].mxu0 %vm210_vm0, %v5398_v17 }
 0x54d   : > { %v13716_v52 = vpop.f32.mrb[162].mxu1  ;;  %v13718_v63 = vpop.f32.mrb[162].mxu0 }
 0x54e   : > { %16824 = vst [vmem:[#allocation180_spill] sm:$0xff] %v13716_v52  ;;  %16825 = vst [vmem:[#allocation218_spill] sm:$0xff] %v13718_v63  ;;  %v13722_v31 = vpop.f32.mrb[163].mxu1  ;;  %v13724_v47 = vpop.f32.mrb[163].mxu0  ;;  %v5047_v43 = vmul.f32 %v13716_v52, %v13274_v18  ;;  %v5400_v61 = vmul.f32 %v13718_v63, %v13274_v18 }
 0x54f   : > { %16826 = vst [vmem:[#allocation156_spill] sm:$0xff] %v13722_v31  ;;  %16827 = vst [vmem:[#allocation213_spill] sm:$0xff] %v13724_v47  ;;  %v5046_v48 = vmul.f32 %v13722_v31, %v13271_v45  ;;  %v5399_v19 = vmul.f32 %v13724_v47, %v13271_v45 }
 0x551   : > { %v13734_v58 = vpop.f32.mrb[164].mxu1  ;;  %v13736_v12 = vpop.f32.mrb[164].mxu0  ;;  %9316 = vmatprep.mubr.msk.f32.mxu1 %vm210_vm0, %v5046_v48  ;;  %9372 = vmatprep.mubr.msk.f32.mxu0 %vm210_vm0, %v5399_v19 }
 0x552   : > { %16828 = vst [vmem:[#allocation214_spill] sm:$0xff] %v13734_v58  ;;  %16829 = vst [vmem:[#allocation158_spill] sm:$0xff] %v13736_v12  ;;  %v13740_v17 = vpop.f32.mrb[165].mxu1  ;;  %v13742_v31 = vpop.f32.mrb[165].mxu0  ;;  %9317 = vmatmul.mubr.msk.f32.gmra.mrb[226].mxu1 %vm210_vm0, %v5047_v43  ;;  %9373 = vmatmul.mubr.msk.f32.gmra.mrb[226].mxu0 %vm210_vm0, %v5400_v61  ;;  %v5049_v20 = vmul.f32 %v13734_v58, %v13288_v28  ;;  %v5402_v48 = vmul.f32 %v13736_v12, %v13288_v28 }
 0x553   : > { %16830 = vst [vmem:[#allocation215_spill] sm:$0xff] %v13740_v17  ;;  %16831 = vst [vmem:[#allocation216_spill] sm:$0xff] %v13742_v31  ;;  %v5048_v47 = vmul.f32 %v13740_v17, %v13285_v9  ;;  %v5401_v46 = vmul.f32 %v13742_v31, %v13285_v9 }
 0x555   : > { %9319 = vmatprep.mubr.msk.f32.mxu1 %vm210_vm0, %v5048_v47  ;;  %9375 = vmatprep.mubr.msk.f32.mxu0 %vm210_vm0, %v5401_v46 }
 0x556   : > { %9320 = vmatmul.mubr.msk.f32.gmra.mrb[228].mxu1 %vm210_vm0, %v5049_v20  ;;  %9376 = vmatmul.mubr.msk.f32.gmra.mrb[228].mxu0 %vm210_vm0, %v5402_v48 }
 0x557   : > { %v13754_v19 = vpop.f32.mrb[166].mxu1  ;;  %v13756_v25 = vpop.f32.mrb[166].mxu0 }
 0x558   : > { %16832 = vst [vmem:[#allocation21_spill] sm:$0xff] %v13754_v19  ;;  %16833 = vst [vmem:[#allocation63_spill] sm:$0xff] %v13756_v25  ;;  %v13760_v61 = vpop.f32.mrb[167].mxu1  ;;  %v13762_v43 = vpop.f32.mrb[167].mxu0  ;;  %v5051_v24 = vmul.f32 %v13754_v19, %v13302_v40  ;;  %v5404_v47 = vmul.f32 %v13756_v25, %v13302_v40 }
 0x559   : > { %16834 = vst [vmem:[#allocation185_spill] sm:$0xff] %v13760_v61  ;;  %16835 = vst [vmem:[#allocation64_spill] sm:$0xff] %v13762_v43  ;;  %v5050_v31 = vmul.f32 %v13760_v61, %v13299_v56  ;;  %v5403_v17 = vmul.f32 %v13762_v43, %v13299_v56 }
 0x55b   : > { %v13774_v46 = vpop.f32.mrb[168].mxu1  ;;  %v13776_v59 = vpop.f32.mrb[168].mxu0  ;;  %9322 = vmatprep.mubr.msk.f32.mxu1 %vm210_vm0, %v5050_v31  ;;  %9378 = vmatprep.mubr.msk.f32.mxu0 %vm210_vm0, %v5403_v17 }
 0x55c   : > { %16836 = vst [vmem:[#allocation121_spill] sm:$0xff] %v13774_v46  ;;  %16837 = vst [vmem:[#allocation22_spill] sm:$0xff] %v13776_v59  ;;  %v13780_v20 = vpop.f32.mrb[169].mxu1  ;;  %v13782_v48 = vpop.f32.mrb[169].mxu0  ;;  %9323 = vmatmul.mubr.msk.f32.gmra.mrb[230].mxu1 %vm210_vm0, %v5051_v24  ;;  %9379 = vmatmul.mubr.msk.f32.gmra.mrb[230].mxu0 %vm210_vm0, %v5404_v47  ;;  %v5053_v25 = vmul.f32 %v13774_v46, %v13316_v22  ;;  %v5406_v31 = vmul.f32 %v13776_v59, %v13316_v22 }
 0x55d   : > { %16838 = vst [vmem:[#allocation186_spill] sm:$0xff] %v13780_v20  ;;  %16839 = vst [vmem:[#allocation61_spill] sm:$0xff] %v13782_v48  ;;  %v5052_v43 = vmul.f32 %v13780_v20, %v13313_v15  ;;  %v5405_v61 = vmul.f32 %v13782_v48, %v13313_v15 }
 0x55f   : > { %v13794_v17 = vpop.f32.mrb[170].mxu1  ;;  %v13796_v19 = vpop.f32.mrb[170].mxu0  ;;  %9325 = vmatprep.mubr.msk.f32.mxu1 %vm210_vm0, %v5052_v43  ;;  %9381 = vmatprep.mubr.msk.f32.mxu0 %vm210_vm0, %v5405_v61 }
 0x560   : > { %16840 = vst [vmem:[#allocation227_spill] sm:$0xff] %v13794_v17  ;;  %16841 = vst [vmem:[#allocation62_spill] sm:$0xff] %v13796_v19  ;;  %v13800_v24 = vpop.f32.mrb[171].mxu1  ;;  %v13802_v47 = vpop.f32.mrb[171].mxu0  ;;  %9326 = vmatmul.mubr.msk.f32.gmra.mrb[232].mxu1 %vm210_vm0, %v5053_v25  ;;  %9382 = vmatmul.mubr.msk.f32.gmra.mrb[232].mxu0 %vm210_vm0, %v5406_v31  ;;  %v5055_v59 = vmul.f32 %v13794_v17, %v13330_v2  ;;  %v5408_v61 = vmul.f32 %v13796_v19, %v13330_v2 }
 0x561   : > { %16842 = vst [vmem:[#allocation134_spill] sm:$0xff] %v13800_v24  ;;  %16843 = vst [vmem:[#allocation119_spill] sm:$0xff] %v13802_v47  ;;  %v5054_v48 = vmul.f32 %v13800_v24, %v13327_v49  ;;  %v5407_v20 = vmul.f32 %v13802_v47, %v13327_v49 }
 0x563   : > { %v13814_v43 = vpop.f32.mrb[172].mxu1  ;;  %v13816_v46 = vpop.f32.mrb[172].mxu0  ;;  %9328 = vmatprep.mubr.msk.f32.mxu1 %vm210_vm0, %v5054_v48  ;;  %9384 = vmatprep.mubr.msk.f32.mxu0 %vm210_vm0, %v5407_v20 }
 0x564   : > { %16844 = vst [vmem:[#allocation184_spill] sm:$0xff] %v13814_v43  ;;  %16845 = vst [vmem:[#allocation132_spill] sm:$0xff] %v13816_v46  ;;  %v13820_v25 = vpop.f32.mrb[173].mxu1  ;;  %v13822_v31 = vpop.f32.mrb[173].mxu0  ;;  %9329 = vmatmul.mubr.msk.f32.gmra.mrb[234].mxu1 %vm210_vm0, %v5055_v59  ;;  %9385 = vmatmul.mubr.msk.f32.gmra.mrb[234].mxu0 %vm210_vm0, %v5408_v61  ;;  %v5057_v19 = vmul.f32 %v13814_v43, %v13344_v60  ;;  %v5410_v20 = vmul.f32 %v13816_v46, %v13344_v60 }
 0x565   : > { %16846 = vst [vmem:[#allocation223_spill] sm:$0xff] %v13820_v25  ;;  %16847 = vst [vmem:[#allocation226_spill] sm:$0xff] %v13822_v31  ;;  %v5056_v47 = vmul.f32 %v13820_v25, %v13341_v5  ;;  %v5409_v24 = vmul.f32 %v13822_v31, %v13341_v5 }
 0x567   : > { %v13834_v48 = vpop.f32.mrb[174].mxu1  ;;  %v13836_v17 = vpop.f32.mrb[174].mxu0  ;;  %9331 = vmatprep.mubr.msk.f32.mxu1 %vm210_vm0, %v5056_v47  ;;  %9387 = vmatprep.mubr.msk.f32.mxu0 %vm210_vm0, %v5409_v24 }
 0x568   : > { %16848 = vst [vmem:[#allocation224_spill] sm:$0xff] %v13834_v48  ;;  %16849 = vst [vmem:[#allocation23_spill] sm:$0xff] %v13836_v17  ;;  %v13840_v59 = vpop.f32.mrb[175].mxu1  ;;  %v13842_v61 = vpop.f32.mrb[175].mxu0  ;;  %9332 = vmatmul.mubr.msk.f32.gmra.mrb[236].mxu1 %vm210_vm0, %v5057_v19  ;;  %9388 = vmatmul.mubr.msk.f32.gmra.mrb[236].mxu0 %vm210_vm0, %v5410_v20  ;;  %v5059_v46 = vmul.f32 %v13834_v48, %v13358_v8  ;;  %v5412_v24 = vmul.f32 %v13836_v17, %v13358_v8 }
 0x569   : > { %16850 = vst [vmem:[#allocation160_spill] sm:$0xff] %v13840_v59  ;;  %16851 = vst [vmem:[#allocation219_spill] sm:$0xff] %v13842_v61  ;;  %v5058_v31 = vmul.f32 %v13840_v59, %v13355_v7  ;;  %v5411_v25 = vmul.f32 %v13842_v61, %v13355_v7 }
 0x56b   : > { %v13854_v47 = vpop.f32.mrb[176].mxu1  ;;  %v13856_v43 = vpop.f32.mrb[176].mxu0  ;;  %9334 = vmatprep.mubr.msk.f32.mxu1 %vm210_vm0, %v5058_v31  ;;  %9390 = vmatprep.mubr.msk.f32.mxu0 %vm210_vm0, %v5411_v25 }
 0x56c   : > { %16852 = vst [vmem:[#allocation220_spill] sm:$0xff] %v13854_v47  ;;  %v13860_v19 = vpop.f32.mrb[177].mxu1  ;;  %v13862_v20 = vpop.f32.mrb[177].mxu0  ;;  %9335 = vmatmul.mubr.msk.f32.gmra.mrb[238].mxu1 %vm210_vm0, %v5059_v46  ;;  %9391 = vmatmul.mubr.msk.f32.gmra.mrb[238].mxu0 %vm210_vm0, %v5412_v24  ;;  %v5735_v59 = vmul.f32 %v13854_v47, %v13140_v42 }
 0x56d   : > { %16853 = vst [vmem:[#allocation162_spill] sm:$0xff] %v13860_v19  ;;  %v5734_v61 = vmul.f32 %v13860_v19, %v13137_v30 }
 0x56f   : > { %v13870_v17 = vpop.f32.mrb[178].mxu1  ;;  %v13872_v48 = vpop.f32.mrb[178].mxu0  ;;  %9401 = vmatprep.mubr.msk.f32.mxu1 %vm210_vm0, %v5734_v61 }
 0x570   : > { %16854 = vst [vmem:[#allocation221_spill] sm:$0xff] %v13870_v17  ;;  %v13875_v25 = vpop.f32.mrb[179].mxu1  ;;  %v13877_v31 = vpop.f32.mrb[179].mxu0  ;;  %9402 = vmatmul.mubr.msk.f32.vlgmr.msra.gmra.mrb[240].mxu1 %vm210_vm0, %v5735_v59  ;;  %v5737_v24 = vmul.f32 %v13870_v17, %v13162_v53 }
 0x571   : > { %16855 = vst [vmem:[#allocation222_spill] sm:$0xff] %v13875_v25  ;;  %v5736_v46 = vmul.f32 %v13875_v25, %v13159_v33  ;;  %v155_v25 = vld [vmem:[%s15613_s1 + $0x50] sm:$0xff] }
 0x572   : > { %v9637_v54 = vpack.c.bf16 %v156_v11, %v155_v25 }
 0x573   : > { %v13884_v27 = vpop.f32.mrb[180].mxu1  ;;  %v13886_v55 = vpop.f32.mrb[180].mxu0  ;;  %9404 = vmatprep.mubr.msk.f32.mxu1 %vm210_vm0, %v5736_v46 }
 0x574   : > { %16856 = vst [vmem:[#allocation67_spill] sm:$0xff] %v13884_v27  ;;  %v13889_v12 = vpop.f32.mrb[181].mxu1  ;;  %v13891_v61 = vpop.f32.mrb[181].mxu0  ;;  %9405 = vmatmul.mubr.msk.f32.gmra.mrb[242].mxu1 %vm210_vm0, %v5737_v24  ;;  %v5739_v58 = vmul.f32 %v13884_v27, %v13176_v44 }
 0x575   : > { %16857 = vst [vmem:[#allocation68_spill] sm:$0xff] %v13889_v12  ;;  %v5738_v59 = vmul.f32 %v13889_v12, %v13173_v26 }
 0x577   : > { %v13898_v0 = vpop.f32.mrb[182].mxu1  ;;  %v13900_v1 = vpop.f32.mrb[182].mxu0  ;;  %9407 = vmatprep.mubr.msk.f32.mxu1 %vm210_vm0, %v5738_v59 }
 0x578   : > { %16858 = vst [vmem:[#allocation125_spill] sm:$0xff] %v13898_v0  ;;  %16859 = vst [vmem:[#allocation24_spill] sm:$0xff] %v13900_v1  ;;  %v13903_v63 = vpop.f32.mrb[183].mxu1  ;;  %v13905_v46 = vpop.f32.mrb[183].mxu0  ;;  %9408 = vmatmul.mubr.msk.f32.gmra.mrb[244].mxu1 %vm210_vm0, %v5739_v58  ;;  %v5741_v12 = vmul.f32 %v13898_v0, %v13190_v36 }
 0x579   : > { %16860 = vst [vmem:[#allocation65_spill] sm:$0xff] %v13903_v63  ;;  %16861 = vst [vmem:[#allocation136_spill] sm:$0xff] %v13905_v46  ;;  %v5740_v24 = vmul.f32 %v13903_v63, %v13187_v57 }
 0x57b   : > { %v13912_v52 = vpop.f32.mrb[184].mxu1  ;;  %v13914_v27 = vpop.f32.mrb[184].mxu0  ;;  %9410 = vmatprep.mubr.msk.f32.mxu1 %vm210_vm0, %v5740_v24 }
 0x57c   : > { %16862 = vst [vmem:[#allocation66_spill] sm:$0xff] %v13912_v52  ;;  %16863 = vst [vmem:[#allocation123_spill] sm:$0xff] %v13914_v27  ;;  %v13917_v44 = vpop.f32.mrb[185].mxu1  ;;  %v13919_v59 = vpop.f32.mrb[185].mxu0  ;;  %9411 = vmatmul.mubr.msk.f32.gmra.mrb[246].mxu1 %vm210_vm0, %v5741_v12  ;;  %v5743_v63 = vmul.f32 %v13912_v52, %v13204_v16 }
 0x57d   : > { %16864 = vst [vmem:[#allocation25_spill] sm:$0xff] %v13917_v44  ;;  %16865 = vst [vmem:[#allocation71_spill] sm:$0xff] %v13919_v59  ;;  %v5742_v58 = vmul.f32 %v13917_v44, %v13201_v50 }
 0x57f   : > { %v13926_v57 = vpop.f32.mrb[186].mxu1  ;;  %v13928_v0 = vpop.f32.mrb[186].mxu0  ;;  %9413 = vmatprep.mubr.msk.f32.mxu1 %vm210_vm0, %v5742_v58 }
 0x580   : > { %16866 = vst [vmem:[#allocation72_spill] sm:$0xff] %v13926_v57  ;;  %16867 = vst [vmem:[#allocation129_spill] sm:$0xff] %v13928_v0  ;;  %v13931_v36 = vpop.f32.mrb[187].mxu1  ;;  %v13933_v24 = vpop.f32.mrb[187].mxu0  ;;  %9414 = vmatmul.mubr.msk.f32.gmra.mrb[248].mxu1 %vm210_vm0, %v5743_v63  ;;  %v5745_v44 = vmul.f32 %v13926_v57, %v13218_v35 }
 0x581   : > { %16868 = vst [vmem:[#allocation27_spill] sm:$0xff] %v13931_v36  ;;  %16869 = vst [vmem:[#allocation187_spill] sm:$0xff] %v13933_v24  ;;  %v5744_v12 = vmul.f32 %v13931_v36, %v13215_v3 }
 0x583   : > { %v13940_v50 = vpop.f32.mrb[188].mxu1  ;;  %v13942_v52 = vpop.f32.mrb[188].mxu0  ;;  %9416 = vmatprep.mubr.msk.f32.mxu1 %vm210_vm0, %v5744_v12 }
 0x584   : > { %16870 = vst [vmem:[#allocation69_spill] sm:$0xff] %v13940_v50  ;;  %16871 = vst [vmem:[#allocation190_spill] sm:$0xff] %v13942_v52  ;;  %v13945_v16 = vpop.f32.mrb[189].mxu1  ;;  %v13947_v58 = vpop.f32.mrb[189].mxu0  ;;  %9417 = vmatmul.mubr.msk.f32.gmra.mrb[250].mxu1 %vm210_vm0, %v5745_v44  ;;  %v5747_v36 = vmul.f32 %v13940_v50, %v13232_v6 }
 0x585   : > { %16872 = vst [vmem:[#allocation70_spill] sm:$0xff] %v13945_v16  ;;  %16873 = vst [vmem:[#allocation10_spill] sm:$0xff] %v13947_v58  ;;  %v5746_v63 = vmul.f32 %v13945_v16, %v13229_v13 }
 0x587   : > { %v13954_v3 = vpop.f32.mrb[190].mxu1  ;;  %v13956_v57 = vpop.f32.mrb[190].mxu0  ;;  %9419 = vmatprep.mubr.msk.f32.mxu1 %vm210_vm0, %v5746_v63 }
 0x588   : > { %16874 = vst [vmem:[#allocation127_spill] sm:$0xff] %v13954_v3  ;;  %16875 = vst [vmem:[#allocation138_spill] sm:$0xff] %v13956_v57  ;;  %v13959_v35 = vpop.f32.mrb[191].mxu1  ;;  %v13961_v12 = vpop.f32.mrb[191].mxu0  ;;  %9420 = vmatmul.mubr.msk.f32.gmra.mrb[252].mxu1 %vm210_vm0, %v5747_v36  ;;  %v5749_v16 = vmul.f32 %v13954_v3, %v13246_v32 }
 0x589   : > { %16876 = vst [vmem:[#allocation26_spill] sm:$0xff] %v13959_v35  ;;  %16877 = vst [vmem:[#allocation75_spill] sm:$0xff] %v13961_v12  ;;  %v5748_v44 = vmul.f32 %v13959_v35, %v13243_v14 }
 0x58b   : > { %v13968_v13 = vpop.f32.mrb[192].mxu1  ;;  %v13970_v50 = vpop.f32.mrb[192].mxu0  ;;  %9422 = vmatprep.mubr.msk.f32.mxu1 %vm210_vm0, %v5748_v44 }
 0x58c   : > { %16878 = vst [vmem:[#allocation106_spill] sm:$0xff] %v13968_v13  ;;  %16879 = vst [vmem:[#allocation76_spill] sm:$0xff] %v13970_v50  ;;  %v13973_v6 = vpop.f32.mrb[193].mxu1  ;;  %v13975_v63 = vpop.f32.mrb[193].mxu0  ;;  %9423 = vmatmul.mubr.msk.f32.gmra.mrb[254].mxu1 %vm210_vm0, %v5749_v16  ;;  %v5751_v35 = vmul.f32 %v13968_v13, %v13260_v62 }
 0x58d   : > { %16880 = vst [vmem:[#allocation133_spill] sm:$0xff] %v13973_v6  ;;  %16881 = vst [vmem:[#allocation140_spill] sm:$0xff] %v13975_v63  ;;  %v5750_v36 = vmul.f32 %v13973_v6, %v13257_v29 }
 0x58f   : > { %v13982_v14 = vpop.f32.mrb[194].mxu1  ;;  %v13984_v3 = vpop.f32.mrb[194].mxu0  ;;  %9425 = vmatprep.mubr.msk.f32.mxu1 %vm210_vm0, %v5750_v36 }
 0x590   : > { %16882 = vst [vmem:[#allocation29_spill] sm:$0xff] %v13982_v14  ;;  %16883 = vst [vmem:[#allocation188_spill] sm:$0xff] %v13984_v3  ;;  %v13987_v32 = vpop.f32.mrb[195].mxu1  ;;  %v13989_v44 = vpop.f32.mrb[195].mxu0  ;;  %9426 = vmatmul.mubr.msk.f32.gmra.mrb[0].mxu1 %vm210_vm0, %v5751_v35  ;;  %v5753_v6 = vmul.f32 %v13982_v14, %v13274_v18 }
 0x591   : > { %16884 = vst [vmem:[#allocation73_spill] sm:$0xff] %v13987_v32  ;;  %16885 = vst [vmem:[#allocation189_spill] sm:$0xff] %v13989_v44  ;;  %v5752_v16 = vmul.f32 %v13987_v32, %v13271_v45 }
 0x593   : > { %v13996_v29 = vpop.f32.mrb[196].mxu1  ;;  %v13998_v41 = vpop.f32.mrb[196].mxu0  ;;  %9428 = vmatprep.mubr.msk.f32.mxu1 %vm210_vm0, %v5752_v16 }
 0x594   : > { %16886 = vst [vmem:[#allocation74_spill] sm:$0xff] %v13996_v29  ;;  %16887 = vst [vmem:[#allocation43_spill] sm:$0xff] %v13998_v41  ;;  %v14001_v39 = vpop.f32.mrb[197].mxu1  ;;  %v14003_v36 = vpop.f32.mrb[197].mxu0  ;;  %9429 = vmatmul.mubr.msk.f32.gmra.mrb[2].mxu1 %vm210_vm0, %v5753_v6  ;;  %v5755_v32 = vmul.f32 %v13996_v29, %v13288_v28 }
 0x595   : > { %16888 = vst [vmem:[#allocation131_spill] sm:$0xff] %v14001_v39  ;;  %16889 = vst [vmem:[#allocation44_spill] sm:$0xff] %v14003_v36  ;;  %v5754_v35 = vmul.f32 %v14001_v39, %v13285_v9 }
 0x597   : > { %v14010_v45 = vpop.f32.mrb[198].mxu1  ;;  %v14012_v14 = vpop.f32.mrb[198].mxu0  ;;  %9431 = vmatprep.mubr.msk.f32.mxu1 %vm210_vm0, %v5754_v35 }
 0x598   : > { %16890 = vst [vmem:[#allocation28_spill] sm:$0xff] %v14010_v45  ;;  %16891 = vst [vmem:[#allocation13_spill] sm:$0xff] %v14012_v14  ;;  %v14015_v18 = vpop.f32.mrb[199].mxu1  ;;  %v14017_v16 = vpop.f32.mrb[199].mxu0  ;;  %9432 = vmatmul.mubr.msk.f32.gmra.mrb[4].mxu1 %vm210_vm0, %v5755_v32  ;;  %v5757_v39 = vmul.f32 %v14010_v45, %v13302_v40 }
 0x599   : > { %16892 = vst [vmem:[#allocation79_spill] sm:$0xff] %v14015_v18  ;;  %16893 = vst [vmem:[#allocation80_spill] sm:$0xff] %v14017_v16  ;;  %v5756_v6 = vmul.f32 %v14015_v18, %v13299_v56 }
 0x59b   : > { %v14024_v9 = vpop.f32.mrb[200].mxu1  ;;  %v14026_v29 = vpop.f32.mrb[200].mxu0  ;;  %9434 = vmatprep.mubr.msk.f32.mxu1 %vm210_vm0, %v5756_v6 }
 0x59c   : > { %16894 = vst [vmem:[#allocation137_spill] sm:$0xff] %v14024_v9  ;;  %16895 = vst [vmem:[#allocation47_spill] sm:$0xff] %v14026_v29  ;;  %v14029_v28 = vpop.f32.mrb[201].mxu1  ;;  %v14031_v35 = vpop.f32.mrb[201].mxu0  ;;  %9435 = vmatmul.mubr.msk.f32.gmra.mrb[6].mxu1 %vm210_vm0, %v5757_v39  ;;  %v5759_v18 = vmul.f32 %v14024_v9, %v13316_v22 }
 0x59d   : > { %16896 = vst [vmem:[#allocation31_spill] sm:$0xff] %v14029_v28  ;;  %16897 = vst [vmem:[#allocation191_spill] sm:$0xff] %v14031_v35  ;;  %v5758_v32 = vmul.f32 %v14029_v28, %v13313_v15 }
 0x59f   : > { %v14038_v56 = vpop.f32.mrb[202].mxu1  ;;  %v14040_v45 = vpop.f32.mrb[202].mxu0  ;;  %9437 = vmatprep.mubr.msk.f32.mxu1 %vm210_vm0, %v5758_v32 }
 0x5a0   : > { %16898 = vst [vmem:[#allocation77_spill] sm:$0xff] %v14038_v56  ;;  %16899 = vst [vmem:[#allocation192_spill] sm:$0xff] %v14040_v45  ;;  %v14043_v40 = vpop.f32.mrb[203].mxu1  ;;  %v14045_v6 = vpop.f32.mrb[203].mxu0  ;;  %9438 = vmatmul.mubr.msk.f32.gmra.mrb[8].mxu1 %vm210_vm0, %v5759_v18  ;;  %v5761_v28 = vmul.f32 %v14038_v56, %v13330_v2 }
 0x5a1   : > { %16900 = vst [vmem:[#allocation78_spill] sm:$0xff] %v14043_v40  ;;  %16901 = vst [vmem:[#allocation142_spill] sm:$0xff] %v14045_v6  ;;  %v5760_v39 = vmul.f32 %v14043_v40, %v13327_v49 }
 0x5a3   : > { %v14052_v15 = vpop.f32.mrb[204].mxu1  ;;  %v14054_v9 = vpop.f32.mrb[204].mxu0  ;;  %9440 = vmatprep.mubr.msk.f32.mxu1 %vm210_vm0, %v5760_v39 }
 0x5a4   : > { %16902 = vst [vmem:[#allocation6_spill] sm:$0xff] %v14052_v15  ;;  %16903 = vst [vmem:[#allocation135_spill] sm:$0xff] %v14054_v9  ;;  %v14057_v22 = vpop.f32.mrb[205].mxu1  ;;  %v14059_v32 = vpop.f32.mrb[205].mxu0  ;;  %9441 = vmatmul.mubr.msk.f32.gmra.mrb[10].mxu1 %vm210_vm0, %v5761_v28  ;;  %v5763_v40 = vmul.f32 %v14052_v15, %v13344_v60 }
 0x5a5   : > { %16904 = vst [vmem:[#allocation193_spill] sm:$0xff] %v14057_v22  ;;  %16905 = vst [vmem:[#allocation30_spill] sm:$0xff] %v14059_v32  ;;  %v5762_v18 = vmul.f32 %v14057_v22, %v13341_v5  ;;  %v153_v5 = vld [vmem:[%s15613_s1 + $0x40] sm:$0xff] }
 0x5a7   : > { %v14066_v49 = vpop.f32.mrb[206].mxu1  ;;  %v14068_v56 = vpop.f32.mrb[206].mxu0  ;;  %9443 = vmatprep.mubr.msk.f32.mxu1 %vm210_vm0, %v5762_v18  ;;  %v154_v18 = vld [vmem:[%s15613_s1 + $0x48] sm:$0xff] }
 0x5a8   : > { %16906 = vst [vmem:[#allocation83_spill] sm:$0xff] %v14066_v49  ;;  %16907 = vst [vmem:[#allocation45_spill] sm:$0xff] %v14068_v56  ;;  %v14071_v2 = vpop.f32.mrb[207].mxu1  ;;  %v14073_v39 = vpop.f32.mrb[207].mxu0  ;;  %9444 = vmatmul.mubr.msk.f32.gmra.mrb[12].mxu1 %vm210_vm0, %v5763_v40  ;;  %v5765_v22 = vmul.f32 %v14066_v49, %v13358_v8  ;;  %v9633_v15 = vpack.c.bf16 %v154_v18, %v153_v5 }
 0x5a9   : > { %16908 = vst [vmem:[#allocation194_spill] sm:$0xff] %v14071_v2  ;;  %16909 = vst [vmem:[#allocation84_spill] sm:$0xff] %v14073_v39  ;;  %v5764_v28 = vmul.f32 %v14071_v2, %v13355_v7 }
 0x5aa   : > { %9634 = vmatprep.subr.bf16.mxu0 %v9633_v15 }
 0x5ab   : > { %9446 = vmatprep.mubr.msk.f32.mxu1 %vm210_vm0, %v5764_v28  ;;  %9636 = vmatpush3.bf16.msra.mxu0 %v9633_v15 }
 0x5ac   : > { %9447 = vmatmul.mubr.msk.f32.gmra.mrb[14].mxu1 %vm210_vm0, %v5765_v22  ;;  %9638 = vmatprep.subr.bf16.mxu0 %v9637_v54 }
 0x5af   : > { %9640 = vmatpush3.bf16.msra.mxu0 %v9637_v54 }
 0x5bc   : > { %v14088_v40 = vpop.f32.mrb[208].mxu1  ;;  %v14090_v2 = vpop.f32.mrb[208].mxu0 }
 0x5bd   : > { %v6088_v28 = vmax.f32 %v13856_v43, %v14088_v40  ;;  %v14094_v7 = vpop.f32.mrb[209].mxu1  ;;  %v14096_v49 = vpop.f32.mrb[209].mxu0 }
 0x5be   : > { %v6087_v8 = vmax.f32 %v13862_v20, %v14094_v7 }
 0x5bf   : > { %v14101_v60 = vmax.f32 %v6088_v28, %v14090_v2 }
 0x5c0   : > { %v14104_v22 = vmax.f32 %v6087_v8, %v14096_v49 }
 0x5c9   : > { %v14106_v15 = vpop.f32.mrb[210].mxu1  ;;  %v14108_v5 = vpop.f32.mrb[210].mxu0 }
 0x5ca   : > { %v6090_v18 = vmax.f32 %v13872_v48, %v14106_v15  ;;  %v14112_v13 = vpop.f32.mrb[211].mxu1  ;;  %v14114_v4 = vpop.f32.mrb[211].mxu0 }
 0x5cb   : > { %v6089_v23 = vmax.f32 %v13877_v31, %v14112_v13 }
 0x5cc   : > { %v14119_v28 = vmax.f32 %v6090_v18, %v14108_v5 }
 0x5cd   : > { %v14122_v8 = vmax.f32 %v6089_v23, %v14114_v4 }
 0x5d9   : > { %v14124_v62 = vpop.f32.mrb[212].mxu1  ;;  %v14126_v26 = vpop.f32.mrb[212].mxu0 }
 0x5da   : > { %v6092_v17 = vmax.f32 %v13886_v55, %v14124_v62  ;;  %v14130_v51 = vpop.f32.mrb[213].mxu1  ;;  %v14132_v34 = vpop.f32.mrb[213].mxu0 }
 0x5db   : > { %v6091_v53 = vmax.f32 %v13891_v61, %v14130_v51 }
 0x5dc   : > { %v14137_v18 = vmax.f32 %v6092_v17, %v14126_v26 }
 0x5dd   : > { %v14140_v23 = vmax.f32 %v6091_v53, %v14132_v34 }
 0x5e7   : > { %v14148_v33 = vpop.f32.mrb[214].mxu1  ;;  %v14150_v19 = vpop.f32.mrb[214].mxu0 }
 0x5e8   : > { %16910 = vst [vmem:[#allocation141_spill] sm:$0xff] %v14148_v33  ;;  %16911 = vst [vmem:[#allocation33_spill] sm:$0xff] %v14150_v19  ;;  %v6094_v17 = vmax.f32 %v13900_v1, %v14148_v33  ;;  %v14154_v53 = vpop.f32.mrb[215].mxu1  ;;  %v14156_v38 = vpop.f32.mrb[215].mxu0 }
 0x5e9   : > { %16912 = vst [vmem:[#allocation5_spill] sm:$0xff] %v14154_v53  ;;  %16913 = vst [vmem:[#allocation81_spill] sm:$0xff] %v14156_v38  ;;  %v6093_v21 = vmax.f32 %v13905_v46, %v14154_v53 }
 0x5ea   : > { %v14161_v30 = vmax.f32 %v6094_v17, %v14150_v19 }
 0x5eb   : > { %v14164_v11 = vmax.f32 %v6093_v21, %v14156_v38 }
 0x5f7   : > { %v14166_v54 = vpop.f32.mrb[216].mxu1  ;;  %v14168_v25 = vpop.f32.mrb[216].mxu0 }
 0x5f8   : > { %16914 = vst [vmem:[#allocation48_spill] sm:$0xff] %v14166_v54  ;;  %16915 = vst [vmem:[#allocation82_spill] sm:$0xff] %v14168_v25  ;;  %v6096_v33 = vmax.f32 %v13914_v27, %v14166_v54  ;;  %v14172_v1 = vpop.f32.mrb[217].mxu1  ;;  %v14174_v47 = vpop.f32.mrb[217].mxu0 }
 0x5f9   : > { %16916 = vst [vmem:[#allocation108_spill] sm:$0xff] %v14172_v1  ;;  %16917 = vst [vmem:[#allocation139_spill] sm:$0xff] %v14174_v47  ;;  %v6095_v53 = vmax.f32 %v13919_v59, %v14172_v1 }
 0x5fa   : > { %v14179_v17 = vmax.f32 %v6096_v33, %v14168_v25 }
 0x5fb   : > { %v14182_v21 = vmax.f32 %v6095_v53, %v14174_v47 }
 0x605   : > { %v14184_v38 = vpop.f32.mrb[218].mxu1  ;;  %v14186_v46 = vpop.f32.mrb[218].mxu0 }
 0x606   : > { %16918 = vst [vmem:[#allocation14_spill] sm:$0xff] %v14184_v38  ;;  %v6098_v54 = vmax.f32 %v13928_v0, %v14184_v38  ;;  %v14190_v27 = vpop.f32.mrb[219].mxu1  ;;  %v14192_v19 = vpop.f32.mrb[219].mxu0 }
 0x607   : > { %16919 = vst [vmem:[#allocation32_spill] sm:$0xff] %v14190_v27  ;;  %16920 = vst [vmem:[#allocation87_spill] sm:$0xff] %v14192_v19  ;;  %v6097_v1 = vmax.f32 %v13933_v24, %v14190_v27 }
 0x608   : > { %v14197_v33 = vmax.f32 %v6098_v54, %v14186_v46 }
 0x609   : > { %v14200_v53 = vmax.f32 %v6097_v1, %v14192_v19 }
 0x60b   : > { %16921 = vst [vmem:[#allocation15_spill] sm:$0xff] %v14200_v53 }
 0x613   : > { %v14202_v47 = vpop.f32.mrb[220].mxu1  ;;  %v14204_v59 = vpop.f32.mrb[220].mxu0 }
 0x614   : > { %16922 = vst [vmem:[#allocation199_spill] sm:$0xff] %v14202_v47  ;;  %16923 = vst [vmem:[#allocation88_spill] sm:$0xff] %v14204_v59  ;;  %v6100_v38 = vmax.f32 %v13942_v52, %v14202_v47  ;;  %v14208_v0 = vpop.f32.mrb[221].mxu1  ;;  %v14210_v25 = vpop.f32.mrb[221].mxu0 }
 0x615   : > { %16924 = vst [vmem:[#allocation166_spill] sm:$0xff] %v14208_v0  ;;  %16925 = vst [vmem:[#allocation145_spill] sm:$0xff] %v14210_v25  ;;  %v6099_v27 = vmax.f32 %v13947_v58, %v14208_v0 }
 0x616   : > { %v14215_v54 = vmax.f32 %v6100_v38, %v14204_v59 }
 0x617   : > { %v14218_v1 = vmax.f32 %v6099_v27, %v14210_v25 }
 0x619   : > { %v14220_v19 = vpop.f32.mrb[222].mxu1  ;;  %v14222_v24 = vpop.f32.mrb[222].mxu0 }
 0x61a   : > { %16926 = vst [vmem:[#allocation195_spill] sm:$0xff] %v14220_v19  ;;  %16927 = vst [vmem:[#allocation35_spill] sm:$0xff] %v14222_v24  ;;  %v6102_v47 = vmax.f32 %v13956_v57, %v14220_v19  ;;  %v14226_v52 = vpop.f32.mrb[223].mxu1  ;;  %v14228_v53 = vpop.f32.mrb[223].mxu0 }
 0x61b   : > { %16928 = vst [vmem:[#allocation105_spill] sm:$0xff] %v14226_v52  ;;  %16929 = vst [vmem:[#allocation46_spill] sm:$0xff] %v14228_v53  ;;  %v6101_v0 = vmax.f32 %v13961_v12, %v14226_v52 }
 0x61c   : > { %v14233_v38 = vmax.f32 %v6102_v47, %v14222_v24 }
 0x61d   : > { %v14236_v27 = vmax.f32 %v6101_v0, %v14228_v53 }
 0x61f   : > { %v14238_v25 = vpop.f32.mrb[224].mxu1  ;;  %v14240_v58 = vpop.f32.mrb[224].mxu0 }
 0x620   : > { %16930 = vst [vmem:[#allocation85_spill] sm:$0xff] %v14238_v25  ;;  %v6104_v19 = vmax.f32 %v13970_v50, %v14238_v25  ;;  %v14244_v57 = vpop.f32.mrb[225].mxu1  ;;  %v14246_v59 = vpop.f32.mrb[225].mxu0 }
 0x621   : > { %16931 = vst [vmem:[#allocation107_spill] sm:$0xff] %v14244_v57  ;;  %16932 = vst [vmem:[#allocation86_spill] sm:$0xff] %v14246_v59  ;;  %v6103_v52 = vmax.f32 %v13975_v63, %v14244_v57 }
 0x622   : > { %v14251_v47 = vmax.f32 %v6104_v19, %v14240_v58 }
 0x623   : > { %v14254_v0 = vmax.f32 %v6103_v52, %v14246_v59 }
 0x625   : > { %16933 = vst [vmem:[#allocation112_spill] sm:$0xff] %v14254_v0  ;;  %v14256_v53 = vpop.f32.mrb[226].mxu1  ;;  %v14258_v12 = vpop.f32.mrb[226].mxu0 }
 0x626   : > { %16934 = vst [vmem:[#allocation143_spill] sm:$0xff] %v14256_v53  ;;  %v6106_v25 = vmax.f32 %v13984_v3, %v14256_v53  ;;  %v14262_v50 = vpop.f32.mrb[227].mxu1  ;;  %v14264_v24 = vpop.f32.mrb[227].mxu0 }
 0x627   : > { %16935 = vst [vmem:[#allocation200_spill] sm:$0xff] %v14262_v50  ;;  %16936 = vst [vmem:[#allocation34_spill] sm:$0xff] %v14264_v24  ;;  %v6105_v57 = vmax.f32 %v13989_v44, %v14262_v50 }
 0x628   : > { %v14269_v19 = vmax.f32 %v6106_v25, %v14258_v12 }
 0x629   : > { %v14272_v52 = vmax.f32 %v6105_v57, %v14264_v24  ;;  %v14274_v59 = vpop.f32.mrb[228].mxu1  ;;  %v14276_v63 = vpop.f32.mrb[228].mxu0 }
 0x62a   : > { %16938 = vst [vmem:[#allocation92_spill] sm:$0xff] %v14274_v59  ;;  %16939 = vst [vmem:[#allocation149_spill] sm:$0xff] %v14276_v63  ;;  %v6108_v53 = vmax.f32 %v13998_v41, %v14274_v59  ;;  %v14280_v3 = vpop.f32.mrb[229].mxu1  ;;  %v14282_v0 = vpop.f32.mrb[229].mxu0 }
 0x62b   : > { %16937 = vst [vmem:[#allocation91_spill] sm:$0xff] %v14272_v52  ;;  %16940 = vst [vmem:[#allocation37_spill] sm:$0xff] %v14280_v3  ;;  %v6107_v50 = vmax.f32 %v14003_v36, %v14280_v3 }
 0x62c   : > { %16941 = vst [vmem:[#allocation144_spill] sm:$0xff] %v14282_v0  ;;  %v14287_v25 = vmax.f32 %v6108_v53, %v14276_v63 }
 0x62d   : > { %v14290_v57 = vmax.f32 %v6107_v50, %v14282_v0 }
 0x62f   : > { %v14292_v24 = vpop.f32.mrb[230].mxu1  ;;  %v14294_v44 = vpop.f32.mrb[230].mxu0 }
 0x630   : > { %16942 = vst [vmem:[#allocation89_spill] sm:$0xff] %v14292_v24  ;;  %16943 = vst [vmem:[#allocation90_spill] sm:$0xff] %v14294_v44  ;;  %v6110_v59 = vmax.f32 %v14012_v14, %v14292_v24  ;;  %v14298_v41 = vpop.f32.mrb[231].mxu1  ;;  %v14300_v52 = vpop.f32.mrb[231].mxu0 }
 0x631   : > { %16944 = vst [vmem:[#allocation147_spill] sm:$0xff] %v14298_v41  ;;  %16945 = vst [vmem:[#allocation36_spill] sm:$0xff] %v14300_v52  ;;  %v6109_v3 = vmax.f32 %v14017_v16, %v14298_v41 }
 0x632   : > { %v14305_v53 = vmax.f32 %v6110_v59, %v14294_v44 }
 0x633   : > { %v14308_v50 = vmax.f32 %v6109_v3, %v14300_v52  ;;  %v14310_v0 = vpop.f32.mrb[232].mxu1  ;;  %v14312_v36 = vpop.f32.mrb[232].mxu0 }
 0x634   : > { %16946 = vst [vmem:[#allocation95_spill] sm:$0xff] %v14305_v53  ;;  %16948 = vst [vmem:[#allocation153_spill] sm:$0xff] %v14310_v0  ;;  %v6112_v24 = vmax.f32 %v14026_v29, %v14310_v0  ;;  %v14316_v14 = vpop.f32.mrb[233].mxu1  ;;  %v14318_v63 = vpop.f32.mrb[233].mxu0  ;;  %v17002_v53 = vld [vmem:[#allocation87_spill] sm:$0xff] }
 0x635   : > { %16947 = vst [vmem:[#allocation96_spill] sm:$0xff] %v14308_v50  ;;  %16949 = vst [vmem:[#allocation39_spill] sm:$0xff] %v14312_v36  ;;  %v6111_v41 = vmax.f32 %v14031_v35, %v14316_v14 }
 0x636   : > { %16950 = vst [vmem:[#allocation93_spill] sm:$0xff] %v14316_v14  ;;  %16951 = vst [vmem:[#allocation118_spill] sm:$0xff] %v14318_v63  ;;  %v14323_v59 = vmax.f32 %v6112_v24, %v14312_v36 }
 0x637   : > { %v14326_v3 = vmax.f32 %v6111_v41, %v14318_v63  ;;  %v14328_v52 = vpop.f32.mrb[234].mxu1  ;;  %v14330_v16 = vpop.f32.mrb[234].mxu0 }
 0x638   : > { %16952 = vst [vmem:[#allocation196_spill] sm:$0xff] %v14323_v59  ;;  %16954 = vst [vmem:[#allocation151_spill] sm:$0xff] %v14328_v52  ;;  %v6114_v0 = vmax.f32 %v14040_v45, %v14328_v52  ;;  %v14334_v29 = vpop.f32.mrb[235].mxu1  ;;  %v14336_v44 = vpop.f32.mrb[235].mxu0  ;;  %v16990_v59 = vld [vmem:[#allocation139_spill] sm:$0xff] }
 0x639   : > { %16953 = vst [vmem:[#allocation94_spill] sm:$0xff] %v14326_v3  ;;  %16955 = vst [vmem:[#allocation38_spill] sm:$0xff] %v14330_v16  ;;  %v6113_v14 = vmax.f32 %v14045_v6, %v14334_v29 }
 0x63a   : > { %16956 = vst [vmem:[#allocation99_spill] sm:$0xff] %v14334_v29  ;;  %16957 = vst [vmem:[#allocation100_spill] sm:$0xff] %v14336_v44  ;;  %v14341_v24 = vmax.f32 %v6114_v0, %v14330_v16 }
 0x63b   : > { %v14344_v41 = vmax.f32 %v6113_v14, %v14336_v44  ;;  %v14346_v63 = vpop.f32.mrb[236].mxu1  ;;  %v14348_v35 = vpop.f32.mrb[236].mxu0 }
 0x63c   : > { %16958 = vst [vmem:[#allocation157_spill] sm:$0xff] %v14341_v24  ;;  %16960 = vst [vmem:[#allocation97_spill] sm:$0xff] %v14346_v63  ;;  %v6116_v52 = vmax.f32 %v14054_v9, %v14346_v63  ;;  %v14352_v45 = vpop.f32.mrb[237].mxu1  ;;  %v14354_v36 = vpop.f32.mrb[237].mxu0 }
 0x63d   : > { %16959 = vst [vmem:[#allocation41_spill] sm:$0xff] %v14344_v41  ;;  %16961 = vst [vmem:[#allocation98_spill] sm:$0xff] %v14348_v35  ;;  %v6115_v29 = vmax.f32 %v14059_v32, %v14352_v45 }
 0x63e   : > { %16962 = vst [vmem:[#allocation146_spill] sm:$0xff] %v14352_v45  ;;  %16963 = vst [vmem:[#allocation155_spill] sm:$0xff] %v14354_v36  ;;  %v14359_v0 = vmax.f32 %v6116_v52, %v14348_v35 }
 0x63f   : > { %v14362_v14 = vmax.f32 %v6115_v29, %v14354_v36  ;;  %v14364_v44 = vpop.f32.mrb[238].mxu1  ;;  %v14366_v6 = vpop.f32.mrb[238].mxu0 }
 0x640   : > { %16964 = vst [vmem:[#allocation197_spill] sm:$0xff] %v14359_v0  ;;  %16966 = vst [vmem:[#allocation103_spill] sm:$0xff] %v14364_v44  ;;  %v6118_v63 = vmax.f32 %v14068_v56, %v14364_v44  ;;  %v14370_v9 = vpop.f32.mrb[239].mxu1  ;;  %v14372_v16 = vpop.f32.mrb[239].mxu0 }
 0x641   : > { %16965 = vst [vmem:[#allocation40_spill] sm:$0xff] %v14362_v14  ;;  %16967 = vst [vmem:[#allocation198_spill] sm:$0xff] %v14366_v6  ;;  %v6117_v45 = vmax.f32 %v14073_v39, %v14370_v9 }
 0x642   : > { %16968 = vst [vmem:[#allocation104_spill] sm:$0xff] %v14370_v9  ;;  %16969 = vst [vmem:[#allocation161_spill] sm:$0xff] %v14372_v16  ;;  %v14377_v52 = vmax.f32 %v6118_v63, %v14366_v6 }
 0x643   : > { %v14380_v29 = vmax.f32 %v6117_v45, %v14372_v16  ;;  %v9403_v36 = vpop.f32.mrb[240].mxu1 }
 0x644   : > { %16970 = vst [vmem:[#allocation42_spill] sm:$0xff] %v14377_v52  ;;  %v6152_v32 = vmax.f32 %v14101_v60, %v9403_v36  ;;  %v5928_v35 = vpop.f32.mrb[241].mxu1 }
 0x645   : > { %16971 = vst [vmem:[#allocation101_spill] sm:$0xff] %v14380_v29  ;;  %v6151_v14 = vmax.f32 %v14104_v22, %v5928_v35 }
 0x646   : > { %v6184_v44 = vsub.f32 %v13856_v43, %v6152_v32  ;;  %v6280_v56 = vsub.f32 %v14088_v40, %v6152_v32  ;;  %v6376_v0 = vsub.f32 %v14090_v2, %v6152_v32  ;;  %v6472_v41 = vsub.f32 %v9403_v36, %v6152_v32 }
 0x647   : > { %v6183_v9 = vsub.f32 %v13862_v20, %v6151_v14  ;;  %v6279_v63 = vsub.f32 %v14094_v7, %v6151_v14  ;;  %v6375_v45 = vsub.f32 %v14096_v49, %v6151_v14  ;;  %v6471_v16 = vsub.f32 %v5928_v35, %v6151_v14  ;;  %v9406_v39 = vpop.f32.mrb[242].mxu1 }
 0x648   : > { %v6217_v6 = vmul.f32 1.442695, %v6184_v44  ;;  %v6313_v60 = vmul.f32 1.442695, %v6280_v56  ;;  %v6409_v29 = vmul.f32 1.442695, %v6376_v0  ;;  %v6154_v22 = vmax.f32 %v14119_v28, %v9406_v39 }
 0x649   : > { %v6505_v52 = vmul.f32 1.442695, %v6472_v41  ;;  %v6215_v43 = vmul.f32 1.442695, %v6183_v9  ;;  %v6311_v40 = vmul.f32 1.442695, %v6279_v63 }
 0x64a   : > { %10006 = vpow2.f32 %v6217_v6  ;;  %v6407_v24 = vmul.f32 1.442695, %v6375_v45  ;;  %v6186_v2 = vsub.f32 %v13872_v48, %v6154_v22  ;;  %v5938_v36 = vpop.f32.mrb[243].mxu1  ;;  %v6282_v7 = vsub.f32 %v14106_v15, %v6154_v22 }
 0x64b   : > { %10008 = vpow2.f32 %v6313_v60  ;;  %v6378_v49 = vsub.f32 %v14108_v5, %v6154_v22  ;;  %v6474_v20 = vsub.f32 %v9406_v39, %v6154_v22  ;;  %v9409_v35 = vpop.f32.mrb[244].mxu1  ;;  %v6503_v56 = vmul.f32 1.442695, %v6471_v16 }
 0x64c   : > { %10010 = vpow2.f32 %v6409_v29  ;;  %v6153_v44 = vmax.f32 %v14122_v8, %v5938_v36  ;;  %v6156_v32 = vmax.f32 %v14137_v18, %v9409_v35  ;;  %v14396_v9 = vpop.f32.mrb[245].mxu1  ;;  %v6221_v6 = vmul.f32 1.442695, %v6186_v2 }
 0x64d   : > { %10012 = vpow2.f32 %v6505_v52  ;;  %v6317_v28 = vmul.f32 1.442695, %v6282_v7  ;;  %v6413_v48 = vmul.f32 1.442695, %v6378_v49  ;;  %v6509_v0 = vmul.f32 1.442695, %v6474_v20 }
 0x64e   : > { %10014 = vpow2.f32 %v6215_v43  ;;  %v6185_v41 = vsub.f32 %v13877_v31, %v6153_v44  ;;  %v6281_v15 = vsub.f32 %v14112_v13, %v6153_v44  ;;  %v6377_v39 = vsub.f32 %v14114_v4, %v6153_v44 }
 0x64f   : > { %10016 = vpow2.f32 %v6311_v40  ;;  %v6473_v5 = vsub.f32 %v5938_v36, %v6153_v44  ;;  %v6188_v16 = vsub.f32 %v13886_v55, %v6156_v32  ;;  %v6284_v8 = vsub.f32 %v14124_v62, %v6156_v32  ;;  %v14403_v18 = vpop.f32.mrb[246].mxu1 }
 0x650   : > { %10018 = vpow2.f32 %v6407_v24  ;;  %v6219_v14 = vmul.f32 1.442695, %v6185_v41  ;;  %v6315_v52 = vmul.f32 1.442695, %v6281_v15  ;;  %v6411_v29 = vmul.f32 1.442695, %v6377_v39 }
 0x651   : > { %10020 = vpow2.f32 %v6503_v56  ;;  %v6507_v63 = vmul.f32 1.442695, %v6473_v5  ;;  %v6225_v31 = vmul.f32 1.442695, %v6188_v16  ;;  %v6380_v13 = vsub.f32 %v14126_v26, %v6156_v32  ;;  %v14408_v55 = vpop.f32.mrb[247].mxu1  ;;  %v16972_v41 = vld [vmem:[#allocation220_spill] sm:$0xff] }
 0x652   : > { %10022 = vpow2.f32 %v6221_v6  ;;  %v6476_v4 = vsub.f32 %v9409_v35, %v6156_v32  ;;  %v6155_v45 = vmax.f32 %v14140_v23, %v14396_v9  ;;  %v6321_v62 = vmul.f32 1.442695, %v6284_v8  ;;  %v16974_v16 = vld [vmem:[#allocation141_spill] sm:$0xff] }
 0x653   : > { %10024 = vpow2.f32 %v6317_v28  ;;  %v14412_v24 = vmax.f32 %v14161_v30, %v14403_v18  ;;  %v14416_v60 = vmax.f32 %v14164_v11, %v14408_v55  ;;  %v14418_v22 = vpop.f32.mrb[248].mxu1  ;;  %v6417_v26 = vmul.f32 1.442695, %v6380_v13 }
 0x654   : > { %v10007_v43 = vpop.eup %10006  ;;  %10026 = vpow2.f32 %v6413_v48  ;;  %v6513_v40 = vmul.f32 1.442695, %v6476_v4  ;;  %v6187_v23 = vsub.f32 %v13891_v61, %v6155_v45  ;;  %v14421_v2 = vpop.f32.mrb[249].mxu1  ;;  %v6283_v30 = vsub.f32 %v14130_v51, %v6155_v45 }
 0x655   : > { %v10009_v36 = vpop.eup %10008  ;;  %v6664_v7 = vmul.f32 %v10007_v43, %v13140_v42  ;;  %10028 = vpow2.f32 %v6509_v0  ;;  %v6379_v49 = vsub.f32 %v14132_v34, %v6155_v45  ;;  %v6475_v39 = vsub.f32 %v14396_v9, %v6155_v45 }
 0x656   : > { %v10011_v11 = vpop.eup %10010  ;;  %v6568_v20 = vadd.f32 %v10009_v36, %v10007_v43  ;;  %v6696_v35 = vmul.f32 %v10009_v36, %v13535_v37  ;;  %10030 = vpow2.f32 %v6219_v14  ;;  %v6223_v56 = vmul.f32 1.442695, %v6187_v23  ;;  %v16975_v36 = vld [vmem:[#allocation33_spill] sm:$0xff] }
 0x657   : > { %v10013_v44 = vpop.eup %10012  ;;  %v6760_v32 = vmul.f32 %v10011_v11, %v13537_v10  ;;  %10032 = vpow2.f32 %v6315_v52  ;;  %v6319_v61 = vmul.f32 1.442695, %v6283_v30  ;;  %v6415_v6 = vmul.f32 1.442695, %v6379_v49  ;;  %v14428_v28 = vpop.f32.mrb[250].mxu1  ;;  %v16973_v10 = vld [vmem:[#allocation24_spill] sm:$0xff] }
 0x658   : > { %v14430_v42 = vpop.eup %10014  ;;  %v6600_v48 = vadd.f32 %v10011_v11, %v6568_v20  ;;  %v6728_v51 = vadd.f32 %v6696_v35, %v6664_v7  ;;  %v6824_v34 = vmul.f32 %v10013_v44, %v16972_v41  ;;  %10034 = vpow2.f32 %v6411_v29  ;;  %v14433_v15 = vpop.f32.mrb[251].mxu1  ;;  %v16977_v20 = vld [vmem:[#allocation5_spill] sm:$0xff] }
 0x659   : > { %v14435_v37 = vpop.eup %10016  ;;  %10036 = vpow2.f32 %v6507_v63  ;;  %v6190_v5 = vsub.f32 %v16973_v10, %v14412_v24  ;;  %v6286_v8 = vsub.f32 %v16974_v16, %v14412_v24  ;;  %v6511_v63 = vmul.f32 1.442695, %v6475_v39 }
 0x65a   : > { %v14442_v0 = vpop.eup %10018  ;;  %v6632_v14 = vadd.f32 %v10013_v44, %v6600_v48  ;;  %v6792_v52 = vadd.f32 %v6760_v32, %v6728_v51  ;;  %v6567_v29 = vadd.f32 %v14435_v37, %v14430_v42  ;;  %10038 = vpow2.f32 %v6225_v31 }
 0x65b   : > { %v14446_v13 = vpop.eup %10020  ;;  %10040 = vpow2.f32 %v6321_v62  ;;  %v6229_v4 = vmul.f32 1.442695, %v6190_v5  ;;  %v6325_v9 = vmul.f32 1.442695, %v6286_v8  ;;  %v6382_v7 = vsub.f32 %v16975_v36, %v14412_v24  ;;  %v14455_v30 = vpop.f32.mrb[252].mxu1  ;;  %v16976_v62 = vld [vmem:[#allocation136_spill] sm:$0xff] }
 0x65c   : > { %v14448_v45 = vpop.eup %10022  ;;  %v14450_v43 = vadd.f32 %v6824_v34, %v6792_v52  ;;  %10042 = vrcp.f32 %v6632_v14  ;;  %v6599_v23 = vadd.f32 %v14442_v0, %v6567_v29  ;;  %v6478_v31 = vsub.f32 %v14403_v18, %v14412_v24  ;;  %v14465_v44 = vpop.f32.mrb[253].mxu1  ;;  %v16980_v5 = vld [vmem:[#allocation81_spill] sm:$0xff] }
 0x65d   : > { %v14457_v49 = vpop.eup %10024  ;;  %10044 = vpow2.f32 %v6417_v26  ;;  %v6189_v11 = vsub.f32 %v16976_v62, %v14416_v60  ;;  %v6285_v35 = vsub.f32 %v16977_v20, %v14416_v60  ;;  %v6421_v26 = vmul.f32 1.442695, %v6382_v7  ;;  %v16982_v62 = vld [vmem:[#allocation48_spill] sm:$0xff] }
 0x65e   : > { %v14467_v32 = vpop.eup %10026  ;;  %v6631_v48 = vadd.f32 %v14446_v13, %v6599_v23  ;;  %v6570_v51 = vadd.f32 %v14457_v49, %v14448_v45  ;;  %10046 = vpow2.f32 %v6513_v40  ;;  %v6517_v18 = vmul.f32 1.442695, %v6478_v31 }
 0x65f   : > { %16978 = vst [vmem:[#allocation51_spill] sm:$0xff] %v14467_v32  ;;  %v14472_v41 = vpop.eup %10028  ;;  %10048 = vpow2.f32 %v6223_v56  ;;  %v6227_v24 = vmul.f32 1.442695, %v6189_v11  ;;  %v6323_v34 = vmul.f32 1.442695, %v6285_v35  ;;  %v6381_v16 = vsub.f32 %v16980_v5, %v14416_v60  ;;  %v14481_v14 = vpop.f32.mrb[254].mxu1 }
 0x660   : > { %16979 = vst [vmem:[#allocation102_spill] sm:$0xff] %v14472_v41  ;;  %v14474_v39 = vpop.eup %10030  ;;  %10050 = vrcp.f32 %v6631_v48  ;;  %v6602_v10 = vadd.f32 %v14467_v32, %v6570_v51  ;;  %v6477_v8 = vsub.f32 %v14408_v55, %v14416_v60  ;;  %v6160_v56 = vmax.f32 %v14179_v17, %v14418_v22  ;;  %v14493_v23 = vpop.f32.mrb[255].mxu1  ;;  %v16984_v48 = vld [vmem:[#allocation82_spill] sm:$0xff] }
 0x661   : > { %v14483_v40 = vpop.eup %10032  ;;  %10052 = vpow2.f32 %v6319_v61  ;;  %v6159_v52 = vmax.f32 %v14182_v21, %v14421_v2  ;;  %v14491_v29 = vmax.f32 %v14197_v33, %v14428_v28  ;;  %v6419_v61 = vmul.f32 1.442695, %v6381_v16  ;;  %v16981_v21 = vld [vmem:[#allocation123_spill] sm:$0xff] }
 0x662   : > { %v14495_v36 = vpop.eup %10034  ;;  %v6634_v55 = vadd.f32 %v14472_v41, %v6602_v10  ;;  %v6569_v60 = vadd.f32 %v14483_v40, %v14474_v39  ;;  %10054 = vpow2.f32 %v6415_v6  ;;  %v6515_v17 = vmul.f32 1.442695, %v6477_v8  ;;  %v16986_v8 = vld [vmem:[#allocation71_spill] sm:$0xff] }
 0x663   : > { %v14500_v7 = vpop.eup %10036  ;;  %10056 = vpow2.f32 %v6511_v63  ;;  %v6192_v31 = vsub.f32 %v16981_v21, %v6160_v56  ;;  %v6288_v33 = vsub.f32 %v16982_v62, %v6160_v56  ;;  %v14504_v11 = vpop.f32.mrb[0].mxu1  ;;  %v6384_v51 = vsub.f32 %v16984_v48, %v6160_v56 }
 0x664   : > { %v14506_v20 = vpop.eup %10038  ;;  %10058 = vrcp.f32 %v6634_v55  ;;  %v6601_v35 = vadd.f32 %v14495_v36, %v6569_v60  ;;  %v6480_v6 = vsub.f32 %v14418_v22, %v6160_v56  ;;  %v14511_v10 = vpop.f32.mrb[1].mxu1  ;;  %v6191_v21 = vsub.f32 %v16986_v8, %v6159_v52 }
 0x665   : > { %16983 = vst [vmem:[#allocation159_spill] sm:$0xff] %v14506_v20  ;;  %v14513_v5 = vpop.eup %10040  ;;  %10060 = vpow2.f32 %v6229_v4  ;;  %v6233_v63 = vmul.f32 1.442695, %v6192_v31  ;;  %v6329_v16 = vmul.f32 1.442695, %v6288_v33  ;;  %v16988_v4 = vld [vmem:[#allocation108_spill] sm:$0xff] }
 0x666   : > { %16985 = vst [vmem:[#allocation116_spill] sm:$0xff] %v14513_v5  ;;  %v14516_v62 = vpop.eup %10042  ;;  %v6633_v3 = vadd.f32 %v14500_v7, %v6601_v35  ;;  %v6572_v55 = vadd.f32 %v14513_v5, %v14506_v20  ;;  %10062 = vpow2.f32 %v6325_v9  ;;  %v6425_v60 = vmul.f32 1.442695, %v6384_v51  ;;  %v16993_v20 = vld [vmem:[#allocation14_spill] sm:$0xff] }
 0x667   : > { %v14521_v48 = vpop.eup %10044  ;;  %10064 = vpow2.f32 %v6421_v26  ;;  %v14523_v22 = vmul.f32 1.442695, %v6480_v6  ;;  %v14525_v56 = vmul.f32 1.442695, %v6191_v21  ;;  %v6287_v31 = vsub.f32 %v16988_v4, %v6159_v52  ;;  %v14528_v33 = vpop.f32.mrb[2].mxu1  ;;  %v16992_v21 = vld [vmem:[#allocation129_spill] sm:$0xff] }
 0x668   : > { %16987 = vst [vmem:[#allocation52_spill] sm:$0xff] %v14521_v48  ;;  %v14530_v8 = vpop.eup %10046  ;;  %10066 = vrcp.f32 %v6633_v3  ;;  %v6604_v35 = vadd.f32 %v14521_v48, %v6572_v55  ;;  %v6383_v5 = vsub.f32 %v16990_v59, %v6159_v52  ;;  %v6479_v9 = vsub.f32 %v14421_v2, %v6159_v52  ;;  %v14535_v51 = vpop.f32.mrb[3].mxu1 }
 0x669   : > { %16989 = vst [vmem:[#allocation7_spill] sm:$0xff] %v14530_v8  ;;  %v14537_v26 = vpop.eup %10048  ;;  %10068 = vpow2.f32 %v6517_v18  ;;  %v14539_v6 = vmul.f32 1.442695, %v6287_v31  ;;  %v6194_v4 = vsub.f32 %v16992_v21, %v14491_v29  ;;  %v6290_v50 = vsub.f32 %v16993_v20, %v14491_v29 }
 0x66a   : > { %16991 = vst [vmem:[#allocation8_spill] sm:$0xff] %v14537_v26  ;;  %v14545_v3 = vpop.eup %10050  ;;  %v6636_v55 = vadd.f32 %v14530_v8, %v6604_v35  ;;  %10070 = vpow2.f32 %v6227_v24  ;;  %v14548_v59 = vmul.f32 1.442695, %v6383_v5  ;;  %v14550_v2 = vmul.f32 1.442695, %v6479_v9 }
 0x66b   : > { %v14552_v52 = vpop.eup %10052  ;;  %10072 = vpow2.f32 %v6323_v34  ;;  %v14554_v18 = vmul.f32 1.442695, %v6194_v4  ;;  %v14556_v31 = vmul.f32 1.442695, %v6290_v50  ;;  %v6386_v21 = vsub.f32 %v14186_v46, %v14491_v29  ;;  %v14560_v20 = vpop.f32.mrb[4].mxu1  ;;  %v16996_v34 = vld [vmem:[#allocation15_spill] sm:$0xff] }
 0x66c   : > { %16994 = vst [vmem:[#allocation11_spill] sm:$0xff] %v14552_v52  ;;  %v14562_v48 = vpop.eup %10054  ;;  %10074 = vrcp.f32 %v6636_v55  ;;  %v6571_v24 = vadd.f32 %v14552_v52, %v14537_v26  ;;  %v6482_v5 = vsub.f32 %v14428_v28, %v14491_v29  ;;  %v6161_v35 = vmax.f32 %v16996_v34, %v14433_v15  ;;  %v14570_v9 = vpop.f32.mrb[5].mxu1  ;;  %v16999_v34 = vld [vmem:[#allocation187_spill] sm:$0xff] }
 0x66d   : > { %16995 = vst [vmem:[#allocation12_spill] sm:$0xff] %v14562_v48  ;;  %v14572_v50 = vpop.eup %10056  ;;  %10076 = vpow2.f32 %v6419_v61  ;;  %v14574_v46 = vmul.f32 1.442695, %v6386_v21  ;;  %v6164_v4 = vmax.f32 %v14215_v54, %v14455_v30  ;;  %v14580_v55 = vmax.f32 %v14218_v1, %v14465_v44  ;;  %v17001_v61 = vld [vmem:[#allocation32_spill] sm:$0xff] }
 0x66e   : > { %16997 = vst [vmem:[#allocation220_spill] sm:$0xff] %v14572_v50  ;;  %v14582_v8 = vpop.eup %10058  ;;  %v6603_v28 = vadd.f32 %v14562_v48, %v6571_v24  ;;  %10078 = vpow2.f32 %v6515_v17  ;;  %v14585_v29 = vmul.f32 1.442695, %v6482_v5  ;;  %v6193_v52 = vsub.f32 %v16999_v34, %v6161_v35  ;;  %v17004_v5 = vld [vmem:[#allocation190_spill] sm:$0xff] }
 0x66f   : > { %16998 = vst [vmem:[#allocation24_spill] sm:$0xff] %v14582_v8  ;;  %v14588_v26 = vpop.eup %10060  ;;  %10080 = vpow2.f32 %v6233_v63  ;;  %v6289_v21 = vsub.f32 %v17001_v61, %v6161_v35  ;;  %v6385_v54 = vsub.f32 %v17002_v53, %v6161_v35  ;;  %v6481_v41 = vsub.f32 %v14433_v15, %v6161_v35  ;;  %v14593_v1 = vpop.f32.mrb[6].mxu1 }
 0x670   : > { %17000 = vst [vmem:[#allocation141_spill] sm:$0xff] %v14588_v26  ;;  %v14595_v32 = vpop.eup %10062  ;;  %v6635_v24 = vadd.f32 %v14572_v50, %v6603_v28  ;;  %10082 = vpow2.f32 %v6329_v16  ;;  %v14598_v17 = vmul.f32 1.442695, %v6193_v52  ;;  %v6196_v34 = vsub.f32 %v17004_v5, %v6164_v4  ;;  %v14601_v48 = vpop.f32.mrb[7].mxu1  ;;  %v17006_v28 = vld [vmem:[#allocation199_spill] sm:$0xff] }
 0x671   : > { %17003 = vst [vmem:[#allocation33_spill] sm:$0xff] %v14595_v32  ;;  %v14603_v63 = vpop.eup %10064  ;;  %v6574_v53 = vadd.f32 %v14595_v32, %v14588_v26  ;;  %10084 = vpow2.f32 %v6425_v60  ;;  %v14607_v15 = vmul.f32 1.442695, %v6289_v21  ;;  %v14609_v35 = vmul.f32 1.442695, %v6385_v54  ;;  %v17008_v60 = vld [vmem:[#allocation88_spill] sm:$0xff] }
 0x672   : > { %17005 = vst [vmem:[#allocation136_spill] sm:$0xff] %v14603_v63  ;;  %v14611_v61 = vpop.eup %10066  ;;  %10086 = vrcp.f32 %v6635_v24  ;;  %v14613_v16 = vmul.f32 1.442695, %v6481_v41  ;;  %v14615_v52 = vmul.f32 1.442695, %v6196_v34  ;;  %v6292_v5 = vsub.f32 %v17006_v28, %v6164_v4  ;;  %v17010_v24 = vld [vmem:[#allocation10_spill] sm:$0xff] }
 0x673   : > { %v14618_v50 = vpop.eup %10068  ;;  %v6606_v8 = vadd.f32 %v14603_v63, %v6574_v53  ;;  %10088 = vpow2.f32 %v14523_v22  ;;  %v6388_v21 = vsub.f32 %v17008_v60, %v6164_v4  ;;  %v6484_v54 = vsub.f32 %v14455_v30, %v6164_v4  ;;  %v14624_v32 = vpop.f32.mrb[8].mxu1  ;;  %v17011_v28 = vld [vmem:[#allocation166_spill] sm:$0xff] }
 0x674   : > { %17007 = vst [vmem:[#allocation5_spill] sm:$0xff] %v14618_v50  ;;  %v14626_v26 = vpop.eup %10070  ;;  %10090 = vpow2.f32 %v14525_v56  ;;  %v14629_v41 = vmul.f32 1.442695, %v6292_v5  ;;  %v6195_v34 = vsub.f32 %v17010_v24, %v14580_v55  ;;  %v6291_v53 = vsub.f32 %v17011_v28, %v14580_v55  ;;  %v14635_v63 = vpop.f32.mrb[9].mxu1 }
 0x675   : > { %17009 = vst [vmem:[#allocation81_spill] sm:$0xff] %v14626_v26  ;;  %17012 = vst [vmem:[#allocation123_spill] sm:$0xff] %v14635_v63  ;;  %v14637_v22 = vpop.eup %10072  ;;  %v6638_v30 = vadd.f32 %v14618_v50, %v6606_v8  ;;  %10092 = vpow2.f32 %v14539_v6  ;;  %v14641_v4 = vmul.f32 1.442695, %v6388_v21  ;;  %v14643_v60 = vmul.f32 1.442695, %v6484_v54 }
 0x676   : > { %17013 = vst [vmem:[#allocation48_spill] sm:$0xff] %v14637_v22  ;;  %v14645_v56 = vpop.eup %10074  ;;  %v6573_v5 = vadd.f32 %v14637_v22, %v14626_v26  ;;  %10094 = vpow2.f32 %v14548_v59  ;;  %v14650_v24 = vmul.f32 1.442695, %v6195_v34  ;;  %v14652_v28 = vmul.f32 1.442695, %v6291_v53  ;;  %v17016_v8 = vld [vmem:[#allocation145_spill] sm:$0xff] }
 0x677   : > { %17014 = vst [vmem:[#allocation82_spill] sm:$0xff] %v14645_v56  ;;  %v14654_v63 = vpop.eup %10076  ;;  %10096 = vrcp.f32 %v6638_v30  ;;  %v6387_v6 = vsub.f32 %v17016_v8, %v14580_v55  ;;  %v6483_v21 = vsub.f32 %v14465_v44, %v14580_v55  ;;  %v6166_v54 = vmax.f32 %v14233_v38, %v14481_v14  ;;  %v14662_v50 = vpop.f32.mrb[10].mxu1 }
 0x678   : > { %17015 = vst [vmem:[#allocation71_spill] sm:$0xff] %v14654_v63  ;;  %17017 = vst [vmem:[#allocation108_spill] sm:$0xff] %v14662_v50  ;;  %v14664_v22 = vpop.eup %10078  ;;  %v6605_v59 = vadd.f32 %v14654_v63, %v6573_v5  ;;  %10098 = vpow2.f32 %v14550_v2  ;;  %v6165_v34 = vmax.f32 %v14236_v27, %v14493_v23  ;;  %v14672_v53 = vmax.f32 %v14251_v47, %v14504_v11  ;;  %v14674_v30 = vpop.f32.mrb[11].mxu1  ;;  %v17021_v5 = vld [vmem:[#allocation138_spill] sm:$0xff]  ;;  %v17023_v47 = vld [vmem:[#allocation195_spill] sm:$0xff] }
 0x679   : > { %17018 = vst [vmem:[#allocation139_spill] sm:$0xff] %v14664_v22  ;;  %17019 = vst [vmem:[#allocation129_spill] sm:$0xff] %v14674_v30  ;;  %v14676_v44 = vpop.eup %10080  ;;  %10100 = vpow2.f32 %v14554_v18  ;;  %v14679_v38 = vmul.f32 1.442695, %v6387_v6  ;;  %v14681_v55 = vmul.f32 1.442695, %v6483_v21  ;;  %v6198_v8 = vsub.f32 %v17021_v5, %v6166_v54 }
 0x67a   : > { %17020 = vst [vmem:[#allocation14_spill] sm:$0xff] %v14676_v44  ;;  %v14684_v2 = vpop.eup %10082  ;;  %v6637_v27 = vadd.f32 %v14664_v22, %v6605_v59  ;;  %10102 = vpow2.f32 %v14556_v31  ;;  %v6294_v50 = vsub.f32 %v17023_v47, %v6166_v54  ;;  %v17024_v63 = vld [vmem:[#allocation35_spill] sm:$0xff]  ;;  %v6486_v21 = vsub.f32 %v14481_v14, %v6166_v54 }
 0x67b   : > { %17022 = vst [vmem:[#allocation15_spill] sm:$0xff] %v14684_v2  ;;  %v6390_v30 = vsub.f32 %v17024_v63, %v6166_v54  ;;  %v14690_v26 = vpop.eup %10084  ;;  %v6576_v18 = vadd.f32 %v14684_v2, %v14676_v44  ;;  %10104 = vpow2.f32 %v14574_v46  ;;  %v14695_v6 = vmul.f32 1.442695, %v6198_v8  ;;  %v14698_v5 = vpop.f32.mrb[12].mxu1  ;;  %v17027_v63 = vld [vmem:[#allocation75_spill] sm:$0xff]  ;;  %v17030_v54 = vld [vmem:[#allocation105_spill] sm:$0xff] }
 0x67c   : > { %17025 = vst [vmem:[#allocation187_spill] sm:$0xff] %v14690_v26  ;;  %17026 = vst [vmem:[#allocation32_spill] sm:$0xff] %v14698_v5  ;;  %v14700_v59 = vpop.eup %10086  ;;  %10106 = vrcp.f32 %v6637_v27  ;;  %v14702_v31 = vmul.f32 1.442695, %v6294_v50  ;;  %v6197_v22 = vsub.f32 %v17027_v63, %v6165_v34  ;;  %v14707_v56 = vpop.f32.mrb[13].mxu1  ;;  %v6293_v8 = vsub.f32 %v17030_v54, %v6165_v34 }
 0x67d   : > { %v14704_v47 = vmul.f32 1.442695, %v6390_v30  ;;  %17028 = vst [vmem:[#allocation87_spill] sm:$0xff] %v14707_v56  ;;  %v14709_v2 = vpop.eup %10088  ;;  %v6608_v46 = vadd.f32 %v14690_v26, %v6576_v18  ;;  %10108 = vpow2.f32 %v14585_v29  ;;  %v14713_v14 = vmul.f32 1.442695, %v6486_v21  ;;  %v17032_v30 = vld [vmem:[#allocation46_spill] sm:$0xff] }
 0x67e   : > { %17029 = vst [vmem:[#allocation190_spill] sm:$0xff] %v14709_v2  ;;  %v14716_v5 = vpop.eup %10090  ;;  %10110 = vpow2.f32 %v14598_v17  ;;  %v14719_v50 = vmul.f32 1.442695, %v6197_v22  ;;  %v6389_v27 = vsub.f32 %v17032_v30, %v6165_v34  ;;  %v6485_v63 = vsub.f32 %v14493_v23, %v6165_v34  ;;  %v17034_v21 = vld [vmem:[#allocation76_spill] sm:$0xff]  ;;  %v17038_v30 = vld [vmem:[#allocation85_spill] sm:$0xff] }
 0x67f   : > { %17031 = vst [vmem:[#allocation199_spill] sm:$0xff] %v14716_v5  ;;  %v14723_v56 = vpop.eup %10092  ;;  %v6640_v18 = vadd.f32 %v14709_v2, %v6608_v46  ;;  %10112 = vpow2.f32 %v14607_v15  ;;  %v14727_v29 = vmul.f32 1.442695, %v6293_v8  ;;  %v6200_v54 = vsub.f32 %v17034_v21, %v14672_v53  ;;  %v14731_v26 = vpop.f32.mrb[14].mxu1 }
 0x680   : > { %17033 = vst [vmem:[#allocation88_spill] sm:$0xff] %v14723_v56  ;;  %17035 = vst [vmem:[#allocation10_spill] sm:$0xff] %v14731_v26  ;;  %v14733_v17 = vpop.eup %10094  ;;  %v6575_v22 = vadd.f32 %v14723_v56, %v14716_v5  ;;  %10114 = vpow2.f32 %v14609_v35  ;;  %v14738_v23 = vmul.f32 1.442695, %v6389_v27  ;;  %v14740_v34 = vmul.f32 1.442695, %v6485_v63 }
 0x681   : > { %17036 = vst [vmem:[#allocation166_spill] sm:$0xff] %v14733_v17  ;;  %v14742_v46 = vpop.f32.mrb[15].mxu1  ;;  %v14744_v15 = vpop.eup %10096  ;;  %10116 = vrcp.f32 %v6640_v18  ;;  %v14746_v8 = vmul.f32 1.442695, %v6200_v54  ;;  %v6296_v21 = vsub.f32 %v17038_v30, %v14672_v53  ;;  %v6392_v26 = vsub.f32 %v14240_v58, %v14672_v53  ;;  %v17040_v63 = vld [vmem:[#allocation112_spill] sm:$0xff] }
 0x682   : > { %17037 = vst [vmem:[#allocation145_spill] sm:$0xff] %v14742_v46  ;;  %v14752_v2 = vpop.eup %10098  ;;  %v6607_v35 = vadd.f32 %v14733_v17, %v6575_v22  ;;  %10118 = vpow2.f32 %v14613_v16  ;;  %v6488_v27 = vsub.f32 %v14504_v11, %v14672_v53  ;;  %v6167_v18 = vmax.f32 %v17040_v63, %v14511_v10  ;;  %v17043_v53 = vld [vmem:[#allocation140_spill] sm:$0xff] }
 0x683   : > { %17039 = vst [vmem:[#allocation138_spill] sm:$0xff] %v14752_v2  ;;  %v14760_v54 = vpop.eup %10100  ;;  %10120 = vpow2.f32 %v14615_v52  ;;  %v14763_v30 = vmul.f32 1.442695, %v6296_v21  ;;  %v14765_v46 = vmul.f32 1.442695, %v6392_v26  ;;  %v6170_v58 = vmax.f32 %v14269_v19, %v14528_v33  ;;  %v17045_v26 = vld [vmem:[#allocation107_spill] sm:$0xff] }
 0x684   : > { %17041 = vst [vmem:[#allocation195_spill] sm:$0xff] %v14760_v54  ;;  %v14769_v22 = vpop.eup %10102  ;;  %v6639_v16 = vadd.f32 %v14752_v2, %v6607_v35  ;;  %10122 = vpow2.f32 %v14629_v41  ;;  %v14773_v11 = vmul.f32 1.442695, %v6488_v27  ;;  %v6199_v63 = vsub.f32 %v17043_v53, %v6167_v18  ;;  %v17046_v19 = vld [vmem:[#allocation86_spill] sm:$0xff]  ;;  %v17047_v27 = vld [vmem:[#allocation188_spill] sm:$0xff] }
 0x685   : > { %17042 = vst [vmem:[#allocation35_spill] sm:$0xff] %v14769_v22  ;;  %v14776_v44 = vpop.eup %10104  ;;  %v6578_v52 = vadd.f32 %v14769_v22, %v14760_v54  ;;  %10124 = vpow2.f32 %v14641_v4  ;;  %v6295_v21 = vsub.f32 %v17045_v26, %v6167_v18  ;;  %v6391_v17 = vsub.f32 %v17046_v19, %v6167_v18  ;;  %v17054_v22 = vld [vmem:[#allocation200_spill] sm:$0xff] }
 0x686   : > { %17044 = vst [vmem:[#allocation75_spill] sm:$0xff] %v14776_v44  ;;  %v14783_v56 = vpop.eup %10106  ;;  %10126 = vrcp.f32 %v6639_v16  ;;  %v14785_v35 = vmul.f32 1.442695, %v6199_v63  ;;  %v6487_v41 = vsub.f32 %v14511_v10, %v6167_v18  ;;  %v6202_v53 = vsub.f32 %v17047_v27, %v6170_v58  ;;  %v17049_v10 = vld [vmem:[#allocation143_spill] sm:$0xff] }
 0x687   : > { %v14789_v2 = vpop.eup %10108  ;;  %v6610_v5 = vadd.f32 %v14776_v44, %v6578_v52  ;;  %10128 = vpow2.f32 %v14643_v60  ;;  %v14793_v4 = vmul.f32 1.442695, %v6295_v21  ;;  %v14795_v26 = vmul.f32 1.442695, %v6391_v17 }
 0x688   : > { %17048 = vst [vmem:[#allocation105_spill] sm:$0xff] %v14789_v2  ;;  %v14797_v19 = vpop.eup %10110  ;;  %10130 = vpow2.f32 %v14650_v24  ;;  %v14800_v16 = vmul.f32 1.442695, %v6487_v41  ;;  %v14802_v63 = vmul.f32 1.442695, %v6202_v53  ;;  %v6298_v18 = vsub.f32 %v17049_v10, %v6170_v58  ;;  %v17051_v53 = vld [vmem:[#allocation91_spill] sm:$0xff] }
 0x689   : > { %v14805_v27 = vpop.eup %10112  ;;  %v6642_v52 = vadd.f32 %v14789_v2, %v6610_v5  ;;  %10132 = vpow2.f32 %v14652_v28  ;;  %v6394_v60 = vsub.f32 %v14258_v12, %v6170_v58  ;;  %v6490_v17 = vsub.f32 %v14528_v33, %v6170_v58  ;;  %v17052_v33 = vld [vmem:[#allocation167_spill] sm:$0xff] }
 0x68a   : > { %17050 = vst [vmem:[#allocation46_spill] sm:$0xff] %v14805_v27  ;;  %v14811_v21 = vpop.eup %10114  ;;  %v6577_v24 = vadd.f32 %v14805_v27, %v14797_v19  ;;  %10134 = vpow2.f32 %v14679_v38  ;;  %v14816_v41 = vmul.f32 1.442695, %v6298_v18  ;;  %v6169_v10 = vmax.f32 %v17051_v53, %v14535_v51  ;;  %v17053_v38 = vld [vmem:[#allocation189_spill] sm:$0xff] }
 0x68b   : > { %v14820_v44 = vpop.eup %10116  ;;  %10136 = vrcp.f32 %v6642_v52  ;;  %v14822_v28 = vmul.f32 1.442695, %v6394_v60  ;;  %v14824_v12 = vmul.f32 1.442695, %v6490_v17  ;;  %v6663_v5 = vmul.f32 %v14430_v42, %v17052_v33  ;;  %v17055_v52 = vld [vmem:[#allocation34_spill] sm:$0xff]  ;;  %v17056_v27 = vld [vmem:[#allocation53_spill] sm:$0xff] }
 0x68c   : > { %v14828_v58 = vpop.eup %10118  ;;  %v6609_v2 = vadd.f32 %v14811_v21, %v6577_v24  ;;  %10138 = vpow2.f32 %v14681_v55  ;;  %v6201_v18 = vsub.f32 %v17053_v38, %v6169_v10  ;;  %v6297_v53 = vsub.f32 %v17054_v22, %v6169_v10 }
 0x68d   : > { %v14834_v54 = vpop.eup %10120  ;;  %10140 = vpow2.f32 %v14695_v6  ;;  %v6393_v60 = vsub.f32 %v17055_v52, %v6169_v10  ;;  %v6489_v17 = vsub.f32 %v14535_v51, %v6169_v10  ;;  %v6695_v42 = vmul.f32 %v14435_v37, %v17056_v27 }
 0x68e   : > { %v14841_v33 = vpop.eup %10122  ;;  %v6641_v24 = vadd.f32 %v14828_v58, %v6609_v2  ;;  %10142 = vpow2.f32 %v14702_v31  ;;  %v14845_v55 = vmul.f32 1.442695, %v6201_v18  ;;  %v14847_v22 = vmul.f32 1.442695, %v6297_v53  ;;  %v17058_v31 = vld [vmem:[#allocation170_spill] sm:$0xff] }
 0x68f   : > { %17057 = vst [vmem:[#allocation76_spill] sm:$0xff] %v14841_v33  ;;  %v14849_v38 = vpop.eup %10124  ;;  %v6580_v6 = vadd.f32 %v14841_v33, %v14834_v54  ;;  %10144 = vpow2.f32 %v14704_v47  ;;  %v14854_v51 = vmul.f32 1.442695, %v6393_v60  ;;  %v14856_v37 = vmul.f32 1.442695, %v6489_v17  ;;  %v17059_v18 = vld [vmem:[#allocation162_spill] sm:$0xff] }
 0x690   : > { %v14858_v27 = vpop.eup %10126  ;;  %10146 = vrcp.f32 %v6641_v24  ;;  %v6727_v2 = vadd.f32 %v6695_v42, %v6663_v5  ;;  %v6759_v10 = vmul.f32 %v14442_v0, %v17058_v31  ;;  %v6823_v53 = vmul.f32 %v14446_v13, %v17059_v18  ;;  %v17060_v5 = vld [vmem:[#allocation110_spill] sm:$0xff] }
 0x691   : > { %v14864_v52 = vpop.eup %10128  ;;  %v6612_v33 = vadd.f32 %v14849_v38, %v6580_v6  ;;  %10148 = vpow2.f32 %v14713_v14  ;;  %v6920_v47 = vmul.f32 %v14516_v62, %v14450_v43  ;;  %v6172_v60 = vmax.f32 %v14287_v25, %v14560_v20  ;;  %v17061_v43 = vld [vmem:[#allocation43_spill] sm:$0xff]  ;;  %v17062_v25 = vld [vmem:[#allocation92_spill] sm:$0xff] }
 0x692   : > { %v14872_v17 = vpop.eup %10130  ;;  %10150 = vpow2.f32 %v14719_v50  ;;  %v6791_v0 = vadd.f32 %v6759_v10, %v6727_v2  ;;  %v6171_v13 = vmax.f32 %v14290_v57, %v14570_v9  ;;  %v6665_v42 = vmul.f32 %v14474_v39, %v17060_v5  ;;  %v17063_v2 = vld [vmem:[#allocation149_spill] sm:$0xff] }
 0x693   : > { %v14879_v24 = vpop.eup %10132  ;;  %v6644_v14 = vadd.f32 %v14864_v52, %v6612_v33  ;;  %10152 = vpow2.f32 %v14727_v29  ;;  %v6204_v62 = vsub.f32 %v17061_v43, %v6172_v60  ;;  %v6300_v6 = vsub.f32 %v17062_v25, %v6172_v60 }
 0x694   : > { %v14885_v31 = vpop.eup %10134  ;;  %v6579_v50 = vadd.f32 %v14879_v24, %v14872_v17  ;;  %10154 = vpow2.f32 %v14738_v23  ;;  %v6855_v57 = vadd.f32 %v6823_v53, %v6791_v0  ;;  %v6396_v39 = vsub.f32 %v17063_v2, %v6172_v60 }
 0x695   : > { %v14891_v10 = vpop.eup %10136  ;;  %10156 = vrcp.f32 %v6644_v14  ;;  %v14893_v33 = vmul.f32 1.442695, %v6204_v62  ;;  %v14895_v29 = vmul.f32 1.442695, %v6300_v6  ;;  %v6492_v18 = vsub.f32 %v14560_v20, %v6172_v60  ;;  %v17065_v62 = vld [vmem:[#allocation44_spill] sm:$0xff]  ;;  %v17066_v6 = vld [vmem:[#allocation37_spill] sm:$0xff] }
 0x696   : > { %v14898_v5 = vpop.eup %10138  ;;  %v6611_v43 = vadd.f32 %v14885_v31, %v6579_v50  ;;  %10158 = vpow2.f32 %v14740_v34  ;;  %v6919_v23 = vmul.f32 %v14545_v3, %v6855_v57  ;;  %v14903_v53 = vmul.f32 1.442695, %v6396_v39  ;;  %v17068_v3 = vld [vmem:[#allocation144_spill] sm:$0xff] }
 0x697   : > { %v14905_v0 = vpop.eup %10140  ;;  %10160 = vpow2.f32 %v14746_v8  ;;  %v14908_v14 = vmul.f32 1.442695, %v6492_v18  ;;  %v6203_v25 = vsub.f32 %v17065_v62, %v6171_v13  ;;  %v6299_v20 = vsub.f32 %v17066_v6, %v6171_v13  ;;  %v17073_v6 = vld [vmem:[#allocation222_spill] sm:$0xff] }
 0x698   : > { %17064 = vst [vmem:[#allocation85_spill] sm:$0xff] %v14905_v0  ;;  %v14912_v60 = vpop.eup %10142  ;;  %v6643_v50 = vadd.f32 %v14898_v5, %v6611_v43  ;;  %10162 = vpow2.f32 %v14763_v30  ;;  %9457 = vmatprep.mubr.msk.f32.mxu0 %vm210_vm0, %v6919_v23  ;;  %v6395_v34 = vsub.f32 %v17068_v3, %v6171_v13  ;;  %v6491_v57 = vsub.f32 %v14570_v9, %v6171_v13  ;;  %v17070_v9 = vld [vmem:[#allocation111_spill] sm:$0xff] }
 0x699   : > { %17067 = vst [vmem:[#allocation112_spill] sm:$0xff] %v14912_v60  ;;  %v14919_v2 = vpop.eup %10144  ;;  %v6582_v8 = vadd.f32 %v14912_v60, %v14905_v0  ;;  %10164 = vpow2.f32 %v14765_v46  ;;  %9458 = vmatmul.mubr.msk.f32.vlgmr.msra.gmra.mrb[240].mxu0 %vm210_vm0, %v6920_v47  ;;  %v14925_v39 = vmul.f32 1.442695, %v6203_v25  ;;  %v14927_v18 = vmul.f32 1.442695, %v6299_v20  ;;  %v17072_v47 = vld [vmem:[#allocation171_spill] sm:$0xff] }
 0x69a   : > { %17069 = vst [vmem:[#allocation140_spill] sm:$0xff] %v14919_v2  ;;  %v14929_v30 = vpop.eup %10146  ;;  %10166 = vrcp.f32 %v6643_v50  ;;  %v14931_v43 = vmul.f32 1.442695, %v6395_v34  ;;  %v14933_v23 = vmul.f32 1.442695, %v6491_v57  ;;  %v6697_v13 = vmul.f32 %v14483_v40, %v17070_v9  ;;  %v17074_v34 = vld [vmem:[#allocation168_spill] sm:$0xff] }
 0x69b   : > { %v14937_v62 = vpop.eup %10148  ;;  %v6614_v46 = vadd.f32 %v14919_v2, %v6582_v8  ;;  %10168 = vpow2.f32 %v14773_v11  ;;  %v6761_v25 = vmul.f32 %v14495_v36, %v17072_v47  ;;  %v6825_v20 = vmul.f32 %v14500_v7, %v17073_v6  ;;  %v17075_v57 = vld [vmem:[#allocation54_spill] sm:$0xff]  ;;  %v17077_v36 = vld [vmem:[#allocation120_spill] sm:$0xff]  ;;  %v17078_v47 = vld [vmem:[#allocation51_spill] sm:$0xff] }
 0x69c   : > { %17071 = vst [vmem:[#allocation107_spill] sm:$0xff] %v14937_v62  ;;  %v14945_v50 = vpop.eup %10150  ;;  %10170 = vpow2.f32 %v14785_v35  ;;  %v6729_v3 = vadd.f32 %v6697_v13, %v6665_v42  ;;  %v6666_v40 = vmul.f32 %v14448_v45, %v17074_v34  ;;  %v6698_v9 = vmul.f32 %v14457_v49, %v17075_v57  ;;  %v17079_v6 = vld [vmem:[#allocation221_spill] sm:$0xff]  ;;  %v17080_v2 = vld [vmem:[#allocation102_spill] sm:$0xff]  ;;  %v17083_v34 = vld [vmem:[#allocation96_spill] sm:$0xff] }
 0x69d   : > { %v14952_v8 = vpop.eup %10152  ;;  %v6646_v11 = vadd.f32 %v14937_v62, %v6614_v46  ;;  %10172 = vpow2.f32 %v14793_v4  ;;  %v6762_v7 = vmul.f32 %v17078_v47, %v17077_v36  ;;  %v6826_v60 = vmul.f32 %v17080_v2, %v17079_v6  ;;  %v17082_v4 = vld [vmem:[#allocation95_spill] sm:$0xff]  ;;  %v17084_v2 = vld [vmem:[#allocation16_spill] sm:$0xff] }
 0x69e   : > { %17076 = vst [vmem:[#allocation86_spill] sm:$0xff] %v14952_v8  ;;  %v14960_v35 = vpop.eup %10154  ;;  %v6581_v45 = vadd.f32 %v14952_v8, %v14945_v50  ;;  %10174 = vpow2.f32 %v14795_v26  ;;  %v6793_v49 = vadd.f32 %v6761_v25, %v6729_v3  ;;  %v6730_v42 = vadd.f32 %v6698_v9, %v6666_v40  ;;  %v17085_v36 = vld [vmem:[#allocation8_spill] sm:$0xff]  ;;  %v17086_v9 = vld [vmem:[#allocation13_spill] sm:$0xff] }
 0x69f   : > { %v14965_v13 = vpop.eup %10156  ;;  %10176 = vrcp.f32 %v6646_v11  ;;  %v6174_v46 = vmax.f32 %v17082_v4, %v14593_v1  ;;  %v14971_v57 = vmax.f32 %v17083_v34, %v14601_v48  ;;  %v14975_v47 = vmul.f32 %v17085_v36, %v17084_v2  ;;  %v17087_v4 = vld [vmem:[#allocation89_spill] sm:$0xff]  ;;  %v17089_v36 = vld [vmem:[#allocation202_spill] sm:$0xff] }
 0x6a0   : > { %17081 = vst [vmem:[#allocation188_spill] sm:$0xff] %v14965_v13  ;;  %v14977_v6 = vpop.eup %10158  ;;  %v6613_v26 = vadd.f32 %v14960_v35, %v6581_v45  ;;  %10178 = vpow2.f32 %v14800_v16  ;;  %v6857_v25 = vadd.f32 %v6825_v20, %v6793_v49  ;;  %v6794_v3 = vadd.f32 %v6762_v7, %v6730_v42  ;;  %v17088_v13 = vld [vmem:[#allocation90_spill] sm:$0xff]  ;;  %v17090_v45 = vld [vmem:[#allocation115_spill] sm:$0xff] }
 0x6a1   : > { %v10161_v40 = vpop.eup %10160  ;;  %10180 = vpow2.f32 %v14802_v63  ;;  %v6206_v11 = vsub.f32 %v17086_v9, %v6174_v46  ;;  %v6302_v34 = vsub.f32 %v17087_v4, %v6174_v46  ;;  %v6398_v62 = vsub.f32 %v17088_v13, %v6174_v46  ;;  %v17091_v13 = vld [vmem:[#allocation130_spill] sm:$0xff] }
 0x6a2   : > { %v10163_v0 = vpop.eup %10162  ;;  %v6645_v2 = vadd.f32 %v14977_v6, %v6613_v26  ;;  %v6680_v8 = vmul.f32 %v10161_v40, %v17089_v36  ;;  %10182 = vpow2.f32 %v14816_v41  ;;  %v6921_v16 = vmul.f32 %v14611_v61, %v6857_v25 }
 0x6a3   : > { %v10165_v20 = vpop.eup %10164  ;;  %v6584_v7 = vadd.f32 %v10163_v0, %v10161_v40  ;;  %v6712_v49 = vmul.f32 %v10163_v0, %v17090_v45  ;;  %10184 = vpow2.f32 %v14822_v28  ;;  %v6858_v63 = vadd.f32 %v6826_v60, %v6794_v3  ;;  %v17092_v0 = vld [vmem:[#allocation24_spill] sm:$0xff]  ;;  %v17093_v60 = vld [vmem:[#allocation106_spill] sm:$0xff] }
 0x6a4   : > { %v14991_v42 = vpop.eup %10166  ;;  %10186 = vrcp.f32 %v6645_v2  ;;  %v6776_v9 = vmul.f32 %v10165_v20, %v17091_v13  ;;  %9460 = vmatprep.mubr.msk.f32.mxu0 %vm210_vm0, %v6921_v16  ;;  %v14995_v26 = vmul.f32 1.442695, %v6206_v11  ;;  %v14997_v4 = vmul.f32 1.442695, %v6302_v34 }
 0x6a5   : > { %v10169_v41 = vpop.eup %10168  ;;  %v6616_v61 = vadd.f32 %v10165_v20, %v6584_v7  ;;  %v6744_v25 = vadd.f32 %v6712_v49, %v6680_v8  ;;  %10188 = vpow2.f32 %v14824_v12  ;;  %v6922_v40 = vmul.f32 %v17092_v0, %v6858_v63  ;;  %v17094_v12 = vld [vmem:[#allocation80_spill] sm:$0xff]  ;;  %v17100_v0 = vld [vmem:[#allocation126_spill] sm:$0xff] }
 0x6a6   : > { %v15001_v28 = vpop.eup %10170  ;;  %v6840_v3 = vmul.f32 %v10169_v41, %v17093_v60  ;;  %10190 = vpow2.f32 %v14845_v55  ;;  %v15005_v2 = vmul.f32 1.442695, %v6398_v62  ;;  %v6494_v11 = vsub.f32 %v14593_v1, %v6174_v46  ;;  %v17095_v1 = vld [vmem:[#allocation147_spill] sm:$0xff]  ;;  %v17098_v49 = vld [vmem:[#allocation36_spill] sm:$0xff] }
 0x6a7   : > { %v15008_v36 = vpop.eup %10172  ;;  %v6648_v34 = vadd.f32 %v10169_v41, %v6616_v61  ;;  %v6808_v16 = vadd.f32 %v6776_v9, %v6744_v25  ;;  %10192 = vpow2.f32 %v14847_v22  ;;  %9461 = vmatmul.mubr.msk.f32.gmra.mrb[242].mxu0 %vm210_vm0, %v6922_v40  ;;  %v6205_v8 = vsub.f32 %v17094_v12, %v14971_v57  ;;  %v17101_v40 = vld [vmem:[#allocation11_spill] sm:$0xff] }
 0x6a8   : > { %v15014_v20 = vpop.eup %10174  ;;  %v6583_v55 = vadd.f32 %v15008_v36, %v15001_v28  ;;  %10194 = vpow2.f32 %v14854_v51  ;;  %v15019_v62 = vmul.f32 1.442695, %v6494_v11  ;;  %v6301_v46 = vsub.f32 %v17095_v1, %v14971_v57  ;;  %v17103_v11 = vld [vmem:[#allocation12_spill] sm:$0xff] }
 0x6a9   : > { %v15023_v7 = vpop.eup %10176  ;;  %v15025_v22 = vadd.f32 %v6840_v3, %v6808_v16  ;;  %10196 = vrcp.f32 %v6648_v34  ;;  %v15027_v45 = vmul.f32 1.442695, %v6205_v8  ;;  %v6397_v63 = vsub.f32 %v17098_v49, %v14971_v57  ;;  %v17102_v3 = vld [vmem:[#allocation212_spill] sm:$0xff] }
 0x6aa   : > { %17096 = vst [vmem:[#allocation143_spill] sm:$0xff] %v15023_v7  ;;  %v15031_v13 = vpop.eup %10178  ;;  %v6615_v9 = vadd.f32 %v15014_v20, %v6583_v55  ;;  %10198 = vpow2.f32 %v14856_v37  ;;  %v15035_v51 = vmul.f32 1.442695, %v6301_v46  ;;  %v6493_v41 = vsub.f32 %v14601_v48, %v14971_v57  ;;  %v17104_v37 = vld [vmem:[#allocation150_spill] sm:$0xff] }
 0x6ab   : > { %17097 = vst [vmem:[#allocation91_spill] sm:$0xff] %v15025_v22  ;;  %17099 = vst [vmem:[#allocation167_spill] sm:$0xff] %v15031_v13  ;;  %v10181_v61 = vpop.eup %10180  ;;  %10200 = vpow2.f32 %v14893_v33  ;;  %v15040_v25 = vmul.f32 1.442695, %v6397_v63  ;;  %v6699_v60 = vmul.f32 %v17101_v40, %v17100_v0  ;;  %v6763_v34 = vmul.f32 %v17103_v11, %v17102_v3  ;;  %v17105_v33 = vld [vmem:[#allocation180_spill] sm:$0xff]  ;;  %v17106_v63 = vld [vmem:[#allocation218_spill] sm:$0xff] }
 0x6ac   : > { %v10183_v16 = vpop.eup %10182  ;;  %v6647_v12 = vadd.f32 %v15031_v13, %v6615_v9  ;;  %v6682_v8 = vmul.f32 %v10181_v61, %v17104_v37  ;;  %10202 = vpow2.f32 %v14895_v29  ;;  %v15049_v55 = vmul.f32 1.442695, %v6493_v41  ;;  %v17107_v9 = vld [vmem:[#allocation68_spill] sm:$0xff]  ;;  %v17109_v11 = vld [vmem:[#allocation163_spill] sm:$0xff] }
 0x6ad   : > { %v10185_v48 = vpop.eup %10184  ;;  %v6586_v57 = vadd.f32 %v10183_v16, %v10181_v61  ;;  %v6714_v1 = vmul.f32 %v10183_v16, %v17105_v33  ;;  %10204 = vpow2.f32 %v14903_v53  ;;  %v6731_v46 = vadd.f32 %v6699_v60, %v14975_v47  ;;  %v17108_v40 = vld [vmem:[#allocation220_spill] sm:$0xff]  ;;  %v17110_v29 = vld [vmem:[#allocation159_spill] sm:$0xff]  ;;  %v17111_v47 = vld [vmem:[#allocation29_spill] sm:$0xff] }
 0x6ae   : > { %v15054_v49 = vpop.eup %10186  ;;  %10206 = vrcp.f32 %v6647_v12  ;;  %v6778_v0 = vmul.f32 %v10185_v48, %v17106_v63  ;;  %v6827_v3 = vmul.f32 %v17108_v40, %v17107_v9  ;;  %v6668_v41 = vmul.f32 %v17110_v29, %v17109_v11  ;;  %v17112_v12 = vld [vmem:[#allocation175_spill] sm:$0xff]  ;;  %v17113_v33 = vld [vmem:[#allocation116_spill] sm:$0xff] }
 0x6af   : > { %v10189_v37 = vpop.eup %10188  ;;  %v6618_v7 = vadd.f32 %v10185_v48, %v6586_v57  ;;  %v6746_v61 = vadd.f32 %v6714_v1, %v6682_v8  ;;  %10208 = vpow2.f32 %v14908_v14  ;;  %v6795_v16 = vadd.f32 %v6763_v34, %v6731_v46  ;;  %v17114_v22 = vld [vmem:[#allocation211_spill] sm:$0xff]  ;;  %v17115_v9 = vld [vmem:[#allocation52_spill] sm:$0xff] }
 0x6b0   : > { %v15062_v53 = vpop.eup %10190  ;;  %v6842_v60 = vmul.f32 %v10189_v37, %v17111_v47  ;;  %10210 = vpow2.f32 %v14925_v39  ;;  %v6700_v63 = vmul.f32 %v17113_v33, %v17112_v12  ;;  %v6764_v40 = vmul.f32 %v17115_v9, %v17114_v22  ;;  %v17116_v57 = vld [vmem:[#allocation67_spill] sm:$0xff]  ;;  %v17123_v12 = vld [vmem:[#allocation153_spill] sm:$0xff] }
 0x6b1   : > { %v15070_v13 = vpop.eup %10192  ;;  %v6650_v11 = vadd.f32 %v10189_v37, %v6618_v7  ;;  %v6810_v48 = vadd.f32 %v6778_v0, %v6746_v61  ;;  %10212 = vpow2.f32 %v14927_v18  ;;  %v6859_v14 = vadd.f32 %v6827_v3, %v6795_v16  ;;  %v17117_v1 = vld [vmem:[#allocation7_spill] sm:$0xff]  ;;  %v17119_v18 = vld [vmem:[#allocation196_spill] sm:$0xff]  ;;  %v17121_v61 = vld [vmem:[#allocation94_spill] sm:$0xff] }
 0x6b2   : > { %v15073_v34 = vpop.eup %10194  ;;  %v6585_v8 = vadd.f32 %v15070_v13, %v15062_v53  ;;  %10214 = vpow2.f32 %v14931_v43  ;;  %v6732_v39 = vadd.f32 %v6700_v63, %v6668_v41  ;;  %v6828_v46 = vmul.f32 %v17117_v1, %v17116_v57  ;;  %v17120_v41 = vld [vmem:[#allocation123_spill] sm:$0xff]  ;;  %v17126_v57 = vld [vmem:[#allocation214_spill] sm:$0xff] }
 0x6b3   : > { %v15080_v29 = vpop.eup %10196  ;;  %v15082_v22 = vadd.f32 %v6842_v60, %v6810_v48  ;;  %10216 = vrcp.f32 %v6650_v11  ;;  %v6923_v7 = vmul.f32 %v14700_v59, %v6859_v14  ;;  %v6176_v0 = vmax.f32 %v17119_v18, %v14624_v32  ;;  %v17122_v60 = vld [vmem:[#allocation47_spill] sm:$0xff]  ;;  %v17125_v14 = vld [vmem:[#allocation204_spill] sm:$0xff]  ;;  %v17128_v18 = vld [vmem:[#allocation158_spill] sm:$0xff] }
 0x6b4   : > { %v15087_v3 = vpop.eup %10198  ;;  %v6617_v37 = vadd.f32 %v15073_v34, %v6585_v8  ;;  %10218 = vpow2.f32 %v14933_v23  ;;  %v6796_v43 = vadd.f32 %v6764_v40, %v6732_v39  ;;  %v6175_v16 = vmax.f32 %v17121_v61, %v17120_v41  ;;  %v17124_v63 = vld [vmem:[#allocation39_spill] sm:$0xff] }
 0x6b5   : > { %17118 = vst [vmem:[#allocation189_spill] sm:$0xff] %v15082_v22  ;;  %v10201_v47 = vpop.eup %10200  ;;  %10220 = vpow2.f32 %v14995_v26  ;;  %9463 = vmatprep.mubr.msk.f32.mxu0 %vm210_vm0, %v6923_v7  ;;  %v6208_v59 = vsub.f32 %v17122_v60, %v6176_v0  ;;  %v6304_v33 = vsub.f32 %v17123_v12, %v6176_v0  ;;  %v6400_v9 = vsub.f32 %v17124_v63, %v6176_v0  ;;  %v17129_v60 = vld [vmem:[#allocation82_spill] sm:$0xff] }
 0x6b6   : > { %v10203_v11 = vpop.eup %10202  ;;  %v6649_v48 = vadd.f32 %v15087_v3, %v6617_v37  ;;  %v6684_v23 = vmul.f32 %v10201_v47, %v17125_v14  ;;  %10222 = vpow2.f32 %v14997_v4  ;;  %v6860_v40 = vadd.f32 %v6828_v46, %v6796_v43  ;;  %v17130_v43 = vld [vmem:[#allocation74_spill] sm:$0xff] }
 0x6b7   : > { %v10205_v8 = vpop.eup %10204  ;;  %v6588_v39 = vadd.f32 %v10203_v11, %v10201_v47  ;;  %v6716_v26 = vmul.f32 %v10203_v11, %v17126_v57  ;;  %10224 = vpow2.f32 %v15005_v2  ;;  %v6265_v1 = vmul.f32 1.442695, %v6208_v59  ;;  %v17131_v59 = vld [vmem:[#allocation191_spill] sm:$0xff] }
 0x6b8   : > { %v15103_v7 = vpop.eup %10206  ;;  %10226 = vrcp.f32 %v6649_v48  ;;  %v6780_v61 = vmul.f32 %v10205_v8, %v17128_v18  ;;  %v6924_v12 = vmul.f32 %v17129_v60, %v6860_v40  ;;  %v6361_v37 = vmul.f32 1.442695, %v6304_v33  ;;  %v17136_v60 = vld [vmem:[#allocation49_spill] sm:$0xff] }
 0x6b9   : > { %17127 = vst [vmem:[#allocation200_spill] sm:$0xff] %v15103_v7  ;;  %v10209_v63 = vpop.eup %10208  ;;  %v6620_v14 = vadd.f32 %v10205_v8, %v6588_v39  ;;  %v6748_v22 = vadd.f32 %v6716_v26, %v6684_v23  ;;  %10228 = vpow2.f32 %v15019_v62  ;;  %v6457_v4 = vmul.f32 1.442695, %v6400_v9  ;;  %v17132_v62 = vld [vmem:[#allocation93_spill] sm:$0xff]  ;;  %v17148_v7 = vld [vmem:[#allocation164_spill] sm:$0xff] }
 0x6ba   : > { %v15108_v46 = vpop.eup %10210  ;;  %v6844_v47 = vmul.f32 %v10209_v63, %v17130_v43  ;;  %10230 = vpow2.f32 %v15027_v45  ;;  %9464 = vmatmul.mubr.msk.f32.gmra.mrb[244].mxu0 %vm210_vm0, %v6924_v12  ;;  %v6496_v2 = vsub.f32 %v14624_v32, %v6176_v0  ;;  %v6207_v11 = vsub.f32 %v17131_v59, %v6175_v16  ;;  %v17138_v43 = vld [vmem:[#allocation208_spill] sm:$0xff]  ;;  %v17140_v59 = vld [vmem:[#allocation154_spill] sm:$0xff] }
 0x6bb   : > { %v15115_v48 = vpop.eup %10212  ;;  %v6652_v33 = vadd.f32 %v10209_v63, %v6620_v14  ;;  %v6812_v40 = vadd.f32 %v6780_v61, %v6748_v22  ;;  %10232 = vpow2.f32 %v15035_v51  ;;  %v6303_v9 = vsub.f32 %v17132_v62, %v6175_v16  ;;  %v17134_v22 = vld [vmem:[#allocation118_spill] sm:$0xff] }
 0x6bc   : > { %v15119_v23 = vpop.eup %10214  ;;  %v6587_v8 = vadd.f32 %v15115_v48, %v15108_v46  ;;  %10234 = vpow2.f32 %v15040_v25  ;;  %v6553_v45 = vmul.f32 1.442695, %v6496_v2  ;;  %v6263_v39 = vmul.f32 1.442695, %v6207_v11  ;;  %v17137_v25 = vld [vmem:[#allocation81_spill] sm:$0xff]  ;;  %v17141_v11 = vld [vmem:[#allocation71_spill] sm:$0xff] }
 0x6bd   : > { %v15124_v32 = vpop.eup %10216  ;;  %v15126_v0 = vadd.f32 %v6844_v47, %v6812_v40  ;;  %10236 = vrcp.f32 %v6652_v33  ;;  %v6359_v57 = vmul.f32 1.442695, %v6303_v9  ;;  %v6399_v26 = vsub.f32 %v17134_v22, %v6175_v16  ;;  %v17139_v47 = vld [vmem:[#allocation48_spill] sm:$0xff]  ;;  %v17142_v9 = vld [vmem:[#allocation174_spill] sm:$0xff]  ;;  %v17143_v22 = vld [vmem:[#allocation21_spill] sm:$0xff] }
 0x6be   : > { %v15129_v51 = vpop.eup %10218  ;;  %v6619_v18 = vadd.f32 %v15119_v23, %v6587_v8  ;;  %10238 = vpow2.f32 %v15049_v55  ;;  %v6495_v61 = vsub.f32 %v17120_v41, %v6175_v16  ;;  %v6669_v12 = vmul.f32 %v17137_v25, %v17136_v60  ;;  %v17145_v25 = vld [vmem:[#allocation63_spill] sm:$0xff] }
 0x6bf   : > { %17133 = vst [vmem:[#allocation34_spill] sm:$0xff] %v15126_v0  ;;  %17135 = vst [vmem:[#allocation53_spill] sm:$0xff] %v15129_v51  ;;  %v10221_v63 = vpop.eup %10220  ;;  %10240 = vpow2.f32 %v6265_v1  ;;  %v6455_v14 = vmul.f32 1.442695, %v6399_v26  ;;  %v6701_v2 = vmul.f32 %v17139_v47, %v17138_v43  ;;  %v6765_v33 = vmul.f32 %v17141_v11, %v17140_v59  ;;  %v17146_v47 = vld [vmem:[#allocation65_spill] sm:$0xff]  ;;  %v17147_v59 = vld [vmem:[#allocation139_spill] sm:$0xff] }
 0x6c0   : > { %v10223_v40 = vpop.eup %10222  ;;  %v6651_v62 = vadd.f32 %v15129_v51, %v6619_v18  ;;  %v6686_v8 = vmul.f32 %v10221_v63, %v17142_v9  ;;  %10242 = vpow2.f32 %v6361_v37  ;;  %v6551_v55 = vmul.f32 1.442695, %v6495_v61  ;;  %v17149_v18 = vld [vmem:[#allocation141_spill] sm:$0xff] }
 0x6c1   : > { %v10225_v41 = vpop.eup %10224  ;;  %v6590_v16 = vadd.f32 %v10223_v40, %v10221_v63  ;;  %v6718_v60 = vmul.f32 %v10223_v40, %v17143_v22  ;;  %10244 = vpow2.f32 %v6457_v4  ;;  %v6733_v1 = vadd.f32 %v6701_v2, %v6669_v12  ;;  %v17151_v4 = vld [vmem:[#allocation28_spill] sm:$0xff]  ;;  %v17153_v40 = vld [vmem:[#allocation33_spill] sm:$0xff]  ;;  %v17154_v22 = vld [vmem:[#allocation207_spill] sm:$0xff] }
 0x6c2   : > { %v15143_v26 = vpop.eup %10226  ;;  %10246 = vrcp.f32 %v6651_v62  ;;  %v6782_v43 = vmul.f32 %v10225_v41, %v17145_v25  ;;  %v6829_v11 = vmul.f32 %v17147_v59, %v17146_v47  ;;  %v6670_v0 = vmul.f32 %v17149_v18, %v17148_v7  ;;  %v17152_v2 = vld [vmem:[#allocation152_spill] sm:$0xff] }
 0x6c3   : > { %17144 = vst [vmem:[#allocation170_spill] sm:$0xff] %v15143_v26  ;;  %v10229_v9 = vpop.eup %10228  ;;  %v6622_v37 = vadd.f32 %v10225_v41, %v6590_v16  ;;  %v6750_v61 = vadd.f32 %v6718_v60, %v6686_v8  ;;  %10248 = vpow2.f32 %v6553_v45  ;;  %v6797_v63 = vadd.f32 %v6765_v33, %v6733_v1  ;;  %v17155_v25 = vld [vmem:[#allocation136_spill] sm:$0xff]  ;;  %v17159_v16 = vld [vmem:[#allocation5_spill] sm:$0xff] }
 0x6c4   : > { %v15150_v51 = vpop.eup %10230  ;;  %v6846_v12 = vmul.f32 %v10229_v9, %v17151_v4  ;;  %10250 = vpow2.f32 %v6263_v39  ;;  %v6702_v62 = vmul.f32 %v17153_v40, %v17152_v2  ;;  %v6766_v26 = vmul.f32 %v17155_v25, %v17154_v22  ;;  %v17158_v39 = vld [vmem:[#allocation125_spill] sm:$0xff] }
 0x6c5   : > { %17150 = vst [vmem:[#allocation162_spill] sm:$0xff] %v15150_v51  ;;  %v15157_v47 = vpop.eup %10232  ;;  %v6654_v59 = vadd.f32 %v10229_v9, %v6622_v37  ;;  %v6814_v7 = vadd.f32 %v6782_v43, %v6750_v61  ;;  %10252 = vpow2.f32 %v6359_v57  ;;  %v6861_v41 = vadd.f32 %v6829_v11, %v6797_v63  ;;  %v17161_v43 = vld [vmem:[#allocation108_spill] sm:$0xff]  ;;  %v17162_v57 = vld [vmem:[#allocation157_spill] sm:$0xff] }
 0x6c6   : > { %17156 = vst [vmem:[#allocation110_spill] sm:$0xff] %v15157_v47  ;;  %v15159_v8 = vpop.eup %10234  ;;  %v6589_v45 = vadd.f32 %v15157_v47, %v15150_v51  ;;  %10254 = vpow2.f32 %v6455_v14  ;;  %v6734_v33 = vadd.f32 %v6702_v62, %v6670_v0  ;;  %v6830_v60 = vmul.f32 %v17159_v16, %v17158_v39  ;;  %v17164_v0 = vld [vmem:[#allocation129_spill] sm:$0xff]  ;;  %v17167_v62 = vld [vmem:[#allocation151_spill] sm:$0xff]  ;;  %v17210_v47 = vld [vmem:[#allocation62_spill] sm:$0xff] }
 0x6c7   : > { %17157 = vst [vmem:[#allocation43_spill] sm:$0xff] %v15159_v8  ;;  %v15165_v1 = vpop.eup %10236  ;;  %v15167_v18 = vadd.f32 %v6846_v12, %v6814_v7  ;;  %10256 = vrcp.f32 %v6654_v59  ;;  %v6925_v9 = vmul.f32 %v14783_v56, %v6861_v41  ;;  %v6178_v11 = vmax.f32 %v17162_v57, %v17161_v43  ;;  %v17165_v63 = vld [vmem:[#allocation41_spill] sm:$0xff]  ;;  %v17166_v12 = vld [vmem:[#allocation192_spill] sm:$0xff]  ;;  %v17168_v56 = vld [vmem:[#allocation38_spill] sm:$0xff] }
 0x6c8   : > { %v15172_v37 = vpop.eup %10238  ;;  %v6621_v61 = vadd.f32 %v15159_v8, %v6589_v45  ;;  %10258 = vpow2.f32 %v6551_v55  ;;  %v6798_v14 = vadd.f32 %v6766_v26, %v6734_v33  ;;  %v6177_v4 = vmax.f32 %v17165_v63, %v17164_v0  ;;  %v17169_v45 = vld [vmem:[#allocation172_spill] sm:$0xff]  ;;  %v17170_v33 = vld [vmem:[#allocation142_spill] sm:$0xff]  ;;  %v17171_v63 = vld [vmem:[#allocation121_spill] sm:$0xff] }
 0x6c9   : > { %17160 = vst [vmem:[#allocation92_spill] sm:$0xff] %v15167_v18  ;;  %17163 = vst [vmem:[#allocation149_spill] sm:$0xff] %v15172_v37  ;;  %v10241_v2 = vpop.eup %10240  ;;  %9466 = vmatprep.mubr.msk.f32.mxu0 %vm210_vm0, %v6925_v9  ;;  %v6210_v40 = vsub.f32 %v17166_v12, %v6178_v11  ;;  %v6306_v22 = vsub.f32 %v17167_v62, %v6178_v11  ;;  %v6402_v25 = vsub.f32 %v17168_v56, %v6178_v11  ;;  %v17173_v62 = vld [vmem:[#allocation22_spill] sm:$0xff] }
 0x6ca   : > { %v6498_v59 = vsub.f32 %v17161_v43, %v6178_v11  ;;  %v10243_v7 = vpop.eup %10242  ;;  %v6653_v41 = vadd.f32 %v15172_v37, %v6621_v61  ;;  %v6688_v55 = vmul.f32 %v10241_v2, %v17169_v45  ;;  %v6862_v26 = vadd.f32 %v6830_v60, %v6798_v14 }
 0x6cb   : > { %v6209_v39 = vsub.f32 %v17170_v33, %v6177_v4  ;;  %v10245_v16 = vpop.eup %10244  ;;  %v6592_v57 = vadd.f32 %v10243_v7, %v10241_v2  ;;  %v6720_v9 = vmul.f32 %v10243_v7, %v17171_v63  ;;  %v6269_v18 = vmul.f32 1.442695, %v6210_v40  ;;  %v17175_v2 = vld [vmem:[#allocation137_spill] sm:$0xff] }
 0x6cc   : > { %v6365_v12 = vmul.f32 1.442695, %v6306_v22  ;;  %v15186_v8 = vpop.eup %10246  ;;  %10260 = vrcp.f32 %v6653_v41  ;;  %v6784_v56 = vmul.f32 %v10245_v16, %v17173_v62  ;;  %v6926_v43 = vmul.f32 %v14744_v15, %v6862_v26  ;;  %v17176_v22 = vld [vmem:[#allocation99_spill] sm:$0xff] }
 0x6cd   : > { %17172 = vst [vmem:[#allocation44_spill] sm:$0xff] %v15186_v8  ;;  %v6461_v11 = vmul.f32 1.442695, %v6402_v25  ;;  %v10249_v61 = vpop.eup %10248  ;;  %v6624_v37 = vadd.f32 %v10245_v16, %v6592_v57  ;;  %v6752_v45 = vadd.f32 %v6720_v9, %v6688_v55  ;;  %10262 = vpow2.f32 %v6269_v18  ;;  %v17178_v25 = vld [vmem:[#allocation100_spill] sm:$0xff]  ;;  %v17198_v8 = vld [vmem:[#allocation190_spill] sm:$0xff] }
 0x6ce   : > { %v6557_v60 = vmul.f32 1.442695, %v6498_v59  ;;  %v15190_v14 = vpop.eup %10250  ;;  %v6848_v33 = vmul.f32 %v10249_v61, %v17175_v2  ;;  %9467 = vmatmul.mubr.msk.f32.gmra.mrb[246].mxu0 %vm210_vm0, %v6926_v43  ;;  %10264 = vpow2.f32 %v6365_v12  ;;  %v6267_v40 = vmul.f32 1.442695, %v6209_v39  ;;  %v17183_v12 = vld [vmem:[#allocation199_spill] sm:$0xff] }
 0x6cf   : > { %17174 = vst [vmem:[#allocation37_spill] sm:$0xff] %v15190_v14  ;;  %v6305_v7 = vsub.f32 %v17176_v22, %v6177_v4  ;;  %v15195_v41 = vpop.eup %10252  ;;  %v6656_v63 = vadd.f32 %v10249_v61, %v6624_v37  ;;  %v6816_v15 = vadd.f32 %v6784_v56, %v6752_v45  ;;  %10266 = vpow2.f32 %v6461_v11  ;;  %v17182_v37 = vld [vmem:[#allocation50_spill] sm:$0xff]  ;;  %v17185_v61 = vld [vmem:[#allocation19_spill] sm:$0xff]  ;;  %v17186_v45 = vld [vmem:[#allocation88_spill] sm:$0xff] }
 0x6d0   : > { %17177 = vst [vmem:[#allocation144_spill] sm:$0xff] %v15195_v41  ;;  %v6401_v26 = vsub.f32 %v17178_v25, %v6177_v4  ;;  %v15198_v55 = vpop.eup %10254  ;;  %v6591_v18 = vadd.f32 %v15195_v41, %v15190_v14  ;;  %10268 = vpow2.f32 %v6557_v60  ;;  %v6497_v16 = vsub.f32 %v17164_v0, %v6177_v4  ;;  %v17187_v0 = vld [vmem:[#allocation181_spill] sm:$0xff]  ;;  %v17188_v4 = vld [vmem:[#allocation166_spill] sm:$0xff] }
 0x6d1   : > { %17179 = vst [vmem:[#allocation111_spill] sm:$0xff] %v15198_v55  ;;  %v6363_v59 = vmul.f32 1.442695, %v6305_v7  ;;  %v15203_v57 = vpop.eup %10256  ;;  %v15205_v39 = vadd.f32 %v6848_v33, %v6816_v15  ;;  %10270 = vrcp.f32 %v6656_v63  ;;  %v6671_v62 = vmul.f32 %v17183_v12, %v17182_v37  ;;  %v17189_v33 = vld [vmem:[#allocation25_spill] sm:$0xff]  ;;  %v17190_v22 = vld [vmem:[#allocation138_spill] sm:$0xff] }
 0x6d2   : > { %17180 = vst [vmem:[#allocation171_spill] sm:$0xff] %v15203_v57  ;;  %v6459_v9 = vmul.f32 1.442695, %v6401_v26  ;;  %v15209_v56 = vpop.eup %10258  ;;  %v6623_v43 = vadd.f32 %v15198_v55, %v6591_v18  ;;  %10272 = vpow2.f32 %v6267_v40  ;;  %v6555_v11 = vmul.f32 1.442695, %v6497_v16  ;;  %v17191_v63 = vld [vmem:[#allocation114_spill] sm:$0xff] }
 0x6d3   : > { %17181 = vst [vmem:[#allocation222_spill] sm:$0xff] %v15205_v39  ;;  %17184 = vst [vmem:[#allocation168_spill] sm:$0xff] %v15209_v56  ;;  %v6703_v60 = vmul.f32 %v17186_v45, %v17185_v61  ;;  %10274 = vpow2.f32 %v6363_v59  ;;  %v6767_v2 = vmul.f32 %v17188_v4, %v17187_v0  ;;  %v6831_v7 = vmul.f32 %v17190_v22, %v17189_v33  ;;  %v17192_v15 = vld [vmem:[#allocation14_spill] sm:$0xff]  ;;  %v17193_v18 = vld [vmem:[#allocation209_spill] sm:$0xff] }
 0x6d4   : > { %v6672_v25 = vmul.f32 %v17192_v15, %v17191_v63  ;;  %v6655_v26 = vadd.f32 %v15209_v56, %v6623_v43  ;;  %10276 = vpow2.f32 %v6459_v9  ;;  %v17194_v40 = vld [vmem:[#allocation15_spill] sm:$0xff]  ;;  %v17195_v12 = vld [vmem:[#allocation210_spill] sm:$0xff]  ;;  %v17199_v4 = vld [vmem:[#allocation32_spill] sm:$0xff] }
 0x6d5   : > { %v6735_v37 = vadd.f32 %v6703_v60, %v6671_v62  ;;  %v6704_v16 = vmul.f32 %v17194_v40, %v17193_v18  ;;  %10278 = vpow2.f32 %v6555_v11  ;;  %v17196_v61 = vld [vmem:[#allocation187_spill] sm:$0xff]  ;;  %v17197_v45 = vld [vmem:[#allocation66_spill] sm:$0xff]  ;;  %v17200_v39 = vld [vmem:[#allocation197_spill] sm:$0xff] }
 0x6d6   : > { %v6768_v59 = vmul.f32 %v17196_v61, %v17195_v12  ;;  %v6832_v0 = vmul.f32 %v17198_v8, %v17197_v45  ;;  %v6180_v33 = vmax.f32 %v17200_v39, %v17199_v4  ;;  %v15229_v22 = vpop.eup %10260  ;;  %10280 = vrcp.f32 %v6655_v26  ;;  %v17202_v9 = vld [vmem:[#allocation87_spill] sm:$0xff]  ;;  %v17203_v62 = vld [vmem:[#allocation40_spill] sm:$0xff]  ;;  %v17205_v40 = vld [vmem:[#allocation97_spill] sm:$0xff] }
 0x6d7   : > { %17201 = vst [vmem:[#allocation54_spill] sm:$0xff] %v15229_v22  ;;  %v6799_v63 = vadd.f32 %v6767_v2, %v6735_v37  ;;  %v6736_v43 = vadd.f32 %v6704_v16, %v6672_v25  ;;  %v6179_v60 = vmax.f32 %v17203_v62, %v17202_v9  ;;  %v10263_v15 = vpop.eup %10262  ;;  %v17204_v18 = vld [vmem:[#allocation135_spill] sm:$0xff]  ;;  %v17206_v12 = vld [vmem:[#allocation98_spill] sm:$0xff]  ;;  %v17207_v55 = vld [vmem:[#allocation124_spill] sm:$0xff] }
 0x6d8   : > { %v6212_v11 = vsub.f32 %v17204_v18, %v6180_v33  ;;  %v6308_v56 = vsub.f32 %v17205_v40, %v6180_v33  ;;  %v6404_v61 = vsub.f32 %v17206_v12, %v6180_v33  ;;  %v6500_v8 = vsub.f32 %v17199_v4, %v6180_v33  ;;  %v10265_v45 = vpop.eup %10264  ;;  %v17208_v26 = vld [vmem:[#allocation30_spill] sm:$0xff]  ;;  %v17209_v16 = vld [vmem:[#allocation227_spill] sm:$0xff] }
 0x6d9   : > { %v6690_v39 = vmul.f32 %v10263_v15, %v17207_v55  ;;  %v6863_v41 = vadd.f32 %v6831_v7, %v6799_v63  ;;  %v6800_v22 = vadd.f32 %v6768_v59, %v6736_v43  ;;  %v6211_v2 = vsub.f32 %v17208_v26, %v6179_v60  ;;  %v10267_v25 = vpop.eup %10266  ;;  %v17211_v59 = vld [vmem:[#allocation77_spill] sm:$0xff] }
 0x6da   : > { %v6594_v37 = vadd.f32 %v10265_v45, %v10263_v15  ;;  %v6722_v62 = vmul.f32 %v10265_v45, %v17209_v16  ;;  %v6273_v14 = vmul.f32 1.442695, %v6212_v11  ;;  %v6369_v57 = vmul.f32 1.442695, %v6308_v56  ;;  %v10269_v18 = vpop.eup %10268  ;;  %v17213_v45 = vld [vmem:[#allocation155_spill] sm:$0xff]  ;;  %v17215_v26 = vld [vmem:[#allocation109_spill] sm:$0xff] }
 0x6db   : > { %v6786_v40 = vmul.f32 %v10267_v25, %v17210_v47  ;;  %v6927_v12 = vmul.f32 %v14858_v27, %v6863_v41  ;;  %v6864_v51 = vadd.f32 %v6832_v0, %v6800_v22  ;;  %v6465_v4 = vmul.f32 1.442695, %v6404_v61  ;;  %v15242_v33 = vpop.eup %10270  ;;  %v17212_v0 = vld [vmem:[#allocation146_spill] sm:$0xff] }
 0x6dc   : > { %v6626_v55 = vadd.f32 %v10267_v25, %v6594_v37  ;;  %v6754_v7 = vadd.f32 %v6722_v62, %v6690_v39  ;;  %v6850_v63 = vmul.f32 %v10269_v18, %v17211_v59  ;;  %10282 = vpow2.f32 %v6273_v14  ;;  %v15245_v43 = vpop.eup %10272  ;;  %v17222_v59 = vld [vmem:[#allocation195_spill] sm:$0xff] }
 0x6dd   : > { %9469 = vmatprep.mubr.msk.f32.mxu0 %vm210_vm0, %v6927_v12  ;;  %v6928_v56 = vmul.f32 %v14820_v44, %v6864_v51  ;;  %10284 = vpow2.f32 %v6369_v57  ;;  %v6561_v15 = vmul.f32 1.442695, %v6500_v8  ;;  %v6271_v47 = vmul.f32 1.442695, %v6211_v2  ;;  %v15249_v11 = vpop.eup %10274 }
 0x6de   : > { %v6658_v27 = vadd.f32 %v10269_v18, %v6626_v55  ;;  %v6818_v41 = vadd.f32 %v6786_v40, %v6754_v7  ;;  %10286 = vpow2.f32 %v6465_v4  ;;  %v6307_v22 = vsub.f32 %v17212_v0, %v6179_v60  ;;  %v15252_v61 = vpop.eup %10276  ;;  %v17217_v18 = vld [vmem:[#allocation60_spill] sm:$0xff]  ;;  %v17218_v40 = vld [vmem:[#allocation46_spill] sm:$0xff]  ;;  %v17220_v4 = vld [vmem:[#allocation27_spill] sm:$0xff] }
 0x6df   : > { %v6593_v14 = vadd.f32 %v15249_v11, %v15245_v43  ;;  %9470 = vmatmul.mubr.msk.f32.gmra.mrb[248].mxu0 %vm210_vm0, %v6928_v56  ;;  %10288 = vpow2.f32 %v6561_v15  ;;  %v6403_v44 = vsub.f32 %v17213_v45, %v6179_v60  ;;  %v6499_v51 = vsub.f32 %v17202_v9, %v6179_v60  ;;  %v15259_v57 = vpop.eup %10278  ;;  %v17219_v60 = vld [vmem:[#allocation225_spill] sm:$0xff]  ;;  %v17223_v56 = vld [vmem:[#allocation59_spill] sm:$0xff] }
 0x6e0   : > { %v15261_v8 = vadd.f32 %v6850_v63, %v6818_v41  ;;  %10290 = vrcp.f32 %v6658_v27  ;;  %v6367_v39 = vmul.f32 1.442695, %v6307_v22  ;;  %v6673_v2 = vmul.f32 %v14797_v19, %v17215_v26  ;;  %v15265_v25 = vpop.eup %10280  ;;  %v17221_v19 = vld [vmem:[#allocation165_spill] sm:$0xff]  ;;  %v17224_v15 = vld [vmem:[#allocation35_spill] sm:$0xff]  ;;  %v17225_v41 = vld [vmem:[#allocation182_spill] sm:$0xff] }
 0x6e1   : > { %17216 = vst [vmem:[#allocation51_spill] sm:$0xff] %v15265_v25  ;;  %v6625_v37 = vadd.f32 %v15252_v61, %v6593_v14  ;;  %10292 = vpow2.f32 %v6271_v47  ;;  %v6463_v16 = vmul.f32 1.442695, %v6403_v44  ;;  %v6559_v62 = vmul.f32 1.442695, %v6499_v51  ;;  %v17226_v0 = vld [vmem:[#allocation75_spill] sm:$0xff] }
 0x6e2   : > { %17214 = vst [vmem:[#allocation120_spill] sm:$0xff] %v15261_v8  ;;  %10294 = vpow2.f32 %v6367_v39  ;;  %v6705_v9 = vmul.f32 %v17218_v40, %v17217_v18  ;;  %v6769_v12 = vmul.f32 %v14811_v21, %v17219_v60  ;;  %v6833_v55 = vmul.f32 %v14828_v58, %v17220_v4  ;;  %v17227_v14 = vld [vmem:[#allocation72_spill] sm:$0xff]  ;;  %v17228_v45 = vld [vmem:[#allocation105_spill] sm:$0xff]  ;;  %v17229_v58 = vld [vmem:[#allocation10_spill] sm:$0xff] }
 0x6e3   : > { %v6657_v7 = vadd.f32 %v15259_v57, %v6625_v37  ;;  %10296 = vpow2.f32 %v6463_v16  ;;  %v6674_v63 = vmul.f32 %v17222_v59, %v17221_v19  ;;  %v6706_v47 = vmul.f32 %v17224_v15, %v17223_v56  ;;  %v17230_v51 = vld [vmem:[#allocation42_spill] sm:$0xff]  ;;  %v17231_v26 = vld [vmem:[#allocation145_spill] sm:$0xff] }
 0x6e4   : > { %10298 = vpow2.f32 %v6559_v62  ;;  %v6737_v27 = vadd.f32 %v6705_v9, %v6673_v2  ;;  %v6770_v22 = vmul.f32 %v17226_v0, %v17225_v41  ;;  %v6834_v21 = vmul.f32 %v17228_v45, %v17227_v14  ;;  %v17232_v37 = vld [vmem:[#allocation101_spill] sm:$0xff]  ;;  %v17234_v2 = vld [vmem:[#allocation20_spill] sm:$0xff]  ;;  %v17238_v41 = vld [vmem:[#allocation103_spill] sm:$0xff] }
 0x6e5   : > { %10300 = vrcp.f32 %v6657_v7  ;;  %v6738_v44 = vadd.f32 %v6706_v47, %v6674_v63  ;;  %v6182_v39 = vmax.f32 %v17230_v51, %v17229_v58  ;;  %v6181_v16 = vmax.f32 %v17232_v37, %v17231_v26  ;;  %v17233_v60 = vld [vmem:[#allocation205_spill] sm:$0xff]  ;;  %v17236_v7 = vld [vmem:[#allocation176_spill] sm:$0xff] }
 0x6e6   : > { %v10283_v18 = vpop.eup %10282  ;;  %v6801_v40 = vadd.f32 %v6769_v12, %v6737_v27  ;;  %v6675_v62 = vmul.f32 %v14872_v17, %v17233_v60  ;;  %v6707_v9 = vmul.f32 %v14879_v24, %v17234_v2  ;;  %v17235_v4 = vld [vmem:[#allocation177_spill] sm:$0xff]  ;;  %v17239_v12 = vld [vmem:[#allocation184_spill] sm:$0xff]  ;;  %v17240_v17 = vld [vmem:[#allocation198_spill] sm:$0xff] }
 0x6e7   : > { %v6771_v19 = vmul.f32 %v14885_v31, %v17235_v4  ;;  %v10285_v59 = vpop.eup %10284  ;;  %v6692_v63 = vmul.f32 %v10283_v18, %v17236_v7  ;;  %v6802_v56 = vadd.f32 %v6770_v22, %v6738_v44  ;;  %v17237_v15 = vld [vmem:[#allocation45_spill] sm:$0xff]  ;;  %v6310_v0 = vsub.f32 %v17238_v41, %v6182_v39  ;;  %v17241_v24 = vld [vmem:[#allocation132_spill] sm:$0xff]  ;;  %v17242_v7 = vld [vmem:[#allocation6_spill] sm:$0xff] }
 0x6e8   : > { %v6214_v47 = vsub.f32 %v17237_v15, %v6182_v39  ;;  %v10287_v14 = vpop.eup %10286  ;;  %v6596_v45 = vadd.f32 %v10285_v59, %v10283_v18  ;;  %v6724_v27 = vmul.f32 %v10285_v59, %v17239_v12  ;;  %v6865_v51 = vadd.f32 %v6833_v55, %v6801_v40 }
 0x6e9   : > { %v6406_v37 = vsub.f32 %v17240_v17, %v6182_v39  ;;  %v10289_v60 = vpop.eup %10288  ;;  %v6788_v2 = vmul.f32 %v10287_v14, %v17241_v24  ;;  %v6866_v25 = vadd.f32 %v6834_v21, %v6802_v56  ;;  %v6373_v4 = vmul.f32 1.442695, %v6310_v0 }
 0x6ea   : > { %v6277_v31 = vmul.f32 1.442695, %v6214_v47  ;;  %v15299_v8 = vpop.eup %10290  ;;  %v6628_v22 = vadd.f32 %v10287_v14, %v6596_v45  ;;  %v6756_v44 = vadd.f32 %v6724_v27, %v6692_v63  ;;  %v6852_v15 = vmul.f32 %v10289_v60, %v17242_v7  ;;  %v17243_v63 = vld [vmem:[#allocation84_spill] sm:$0xff]  ;;  %v17245_v27 = vld [vmem:[#allocation161_spill] sm:$0xff] }
 0x6eb   : > { %v6929_v41 = vmul.f32 %v14929_v30, %v6865_v51  ;;  %v15303_v18 = vpop.eup %10292  ;;  %v6930_v55 = vmul.f32 %v14891_v10, %v6866_v25  ;;  %v6469_v40 = vmul.f32 1.442695, %v6406_v37  ;;  %v6502_v59 = vsub.f32 %v17229_v58, %v6182_v39  ;;  %v17244_v25 = vld [vmem:[#allocation104_spill] sm:$0xff] }
 0x6ec   : > { %10302 = vpow2.f32 %v6277_v31  ;;  %v15307_v12 = vpop.eup %10294  ;;  %v6660_v21 = vadd.f32 %v10289_v60, %v6628_v22  ;;  %v6820_v56 = vadd.f32 %v6788_v2, %v6756_v44  ;;  %v6213_v47 = vsub.f32 %v17243_v63, %v6181_v16  ;;  %v17253_v63 = vld [vmem:[#allocation58_spill] sm:$0xff] }
 0x6ed   : > { %9472 = vmatprep.mubr.msk.f32.mxu0 %vm210_vm0, %v6929_v41  ;;  %10304 = vpow2.f32 %v6373_v4  ;;  %v15311_v0 = vpop.eup %10296  ;;  %v6595_v30 = vadd.f32 %v15307_v12, %v15303_v18  ;;  %v6565_v10 = vmul.f32 1.442695, %v6502_v59  ;;  %v6309_v58 = vsub.f32 %v17244_v25, %v6181_v16  ;;  %v17246_v4 = vld [vmem:[#allocation70_spill] sm:$0xff]  ;;  %v17249_v59 = vld [vmem:[#allocation76_spill] sm:$0xff] }
 0x6ee   : > { %9473 = vmatmul.mubr.msk.f32.gmra.mrb[250].mxu0 %vm210_vm0, %v6930_v55  ;;  %10306 = vpow2.f32 %v6469_v40  ;;  %v15317_v39 = vpop.eup %10298  ;;  %v15319_v14 = vadd.f32 %v6852_v15, %v6820_v56  ;;  %v6275_v45 = vmul.f32 1.442695, %v6213_v47  ;;  %v6405_v51 = vsub.f32 %v17245_v27, %v6181_v16  ;;  %v17247_v15 = vld [vmem:[#allocation122_spill] sm:$0xff]  ;;  %v17248_v40 = vld [vmem:[#allocation117_spill] sm:$0xff]  ;;  %v17250_v56 = vld [vmem:[#allocation183_spill] sm:$0xff] }
 0x6ef   : > { %10308 = vrcp.f32 %v6660_v21  ;;  %v15322_v17 = vpop.eup %10300  ;;  %v6627_v37 = vadd.f32 %v15311_v0, %v6595_v30  ;;  %v6371_v60 = vmul.f32 1.442695, %v6309_v58  ;;  %v6501_v24 = vsub.f32 %v17231_v26, %v6181_v16  ;;  %v17251_v16 = vld [vmem:[#allocation69_spill] sm:$0xff]  ;;  %v17254_v47 = vld [vmem:[#allocation86_spill] sm:$0xff] }
 0x6f0   : > { %10310 = vpow2.f32 %v6565_v10  ;;  %v6467_v2 = vmul.f32 1.442695, %v6405_v51  ;;  %v6739_v31 = vadd.f32 %v6707_v9, %v6675_v62  ;;  %v6835_v22 = vmul.f32 %v14898_v5, %v17246_v4  ;;  %v17252_v5 = vld [vmem:[#allocation206_spill] sm:$0xff]  ;;  %v17257_v51 = vld [vmem:[#allocation148_spill] sm:$0xff] }
 0x6f1   : > { %10312 = vpow2.f32 %v6275_v45  ;;  %v6659_v44 = vadd.f32 %v15317_v39, %v6627_v37  ;;  %v6563_v7 = vmul.f32 1.442695, %v6501_v24  ;;  %v6676_v41 = vmul.f32 %v14834_v54, %v17247_v15  ;;  %v17256_v27 = vld [vmem:[#allocation26_spill] sm:$0xff]  ;;  %v17258_v37 = vld [vmem:[#allocation85_spill] sm:$0xff]  ;;  %v17260_v24 = vld [vmem:[#allocation112_spill] sm:$0xff] }
 0x6f2   : > { %10314 = vpow2.f32 %v6371_v60  ;;  %v6803_v55 = vadd.f32 %v6771_v19, %v6739_v31  ;;  %v6708_v21 = vmul.f32 %v17249_v59, %v17248_v40  ;;  %v6772_v26 = vmul.f32 %v14849_v38, %v17250_v56  ;;  %v17255_v19 = vld [vmem:[#allocation128_spill] sm:$0xff]  ;;  %v17259_v60 = vld [vmem:[#allocation57_spill] sm:$0xff] }
 0x6f3   : > { %10316 = vpow2.f32 %v6467_v2  ;;  %v6836_v62 = vmul.f32 %v14864_v52, %v17251_v16  ;;  %v6677_v9 = vmul.f32 %v14945_v50, %v17252_v5  ;;  %v6709_v30 = vmul.f32 %v17254_v47, %v17253_v63  ;;  %v17261_v31 = vld [vmem:[#allocation169_spill] sm:$0xff]  ;;  %v17263_v15 = vld [vmem:[#allocation140_spill] sm:$0xff]  ;;  %v17265_v16 = vld [vmem:[#allocation23_spill] sm:$0xff] }
 0x6f4   : > { %10318 = vrcp.f32 %v6659_v44  ;;  %v6867_v54 = vadd.f32 %v6835_v22, %v6803_v55  ;;  %v6740_v10 = vadd.f32 %v6708_v21, %v6676_v41  ;;  %v6773_v25 = vmul.f32 %v14960_v35, %v17255_v19  ;;  %v17264_v40 = vld [vmem:[#allocation224_spill] sm:$0xff]  ;;  %v17266_v63 = vld [vmem:[#allocation127_spill] sm:$0xff] }
 0x6f5   : > { %10320 = vpow2.f32 %v6563_v7  ;;  %v6741_v45 = vadd.f32 %v6709_v30, %v6677_v9  ;;  %v6837_v38 = vmul.f32 %v14977_v6, %v17256_v27  ;;  %v6678_v52 = vmul.f32 %v17258_v37, %v17257_v51  ;;  %v17262_v7 = vld [vmem:[#allocation178_spill] sm:$0xff]  ;;  %v17267_v47 = vld [vmem:[#allocation107_spill] sm:$0xff]  ;;  %v17270_v37 = vld [vmem:[#allocation188_spill] sm:$0xff] }
 0x6f6   : > { %v10303_v58 = vpop.eup %10302  ;;  %v6710_v50 = vmul.f32 %v17260_v24, %v17259_v60  ;;  %v6931_v22 = vmul.f32 %v14991_v42, %v6867_v54  ;;  %v6804_v44 = vadd.f32 %v6772_v26, %v6740_v10  ;;  %v6774_v35 = vmul.f32 %v17263_v15, %v17262_v7  ;;  %v17268_v26 = vld [vmem:[#allocation201_spill] sm:$0xff]  ;;  %v17271_v60 = vld [vmem:[#allocation179_spill] sm:$0xff] }
 0x6f7   : > { %v10305_v2 = vpop.eup %10304  ;;  %v6694_v4 = vmul.f32 %v10303_v58, %v17261_v31  ;;  %v6805_v6 = vadd.f32 %v6773_v25, %v6741_v45  ;;  %v6838_v42 = vmul.f32 %v17267_v47, %v17266_v63  ;;  %v6679_v30 = vmul.f32 %v15001_v28, %v17268_v26  ;;  %v17269_v45 = vld [vmem:[#allocation83_spill] sm:$0xff]  ;;  %v17272_v24 = vld [vmem:[#allocation217_spill] sm:$0xff]  ;;  %v17278_v63 = vld [vmem:[#allocation156_spill] sm:$0xff] }
 0x6f8   : > { %v10307_v41 = vpop.eup %10306  ;;  %v6598_v55 = vadd.f32 %v10305_v2, %v10303_v58  ;;  %v6726_v59 = vmul.f32 %v10305_v2, %v17264_v40  ;;  %v6742_v21 = vadd.f32 %v6710_v50, %v6678_v52  ;;  %9475 = vmatprep.mubr.msk.f32.mxu0 %vm210_vm0, %v6931_v22  ;;  %v6868_v9 = vadd.f32 %v6836_v62, %v6804_v44  ;;  %v17273_v15 = vld [vmem:[#allocation133_spill] sm:$0xff] }
 0x6f9   : > { %v15354_v56 = vpop.eup %10308  ;;  %v6790_v5 = vmul.f32 %v10307_v41, %v17265_v16  ;;  %v6869_v58 = vadd.f32 %v6837_v38, %v6805_v6  ;;  %v6711_v62 = vmul.f32 %v15008_v36, %v17271_v60  ;;  %v6775_v50 = vmul.f32 %v15014_v20, %v17272_v24  ;;  %v17274_v36 = vld [vmem:[#allocation167_spill] sm:$0xff]  ;;  %v17277_v6 = vld [vmem:[#allocation173_spill] sm:$0xff] }
 0x6fa   : > { %v10311_v54 = vpop.eup %10310  ;;  %v6630_v10 = vadd.f32 %v10307_v41, %v6598_v55  ;;  %v6758_v19 = vadd.f32 %v6726_v59, %v6694_v4  ;;  %v6806_v27 = vadd.f32 %v6774_v35, %v6742_v21  ;;  %v6932_v52 = vmul.f32 %v17270_v37, %v6868_v9  ;;  %v17275_v41 = vld [vmem:[#allocation91_spill] sm:$0xff]  ;;  %v17279_v47 = vld [vmem:[#allocation213_spill] sm:$0xff]  ;;  %v17284_v37 = vld [vmem:[#allocation216_spill] sm:$0xff] }
 0x6fb   : > { %v15362_v25 = vpop.eup %10312  ;;  %v6854_v51 = vmul.f32 %v10311_v54, %v17269_v45  ;;  %v6933_v4 = vmul.f32 %v15054_v49, %v6869_v58  ;;  %v6743_v7 = vadd.f32 %v6711_v62, %v6679_v30  ;;  %v6839_v35 = vmul.f32 %v17274_v36, %v17273_v15  ;;  %v17276_v49 = vld [vmem:[#allocation143_spill] sm:$0xff]  ;;  %v17280_v26 = vld [vmem:[#allocation73_spill] sm:$0xff]  ;;  %v17293_v36 = vld [vmem:[#allocation64_spill] sm:$0xff] }
 0x6fc   : > { %v15370_v2 = vpop.eup %10314  ;;  %v6662_v28 = vadd.f32 %v10311_v54, %v6630_v10  ;;  %v6822_v31 = vadd.f32 %v6790_v5, %v6758_v19  ;;  %v6870_v38 = vadd.f32 %v6838_v42, %v6806_v27  ;;  %9476 = vmatmul.mubr.msk.f32.gmra.mrb[252].mxu0 %vm210_vm0, %v6932_v52  ;;  %v6936_v20 = vmul.f32 %v15080_v29, %v17275_v41  ;;  %v17281_v54 = vld [vmem:[#allocation189_spill] sm:$0xff]  ;;  %v17282_v19 = vld [vmem:[#allocation203_spill] sm:$0xff] }
 0x6fd   : > { %v15373_v22 = vpop.eup %10316  ;;  %v6597_v44 = vadd.f32 %v15370_v2, %v15362_v25  ;;  %9478 = vmatprep.mubr.msk.f32.mxu0 %vm210_vm0, %v6933_v4  ;;  %v6681_v21 = vmul.f32 %v15062_v53, %v17277_v6  ;;  %v6807_v9 = vadd.f32 %v6775_v50, %v6743_v7  ;;  %v6713_v29 = vmul.f32 %v15070_v13, %v17278_v63  ;;  %v17283_v58 = vld [vmem:[#allocation215_spill] sm:$0xff]  ;;  %v17286_v60 = vld [vmem:[#allocation53_spill] sm:$0xff]  ;;  %v17289_v50 = vld [vmem:[#allocation162_spill] sm:$0xff] }
 0x6fe   : > { %v15382_v55 = vpop.eup %10318  ;;  %v15384_v40 = vadd.f32 %v6854_v51, %v6822_v31  ;;  %10322 = vrcp.f32 %v6662_v28  ;;  %v6934_v59 = vmul.f32 %v17276_v49, %v6870_v38  ;;  %v6777_v42 = vmul.f32 %v15073_v34, %v17279_v47  ;;  %v17291_v38 = vld [vmem:[#allocation185_spill] sm:$0xff]  ;;  %v17295_v41 = vld [vmem:[#allocation79_spill] sm:$0xff]  ;;  %v17297_v6 = vld [vmem:[#allocation92_spill] sm:$0xff] }
 0x6ff   : > { %v15390_v16 = vpop.eup %10320  ;;  %v6629_v5 = vadd.f32 %v15373_v22, %v6597_v44  ;;  %v6841_v30 = vmul.f32 %v15087_v3, %v17280_v26  ;;  %v6938_v10 = vmul.f32 %v15124_v32, %v17281_v54  ;;  %v6683_v53 = vmul.f32 %v15108_v46, %v17282_v19  ;;  %v17285_v3 = vld [vmem:[#allocation131_spill] sm:$0xff]  ;;  %v17287_v32 = vld [vmem:[#allocation34_spill] sm:$0xff]  ;;  %v17288_v46 = vld [vmem:[#allocation17_spill] sm:$0xff] }
 0x700   : > { %v6715_v27 = vmul.f32 %v15115_v48, %v17283_v58  ;;  %9479 = vmatmul.mubr.msk.f32.gmra.mrb[254].mxu0 %vm210_vm0, %v6934_v59  ;;  %v6871_v13 = vadd.f32 %v6839_v35, %v6807_v9  ;;  %v6745_v51 = vadd.f32 %v6713_v29, %v6681_v21  ;;  %v6779_v34 = vmul.f32 %v15119_v23, %v17284_v37  ;;  %v17290_v48 = vld [vmem:[#allocation200_spill] sm:$0xff]  ;;  %v17292_v44 = vld [vmem:[#allocation110_spill] sm:$0xff]  ;;  %v17294_v23 = vld [vmem:[#allocation43_spill] sm:$0xff] }
 0x701   : > { %v6661_v45 = vadd.f32 %v15390_v16, %v6629_v5  ;;  %v6843_v62 = vmul.f32 %v17286_v60, %v17285_v3  ;;  %v6940_v24 = vmul.f32 %v15165_v1, %v17287_v32  ;;  %v6685_v28 = vmul.f32 %v17289_v50, %v17288_v46  ;;  %v17296_v49 = vld [vmem:[#allocation149_spill] sm:$0xff]  ;;  %v17298_v21 = vld [vmem:[#allocation171_spill] sm:$0xff]  ;;  %v17302_v26 = vld [vmem:[#allocation144_spill] sm:$0xff] }
 0x702   : > { %v6747_v52 = vadd.f32 %v6715_v27, %v6683_v53  ;;  %v6935_v31 = vmul.f32 %v17290_v48, %v6871_v13  ;;  %v6809_v4 = vadd.f32 %v6777_v42, %v6745_v51  ;;  %v6717_v7 = vmul.f32 %v17292_v44, %v17291_v38  ;;  %v17299_v63 = vld [vmem:[#allocation55_spill] sm:$0xff]  ;;  %v17300_v29 = vld [vmem:[#allocation37_spill] sm:$0xff]  ;;  %v17301_v42 = vld [vmem:[#allocation186_spill] sm:$0xff] }
 0x703   : > { %10324 = vrcp.f32 %v6661_v45  ;;  %v6781_v35 = vmul.f32 %v17294_v23, %v17293_v36  ;;  %v6845_v59 = vmul.f32 %v17296_v49, %v17295_v41  ;;  %v6942_v1 = vmul.f32 %v17298_v21, %v17297_v6  ;;  %v17303_v53 = vld [vmem:[#allocation61_spill] sm:$0xff]  ;;  %v17304_v58 = vld [vmem:[#allocation111_spill] sm:$0xff]  ;;  %v17306_v13 = vld [vmem:[#allocation168_spill] sm:$0xff] }
 0x704   : > { %v6811_v15 = vadd.f32 %v6779_v34, %v6747_v52  ;;  %9481 = vmatprep.mubr.msk.f32.mxu0 %vm210_vm0, %v6935_v31  ;;  %v6873_v5 = vadd.f32 %v6841_v30, %v6809_v4  ;;  %v6749_v9 = vadd.f32 %v6717_v7, %v6685_v28  ;;  %v6687_v47 = vmul.f32 %v17300_v29, %v17299_v63  ;;  %v17305_v45 = vld [vmem:[#allocation31_spill] sm:$0xff]  ;;  %v17307_v37 = vld [vmem:[#allocation222_spill] sm:$0xff]  ;;  %v17309_v32 = vld [vmem:[#allocation56_spill] sm:$0xff] }
 0x705   : > { %v6719_v54 = vmul.f32 %v17302_v26, %v17301_v42  ;;  %9482 = vmatmul.mubr.msk.f32.gmra.mrb[0].mxu0 %vm210_vm0, %v6936_v20  ;;  %v6783_v27 = vmul.f32 %v17304_v58, %v17303_v53  ;;  %v6847_v51 = vmul.f32 %v17306_v13, %v17305_v45  ;;  %v6944_v34 = vmul.f32 %v15242_v33, %v17307_v37  ;;  %v17308_v30 = vld [vmem:[#allocation170_spill] sm:$0xff]  ;;  %v17310_v28 = vld [vmem:[#allocation44_spill] sm:$0xff]  ;;  %v17312_v31 = vld [vmem:[#allocation119_spill] sm:$0xff] }
 0x706   : > { %v6875_v19 = vadd.f32 %v6843_v62, %v6811_v15  ;;  %v6937_v52 = vmul.f32 %v17308_v30, %v6873_v5  ;;  %v6813_v3 = vadd.f32 %v6781_v35, %v6749_v9  ;;  %v6689_v46 = vmul.f32 %v15245_v43, %v17309_v32  ;;  %v17311_v62 = vld [vmem:[#allocation134_spill] sm:$0xff]  ;;  %v17314_v15 = vld [vmem:[#allocation120_spill] sm:$0xff]  ;;  %v17315_v43 = vld [vmem:[#allocation113_spill] sm:$0xff] }
 0x707   : > { %v6751_v60 = vadd.f32 %v6719_v54, %v6687_v47  ;;  %v6721_v48 = vmul.f32 %v15249_v11, %v17311_v62  ;;  %v6785_v4 = vmul.f32 %v15252_v61, %v17312_v31  ;;  %v17313_v38 = vld [vmem:[#allocation78_spill] sm:$0xff]  ;;  %v6946_v36 = vmul.f32 %v15299_v8, %v17314_v15  ;;  %v17316_v11 = vld [vmem:[#allocation223_spill] sm:$0xff] }
 0x708   : > { %v10323_v50 = vpop.eup %10322  ;;  %v6939_v20 = vmul.f32 %v17310_v28, %v6875_v19  ;;  %v6849_v44 = vmul.f32 %v15259_v57, %v17313_v38  ;;  %9484 = vmatprep.mubr.msk.f32.mxu0 %vm210_vm0, %v6937_v52  ;;  %v6877_v33 = vadd.f32 %v6845_v59, %v6813_v3  ;;  %v6691_v23 = vmul.f32 %v15303_v18, %v17315_v43  ;;  %v17317_v61 = vld [vmem:[#allocation226_spill] sm:$0xff]  ;;  %v17318_v57 = vld [vmem:[#allocation193_spill] sm:$0xff]  ;;  %v17323_v42 = vld [vmem:[#allocation51_spill] sm:$0xff] }
 0x709   : > { %v6815_v7 = vadd.f32 %v6783_v27, %v6751_v60  ;;  %9485 = vmatmul.mubr.msk.f32.gmra.mrb[2].mxu0 %vm210_vm0, %v6938_v10  ;;  %v6753_v35 = vadd.f32 %v6721_v48, %v6689_v46  ;;  %v6723_v41 = vmul.f32 %v15307_v12, %v17316_v11  ;;  %v6787_v49 = vmul.f32 %v15311_v0, %v17317_v61  ;;  %v17319_v59 = vld [vmem:[#allocation54_spill] sm:$0xff]  ;;  %v17321_v12 = vld [vmem:[#allocation160_spill] sm:$0xff]  ;;  %v17322_v0 = vld [vmem:[#allocation219_spill] sm:$0xff] }
 0x70a   : > { %v6851_v6 = vmul.f32 %v15317_v39, %v17318_v57  ;;  %9487 = vmatprep.mubr.msk.f32.mxu0 %vm210_vm0, %v6939_v20  ;;  %v6941_v21 = vmul.f32 %v17319_v59, %v6877_v33  ;;  %v6948_v18 = vmul.f32 %v15354_v56, %v15319_v14  ;;  %v17320_v5 = vld [vmem:[#allocation18_spill] sm:$0xff]  ;;  %v6725_v29 = vmul.f32 %v15370_v2, %v17321_v12 }
 0x70b   : > { %v6879_v8 = vadd.f32 %v6847_v51, %v6815_v7  ;;  %v6693_v10 = vmul.f32 %v15362_v25, %v17320_v5  ;;  %v6817_v9 = vadd.f32 %v6785_v4, %v6753_v35  ;;  %v6755_v63 = vadd.f32 %v6723_v41, %v6691_v23  ;;  %v17324_v54 = vld [vmem:[#allocation194_spill] sm:$0xff] }
 0x70c   : > { %v6789_v47 = vmul.f32 %v15373_v22, %v17322_v0  ;;  %v6853_v19 = vmul.f32 %v15390_v16, %v17324_v54  ;;  %v6950_v53 = vmul.f32 %v10323_v50, %v15384_v40 }
 0x70d   : > { %v10325_v39 = vpop.eup %10324  ;;  %v6943_v26 = vmul.f32 %v17323_v42, %v6879_v8  ;;  %9488 = vmatmul.mubr.msk.f32.gmra.mrb[4].mxu0 %vm210_vm0, %v6940_v24  ;;  %v6881_v14 = vadd.f32 %v6849_v44, %v6817_v9  ;;  %v6819_v56 = vadd.f32 %v6787_v49, %v6755_v63  ;;  %v6757_v25 = vadd.f32 %v6725_v29, %v6693_v10  ;;  %v10327_v24 = vld [vmem:[%s15613_s1 + $0x60] sm:$0xff] }
 0x70e   : > { %9490 = vmatprep.mubr.msk.f32.mxu0 %vm210_vm0, %v6941_v21 }
 0x70f   : > { %v6945_v2 = vmul.f32 %v15322_v17, %v6881_v14  ;;  %v6883_v58 = vadd.f32 %v6851_v6, %v6819_v56  ;;  %v6821_v22 = vadd.f32 %v6789_v47, %v6757_v25  ;;  %v17325_v17 = vld [vmem:[#allocation9_spill] sm:$0xff] }
 0x711   : > { %9491 = vmatmul.mubr.msk.f32.gmra.mrb[6].mxu0 %vm210_vm0, %v6942_v1  ;;  %v6947_v27 = vmul.f32 %v15382_v55, %v6883_v58  ;;  %v6885_v16 = vadd.f32 %v6853_v19, %v6821_v22  ;;  %v6953_v55 = vsub.s32 2, %v17325_v17 }
 0x712   : > { %9493 = vmatprep.mubr.msk.f32.mxu0 %vm210_vm0, %v6943_v26 }
 0x713   : > { %v6949_v40 = vmul.f32 %v10325_v39, %v6885_v16  ;;  %v15492_v1 = vrot.slane %v10327_v24, %v6953_v55 }
 0x715   : > { %9494 = vmatmul.mubr.msk.f32.gmra.mrb[8].mxu0 %vm210_vm0, %v6944_v34 }
 0x716   : > { %9496 = vmatprep.mubr.msk.f32.mxu0 %vm210_vm0, %v6945_v2 }
 0x719   : > { %9497 = vmatmul.mubr.msk.f32.gmra.mrb[10].mxu0 %vm210_vm0, %v6946_v36 }
 0x71a   : > { %9499 = vmatprep.mubr.msk.f32.mxu0 %vm210_vm0, %v6947_v27 }
 0x71d   : > { %9500 = vmatmul.mubr.msk.f32.gmra.mrb[12].mxu0 %vm210_vm0, %v6948_v18 }
 0x71e   : > { %9502 = vmatprep.mubr.msk.f32.mxu0 %vm210_vm0, %v6949_v40 }
 0x721   : > { %9503 = vmatmul.mubr.msk.f32.gmra.mrb[14].mxu0 %vm210_vm0, %v6950_v53 }
 0x76c   : > { %v9459_v45 = vpop.f32.mrb[240].mxu0 }
 0x76d   : > { %v7123_v13 = vadd.f32 %v9459_v45, %v15492_v1  ;;  %v7117_v51 = vpop.f32.mrb[241].mxu0 }
 0x76e   : > { %v7118_v37 = vadd.f32 %v7117_v51, %v15492_v1 }
 0x76f   : > { %7277 = vst [vmem:[%s15496_s5 + $0x8] sm:$0xff] %v7123_v13 }
 0x770   : > { %7276 = vst [vmem:[%s15496_s5] sm:$0xff] %v7118_v37 }
 0x77a   : > { %v9462_v34 = vpop.f32.mrb[242].mxu0 }
 0x77b   : > { %v7133_v30 = vadd.f32 %v9462_v34, %v15492_v1  ;;  %v7127_v52 = vpop.f32.mrb[243].mxu0 }
 0x77c   : > { %v7128_v3 = vadd.f32 %v7127_v52, %v15492_v1 }
 0x77d   : > { %7279 = vst [vmem:[%s15496_s5 + $0x18] sm:$0xff] %v7133_v30 }
 0x77e   : > { %7278 = vst [vmem:[%s15496_s5 + $0x10] sm:$0xff] %v7128_v3 }
 0x78d   : > { %v9465_v60 = vpop.f32.mrb[244].mxu0 }
 0x78e   : > { %v7143_v32 = vadd.f32 %v9465_v60, %v15492_v1  ;;  %v7137_v46 = vpop.f32.mrb[245].mxu0 }
 0x78f   : > { %v7138_v50 = vadd.f32 %v7137_v46, %v15492_v1 }
 0x790   : > { %7281 = vst [vmem:[%s15496_s5 + $0x28] sm:$0xff] %v7143_v32 }
 0x791   : > { %7280 = vst [vmem:[%s15496_s5 + $0x20] sm:$0xff] %v7138_v50 }
 0x7a1   : > { %v9468_v28 = vpop.f32.mrb[246].mxu0 }
 0x7a2   : > { %v7153_v20 = vadd.f32 %v9468_v28, %v15492_v1  ;;  %v7147_v62 = vpop.f32.mrb[247].mxu0 }
 0x7a3   : > { %v7148_v48 = vadd.f32 %v7147_v62, %v15492_v1 }
 0x7a4   : > { %7283 = vst [vmem:[%s15496_s5 + $0x38] sm:$0xff] %v7153_v20 }
 0x7a5   : > { %7282 = vst [vmem:[%s15496_s5 + $0x30] sm:$0xff] %v7148_v48 }
 0x7b2   : > { %v9471_v31 = vpop.f32.mrb[248].mxu0 }
 0x7b3   : > { %v7163_v4 = vadd.f32 %v9471_v31, %v15492_v1  ;;  %v7157_v38 = vpop.f32.mrb[249].mxu0 }
 0x7b4   : > { %v7158_v44 = vadd.f32 %v7157_v38, %v15492_v1 }
 0x7b5   : > { %7285 = vst [vmem:[%s15496_s5 + $0x48] sm:$0xff] %v7163_v4 }
 0x7b6   : > { %7284 = vst [vmem:[%s15496_s5 + $0x40] sm:$0xff] %v7158_v44 }
 0x7c1   : > { %v9474_v33 = vpop.f32.mrb[250].mxu0 }
 0x7c2   : > { %v7173_v7 = vadd.f32 %v9474_v33, %v15492_v1  ;;  %v7167_v15 = vpop.f32.mrb[251].mxu0 }
 0x7c3   : > { %v7168_v36 = vadd.f32 %v7167_v15, %v15492_v1 }
 0x7c4   : > { %7287 = vst [vmem:[%s15496_s5 + $0x58] sm:$0xff] %v7173_v7 }
 0x7c5   : > { %7286 = vst [vmem:[%s15496_s5 + $0x50] sm:$0xff] %v7168_v36 }
 0x7cf   : > { %v9477_v43 = vpop.f32.mrb[252].mxu0 }
 0x7d0   : > { %v7183_v23 = vadd.f32 %v9477_v43, %v15492_v1  ;;  %v7177_v35 = vpop.f32.mrb[253].mxu0 }
 0x7d1   : > { %v7178_v11 = vadd.f32 %v7177_v35, %v15492_v1 }
 0x7d2   : > { %7289 = vst [vmem:[%s15496_s5 + $0x68] sm:$0xff] %v7183_v23 }
 0x7d3   : > { %7288 = vst [vmem:[%s15496_s5 + $0x60] sm:$0xff] %v7178_v11  ;;  %v9480_v41 = vpop.f32.mrb[254].mxu0 }
 0x7d4   : > { %v7193_v61 = vadd.f32 %v9480_v41, %v15492_v1  ;;  %v7187_v49 = vpop.f32.mrb[255].mxu0 }
 0x7d5   : > { %v7188_v57 = vadd.f32 %v7187_v49, %v15492_v1 }
 0x7d6   : > { %7291 = vst [vmem:[%s15496_s5 + $0x78] sm:$0xff] %v7193_v61 }
 0x7d7   : > { %7290 = vst [vmem:[%s15496_s5 + $0x70] sm:$0xff] %v7188_v57 }
 0x7d8   : > { %v9483_v6 = vpop.f32.mrb[0].mxu0 }
 0x7d9   : > { %v7203_v59 = vadd.f32 %v9483_v6, %v15492_v1  ;;  %v7197_v21 = vpop.f32.mrb[1].mxu0 }
 0x7da   : > { %v7198_v8 = vadd.f32 %v7197_v21, %v15492_v1 }
 0x7db   : > { %7293 = vst [vmem:[%s15496_s5 + $0x88] sm:$0xff] %v7203_v59 }
 0x7dc   : > { %7292 = vst [vmem:[%s15496_s5 + $0x80] sm:$0xff] %v7198_v8  ;;  %v9486_v18 = vpop.f32.mrb[2].mxu0 }
 0x7dd   : > { %v7213_v5 = vadd.f32 %v9486_v18, %v15492_v1  ;;  %v7207_v10 = vpop.f32.mrb[3].mxu0 }
 0x7de   : > { %v7208_v9 = vadd.f32 %v7207_v10, %v15492_v1 }
 0x7df   : > { %7295 = vst [vmem:[%s15496_s5 + $0x98] sm:$0xff] %v7213_v5 }
 0x7e0   : > { %7294 = vst [vmem:[%s15496_s5 + $0x90] sm:$0xff] %v7208_v9  ;;  %v9489_v63 = vpop.f32.mrb[4].mxu0 }
 0x7e1   : > { %v7223_v12 = vadd.f32 %v9489_v63, %v15492_v1  ;;  %v7217_v29 = vpop.f32.mrb[5].mxu0 }
 0x7e2   : > { %v7218_v0 = vadd.f32 %v7217_v29, %v15492_v1 }
 0x7e3   : > { %7297 = vst [vmem:[%s15496_s5 + $0xa8] sm:$0xff] %v7223_v12 }
 0x7e4   : > { %7296 = vst [vmem:[%s15496_s5 + $0xa0] sm:$0xff] %v7218_v0  ;;  %v9492_v47 = vpop.f32.mrb[6].mxu0 }
 0x7e5   : > { %v7233_v39 = vadd.f32 %v9492_v47, %v15492_v1  ;;  %v7227_v42 = vpop.f32.mrb[7].mxu0 }
 0x7e6   : > { %v7228_v26 = vadd.f32 %v7227_v42, %v15492_v1 }
 0x7e7   : > { %7299 = vst [vmem:[%s15496_s5 + $0xb8] sm:$0xff] %v7233_v39 }
 0x7e8   : > { %7298 = vst [vmem:[%s15496_s5 + $0xb0] sm:$0xff] %v7228_v26  ;;  %v9495_v54 = vpop.f32.mrb[8].mxu0 }
 0x7e9   : > { %v7243_v19 = vadd.f32 %v9495_v54, %v15492_v1  ;;  %v7237_v53 = vpop.f32.mrb[9].mxu0 }
 0x7ea   : > { %v7238_v14 = vadd.f32 %v7237_v53, %v15492_v1 }
 0x7eb   : > { %7301 = vst [vmem:[%s15496_s5 + $0xc8] sm:$0xff] %v7243_v19 }
 0x7ec   : > { %7300 = vst [vmem:[%s15496_s5 + $0xc0] sm:$0xff] %v7238_v14  ;;  %v9498_v56 = vpop.f32.mrb[10].mxu0 }
 0x7ed   : > { %v7253_v25 = vadd.f32 %v9498_v56, %v15492_v1  ;;  %v7247_v2 = vpop.f32.mrb[11].mxu0 }
 0x7ee   : > { %v7248_v58 = vadd.f32 %v7247_v2, %v15492_v1 }
 0x7ef   : > { %7303 = vst [vmem:[%s15496_s5 + $0xd8] sm:$0xff] %v7253_v25 }
 0x7f0   : > { %7302 = vst [vmem:[%s15496_s5 + $0xd0] sm:$0xff] %v7248_v58  ;;  %v9501_v22 = vpop.f32.mrb[12].mxu0 }
 0x7f1   : > { %v7263_v27 = vadd.f32 %v9501_v22, %v15492_v1  ;;  %v7257_v16 = vpop.f32.mrb[13].mxu0 }
 0x7f2   : > { %v7258_v40 = vadd.f32 %v7257_v16, %v15492_v1 }
 0x7f3   : > { %7305 = vst [vmem:[%s15496_s5 + $0xe8] sm:$0xff] %v7263_v27 }
 0x7f4   : > { %7304 = vst [vmem:[%s15496_s5 + $0xe0] sm:$0xff] %v7258_v40  ;;  %v9504_v17 = vpop.f32.mrb[14].mxu0 }
 0x7f5   : > { %v7273_v55 = vadd.f32 %v9504_v17, %v15492_v1  ;;  %v7267_v24 = vpop.f32.mrb[15].mxu0 }
 0x7f6   : > { %v7268_v45 = vadd.f32 %v7267_v24, %v15492_v1 }
 0x7f7   : > { %7307 = vst [vmem:[%s15496_s5 + $0xf8] sm:$0xff] %v7273_v55 }
 0x7f8   : > { %7306 = vst [vmem:[%s15496_s5 + $0xf0] sm:$0xff] %v7268_v45 }
 0x7f9   : > { %10341 = shalt.err (!%p10338_p3)
}
 0x7fa   : > { %s10342_s24 = scalar_lea.hbm %s15562_s16, 4096  ;;  %s10346_s27 = scalar_lea.hbm %s15614_s2, 8192 }
 0x7fb   : > { %p10343_p4 = scmp.ne.s32.totalorder %s15562_s16, %s10342_s24  ;;  %p10347_p9 = scmp.lt.u32.totalorder %s15562_s16, %s15614_s2 }
 0x7fc   : > { %p10348_p10 = scmp.lt.u32.totalorder %s10346_s27, %s10342_s24  ;;  %p10350_p12 = scmp.lt.u32.totalorder %s10342_s24, %s15562_s16 }
 0x7fd   : > { %p10344_p7 = pnand %p10343_p4, %p10448_p5 }
 0x7fe   : > { %p10349_p11 = por %p10348_p10, %p10347_p9 }
 0x7ff   : > { %p10345_p8 = pneg %p10344_p7 }
 0x800   : > { %p10351_p13 = por %p10350_p12, %p10349_p11 }
 0x802   : > { %p10352_p0 = pnand %p10351_p13, %p10345_p8 }
 0x804   : > { %10355 = shalt.err (!%p10352_p0)
}
 0x805   : > { %s10393_s30 = smov 128   ;;  %s10394_s3 = smov 8  }
 0x806   : > { %9645 = dma.vmem_to_hbm [thread:$0]  (%p10448_p5), %s15564_s7, 4096, %s15562_s16, %s15571_s13, %s10393_s30, %s10393_s30, %s10394_s3  }
 0x807 PF: > { %p9651_p1 = scmp.ge.s32.totalorder %s10390_s12, 2  ;;  %s7337_s4 = sand.u32 1, %s10378_s9  }
 0x808   : > { %s7338_s5 = scalar_lea.sflag [#allocation3], %s7337_s4 }
 0x809   : > { %p9648_p2 = pnand %p9651_p1, %p10452_p6 }
 0x80b   : > { %10373 = dma.done.wait (!%p9648_p2), %s7338_s5, 4096  }
 0x80c   : > { %10375 = vsyncadd (!%p9648_p2), %s7338_s5, 4294963200  ;;  %p12_p3 = scmp.ge.s32.totalorder %s10435_s15, 4   ;;  %s17326_s9 = smov %s10382_s10 }
 0x80d   : > { %s17327_s10 = smov %s10386_s11  ;;  %s17328_s11 = smov %s10446_s18 }
 0x80e   : > { %s17329_s12 = smov %s10435_s15  ;;  %14 = sbr.rel (!%p12_p3) target bundleno = 3 (0x3), region = 63 }
 0x815   :  { %7343 = vsyncpa [#allocation3], 1 }
 0x816   :  { %7345 = vsyncpa [#allocation3 + $0x1], 1 }

</bundles_post_ra>
